<compile_context>
chip_gen: v6e
topology: v6e:2x2x1
jax: 0.10.0
libtpu: 0.0.40
codegen_flags: <defaults>
</compile_context>

<pallas_src>
import functools

import jax
import jax.numpy as jnp
from jax.experimental import pallas as pl
from jax.experimental.pallas import tpu as pltpu


def _fused_cnn_kernel(x_ref, masks_ref, wf_ref, bf_ref, wh_ref, bh_ref,
                      wl_ref, bl_ref, o_ref, patches_ref,
                      *, H, W, N, n_hidden, negative_slope):
    """Whole simple_CNN forward (all layers, all images) in one invocation."""
    C = x_ref.shape[0]                     # hidden width (= padded input width)
    HW = H * W
    cout = o_ref.shape[1]

    # Static lane shifts of the 3x3 stencil taps, row-major tap order
    # (matches the (co, ky, kx, ci) -> (co, 9C) weight reshape in the wrapper).
    shifts = tuple(dy * W + dx for dy in (-1, 0, 1) for dx in (-1, 0, 1))

    # Per-tap 0/1 validity masks (image border + cross-image), loaded once.
    masks = [masks_ref[pl.ds(i, 1), :] for i in range(9)]      # each (1, N*H*W)

    x0 = x_ref[...]                        # (C, N*H*W) f32, channel-padded NCHW

    def conv(act, w, b, relu):
        # Transposed im2col: patches[tap*C + ci, p] = act[ci, p + shift(tap)].
        # Every store is a full-lane, sublane-aligned (C, N*H*W) bf16 store.
        for idx, d in enumerate(shifts):
            if d == 0:
                tap = act                                      # center tap: always valid
            else:
                tap = jnp.roll(act, -d, axis=1) * masks[idx]
            patches_ref[pl.ds(idx * C, C), :] = tap.astype(jnp.bfloat16)
        # One MXU matmul per layer: (co, 9C) x (9C, N*H*W), f32 accumulation.
        y = jnp.dot(w, patches_ref[...], preferred_element_type=jnp.float32) + b
        if relu:
            y = jnp.where(y > 0, y, negative_slope * y)        # LeakyReLU
        return y

    act = conv(x0, wf_ref[...], bf_ref[...], relu=True)        # in_conv + LeakyReLU
    for i in range(n_hidden):                                  # hidden convs
        act = conv(act, wh_ref[i], bh_ref[i], relu=True)
    y = conv(act, wl_ref[...], bl_ref[...], relu=False)        # out_conv (rows padded to 8)
    out = y[:cout, :] + x0[:cout, :]                           # fused residual add

    # Lane-dense output: (cout, H*W) per image, 128-aligned lane slices.
    for n in range(N):
        o_ref[n] = out[:, n * HW:(n + 1) * HW].astype(o_ref.dtype)


def simple_cnn_forward(x_nchw, params, negative_slope=0.01):
    """Matches simple_CNN.forward (nl_type='relu' -> LeakyReLU, bn=False)."""
    N, Cin, H, W = x_nchw.shape
    w0, b0 = params[0]
    wl, bl = params[-1]
    hidden = params[1:-1]
    C = w0.shape[-1]                     # n_ch
    Cout = wl.shape[-1]                  # n_ch_out
    n_hidden = len(hidden)
    HW, NHW = H * W, N * H * W
    co_pad = ((Cout + 7) // 8) * 8       # pad out_conv rows to a full sublane tile
    assert n_hidden >= 1 and C >= Cin
    assert Cout == Cin, "residual add requires n_ch_out == n_ch_in"
    assert NHW % 128 == 0, "N*H*W must be lane-aligned (multiple of 128)"
    assert 18 * C * NHW < (24 << 20), "image too large for the untiled VMEM design"

    # Channel-major, batch-folded input: (C, N*H*W) f32, channels zero-padded
    # to the hidden width so every layer shares one K = 9*C.
    x_cm = jnp.transpose(
        jnp.pad(x_nchw.reshape(N, Cin, HW).astype(jnp.float32),
                ((0, 0), (0, C - Cin), (0, 0))),
        (1, 0, 2)).reshape(C, NHW)

    # Per-tap validity masks over the batch-folded flattened spatial axis: they
    # implement SAME padding and kill cross-image leakage from the lane shifts.
    pos = jnp.arange(HW)
    yy, xx = pos // W, pos % W
    masks = jnp.stack([
        ((yy + dy >= 0) & (yy + dy < H) & (xx + dx >= 0) & (xx + dx < W))
        for dy in (-1, 0, 1) for dx in (-1, 0, 1)]).astype(jnp.float32)
    masks = jnp.tile(masks, (1, N))                            # (9, N*H*W)

    def w2mat(w, co_to=None):
        # (3,3,ci,co) HWIO -> (co_to, 9*C) bf16 im2col matrix (ci padded to C).
        ci, co = w.shape[2], w.shape[3]
        w = jnp.pad(w, ((0, 0), (0, 0), (0, C - ci), (0, (co_to or co) - co)))
        return jnp.transpose(w, (3, 0, 1, 2)).reshape(-1, 9 * C).astype(jnp.bfloat16)

    w_first = w2mat(w0)                                        # (C, 9C)
    b_first = b0.reshape(C, 1).astype(jnp.float32)
    w_hid = jnp.stack([w2mat(w) for (w, _) in hidden])         # (nh, C, 9C)
    b_hid = jnp.stack([b.reshape(C, 1).astype(jnp.float32) for (_, b) in hidden])
    w_last = w2mat(wl, co_to=co_pad)                           # (co_pad, 9C)
    b_last = jnp.pad(bl, (0, co_pad - Cout)).reshape(co_pad, 1).astype(jnp.float32)

    kernel = functools.partial(
        _fused_cnn_kernel, H=H, W=W, N=N, n_hidden=n_hidden,
        negative_slope=negative_slope)

    out = pl.pallas_call(
        kernel,
        out_shape=jax.ShapeDtypeStruct((N, Cout, HW), x_nchw.dtype),
        # Single invocation, no grid: batch folded into the matmul lane dim.
        scratch_shapes=[pltpu.VMEM((9 * C, NHW), jnp.bfloat16)],   # im2col patches
    )(x_cm, masks, w_first, b_first, w_hid, b_hid, w_last, b_last)

    return out.reshape(N, Cout, H, W)


def init_simple_cnn_params(key, n_ch_in=3, n_ch_out=3, n_ch=32, depth=5):
    """Deterministic PyTorch-style (kaiming-uniform-ish) init for all convs."""
    params = []
    dims = [(n_ch_in, n_ch)] + [(n_ch, n_ch)] * (depth - 2) + [(n_ch, n_ch_out)]
    for (cin, cout) in dims:
        key, kw, kb = jax.random.split(key, 3)
        bound = 1.0 / jnp.sqrt(cin * 9.0)
        w = jax.random.uniform(kw, (3, 3, cin, cout), jnp.float32, -bound, bound)
        b = jax.random.uniform(kb, (cout,), jnp.float32, -bound, bound)
        params.append((w, b))
    return params


def _reference_forward(x_nchw, params, negative_slope=0.01):
    """Pure-JAX reference of simple_CNN.forward (for correctness checking)."""
    x_in = jnp.transpose(x_nchw, (0, 2, 3, 1))

    def conv(x, w, b):
        y = jax.lax.conv_general_dilated(
            x, w, window_strides=(1, 1), padding=((1, 1), (1, 1)),
            dimension_numbers=("NHWC", "HWIO", "NHWC"),
            precision=jax.lax.Precision.HIGHEST)
        return y + b

    act = lambda t: jnp.where(t > 0, t, negative_slope * t)
    x = act(conv(x_in, *params[0]))
    for (w, b) in params[1:-1]:
        x = act(conv(x, w, b))
    out = conv(x, *params[-1]) + x_in
    return jnp.transpose(out, (0, 3, 1, 2))


if __name__ == "__main__":
    key = jax.random.PRNGKey(0)
    k_param, k_x = jax.random.split(key)

    N, C_IN, H, W = 2, 3, 16, 16
    N_CH, DEPTH = 32, 5

    params = init_simple_cnn_params(k_param, n_ch_in=C_IN, n_ch_out=C_IN,
                                    n_ch=N_CH, depth=DEPTH)
    x = jax.random.normal(k_x, (N, C_IN, H, W), jnp.float32)

    y = simple_cnn_forward(x, params)
    jax.block_until_ready(y)
    assert y.shape == (N, C_IN, H, W)

    y_ref = _reference_forward(x, params)
    err = float(jnp.max(jnp.abs(y - y_ref)))
    assert err < 5e-2, f"max abs err vs reference = {err}"

    print("KERNEL_OK")
</pallas_src>

<mosaic_0001>
module attributes {stable_mosaic.version = 11 : i64} {
  func.func @_fused_cnn_kernel(%arg0: memref<32x512xf32, #tpu.memory_space<vmem>>, %arg1: memref<9x512xf32, #tpu.memory_space<vmem>>, %arg2: memref<32x288xbf16, #tpu.memory_space<vmem>>, %arg3: memref<32x1xf32, #tpu.memory_space<vmem>>, %arg4: memref<3x32x288xbf16, #tpu.memory_space<vmem>>, %arg5: memref<3x32x1xf32, #tpu.memory_space<vmem>>, %arg6: memref<8x288xbf16, #tpu.memory_space<vmem>>, %arg7: memref<8x1xf32, #tpu.memory_space<vmem>>, %arg8: memref<2x3x256xf32, #tpu.memory_space<vmem>>, %arg9: memref<288x512xbf16, #tpu.memory_space<vmem>>) attributes {dimension_semantics = [], scalar_prefetch = 0 : i64, scratch_operands = 1 : i64, tpu.core_type = #tpu.core_type<tc>} {
    %c0 = arith.constant 0 : index
    %c0_0 = arith.constant 0 : index
    %0 = vector.load %arg1[%c0, %c0_0] : memref<9x512xf32, #tpu.memory_space<vmem>>, vector<1x512xf32>
    %c1 = arith.constant 1 : index
    %c0_1 = arith.constant 0 : index
    %1 = vector.load %arg1[%c1, %c0_1] : memref<9x512xf32, #tpu.memory_space<vmem>>, vector<1x512xf32>
    %c2 = arith.constant 2 : index
    %c0_2 = arith.constant 0 : index
    %2 = vector.load %arg1[%c2, %c0_2] : memref<9x512xf32, #tpu.memory_space<vmem>>, vector<1x512xf32>
    %c3 = arith.constant 3 : index
    %c0_3 = arith.constant 0 : index
    %3 = vector.load %arg1[%c3, %c0_3] : memref<9x512xf32, #tpu.memory_space<vmem>>, vector<1x512xf32>
    %c5 = arith.constant 5 : index
    %c0_4 = arith.constant 0 : index
    %4 = vector.load %arg1[%c5, %c0_4] : memref<9x512xf32, #tpu.memory_space<vmem>>, vector<1x512xf32>
    %c6 = arith.constant 6 : index
    %c0_5 = arith.constant 0 : index
    %5 = vector.load %arg1[%c6, %c0_5] : memref<9x512xf32, #tpu.memory_space<vmem>>, vector<1x512xf32>
    %c7 = arith.constant 7 : index
    %c0_6 = arith.constant 0 : index
    %6 = vector.load %arg1[%c7, %c0_6] : memref<9x512xf32, #tpu.memory_space<vmem>>, vector<1x512xf32>
    %c8 = arith.constant 8 : index
    %c0_7 = arith.constant 0 : index
    %7 = vector.load %arg1[%c8, %c0_7] : memref<9x512xf32, #tpu.memory_space<vmem>>, vector<1x512xf32>
    %c0_8 = arith.constant 0 : index
    %c0_9 = arith.constant 0 : index
    %8 = vector.load %arg0[%c0_8, %c0_9] : memref<32x512xf32, #tpu.memory_space<vmem>>, vector<32x512xf32>
    %c0_10 = arith.constant 0 : index
    %c0_11 = arith.constant 0 : index
    %9 = vector.load %arg2[%c0_10, %c0_11] : memref<32x288xbf16, #tpu.memory_space<vmem>>, vector<32x288xbf16>
    %c0_12 = arith.constant 0 : index
    %c0_13 = arith.constant 0 : index
    %10 = vector.load %arg3[%c0_12, %c0_13] : memref<32x1xf32, #tpu.memory_space<vmem>>, vector<32x1xf32>
    %11 = vector.extract_strided_slice %8 {offsets = [0, 495], sizes = [32, 17], strides = [1, 1]} : vector<32x512xf32> to vector<32x17xf32>
    %12 = vector.extract_strided_slice %8 {offsets = [0, 0], sizes = [32, 495], strides = [1, 1]} : vector<32x512xf32> to vector<32x495xf32>
    %13 = tpu.concatenate %11, %12 in 1 : vector<32x17xf32>, vector<32x495xf32> -> vector<32x512xf32>
    %14 = vector.broadcast %0 : vector<1x512xf32> to vector<32x512xf32>
    %15 = arith.mulf %13, %14 : vector<32x512xf32>
    %16 = arith.truncf %15 : vector<32x512xf32> to vector<32x512xbf16>
    %c0_14 = arith.constant 0 : index
    %c0_15 = arith.constant 0 : index
    %17 = vector.load %arg9[%c0_14, %c0_15] : memref<288x512xbf16, #tpu.memory_space<vmem>>, vector<32x512xbf16>
    tpu.vector_store %arg9[%c0_14, %c0_15], %16 {strides = array<i32>} : memref<288x512xbf16, #tpu.memory_space<vmem>>, vector<32x512xbf16>,
    %18 = vector.extract_strided_slice %8 {offsets = [0, 496], sizes = [32, 16], strides = [1, 1]} : vector<32x512xf32> to vector<32x16xf32>
    %19 = vector.extract_strided_slice %8 {offsets = [0, 0], sizes = [32, 496], strides = [1, 1]} : vector<32x512xf32> to vector<32x496xf32>
    %20 = tpu.concatenate %18, %19 in 1 : vector<32x16xf32>, vector<32x496xf32> -> vector<32x512xf32>
    %21 = vector.broadcast %1 : vector<1x512xf32> to vector<32x512xf32>
    %22 = arith.mulf %20, %21 : vector<32x512xf32>
    %23 = arith.truncf %22 : vector<32x512xf32> to vector<32x512xbf16>
    %c32 = arith.constant 32 : index
    %c0_16 = arith.constant 0 : index
    %24 = vector.load %arg9[%c32, %c0_16] : memref<288x512xbf16, #tpu.memory_space<vmem>>, vector<32x512xbf16>
    tpu.vector_store %arg9[%c32, %c0_16], %23 {strides = array<i32>} : memref<288x512xbf16, #tpu.memory_space<vmem>>, vector<32x512xbf16>,
    %25 = vector.extract_strided_slice %8 {offsets = [0, 497], sizes = [32, 15], strides = [1, 1]} : vector<32x512xf32> to vector<32x15xf32>
    %26 = vector.extract_strided_slice %8 {offsets = [0, 0], sizes = [32, 497], strides = [1, 1]} : vector<32x512xf32> to vector<32x497xf32>
    %27 = tpu.concatenate %25, %26 in 1 : vector<32x15xf32>, vector<32x497xf32> -> vector<32x512xf32>
    %28 = vector.broadcast %2 : vector<1x512xf32> to vector<32x512xf32>
    %29 = arith.mulf %27, %28 : vector<32x512xf32>
    %30 = arith.truncf %29 : vector<32x512xf32> to vector<32x512xbf16>
    %c64 = arith.constant 64 : index
    %c0_17 = arith.constant 0 : index
    %31 = vector.load %arg9[%c64, %c0_17] : memref<288x512xbf16, #tpu.memory_space<vmem>>, vector<32x512xbf16>
    tpu.vector_store %arg9[%c64, %c0_17], %30 {strides = array<i32>} : memref<288x512xbf16, #tpu.memory_space<vmem>>, vector<32x512xbf16>,
    %32 = vector.extract_strided_slice %8 {offsets = [0, 511], sizes = [32, 1], strides = [1, 1]} : vector<32x512xf32> to vector<32x1xf32>
    %33 = vector.extract_strided_slice %8 {offsets = [0, 0], sizes = [32, 511], strides = [1, 1]} : vector<32x512xf32> to vector<32x511xf32>
    %34 = tpu.concatenate %32, %33 in 1 : vector<32x1xf32>, vector<32x511xf32> -> vector<32x512xf32>
    %35 = vector.broadcast %3 : vector<1x512xf32> to vector<32x512xf32>
    %36 = arith.mulf %34, %35 : vector<32x512xf32>
    %37 = arith.truncf %36 : vector<32x512xf32> to vector<32x512xbf16>
    %c96 = arith.constant 96 : index
    %c0_18 = arith.constant 0 : index
    %38 = vector.load %arg9[%c96, %c0_18] : memref<288x512xbf16, #tpu.memory_space<vmem>>, vector<32x512xbf16>
    tpu.vector_store %arg9[%c96, %c0_18], %37 {strides = array<i32>} : memref<288x512xbf16, #tpu.memory_space<vmem>>, vector<32x512xbf16>,
    %39 = arith.truncf %8 : vector<32x512xf32> to vector<32x512xbf16>
    %c128 = arith.constant 128 : index
    %c0_19 = arith.constant 0 : index
    %40 = vector.load %arg9[%c128, %c0_19] : memref<288x512xbf16, #tpu.memory_space<vmem>>, vector<32x512xbf16>
    tpu.vector_store %arg9[%c128, %c0_19], %39 {strides = array<i32>} : memref<288x512xbf16, #tpu.memory_space<vmem>>, vector<32x512xbf16>,
    %41 = vector.extract_strided_slice %8 {offsets = [0, 1], sizes = [32, 511], strides = [1, 1]} : vector<32x512xf32> to vector<32x511xf32>
    %42 = vector.extract_strided_slice %8 {offsets = [0, 0], sizes = [32, 1], strides = [1, 1]} : vector<32x512xf32> to vector<32x1xf32>
    %43 = tpu.concatenate %41, %42 in 1 : vector<32x511xf32>, vector<32x1xf32> -> vector<32x512xf32>
    %44 = vector.broadcast %4 : vector<1x512xf32> to vector<32x512xf32>
    %45 = arith.mulf %43, %44 : vector<32x512xf32>
    %46 = arith.truncf %45 : vector<32x512xf32> to vector<32x512xbf16>
    %c160 = arith.constant 160 : index
    %c0_20 = arith.constant 0 : index
    %47 = vector.load %arg9[%c160, %c0_20] : memref<288x512xbf16, #tpu.memory_space<vmem>>, vector<32x512xbf16>
    tpu.vector_store %arg9[%c160, %c0_20], %46 {strides = array<i32>} : memref<288x512xbf16, #tpu.memory_space<vmem>>, vector<32x512xbf16>,
    %48 = vector.extract_strided_slice %8 {offsets = [0, 15], sizes = [32, 497], strides = [1, 1]} : vector<32x512xf32> to vector<32x497xf32>
    %49 = vector.extract_strided_slice %8 {offsets = [0, 0], sizes = [32, 15], strides = [1, 1]} : vector<32x512xf32> to vector<32x15xf32>
    %50 = tpu.concatenate %48, %49 in 1 : vector<32x497xf32>, vector<32x15xf32> -> vector<32x512xf32>
    %51 = vector.broadcast %5 : vector<1x512xf32> to vector<32x512xf32>
    %52 = arith.mulf %50, %51 : vector<32x512xf32>
    %53 = arith.truncf %52 : vector<32x512xf32> to vector<32x512xbf16>
    %c192 = arith.constant 192 : index
    %c0_21 = arith.constant 0 : index
    %54 = vector.load %arg9[%c192, %c0_21] : memref<288x512xbf16, #tpu.memory_space<vmem>>, vector<32x512xbf16>
    tpu.vector_store %arg9[%c192, %c0_21], %53 {strides = array<i32>} : memref<288x512xbf16, #tpu.memory_space<vmem>>, vector<32x512xbf16>,
    %55 = vector.extract_strided_slice %8 {offsets = [0, 16], sizes = [32, 496], strides = [1, 1]} : vector<32x512xf32> to vector<32x496xf32>
    %56 = vector.extract_strided_slice %8 {offsets = [0, 0], sizes = [32, 16], strides = [1, 1]} : vector<32x512xf32> to vector<32x16xf32>
    %57 = tpu.concatenate %55, %56 in 1 : vector<32x496xf32>, vector<32x16xf32> -> vector<32x512xf32>
    %58 = vector.broadcast %6 : vector<1x512xf32> to vector<32x512xf32>
    %59 = arith.mulf %57, %58 : vector<32x512xf32>
    %60 = arith.truncf %59 : vector<32x512xf32> to vector<32x512xbf16>
    %c224 = arith.constant 224 : index
    %c0_22 = arith.constant 0 : index
    %61 = vector.load %arg9[%c224, %c0_22] : memref<288x512xbf16, #tpu.memory_space<vmem>>, vector<32x512xbf16>
    tpu.vector_store %arg9[%c224, %c0_22], %60 {strides = array<i32>} : memref<288x512xbf16, #tpu.memory_space<vmem>>, vector<32x512xbf16>,
    %62 = vector.extract_strided_slice %8 {offsets = [0, 17], sizes = [32, 495], strides = [1, 1]} : vector<32x512xf32> to vector<32x495xf32>
    %63 = vector.extract_strided_slice %8 {offsets = [0, 0], sizes = [32, 17], strides = [1, 1]} : vector<32x512xf32> to vector<32x17xf32>
    %64 = tpu.concatenate %62, %63 in 1 : vector<32x495xf32>, vector<32x17xf32> -> vector<32x512xf32>
    %65 = vector.broadcast %7 : vector<1x512xf32> to vector<32x512xf32>
    %66 = arith.mulf %64, %65 : vector<32x512xf32>
    %67 = arith.truncf %66 : vector<32x512xf32> to vector<32x512xbf16>
    %c256 = arith.constant 256 : index
    %c0_23 = arith.constant 0 : index
    %68 = vector.load %arg9[%c256, %c0_23] : memref<288x512xbf16, #tpu.memory_space<vmem>>, vector<32x512xbf16>
    tpu.vector_store %arg9[%c256, %c0_23], %67 {strides = array<i32>} : memref<288x512xbf16, #tpu.memory_space<vmem>>, vector<32x512xbf16>,
    %c0_24 = arith.constant 0 : index
    %c0_25 = arith.constant 0 : index
    %69 = vector.load %arg9[%c0_24, %c0_25] : memref<288x512xbf16, #tpu.memory_space<vmem>>, vector<288x512xbf16>
    %cst = arith.constant dense<0.000000e+00> : vector<32x512xf32>
    %70 = tpu.matmul %9, %69, %cst {dimension_numbers = #tpu.dot_dimension_numbers<[1], [0], [0], [1], [0, 0, 1, 1], [], []>} : vector<32x288xbf16>, vector<288x512xbf16>, vector<32x512xf32> -> vector<32x512xf32>
    %71 = vector.broadcast %10 : vector<32x1xf32> to vector<32x512xf32>
    %72 = arith.addf %70, %71 : vector<32x512xf32>
    %cst_26 = arith.constant 0.000000e+00 : f32
    %73 = vector.broadcast %cst_26 : f32 to vector<32x512xf32>
    %74 = arith.cmpf ogt, %72, %73 : vector<32x512xf32>
    %cst_27 = arith.constant 0.00999999977 : f32
    %75 = vector.broadcast %cst_27 : f32 to vector<32x512xf32>
    %76 = arith.mulf %75, %72 : vector<32x512xf32>
    %77 = arith.select %74, %72, %76 : vector<32x512xi1>, vector<32x512xf32>
    %c0_28 = arith.constant 0 : index
    %c0_29 = arith.constant 0 : index
    %c0_30 = arith.constant 0 : index
    %78 = vector.load %arg4[%c0_28, %c0_29, %c0_30] : memref<3x32x288xbf16, #tpu.memory_space<vmem>>, vector<1x32x288xbf16>
    %79 = vector.shape_cast %78 : vector<1x32x288xbf16> to vector<32x288xbf16>
    %c0_31 = arith.constant 0 : index
    %c0_32 = arith.constant 0 : index
    %c0_33 = arith.constant 0 : index
    %80 = vector.load %arg5[%c0_31, %c0_32, %c0_33] : memref<3x32x1xf32, #tpu.memory_space<vmem>>, vector<1x32x1xf32>
    %81 = vector.shape_cast %80 : vector<1x32x1xf32> to vector<32x1xf32>
    %82 = vector.extract_strided_slice %77 {offsets = [0, 495], sizes = [32, 17], strides = [1, 1]} : vector<32x512xf32> to vector<32x17xf32>
    %83 = vector.extract_strided_slice %77 {offsets = [0, 0], sizes = [32, 495], strides = [1, 1]} : vector<32x512xf32> to vector<32x495xf32>
    %84 = tpu.concatenate %82, %83 in 1 : vector<32x17xf32>, vector<32x495xf32> -> vector<32x512xf32>
    %85 = vector.broadcast %0 : vector<1x512xf32> to vector<32x512xf32>
    %86 = arith.mulf %84, %85 : vector<32x512xf32>
    %87 = arith.truncf %86 : vector<32x512xf32> to vector<32x512xbf16>
    %c0_34 = arith.constant 0 : index
    %c0_35 = arith.constant 0 : index
    %88 = vector.load %arg9[%c0_34, %c0_35] : memref<288x512xbf16, #tpu.memory_space<vmem>>, vector<32x512xbf16>
    tpu.vector_store %arg9[%c0_34, %c0_35], %87 {strides = array<i32>} : memref<288x512xbf16, #tpu.memory_space<vmem>>, vector<32x512xbf16>,
    %89 = vector.extract_strided_slice %77 {offsets = [0, 496], sizes = [32, 16], strides = [1, 1]} : vector<32x512xf32> to vector<32x16xf32>
    %90 = vector.extract_strided_slice %77 {offsets = [0, 0], sizes = [32, 496], strides = [1, 1]} : vector<32x512xf32> to vector<32x496xf32>
    %91 = tpu.concatenate %89, %90 in 1 : vector<32x16xf32>, vector<32x496xf32> -> vector<32x512xf32>
    %92 = vector.broadcast %1 : vector<1x512xf32> to vector<32x512xf32>
    %93 = arith.mulf %91, %92 : vector<32x512xf32>
    %94 = arith.truncf %93 : vector<32x512xf32> to vector<32x512xbf16>
    %c32_36 = arith.constant 32 : index
    %c0_37 = arith.constant 0 : index
    %95 = vector.load %arg9[%c32_36, %c0_37] : memref<288x512xbf16, #tpu.memory_space<vmem>>, vector<32x512xbf16>
    tpu.vector_store %arg9[%c32_36, %c0_37], %94 {strides = array<i32>} : memref<288x512xbf16, #tpu.memory_space<vmem>>, vector<32x512xbf16>,
    %96 = vector.extract_strided_slice %77 {offsets = [0, 497], sizes = [32, 15], strides = [1, 1]} : vector<32x512xf32> to vector<32x15xf32>
    %97 = vector.extract_strided_slice %77 {offsets = [0, 0], sizes = [32, 497], strides = [1, 1]} : vector<32x512xf32> to vector<32x497xf32>
    %98 = tpu.concatenate %96, %97 in 1 : vector<32x15xf32>, vector<32x497xf32> -> vector<32x512xf32>
    %99 = vector.broadcast %2 : vector<1x512xf32> to vector<32x512xf32>
    %100 = arith.mulf %98, %99 : vector<32x512xf32>
    %101 = arith.truncf %100 : vector<32x512xf32> to vector<32x512xbf16>
    %c64_38 = arith.constant 64 : index
    %c0_39 = arith.constant 0 : index
    %102 = vector.load %arg9[%c64_38, %c0_39] : memref<288x512xbf16, #tpu.memory_space<vmem>>, vector<32x512xbf16>
    tpu.vector_store %arg9[%c64_38, %c0_39], %101 {strides = array<i32>} : memref<288x512xbf16, #tpu.memory_space<vmem>>, vector<32x512xbf16>,
    %103 = vector.extract_strided_slice %77 {offsets = [0, 511], sizes = [32, 1], strides = [1, 1]} : vector<32x512xf32> to vector<32x1xf32>
    %104 = vector.extract_strided_slice %77 {offsets = [0, 0], sizes = [32, 511], strides = [1, 1]} : vector<32x512xf32> to vector<32x511xf32>
    %105 = tpu.concatenate %103, %104 in 1 : vector<32x1xf32>, vector<32x511xf32> -> vector<32x512xf32>
    %106 = vector.broadcast %3 : vector<1x512xf32> to vector<32x512xf32>
    %107 = arith.mulf %105, %106 : vector<32x512xf32>
    %108 = arith.truncf %107 : vector<32x512xf32> to vector<32x512xbf16>
    %c96_40 = arith.constant 96 : index
    %c0_41 = arith.constant 0 : index
    %109 = vector.load %arg9[%c96_40, %c0_41] : memref<288x512xbf16, #tpu.memory_space<vmem>>, vector<32x512xbf16>
    tpu.vector_store %arg9[%c96_40, %c0_41], %108 {strides = array<i32>} : memref<288x512xbf16, #tpu.memory_space<vmem>>, vector<32x512xbf16>,
    %110 = arith.truncf %77 : vector<32x512xf32> to vector<32x512xbf16>
    %c128_42 = arith.constant 128 : index
    %c0_43 = arith.constant 0 : index
    %111 = vector.load %arg9[%c128_42, %c0_43] : memref<288x512xbf16, #tpu.memory_space<vmem>>, vector<32x512xbf16>
    tpu.vector_store %arg9[%c128_42, %c0_43], %110 {strides = array<i32>} : memref<288x512xbf16, #tpu.memory_space<vmem>>, vector<32x512xbf16>,
    %112 = vector.extract_strided_slice %77 {offsets = [0, 1], sizes = [32, 511], strides = [1, 1]} : vector<32x512xf32> to vector<32x511xf32>
    %113 = vector.extract_strided_slice %77 {offsets = [0, 0], sizes = [32, 1], strides = [1, 1]} : vector<32x512xf32> to vector<32x1xf32>
    %114 = tpu.concatenate %112, %113 in 1 : vector<32x511xf32>, vector<32x1xf32> -> vector<32x512xf32>
    %115 = vector.broadcast %4 : vector<1x512xf32> to vector<32x512xf32>
    %116 = arith.mulf %114, %115 : vector<32x512xf32>
    %117 = arith.truncf %116 : vector<32x512xf32> to vector<32x512xbf16>
    %c160_44 = arith.constant 160 : index
    %c0_45 = arith.constant 0 : index
    %118 = vector.load %arg9[%c160_44, %c0_45] : memref<288x512xbf16, #tpu.memory_space<vmem>>, vector<32x512xbf16>
    tpu.vector_store %arg9[%c160_44, %c0_45], %117 {strides = array<i32>} : memref<288x512xbf16, #tpu.memory_space<vmem>>, vector<32x512xbf16>,
    %119 = vector.extract_strided_slice %77 {offsets = [0, 15], sizes = [32, 497], strides = [1, 1]} : vector<32x512xf32> to vector<32x497xf32>
    %120 = vector.extract_strided_slice %77 {offsets = [0, 0], sizes = [32, 15], strides = [1, 1]} : vector<32x512xf32> to vector<32x15xf32>
    %121 = tpu.concatenate %119, %120 in 1 : vector<32x497xf32>, vector<32x15xf32> -> vector<32x512xf32>
    %122 = vector.broadcast %5 : vector<1x512xf32> to vector<32x512xf32>
    %123 = arith.mulf %121, %122 : vector<32x512xf32>
    %124 = arith.truncf %123 : vector<32x512xf32> to vector<32x512xbf16>
    %c192_46 = arith.constant 192 : index
    %c0_47 = arith.constant 0 : index
    %125 = vector.load %arg9[%c192_46, %c0_47] : memref<288x512xbf16, #tpu.memory_space<vmem>>, vector<32x512xbf16>
    tpu.vector_store %arg9[%c192_46, %c0_47], %124 {strides = array<i32>} : memref<288x512xbf16, #tpu.memory_space<vmem>>, vector<32x512xbf16>,
    %126 = vector.extract_strided_slice %77 {offsets = [0, 16], sizes = [32, 496], strides = [1, 1]} : vector<32x512xf32> to vector<32x496xf32>
    %127 = vector.extract_strided_slice %77 {offsets = [0, 0], sizes = [32, 16], strides = [1, 1]} : vector<32x512xf32> to vector<32x16xf32>
    %128 = tpu.concatenate %126, %127 in 1 : vector<32x496xf32>, vector<32x16xf32> -> vector<32x512xf32>
    %129 = vector.broadcast %6 : vector<1x512xf32> to vector<32x512xf32>
    %130 = arith.mulf %128, %129 : vector<32x512xf32>
    %131 = arith.truncf %130 : vector<32x512xf32> to vector<32x512xbf16>
    %c224_48 = arith.constant 224 : index
    %c0_49 = arith.constant 0 : index
    %132 = vector.load %arg9[%c224_48, %c0_49] : memref<288x512xbf16, #tpu.memory_space<vmem>>, vector<32x512xbf16>
    tpu.vector_store %arg9[%c224_48, %c0_49], %131 {strides = array<i32>} : memref<288x512xbf16, #tpu.memory_space<vmem>>, vector<32x512xbf16>,
    %133 = vector.extract_strided_slice %77 {offsets = [0, 17], sizes = [32, 495], strides = [1, 1]} : vector<32x512xf32> to vector<32x495xf32>
    %134 = vector.extract_strided_slice %77 {offsets = [0, 0], sizes = [32, 17], strides = [1, 1]} : vector<32x512xf32> to vector<32x17xf32>
    %135 = tpu.concatenate %133, %134 in 1 : vector<32x495xf32>, vector<32x17xf32> -> vector<32x512xf32>
    %136 = vector.broadcast %7 : vector<1x512xf32> to vector<32x512xf32>
    %137 = arith.mulf %135, %136 : vector<32x512xf32>
    %138 = arith.truncf %137 : vector<32x512xf32> to vector<32x512xbf16>
    %c256_50 = arith.constant 256 : index
    %c0_51 = arith.constant 0 : index
    %139 = vector.load %arg9[%c256_50, %c0_51] : memref<288x512xbf16, #tpu.memory_space<vmem>>, vector<32x512xbf16>
    tpu.vector_store %arg9[%c256_50, %c0_51], %138 {strides = array<i32>} : memref<288x512xbf16, #tpu.memory_space<vmem>>, vector<32x512xbf16>,
    %c0_52 = arith.constant 0 : index
    %c0_53 = arith.constant 0 : index
    %140 = vector.load %arg9[%c0_52, %c0_53] : memref<288x512xbf16, #tpu.memory_space<vmem>>, vector<288x512xbf16>
    %cst_54 = arith.constant dense<0.000000e+00> : vector<32x512xf32>
    %141 = tpu.matmul %79, %140, %cst_54 {dimension_numbers = #tpu.dot_dimension_numbers<[1], [0], [0], [1], [0, 0, 1, 1], [], []>} : vector<32x288xbf16>, vector<288x512xbf16>, vector<32x512xf32> -> vector<32x512xf32>
    %142 = vector.broadcast %81 : vector<32x1xf32> to vector<32x512xf32>
    %143 = arith.addf %141, %142 : vector<32x512xf32>
    %cst_55 = arith.constant 0.000000e+00 : f32
    %144 = vector.broadcast %cst_55 : f32 to vector<32x512xf32>
    %145 = arith.cmpf ogt, %143, %144 : vector<32x512xf32>
    %cst_56 = arith.constant 0.00999999977 : f32
    %146 = vector.broadcast %cst_56 : f32 to vector<32x512xf32>
    %147 = arith.mulf %146, %143 : vector<32x512xf32>
    %148 = arith.select %145, %143, %147 : vector<32x512xi1>, vector<32x512xf32>
    %c1_57 = arith.constant 1 : index
    %c0_58 = arith.constant 0 : index
    %c0_59 = arith.constant 0 : index
    %149 = vector.load %arg4[%c1_57, %c0_58, %c0_59] : memref<3x32x288xbf16, #tpu.memory_space<vmem>>, vector<1x32x288xbf16>
    %150 = vector.shape_cast %149 : vector<1x32x288xbf16> to vector<32x288xbf16>
    %c1_60 = arith.constant 1 : index
    %c0_61 = arith.constant 0 : index
    %c0_62 = arith.constant 0 : index
    %151 = vector.load %arg5[%c1_60, %c0_61, %c0_62] : memref<3x32x1xf32, #tpu.memory_space<vmem>>, vector<1x32x1xf32>
    %152 = vector.shape_cast %151 : vector<1x32x1xf32> to vector<32x1xf32>
    %153 = vector.extract_strided_slice %148 {offsets = [0, 495], sizes = [32, 17], strides = [1, 1]} : vector<32x512xf32> to vector<32x17xf32>
    %154 = vector.extract_strided_slice %148 {offsets = [0, 0], sizes = [32, 495], strides = [1, 1]} : vector<32x512xf32> to vector<32x495xf32>
    %155 = tpu.concatenate %153, %154 in 1 : vector<32x17xf32>, vector<32x495xf32> -> vector<32x512xf32>
    %156 = vector.broadcast %0 : vector<1x512xf32> to vector<32x512xf32>
    %157 = arith.mulf %155, %156 : vector<32x512xf32>
    %158 = arith.truncf %157 : vector<32x512xf32> to vector<32x512xbf16>
    %c0_63 = arith.constant 0 : index
    %c0_64 = arith.constant 0 : index
    %159 = vector.load %arg9[%c0_63, %c0_64] : memref<288x512xbf16, #tpu.memory_space<vmem>>, vector<32x512xbf16>
    tpu.vector_store %arg9[%c0_63, %c0_64], %158 {strides = array<i32>} : memref<288x512xbf16, #tpu.memory_space<vmem>>, vector<32x512xbf16>,
    %160 = vector.extract_strided_slice %148 {offsets = [0, 496], sizes = [32, 16], strides = [1, 1]} : vector<32x512xf32> to vector<32x16xf32>
    %161 = vector.extract_strided_slice %148 {offsets = [0, 0], sizes = [32, 496], strides = [1, 1]} : vector<32x512xf32> to vector<32x496xf32>
    %162 = tpu.concatenate %160, %161 in 1 : vector<32x16xf32>, vector<32x496xf32> -> vector<32x512xf32>
    %163 = vector.broadcast %1 : vector<1x512xf32> to vector<32x512xf32>
    %164 = arith.mulf %162, %163 : vector<32x512xf32>
    %165 = arith.truncf %164 : vector<32x512xf32> to vector<32x512xbf16>
    %c32_65 = arith.constant 32 : index
    %c0_66 = arith.constant 0 : index
    %166 = vector.load %arg9[%c32_65, %c0_66] : memref<288x512xbf16, #tpu.memory_space<vmem>>, vector<32x512xbf16>
    tpu.vector_store %arg9[%c32_65, %c0_66], %165 {strides = array<i32>} : memref<288x512xbf16, #tpu.memory_space<vmem>>, vector<32x512xbf16>,
    %167 = vector.extract_strided_slice %148 {offsets = [0, 497], sizes = [32, 15], strides = [1, 1]} : vector<32x512xf32> to vector<32x15xf32>
    %168 = vector.extract_strided_slice %148 {offsets = [0, 0], sizes = [32, 497], strides = [1, 1]} : vector<32x512xf32> to vector<32x497xf32>
    %169 = tpu.concatenate %167, %168 in 1 : vector<32x15xf32>, vector<32x497xf32> -> vector<32x512xf32>
    %170 = vector.broadcast %2 : vector<1x512xf32> to vector<32x512xf32>
    %171 = arith.mulf %169, %170 : vector<32x512xf32>
    %172 = arith.truncf %171 : vector<32x512xf32> to vector<32x512xbf16>
    %c64_67 = arith.constant 64 : index
    %c0_68 = arith.constant 0 : index
    %173 = vector.load %arg9[%c64_67, %c0_68] : memref<288x512xbf16, #tpu.memory_space<vmem>>, vector<32x512xbf16>
    tpu.vector_store %arg9[%c64_67, %c0_68], %172 {strides = array<i32>} : memref<288x512xbf16, #tpu.memory_space<vmem>>, vector<32x512xbf16>,
    %174 = vector.extract_strided_slice %148 {offsets = [0, 511], sizes = [32, 1], strides = [1, 1]} : vector<32x512xf32> to vector<32x1xf32>
    %175 = vector.extract_strided_slice %148 {offsets = [0, 0], sizes = [32, 511], strides = [1, 1]} : vector<32x512xf32> to vector<32x511xf32>
    %176 = tpu.concatenate %174, %175 in 1 : vector<32x1xf32>, vector<32x511xf32> -> vector<32x512xf32>
    %177 = vector.broadcast %3 : vector<1x512xf32> to vector<32x512xf32>
    %178 = arith.mulf %176, %177 : vector<32x512xf32>
    %179 = arith.truncf %178 : vector<32x512xf32> to vector<32x512xbf16>
    %c96_69 = arith.constant 96 : index
    %c0_70 = arith.constant 0 : index
    %180 = vector.load %arg9[%c96_69, %c0_70] : memref<288x512xbf16, #tpu.memory_space<vmem>>, vector<32x512xbf16>
    tpu.vector_store %arg9[%c96_69, %c0_70], %179 {strides = array<i32>} : memref<288x512xbf16, #tpu.memory_space<vmem>>, vector<32x512xbf16>,
    %181 = arith.truncf %148 : vector<32x512xf32> to vector<32x512xbf16>
    %c128_71 = arith.constant 128 : index
    %c0_72 = arith.constant 0 : index
    %182 = vector.load %arg9[%c128_71, %c0_72] : memref<288x512xbf16, #tpu.memory_space<vmem>>, vector<32x512xbf16>
    tpu.vector_store %arg9[%c128_71, %c0_72], %181 {strides = array<i32>} : memref<288x512xbf16, #tpu.memory_space<vmem>>, vector<32x512xbf16>,
    %183 = vector.extract_strided_slice %148 {offsets = [0, 1], sizes = [32, 511], strides = [1, 1]} : vector<32x512xf32> to vector<32x511xf32>
    %184 = vector.extract_strided_slice %148 {offsets = [0, 0], sizes = [32, 1], strides = [1, 1]} : vector<32x512xf32> to vector<32x1xf32>
    %185 = tpu.concatenate %183, %184 in 1 : vector<32x511xf32>, vector<32x1xf32> -> vector<32x512xf32>
    %186 = vector.broadcast %4 : vector<1x512xf32> to vector<32x512xf32>
    %187 = arith.mulf %185, %186 : vector<32x512xf32>
    %188 = arith.truncf %187 : vector<32x512xf32> to vector<32x512xbf16>
    %c160_73 = arith.constant 160 : index
    %c0_74 = arith.constant 0 : index
    %189 = vector.load %arg9[%c160_73, %c0_74] : memref<288x512xbf16, #tpu.memory_space<vmem>>, vector<32x512xbf16>
    tpu.vector_store %arg9[%c160_73, %c0_74], %188 {strides = array<i32>} : memref<288x512xbf16, #tpu.memory_space<vmem>>, vector<32x512xbf16>,
    %190 = vector.extract_strided_slice %148 {offsets = [0, 15], sizes = [32, 497], strides = [1, 1]} : vector<32x512xf32> to vector<32x497xf32>
    %191 = vector.extract_strided_slice %148 {offsets = [0, 0], sizes = [32, 15], strides = [1, 1]} : vector<32x512xf32> to vector<32x15xf32>
    %192 = tpu.concatenate %190, %191 in 1 : vector<32x497xf32>, vector<32x15xf32> -> vector<32x512xf32>
    %193 = vector.broadcast %5 : vector<1x512xf32> to vector<32x512xf32>
    %194 = arith.mulf %192, %193 : vector<32x512xf32>
    %195 = arith.truncf %194 : vector<32x512xf32> to vector<32x512xbf16>
    %c192_75 = arith.constant 192 : index
    %c0_76 = arith.constant 0 : index
    %196 = vector.load %arg9[%c192_75, %c0_76] : memref<288x512xbf16, #tpu.memory_space<vmem>>, vector<32x512xbf16>
    tpu.vector_store %arg9[%c192_75, %c0_76], %195 {strides = array<i32>} : memref<288x512xbf16, #tpu.memory_space<vmem>>, vector<32x512xbf16>,
    %197 = vector.extract_strided_slice %148 {offsets = [0, 16], sizes = [32, 496], strides = [1, 1]} : vector<32x512xf32> to vector<32x496xf32>
    %198 = vector.extract_strided_slice %148 {offsets = [0, 0], sizes = [32, 16], strides = [1, 1]} : vector<32x512xf32> to vector<32x16xf32>
    %199 = tpu.concatenate %197, %198 in 1 : vector<32x496xf32>, vector<32x16xf32> -> vector<32x512xf32>
    %200 = vector.broadcast %6 : vector<1x512xf32> to vector<32x512xf32>
    %201 = arith.mulf %199, %200 : vector<32x512xf32>
    %202 = arith.truncf %201 : vector<32x512xf32> to vector<32x512xbf16>
    %c224_77 = arith.constant 224 : index
    %c0_78 = arith.constant 0 : index
    %203 = vector.load %arg9[%c224_77, %c0_78] : memref<288x512xbf16, #tpu.memory_space<vmem>>, vector<32x512xbf16>
    tpu.vector_store %arg9[%c224_77, %c0_78], %202 {strides = array<i32>} : memref<288x512xbf16, #tpu.memory_space<vmem>>, vector<32x512xbf16>,
    %204 = vector.extract_strided_slice %148 {offsets = [0, 17], sizes = [32, 495], strides = [1, 1]} : vector<32x512xf32> to vector<32x495xf32>
    %205 = vector.extract_strided_slice %148 {offsets = [0, 0], sizes = [32, 17], strides = [1, 1]} : vector<32x512xf32> to vector<32x17xf32>
    %206 = tpu.concatenate %204, %205 in 1 : vector<32x495xf32>, vector<32x17xf32> -> vector<32x512xf32>
    %207 = vector.broadcast %7 : vector<1x512xf32> to vector<32x512xf32>
    %208 = arith.mulf %206, %207 : vector<32x512xf32>
    %209 = arith.truncf %208 : vector<32x512xf32> to vector<32x512xbf16>
    %c256_79 = arith.constant 256 : index
    %c0_80 = arith.constant 0 : index
    %210 = vector.load %arg9[%c256_79, %c0_80] : memref<288x512xbf16, #tpu.memory_space<vmem>>, vector<32x512xbf16>
    tpu.vector_store %arg9[%c256_79, %c0_80], %209 {strides = array<i32>} : memref<288x512xbf16, #tpu.memory_space<vmem>>, vector<32x512xbf16>,
    %c0_81 = arith.constant 0 : index
    %c0_82 = arith.constant 0 : index
    %211 = vector.load %arg9[%c0_81, %c0_82] : memref<288x512xbf16, #tpu.memory_space<vmem>>, vector<288x512xbf16>
    %cst_83 = arith.constant dense<0.000000e+00> : vector<32x512xf32>
    %212 = tpu.matmul %150, %211, %cst_83 {dimension_numbers = #tpu.dot_dimension_numbers<[1], [0], [0], [1], [0, 0, 1, 1], [], []>} : vector<32x288xbf16>, vector<288x512xbf16>, vector<32x512xf32> -> vector<32x512xf32>
    %213 = vector.broadcast %152 : vector<32x1xf32> to vector<32x512xf32>
    %214 = arith.addf %212, %213 : vector<32x512xf32>
    %cst_84 = arith.constant 0.000000e+00 : f32
    %215 = vector.broadcast %cst_84 : f32 to vector<32x512xf32>
    %216 = arith.cmpf ogt, %214, %215 : vector<32x512xf32>
    %cst_85 = arith.constant 0.00999999977 : f32
    %217 = vector.broadcast %cst_85 : f32 to vector<32x512xf32>
    %218 = arith.mulf %217, %214 : vector<32x512xf32>
    %219 = arith.select %216, %214, %218 : vector<32x512xi1>, vector<32x512xf32>
    %c2_86 = arith.constant 2 : index
    %c0_87 = arith.constant 0 : index
    %c0_88 = arith.constant 0 : index
    %220 = vector.load %arg4[%c2_86, %c0_87, %c0_88] : memref<3x32x288xbf16, #tpu.memory_space<vmem>>, vector<1x32x288xbf16>
    %221 = vector.shape_cast %220 : vector<1x32x288xbf16> to vector<32x288xbf16>
    %c2_89 = arith.constant 2 : index
    %c0_90 = arith.constant 0 : index
    %c0_91 = arith.constant 0 : index
    %222 = vector.load %arg5[%c2_89, %c0_90, %c0_91] : memref<3x32x1xf32, #tpu.memory_space<vmem>>, vector<1x32x1xf32>
    %223 = vector.shape_cast %222 : vector<1x32x1xf32> to vector<32x1xf32>
    %224 = vector.extract_strided_slice %219 {offsets = [0, 495], sizes = [32, 17], strides = [1, 1]} : vector<32x512xf32> to vector<32x17xf32>
    %225 = vector.extract_strided_slice %219 {offsets = [0, 0], sizes = [32, 495], strides = [1, 1]} : vector<32x512xf32> to vector<32x495xf32>
    %226 = tpu.concatenate %224, %225 in 1 : vector<32x17xf32>, vector<32x495xf32> -> vector<32x512xf32>
    %227 = vector.broadcast %0 : vector<1x512xf32> to vector<32x512xf32>
    %228 = arith.mulf %226, %227 : vector<32x512xf32>
    %229 = arith.truncf %228 : vector<32x512xf32> to vector<32x512xbf16>
    %c0_92 = arith.constant 0 : index
    %c0_93 = arith.constant 0 : index
    %230 = vector.load %arg9[%c0_92, %c0_93] : memref<288x512xbf16, #tpu.memory_space<vmem>>, vector<32x512xbf16>
    tpu.vector_store %arg9[%c0_92, %c0_93], %229 {strides = array<i32>} : memref<288x512xbf16, #tpu.memory_space<vmem>>, vector<32x512xbf16>,
    %231 = vector.extract_strided_slice %219 {offsets = [0, 496], sizes = [32, 16], strides = [1, 1]} : vector<32x512xf32> to vector<32x16xf32>
    %232 = vector.extract_strided_slice %219 {offsets = [0, 0], sizes = [32, 496], strides = [1, 1]} : vector<32x512xf32> to vector<32x496xf32>
    %233 = tpu.concatenate %231, %232 in 1 : vector<32x16xf32>, vector<32x496xf32> -> vector<32x512xf32>
    %234 = vector.broadcast %1 : vector<1x512xf32> to vector<32x512xf32>
    %235 = arith.mulf %233, %234 : vector<32x512xf32>
    %236 = arith.truncf %235 : vector<32x512xf32> to vector<32x512xbf16>
    %c32_94 = arith.constant 32 : index
    %c0_95 = arith.constant 0 : index
    %237 = vector.load %arg9[%c32_94, %c0_95] : memref<288x512xbf16, #tpu.memory_space<vmem>>, vector<32x512xbf16>
    tpu.vector_store %arg9[%c32_94, %c0_95], %236 {strides = array<i32>} : memref<288x512xbf16, #tpu.memory_space<vmem>>, vector<32x512xbf16>,
    %238 = vector.extract_strided_slice %219 {offsets = [0, 497], sizes = [32, 15], strides = [1, 1]} : vector<32x512xf32> to vector<32x15xf32>
    %239 = vector.extract_strided_slice %219 {offsets = [0, 0], sizes = [32, 497], strides = [1, 1]} : vector<32x512xf32> to vector<32x497xf32>
    %240 = tpu.concatenate %238, %239 in 1 : vector<32x15xf32>, vector<32x497xf32> -> vector<32x512xf32>
    %241 = vector.broadcast %2 : vector<1x512xf32> to vector<32x512xf32>
    %242 = arith.mulf %240, %241 : vector<32x512xf32>
    %243 = arith.truncf %242 : vector<32x512xf32> to vector<32x512xbf16>
    %c64_96 = arith.constant 64 : index
    %c0_97 = arith.constant 0 : index
    %244 = vector.load %arg9[%c64_96, %c0_97] : memref<288x512xbf16, #tpu.memory_space<vmem>>, vector<32x512xbf16>
    tpu.vector_store %arg9[%c64_96, %c0_97], %243 {strides = array<i32>} : memref<288x512xbf16, #tpu.memory_space<vmem>>, vector<32x512xbf16>,
    %245 = vector.extract_strided_slice %219 {offsets = [0, 511], sizes = [32, 1], strides = [1, 1]} : vector<32x512xf32> to vector<32x1xf32>
    %246 = vector.extract_strided_slice %219 {offsets = [0, 0], sizes = [32, 511], strides = [1, 1]} : vector<32x512xf32> to vector<32x511xf32>
    %247 = tpu.concatenate %245, %246 in 1 : vector<32x1xf32>, vector<32x511xf32> -> vector<32x512xf32>
    %248 = vector.broadcast %3 : vector<1x512xf32> to vector<32x512xf32>
    %249 = arith.mulf %247, %248 : vector<32x512xf32>
    %250 = arith.truncf %249 : vector<32x512xf32> to vector<32x512xbf16>
    %c96_98 = arith.constant 96 : index
    %c0_99 = arith.constant 0 : index
    %251 = vector.load %arg9[%c96_98, %c0_99] : memref<288x512xbf16, #tpu.memory_space<vmem>>, vector<32x512xbf16>
    tpu.vector_store %arg9[%c96_98, %c0_99], %250 {strides = array<i32>} : memref<288x512xbf16, #tpu.memory_space<vmem>>, vector<32x512xbf16>,
    %252 = arith.truncf %219 : vector<32x512xf32> to vector<32x512xbf16>
    %c128_100 = arith.constant 128 : index
    %c0_101 = arith.constant 0 : index
    %253 = vector.load %arg9[%c128_100, %c0_101] : memref<288x512xbf16, #tpu.memory_space<vmem>>, vector<32x512xbf16>
    tpu.vector_store %arg9[%c128_100, %c0_101], %252 {strides = array<i32>} : memref<288x512xbf16, #tpu.memory_space<vmem>>, vector<32x512xbf16>,
    %254 = vector.extract_strided_slice %219 {offsets = [0, 1], sizes = [32, 511], strides = [1, 1]} : vector<32x512xf32> to vector<32x511xf32>
    %255 = vector.extract_strided_slice %219 {offsets = [0, 0], sizes = [32, 1], strides = [1, 1]} : vector<32x512xf32> to vector<32x1xf32>
    %256 = tpu.concatenate %254, %255 in 1 : vector<32x511xf32>, vector<32x1xf32> -> vector<32x512xf32>
    %257 = vector.broadcast %4 : vector<1x512xf32> to vector<32x512xf32>
    %258 = arith.mulf %256, %257 : vector<32x512xf32>
    %259 = arith.truncf %258 : vector<32x512xf32> to vector<32x512xbf16>
    %c160_102 = arith.constant 160 : index
    %c0_103 = arith.constant 0 : index
    %260 = vector.load %arg9[%c160_102, %c0_103] : memref<288x512xbf16, #tpu.memory_space<vmem>>, vector<32x512xbf16>
    tpu.vector_store %arg9[%c160_102, %c0_103], %259 {strides = array<i32>} : memref<288x512xbf16, #tpu.memory_space<vmem>>, vector<32x512xbf16>,
    %261 = vector.extract_strided_slice %219 {offsets = [0, 15], sizes = [32, 497], strides = [1, 1]} : vector<32x512xf32> to vector<32x497xf32>
    %262 = vector.extract_strided_slice %219 {offsets = [0, 0], sizes = [32, 15], strides = [1, 1]} : vector<32x512xf32> to vector<32x15xf32>
    %263 = tpu.concatenate %261, %262 in 1 : vector<32x497xf32>, vector<32x15xf32> -> vector<32x512xf32>
    %264 = vector.broadcast %5 : vector<1x512xf32> to vector<32x512xf32>
    %265 = arith.mulf %263, %264 : vector<32x512xf32>
    %266 = arith.truncf %265 : vector<32x512xf32> to vector<32x512xbf16>
    %c192_104 = arith.constant 192 : index
    %c0_105 = arith.constant 0 : index
    %267 = vector.load %arg9[%c192_104, %c0_105] : memref<288x512xbf16, #tpu.memory_space<vmem>>, vector<32x512xbf16>
    tpu.vector_store %arg9[%c192_104, %c0_105], %266 {strides = array<i32>} : memref<288x512xbf16, #tpu.memory_space<vmem>>, vector<32x512xbf16>,
    %268 = vector.extract_strided_slice %219 {offsets = [0, 16], sizes = [32, 496], strides = [1, 1]} : vector<32x512xf32> to vector<32x496xf32>
    %269 = vector.extract_strided_slice %219 {offsets = [0, 0], sizes = [32, 16], strides = [1, 1]} : vector<32x512xf32> to vector<32x16xf32>
    %270 = tpu.concatenate %268, %269 in 1 : vector<32x496xf32>, vector<32x16xf32> -> vector<32x512xf32>
    %271 = vector.broadcast %6 : vector<1x512xf32> to vector<32x512xf32>
    %272 = arith.mulf %270, %271 : vector<32x512xf32>
    %273 = arith.truncf %272 : vector<32x512xf32> to vector<32x512xbf16>
    %c224_106 = arith.constant 224 : index
    %c0_107 = arith.constant 0 : index
    %274 = vector.load %arg9[%c224_106, %c0_107] : memref<288x512xbf16, #tpu.memory_space<vmem>>, vector<32x512xbf16>
    tpu.vector_store %arg9[%c224_106, %c0_107], %273 {strides = array<i32>} : memref<288x512xbf16, #tpu.memory_space<vmem>>, vector<32x512xbf16>,
    %275 = vector.extract_strided_slice %219 {offsets = [0, 17], sizes = [32, 495], strides = [1, 1]} : vector<32x512xf32> to vector<32x495xf32>
    %276 = vector.extract_strided_slice %219 {offsets = [0, 0], sizes = [32, 17], strides = [1, 1]} : vector<32x512xf32> to vector<32x17xf32>
    %277 = tpu.concatenate %275, %276 in 1 : vector<32x495xf32>, vector<32x17xf32> -> vector<32x512xf32>
    %278 = vector.broadcast %7 : vector<1x512xf32> to vector<32x512xf32>
    %279 = arith.mulf %277, %278 : vector<32x512xf32>
    %280 = arith.truncf %279 : vector<32x512xf32> to vector<32x512xbf16>
    %c256_108 = arith.constant 256 : index
    %c0_109 = arith.constant 0 : index
    %281 = vector.load %arg9[%c256_108, %c0_109] : memref<288x512xbf16, #tpu.memory_space<vmem>>, vector<32x512xbf16>
    tpu.vector_store %arg9[%c256_108, %c0_109], %280 {strides = array<i32>} : memref<288x512xbf16, #tpu.memory_space<vmem>>, vector<32x512xbf16>,
    %c0_110 = arith.constant 0 : index
    %c0_111 = arith.constant 0 : index
    %282 = vector.load %arg9[%c0_110, %c0_111] : memref<288x512xbf16, #tpu.memory_space<vmem>>, vector<288x512xbf16>
    %cst_112 = arith.constant dense<0.000000e+00> : vector<32x512xf32>
    %283 = tpu.matmul %221, %282, %cst_112 {dimension_numbers = #tpu.dot_dimension_numbers<[1], [0], [0], [1], [0, 0, 1, 1], [], []>} : vector<32x288xbf16>, vector<288x512xbf16>, vector<32x512xf32> -> vector<32x512xf32>
    %284 = vector.broadcast %223 : vector<32x1xf32> to vector<32x512xf32>
    %285 = arith.addf %283, %284 : vector<32x512xf32>
    %cst_113 = arith.constant 0.000000e+00 : f32
    %286 = vector.broadcast %cst_113 : f32 to vector<32x512xf32>
    %287 = arith.cmpf ogt, %285, %286 : vector<32x512xf32>
    %cst_114 = arith.constant 0.00999999977 : f32
    %288 = vector.broadcast %cst_114 : f32 to vector<32x512xf32>
    %289 = arith.mulf %288, %285 : vector<32x512xf32>
    %290 = arith.select %287, %285, %289 : vector<32x512xi1>, vector<32x512xf32>
    %c0_115 = arith.constant 0 : index
    %c0_116 = arith.constant 0 : index
    %291 = vector.load %arg6[%c0_115, %c0_116] : memref<8x288xbf16, #tpu.memory_space<vmem>>, vector<8x288xbf16>
    %c0_117 = arith.constant 0 : index
    %c0_118 = arith.constant 0 : index
    %292 = vector.load %arg7[%c0_117, %c0_118] : memref<8x1xf32, #tpu.memory_space<vmem>>, vector<8x1xf32>
    %293 = vector.extract_strided_slice %290 {offsets = [0, 495], sizes = [32, 17], strides = [1, 1]} : vector<32x512xf32> to vector<32x17xf32>
    %294 = vector.extract_strided_slice %290 {offsets = [0, 0], sizes = [32, 495], strides = [1, 1]} : vector<32x512xf32> to vector<32x495xf32>
    %295 = tpu.concatenate %293, %294 in 1 : vector<32x17xf32>, vector<32x495xf32> -> vector<32x512xf32>
    %296 = vector.broadcast %0 : vector<1x512xf32> to vector<32x512xf32>
    %297 = arith.mulf %295, %296 : vector<32x512xf32>
    %298 = arith.truncf %297 : vector<32x512xf32> to vector<32x512xbf16>
    %c0_119 = arith.constant 0 : index
    %c0_120 = arith.constant 0 : index
    %299 = vector.load %arg9[%c0_119, %c0_120] : memref<288x512xbf16, #tpu.memory_space<vmem>>, vector<32x512xbf16>
    tpu.vector_store %arg9[%c0_119, %c0_120], %298 {strides = array<i32>} : memref<288x512xbf16, #tpu.memory_space<vmem>>, vector<32x512xbf16>,
    %300 = vector.extract_strided_slice %290 {offsets = [0, 496], sizes = [32, 16], strides = [1, 1]} : vector<32x512xf32> to vector<32x16xf32>
    %301 = vector.extract_strided_slice %290 {offsets = [0, 0], sizes = [32, 496], strides = [1, 1]} : vector<32x512xf32> to vector<32x496xf32>
    %302 = tpu.concatenate %300, %301 in 1 : vector<32x16xf32>, vector<32x496xf32> -> vector<32x512xf32>
    %303 = vector.broadcast %1 : vector<1x512xf32> to vector<32x512xf32>
    %304 = arith.mulf %302, %303 : vector<32x512xf32>
    %305 = arith.truncf %304 : vector<32x512xf32> to vector<32x512xbf16>
    %c32_121 = arith.constant 32 : index
    %c0_122 = arith.constant 0 : index
    %306 = vector.load %arg9[%c32_121, %c0_122] : memref<288x512xbf16, #tpu.memory_space<vmem>>, vector<32x512xbf16>
    tpu.vector_store %arg9[%c32_121, %c0_122], %305 {strides = array<i32>} : memref<288x512xbf16, #tpu.memory_space<vmem>>, vector<32x512xbf16>,
    %307 = vector.extract_strided_slice %290 {offsets = [0, 497], sizes = [32, 15], strides = [1, 1]} : vector<32x512xf32> to vector<32x15xf32>
    %308 = vector.extract_strided_slice %290 {offsets = [0, 0], sizes = [32, 497], strides = [1, 1]} : vector<32x512xf32> to vector<32x497xf32>
    %309 = tpu.concatenate %307, %308 in 1 : vector<32x15xf32>, vector<32x497xf32> -> vector<32x512xf32>
    %310 = vector.broadcast %2 : vector<1x512xf32> to vector<32x512xf32>
    %311 = arith.mulf %309, %310 : vector<32x512xf32>
    %312 = arith.truncf %311 : vector<32x512xf32> to vector<32x512xbf16>
    %c64_123 = arith.constant 64 : index
    %c0_124 = arith.constant 0 : index
    %313 = vector.load %arg9[%c64_123, %c0_124] : memref<288x512xbf16, #tpu.memory_space<vmem>>, vector<32x512xbf16>
    tpu.vector_store %arg9[%c64_123, %c0_124], %312 {strides = array<i32>} : memref<288x512xbf16, #tpu.memory_space<vmem>>, vector<32x512xbf16>,
    %314 = vector.extract_strided_slice %290 {offsets = [0, 511], sizes = [32, 1], strides = [1, 1]} : vector<32x512xf32> to vector<32x1xf32>
    %315 = vector.extract_strided_slice %290 {offsets = [0, 0], sizes = [32, 511], strides = [1, 1]} : vector<32x512xf32> to vector<32x511xf32>
    %316 = tpu.concatenate %314, %315 in 1 : vector<32x1xf32>, vector<32x511xf32> -> vector<32x512xf32>
    %317 = vector.broadcast %3 : vector<1x512xf32> to vector<32x512xf32>
    %318 = arith.mulf %316, %317 : vector<32x512xf32>
    %319 = arith.truncf %318 : vector<32x512xf32> to vector<32x512xbf16>
    %c96_125 = arith.constant 96 : index
    %c0_126 = arith.constant 0 : index
    %320 = vector.load %arg9[%c96_125, %c0_126] : memref<288x512xbf16, #tpu.memory_space<vmem>>, vector<32x512xbf16>
    tpu.vector_store %arg9[%c96_125, %c0_126], %319 {strides = array<i32>} : memref<288x512xbf16, #tpu.memory_space<vmem>>, vector<32x512xbf16>,
    %321 = arith.truncf %290 : vector<32x512xf32> to vector<32x512xbf16>
    %c128_127 = arith.constant 128 : index
    %c0_128 = arith.constant 0 : index
    %322 = vector.load %arg9[%c128_127, %c0_128] : memref<288x512xbf16, #tpu.memory_space<vmem>>, vector<32x512xbf16>
    tpu.vector_store %arg9[%c128_127, %c0_128], %321 {strides = array<i32>} : memref<288x512xbf16, #tpu.memory_space<vmem>>, vector<32x512xbf16>,
    %323 = vector.extract_strided_slice %290 {offsets = [0, 1], sizes = [32, 511], strides = [1, 1]} : vector<32x512xf32> to vector<32x511xf32>
    %324 = vector.extract_strided_slice %290 {offsets = [0, 0], sizes = [32, 1], strides = [1, 1]} : vector<32x512xf32> to vector<32x1xf32>
    %325 = tpu.concatenate %323, %324 in 1 : vector<32x511xf32>, vector<32x1xf32> -> vector<32x512xf32>
    %326 = vector.broadcast %4 : vector<1x512xf32> to vector<32x512xf32>
    %327 = arith.mulf %325, %326 : vector<32x512xf32>
    %328 = arith.truncf %327 : vector<32x512xf32> to vector<32x512xbf16>
    %c160_129 = arith.constant 160 : index
    %c0_130 = arith.constant 0 : index
    %329 = vector.load %arg9[%c160_129, %c0_130] : memref<288x512xbf16, #tpu.memory_space<vmem>>, vector<32x512xbf16>
    tpu.vector_store %arg9[%c160_129, %c0_130], %328 {strides = array<i32>} : memref<288x512xbf16, #tpu.memory_space<vmem>>, vector<32x512xbf16>,
    %330 = vector.extract_strided_slice %290 {offsets = [0, 15], sizes = [32, 497], strides = [1, 1]} : vector<32x512xf32> to vector<32x497xf32>
    %331 = vector.extract_strided_slice %290 {offsets = [0, 0], sizes = [32, 15], strides = [1, 1]} : vector<32x512xf32> to vector<32x15xf32>
    %332 = tpu.concatenate %330, %331 in 1 : vector<32x497xf32>, vector<32x15xf32> -> vector<32x512xf32>
    %333 = vector.broadcast %5 : vector<1x512xf32> to vector<32x512xf32>
    %334 = arith.mulf %332, %333 : vector<32x512xf32>
    %335 = arith.truncf %334 : vector<32x512xf32> to vector<32x512xbf16>
    %c192_131 = arith.constant 192 : index
    %c0_132 = arith.constant 0 : index
    %336 = vector.load %arg9[%c192_131, %c0_132] : memref<288x512xbf16, #tpu.memory_space<vmem>>, vector<32x512xbf16>
    tpu.vector_store %arg9[%c192_131, %c0_132], %335 {strides = array<i32>} : memref<288x512xbf16, #tpu.memory_space<vmem>>, vector<32x512xbf16>,
    %337 = vector.extract_strided_slice %290 {offsets = [0, 16], sizes = [32, 496], strides = [1, 1]} : vector<32x512xf32> to vector<32x496xf32>
    %338 = vector.extract_strided_slice %290 {offsets = [0, 0], sizes = [32, 16], strides = [1, 1]} : vector<32x512xf32> to vector<32x16xf32>
    %339 = tpu.concatenate %337, %338 in 1 : vector<32x496xf32>, vector<32x16xf32> -> vector<32x512xf32>
    %340 = vector.broadcast %6 : vector<1x512xf32> to vector<32x512xf32>
    %341 = arith.mulf %339, %340 : vector<32x512xf32>
    %342 = arith.truncf %341 : vector<32x512xf32> to vector<32x512xbf16>
    %c224_133 = arith.constant 224 : index
    %c0_134 = arith.constant 0 : index
    %343 = vector.load %arg9[%c224_133, %c0_134] : memref<288x512xbf16, #tpu.memory_space<vmem>>, vector<32x512xbf16>
    tpu.vector_store %arg9[%c224_133, %c0_134], %342 {strides = array<i32>} : memref<288x512xbf16, #tpu.memory_space<vmem>>, vector<32x512xbf16>,
    %344 = vector.extract_strided_slice %290 {offsets = [0, 17], sizes = [32, 495], strides = [1, 1]} : vector<32x512xf32> to vector<32x495xf32>
    %345 = vector.extract_strided_slice %290 {offsets = [0, 0], sizes = [32, 17], strides = [1, 1]} : vector<32x512xf32> to vector<32x17xf32>
    %346 = tpu.concatenate %344, %345 in 1 : vector<32x495xf32>, vector<32x17xf32> -> vector<32x512xf32>
    %347 = vector.broadcast %7 : vector<1x512xf32> to vector<32x512xf32>
    %348 = arith.mulf %346, %347 : vector<32x512xf32>
    %349 = arith.truncf %348 : vector<32x512xf32> to vector<32x512xbf16>
    %c256_135 = arith.constant 256 : index
    %c0_136 = arith.constant 0 : index
    %350 = vector.load %arg9[%c256_135, %c0_136] : memref<288x512xbf16, #tpu.memory_space<vmem>>, vector<32x512xbf16>
    tpu.vector_store %arg9[%c256_135, %c0_136], %349 {strides = array<i32>} : memref<288x512xbf16, #tpu.memory_space<vmem>>, vector<32x512xbf16>,
    %c0_137 = arith.constant 0 : index
    %c0_138 = arith.constant 0 : index
    %351 = vector.load %arg9[%c0_137, %c0_138] : memref<288x512xbf16, #tpu.memory_space<vmem>>, vector<288x512xbf16>
    %cst_139 = arith.constant dense<0.000000e+00> : vector<8x512xf32>
    %352 = tpu.matmul %291, %351, %cst_139 {dimension_numbers = #tpu.dot_dimension_numbers<[1], [0], [0], [1], [0, 0, 1, 1], [], []>} : vector<8x288xbf16>, vector<288x512xbf16>, vector<8x512xf32> -> vector<8x512xf32>
    %353 = vector.broadcast %292 : vector<8x1xf32> to vector<8x512xf32>
    %354 = arith.addf %352, %353 : vector<8x512xf32>
    %355 = vector.extract_strided_slice %354 {offsets = [0, 0], sizes = [3, 512], strides = [1, 1]} : vector<8x512xf32> to vector<3x512xf32>
    %356 = vector.extract_strided_slice %8 {offsets = [0, 0], sizes = [3, 512], strides = [1, 1]} : vector<32x512xf32> to vector<3x512xf32>
    %357 = arith.addf %355, %356 : vector<3x512xf32>
    %358 = vector.extract_strided_slice %357 {offsets = [0, 0], sizes = [3, 256], strides = [1, 1]} : vector<3x512xf32> to vector<3x256xf32>
    %c0_140 = arith.constant 0 : index
    %c0_141 = arith.constant 0 : index
    %c0_142 = arith.constant 0 : index
    %359 = vector.load %arg8[%c0_140, %c0_141, %c0_142] : memref<2x3x256xf32, #tpu.memory_space<vmem>>, vector<1x3x256xf32>
    %360 = vector.shape_cast %359 : vector<1x3x256xf32> to vector<3x256xf32>
    %361 = vector.shape_cast %358 : vector<3x256xf32> to vector<1x3x256xf32>
    tpu.vector_store %arg8[%c0_140, %c0_141, %c0_142], %361 {strides = array<i32>} : memref<2x3x256xf32, #tpu.memory_space<vmem>>, vector<1x3x256xf32>,
    %362 = vector.extract_strided_slice %357 {offsets = [0, 256], sizes = [3, 256], strides = [1, 1]} : vector<3x512xf32> to vector<3x256xf32>
    %c1_143 = arith.constant 1 : index
    %c0_144 = arith.constant 0 : index
    %c0_145 = arith.constant 0 : index
    %363 = vector.load %arg8[%c1_143, %c0_144, %c0_145] : memref<2x3x256xf32, #tpu.memory_space<vmem>>, vector<1x3x256xf32>
    %364 = vector.shape_cast %363 : vector<1x3x256xf32> to vector<3x256xf32>
    %365 = vector.shape_cast %362 : vector<3x256xf32> to vector<1x3x256xf32>
    tpu.vector_store %arg8[%c1_143, %c0_144, %c0_145], %365 {strides = array<i32>} : memref<2x3x256xf32, #tpu.memory_space<vmem>>, vector<1x3x256xf32>,
    return
  }
}

</mosaic_0001>

<bundles_post_ra>
// kernel: tpu_custom_call.1
= control target key start
LH: loop header
LB: loop body
LE: loop exit
PB: predicated region body
PF: predicated region fallthrough
CT: control target
= control target key end

     0   :  { %13 = vsyncpa [#allocation4], 0  ;;  %s17065_s0 = inlined_call_operand.hbm [shape: f32[32,512], index: 0, kind: input, shape index: {}]   ;;  %s17066_s1 = inlined_call_operand.hbm [shape: f32[9,512], index: 1, kind: input, shape index: {}]   ;;  %s17067_s2 = inlined_call_operand.hbm [shape: bf16[32,288], index: 2, kind: input, shape index: {}]   ;;  %s17068_s3 = inlined_call_operand.vmem [shape: f32[32,1], index: 3, kind: input, shape index: {}]   ;;  %s17069_s4 = inlined_call_operand.vmem [shape: bf16[3,32,288], index: 4, kind: input, shape index: {}]   ;;  %s17070_s5 = inlined_call_operand.vmem [shape: f32[3,32,1], index: 5, kind: input, shape index: {}]   ;;  %s17071_s6 = inlined_call_operand.hbm [shape: bf16[8,288], index: 6, kind: input, shape index: {}]   ;;  %s17072_s7 = inlined_call_operand.vmem [shape: f32[8,1], index: 7, kind: input, shape index: {}]   ;;  %s17073_s8 = inlined_call_operand.vmem [shape: f32[2,3,256], index: 8, kind: output, shape index: {}]  }
   0x1   :  { %14 = vsyncpa [#allocation6], 0 }
   0x2   :  { %15 = vsyncpa [#allocation9], 0  ;;  %s11606_s27 = smov [#allocation5]   ;;  %s11607_s29 = smov [#allocation3]  }
   0x3   :  { %s33_s28 = sshll.u32 %s11606_s27, 4  ;;  %s21_s30 = sshll.u32 %s11607_s29, 4  ;;  %s34_s28 = int_to_ptr.vmem [resolvable:$true] %s33_s28  ;;  %s22_s30 = int_to_ptr.vmem [resolvable:$true] %s21_s30 }
   0x4   :  { %s11528_s9 = scalar_lea.vmem %s34_s28, 1024  ;;  %p11533_p1 = scmp.lt.s32.totalorder %s34_s28, %s34_s28 }
   0x5   :  { %p11529_p0 = scmp.ne.s32.totalorder %s34_s28, %s11528_s9  ;;  %p11534_p2 = scmp.lt.s32.totalorder %s11528_s9, %s11528_s9 }
   0x7   :  { %p11535_p3 = por %p11534_p2, %p11533_p1 }
   0x9   :  { %p11536_p4 = pnand %p11535_p3, %p11529_p0 }
   0xb   :  { %11539 = shalt.err (!%p11536_p4)
}
   0xc   :  { %s11608_s10 = smov 512   ;;  %s11609_s11 = smov 32  }
   0xd   :  { %39 = dma.hbm_to_vmem [thread:$0]  %s17066_s1, 1024, %s34_s28, [#allocation6], %s11608_s10, %s11608_s10, %s11609_s11  }
   0xe   :  { %s11548_s14 = scalar_lea.vmem %s22_s30, 2048  ;;  %p11553_p6 = scmp.lt.s32.totalorder %s22_s30, %s22_s30 }
   0xf   :  { %p11549_p5 = scmp.ne.s32.totalorder %s22_s30, %s11548_s14  ;;  %p11554_p7 = scmp.lt.s32.totalorder %s11548_s14, %s11548_s14 }
  0x11   :  { %p11555_p8 = por %p11554_p7, %p11553_p6 }
  0x13   :  { %p11556_p9 = pnand %p11555_p8, %p11549_p5 }
  0x15   :  { %11559 = shalt.err (!%p11556_p9)
}
  0x16   :  { %27 = dma.hbm_to_vmem [thread:$0]  %s17065_s0, 2048, %s22_s30, [#allocation4], %s11608_s10, %s11608_s10, %s11609_s11  }
  0x17   :  { %s11610_s17 = smov [#allocation7]  }
  0x18   :  { %s45_s18 = sshll.u32 %s11610_s17, 4  ;;  %s46_s18 = int_to_ptr.vmem [resolvable:$true] %s45_s18 }
  0x19   :  { %s11568_s19 = scalar_lea.vmem %s46_s18, 768  ;;  %p11573_p11 = scmp.lt.s32.totalorder %s46_s18, %s46_s18 }
  0x1a   :  { %p11569_p10 = scmp.ne.s32.totalorder %s46_s18, %s11568_s19  ;;  %p11574_p12 = scmp.lt.s32.totalorder %s11568_s19, %s11568_s19 }
  0x1c   :  { %p11575_p13 = por %p11574_p12, %p11573_p11 }
  0x1e   :  { %p11576_p0 = pnand %p11575_p13, %p11569_p10 }
  0x20   :  { %11579 = shalt.err (!%p11576_p0)
}
  0x21   :  { %s11611_s1 = smov 192   ;;  %s11612_s20 = smov 12  }
  0x22   :  { %51 = dma.hbm_to_vmem [thread:$0]  %s17067_s2, 768, %s46_s18, [#allocation6], %s11611_s1, %s11611_s1, %s11612_s20  }
  0x23   :  { %s11613_s23 = smov [#allocation8]  }
  0x24   :  { %s64_s24 = sshll.u32 %s11613_s23, 4  ;;  %s65_s24 = int_to_ptr.vmem [resolvable:$true] %s64_s24 }
  0x25   :  { %s11588_s0 = scalar_lea.vmem %s65_s24, 192  ;;  %p11593_p2 = scmp.lt.s32.totalorder %s65_s24, %s65_s24 }
  0x26   :  { %p11589_p1 = scmp.ne.s32.totalorder %s65_s24, %s11588_s0  ;;  %p11594_p3 = scmp.lt.s32.totalorder %s11588_s0, %s11588_s0 }
  0x28   :  { %p11595_p4 = por %p11594_p3, %p11593_p2 }
  0x2a   :  { %p11596_p5 = pnand %p11595_p4, %p11589_p1 }
  0x2c   :  { %11599 = shalt.err (!%p11596_p5)
}
  0x2d   :  { %67 = dma.hbm_to_vmem [thread:$0]  %s17071_s6, 192, %s65_s24, [#allocation9]  }
  0x2e   :  { %11600 = dma.done.wait [#allocation4], 2048  }
  0x2f   :  { %11601 = vsyncadd [#allocation4], 4294965248 }
  0x30   :  { %11602 = dma.done.wait [#allocation6], 1792  }
  0x31   :  { %11603 = vsyncadd [#allocation6], 4294965504 }
  0x32   :  { %11604 = dma.done.wait [#allocation9], 192  }
  0x33   :  { %11605 = vsyncadd [#allocation9], 4294967104  ;;  %v11680_v0 = vld [vmem:[#allocation3 + $0x60] sm:$0xff]  ;;  %s11614_s2 = smov 1   ;;  %v11688_v2 = vld [vmem:[#allocation3 + $0x68] sm:$0xff]  ;;  %s11615_s6 = smov 111   ;;  %v212_v17 = vlaneseq }
  0x34   :  { %v11682_v1 = vld [vmem:[#allocation3 + $0x40] sm:$0xff]  ;;  %658 = vrot.lane.b32.xlu1 %v11680_v0, %s11614_s2  ;;  %v11690_v3 = vld [vmem:[#allocation3 + $0x48] sm:$0xff]  ;;  %v11696_v4 = vld [vmem:[#allocation3 + $0x78] sm:$0xff]  ;;  %s11616_s27 = smov 15   ;;  %v17074_v16 = vmov 0   ;;  %s11618_s28 = smov 16  }
  0x35   :  { %652 = vrot.lane.b32.xlu0 %v11682_v1, %s11614_s2  ;;  %v11698_v5 = vld [vmem:[#allocation3 + $0x58] sm:$0xff]  ;;  %v11700_v6 = vld [vmem:[#allocation3 + $0x8] sm:$0xff]  ;;  %v11702_v7 = vld [vmem:[#allocation3] sm:$0xff]  ;;  %2068 = vmatprep.mubr.bf16.mxu1 %v17074_v16  ;;  %s11619_s29 = smov 17   ;;  %v11827_v18 = vshrl.u32 %v212_v17, 7  ;;  %vm664_vm0 = vcmask 7168  }
  0x36   :  { %v11708_v8 = vld [vmem:[#allocation3 + $0x28] sm:$0xff]  ;;  %v11714_v9 = vld [vmem:[#allocation3 + $0x20] sm:$0xff]  ;;  %v11720_v10 = vld [vmem:[#allocation3 + $0x38] sm:$0xff]  ;;  %11462 = vset.pattern.permute.xlu1 %v17074_v16  ;;  %11461 = vset.pattern.permute.xlu0 %v17074_v16  ;;  %vm1364_vm1 = vcmask 908288   ;;  %s11620_s30 = smov 112   ;;  %vm502_vm2 = vcmask 121856  }
  0x37   :  { %v11722_v11 = vld [vmem:[#allocation3 + $0x18] sm:$0xff]  ;;  %v11728_v12 = vld [vmem:[#allocation3 + $0x50] sm:$0xff]  ;;  %v11834_v19 = vsub.s32 1, %v11827_v18  ;;  %v11847_v24 = vsub.s32 0, %v11827_v18  ;;  %s11621_s9 = smov 113   ;;  %vm1976_vm3 = vcmask 261120  }
  0x38   :  { %660 = vrot.lane.b32.xlu1 %v11688_v2, %s11614_s2  ;;  %v11734_v13 = vld [vmem:[#allocation3 + $0x70] sm:$0xff]  ;;  %vm340_vm4 = vcmask 130048   ;;  %s11622_s10 = smov 127   ;;  %vm178_vm5 = vcmask 138240   ;;  %vm1202_vm6 = vcmask 916480   ;;  %vm1040_vm7 = vcmask 924672  }
  0x39   :  { %654 = vrot.lane.b32.xlu0 %v11690_v3, %s11614_s2  ;;  %v11756_v14 = vld [vmem:[#allocation3 + $0x10] sm:$0xff]  ;;  %vm878_vm8 = vcmask 1039360  }
  0x3a   :  { %v11762_v15 = vld [vmem:[#allocation3 + $0x30] sm:$0xff] }
  0x3b   :  { %v11836_v20 = vld [vmem:[#allocation5 + $0x3] ss:$8 sm:$0xf]  ;;  %v97_v55 = vld [vmem:[#allocation5 + $0x20] ss:$8 sm:$0xf] }
  0x3c   :  { %634 = vrot.lane.b32.xlu1 %v11696_v4, %s11614_s2  ;;  %v11844_v23 = vrot.slane %v11836_v20, %v11834_v19  ;;  %v11865_v31 = vrot.slane %v11836_v20, %v11847_v24  ;;  %v11920_v59 = vrot.slane %v97_v55, %v11834_v19 }
  0x3d   :  { %632 = vrot.lane.b32.xlu0 %v11698_v5, %s11614_s2 }
  0x3e   :  { %17497 = vst [vmem:[#allocation13_spill] sm:$0xff] %v11844_v23  ;;  %17498 = vst [vmem:[#allocation14_spill] sm:$0xff] %v11865_v31 }
  0x3f   :  { %17499 = vst [vmem:[#allocation15_spill] sm:$0xff] %v11920_v59 }
  0x40   :  { %642 = vrot.lane.b32.xlu1 %v11700_v6, %s11614_s2 }
  0x41   :  { %640 = vrot.lane.b32.xlu0 %v11702_v7, %s11614_s2 }
  0x44   :  { %648 = vrot.lane.b32.xlu1 %v11708_v8, %s11614_s2 }
  0x45   :  { %646 = vrot.lane.b32.xlu0 %v11714_v9, %s11614_s2 }
  0x48   :  { %630 = vrot.lane.b32.xlu1 %v11720_v10, %s11614_s2 }
  0x49   :  { %628 = vrot.lane.b32.xlu0 %v11722_v11, %s11614_s2 }
  0x4c   :  { %1352 = vrot.lane.b32.xlu1 %v11728_v12, %s11615_s6 }
  0x4d   :  { %1350 = vrot.lane.b32.xlu0 %v11690_v3, %s11615_s6 }
  0x50   :  { %1360 = vrot.lane.b32.xlu1 %v11734_v13, %s11615_s6 }
  0x51   :  { %1358 = vrot.lane.b32.xlu0 %v11688_v2, %s11615_s6 }
  0x54   :  { %1356 = vrot.lane.b32.xlu1 %v11680_v0, %s11615_s6 }
  0x55   :  { %1348 = vrot.lane.b32.xlu0 %v11682_v1, %s11615_s6 }
  0x58   :  { %492 = vrot.lane.b32.xlu1 %v11690_v3, %s11616_s27 }
  0x59   :  { %490 = vrot.lane.b32.xlu0 %v11682_v1, %s11616_s27 }
  0x5c   :  { %498 = vrot.lane.b32.xlu1 %v11688_v2, %s11616_s27 }
  0x5d   :  { %496 = vrot.lane.b32.xlu0 %v11680_v0, %s11616_s27 }
  0x60   :  { %472 = vrot.lane.b32.xlu1 %v11696_v4, %s11616_s27 }
  0x61   :  { %470 = vrot.lane.b32.xlu0 %v11698_v5, %s11616_s27 }
  0x64   :  { %1336 = vrot.lane.b32.xlu1 %v11756_v14, %s11615_s6 }
  0x65   :  { %1334 = vrot.lane.b32.xlu0 %v11700_v6, %s11615_s6 }
  0x68   :  { %1344 = vrot.lane.b32.xlu1 %v11762_v15, %s11615_s6 }
  0x69   :  { %1342 = vrot.lane.b32.xlu0 %v11708_v8, %s11615_s6 }
  0x6c   :  { %1340 = vrot.lane.b32.xlu1 %v11714_v9, %s11615_s6 }
  0x6d   :  { %1332 = vrot.lane.b32.xlu0 %v11702_v7, %s11615_s6 }
  0x70   :  { %480 = vrot.lane.b32.xlu1 %v11700_v6, %s11616_s27 }
  0x71   :  { %478 = vrot.lane.b32.xlu0 %v11702_v7, %s11616_s27 }
  0x74   :  { %486 = vrot.lane.b32.xlu1 %v11708_v8, %s11616_s27 }
  0x75   :  { %484 = vrot.lane.b32.xlu0 %v11714_v9, %s11616_s27 }
  0x78   :  { %468 = vrot.lane.b32.xlu1 %v11720_v10, %s11616_s27 }
  0x79   :  { %466 = vrot.lane.b32.xlu0 %v11722_v11, %s11616_s27 }
  0x7c   :  { %662 = vrot.lane.b32.xlu1 %v11734_v13, %s11614_s2 }
  0x7d   :  { %656 = vrot.lane.b32.xlu0 %v11728_v12, %s11614_s2 }
  0x80   :  { %330 = vrot.lane.b32.xlu1 %v11690_v3, %s11618_s28 }
  0x81   :  { %328 = vrot.lane.b32.xlu0 %v11682_v1, %s11618_s28 }
  0x84   :  { %336 = vrot.lane.b32.xlu1 %v11688_v2, %s11618_s28 }
  0x85   :  { %334 = vrot.lane.b32.xlu0 %v11680_v0, %s11618_s28 }
  0x88   :  { %310 = vrot.lane.b32.xlu1 %v11696_v4, %s11618_s28 }
  0x89   :  { %308 = vrot.lane.b32.xlu0 %v11698_v5, %s11618_s28 }
  0x8c   :  { %650 = vrot.lane.b32.xlu1 %v11762_v15, %s11614_s2 }
  0x8d   :  { %644 = vrot.lane.b32.xlu0 %v11756_v14, %s11614_s2 }
  0x90   :  { %318 = vrot.lane.b32.xlu1 %v11700_v6, %s11618_s28 }
  0x91   :  { %316 = vrot.lane.b32.xlu0 %v11702_v7, %s11618_s28 }
  0x94   :  { %324 = vrot.lane.b32.xlu1 %v11708_v8, %s11618_s28 }
  0x95   :  { %322 = vrot.lane.b32.xlu0 %v11714_v9, %s11618_s28 }
  0x98   :  { %306 = vrot.lane.b32.xlu1 %v11720_v10, %s11618_s28 }
  0x99   :  { %304 = vrot.lane.b32.xlu0 %v11722_v11, %s11618_s28 }
  0x9c   :  { %500 = vrot.lane.b32.xlu1 %v11734_v13, %s11616_s27 }
  0x9d   :  { %494 = vrot.lane.b32.xlu0 %v11728_v12, %s11616_s27 }
  0xa0   :  { %168 = vrot.lane.b32.xlu1 %v11690_v3, %s11619_s29 }
  0xa1   :  { %166 = vrot.lane.b32.xlu0 %v11682_v1, %s11619_s29 }
  0xa4   :  { %174 = vrot.lane.b32.xlu1 %v11688_v2, %s11619_s29 }
  0xa5   :  { %172 = vrot.lane.b32.xlu0 %v11680_v0, %s11619_s29 }
  0xa6   :  { %v659_v21 = vpop.permute.xlu1 %658 }
  0xa7   :  { %v653_v22 = vpop.permute.xlu0 %652 }
  0xa8   :  { %136 = vrot.lane.b32.xlu1 %v11696_v4, %s11619_s29 }
  0xa9   :  { %134 = vrot.lane.b32.xlu0 %v11698_v5, %s11619_s29 }
  0xaa   :  { %v11849_v25 = vpop.permute.xlu1 %660 }
  0xab   :  { %v11851_v26 = vpop.permute.xlu0 %654  ;;  %v674_v28 = vsel %vm664_vm0, %v659_v21, %v11849_v25 }
  0xac   :  { %v671_v27 = vsel %vm664_vm0, %v653_v22, %v11851_v26  ;;  %488 = vrot.lane.b32.xlu1 %v11762_v15, %s11616_s27  ;;  %v731_v30 = vmul.f32 %v11844_v23, %v674_v28 }
  0xad   :  { %482 = vrot.lane.b32.xlu0 %v11756_v14, %s11616_s27  ;;  %v727_v29 = vmul.f32 %v11844_v23, %v671_v27 }
  0xae   :  { %v11867_v32 = vpop.permute.xlu1 %634 }
  0xaf   :  { %v11869_v33 = vpop.permute.xlu0 %632  ;;  %v11113_v34 = vpack.c.bf16 %v731_v30, %v727_v29  ;;  %v696_v35 = vsel %vm664_vm0, %v11867_v32, %v659_v21 }
  0xb0   :  { %v695_v36 = vsel %vm664_vm0, %v11869_v33, %v653_v22  ;;  %156 = vrot.lane.b32.xlu1 %v11700_v6, %s11619_s29  ;;  %v730_v38 = vmul.f32 %v11865_v31, %v696_v35  ;;  %v11935_v22 = vrot.slane %v97_v55, %v11847_v24 }
  0xb1   :  { %154 = vrot.lane.b32.xlu0 %v11702_v7, %s11619_s29  ;;  %v726_v37 = vmul.f32 %v11865_v31, %v695_v36  ;;  %1983 = vmatprep.subr.bf16.mxu0 %v11113_v34 }
  0xb2   :  { %v11881_v39 = vpop.permute.xlu1 %642  ;;  %17500 = vst [vmem:[#allocation16_spill] sm:$0xff] %v11935_v22 }
  0xb3   :  { %v641_v40 = vpop.permute.xlu0 %640  ;;  %v11112_v41 = vpack.c.bf16 %v730_v38, %v726_v37  ;;  %v11951_v37 = vld [vmem:[#allocation5 + $0x2] ss:$8 sm:$0xf] }
  0xb4   :  { %162 = vrot.lane.b32.xlu1 %v11708_v8, %s11619_s29  ;;  %v665_v42 = vsel %vm664_vm0, %v641_v40, %v11881_v39 }
  0xb5   :  { %160 = vrot.lane.b32.xlu0 %v11714_v9, %s11619_s29  ;;  %1984 = vmatpush1.bf16.msra.mxu0 %v11112_v41  ;;  %v719_v46 = vmul.f32 %v11844_v23, %v665_v42  ;;  %v11957_v42 = vrot.slane %v11951_v37, %v11834_v19 }
  0xb6   :  { %v11889_v43 = vpop.permute.xlu1 %648 }
  0xb7   :  { %v647_v44 = vpop.permute.xlu0 %646  ;;  %17501 = vst [vmem:[#allocation17_spill] sm:$0xff] %v11957_v42 }
  0xb8   :  { %v668_v45 = vsel %vm664_vm0, %v647_v44, %v11889_v43  ;;  %132 = vrot.lane.b32.xlu1 %v11720_v10, %s11619_s29 }
  0xb9   :  { %v723_v47 = vmul.f32 %v11844_v23, %v668_v45  ;;  %130 = vrot.lane.b32.xlu0 %v11722_v11, %s11619_s29 }
  0xba   :  { %v11899_v48 = vpop.permute.xlu1 %630 }
  0xbb   :  { %v11901_v49 = vpop.permute.xlu0 %628  ;;  %v11109_v50 = vpack.c.bf16 %v723_v47, %v719_v46  ;;  %v694_v51 = vsel %vm664_vm0, %v11899_v48, %v647_v44 }
  0xbc   :  { %v693_v52 = vsel %vm664_vm0, %v11901_v49, %v641_v40  ;;  %v722_v53 = vmul.f32 %v11865_v31, %v694_v51  ;;  %338 = vrot.lane.b32.xlu1 %v11734_v13, %s11618_s28 }
  0xbd   :  { %v718_v54 = vmul.f32 %v11865_v31, %v693_v52  ;;  %332 = vrot.lane.b32.xlu0 %v11728_v12, %s11618_s28  ;;  %1985 = vmatprep.subr.bf16.mxu0 %v11109_v50  ;;  %v11977_v52 = vrot.slane %v11951_v37, %v11847_v24 }
  0xbe   :  { %v11913_v56 = vpop.permute.xlu1 %1352 }
  0xbf   :  { %v1351_v57 = vpop.permute.xlu0 %1350  ;;  %v11108_v58 = vpack.c.bf16 %v722_v53, %v718_v54  ;;  %17502 = vst [vmem:[#allocation18_spill] sm:$0xff] %v11977_v52 }
  0xc0   :  { %1190 = vrot.lane.b32.xlu1 %v11728_v12, %s11620_s30  ;;  %v1372_v60 = vsel %vm1364_vm1, %v1351_v57, %v11913_v56 }
  0xc1   :  { %1188 = vrot.lane.b32.xlu0 %v11690_v3, %s11620_s30  ;;  %1986 = vmatpush1.bf16.msra.mxu0 %v11108_v58  ;;  %v1431_v17 = vmul.f32 %v11920_v59, %v1372_v60 }
  0xc2   :  { %v11924_v61 = vpop.permute.xlu1 %1360 }
  0xc3   :  { %v1359_v62 = vpop.permute.xlu0 %1358 }
  0xc4   :  { %v1375_v63 = vsel %vm1364_vm1, %v1359_v62, %v11924_v61  ;;  %1198 = vrot.lane.b32.xlu1 %v11734_v13, %s11620_s30 }
  0xc5   :  { %1196 = vrot.lane.b32.xlu0 %v11688_v2, %s11620_s30  ;;  %v1435_v21 = vmul.f32 %v11920_v59, %v1375_v63 }
  0xc6   :  { %v11937_v27 = vpop.permute.xlu1 %1356 }
  0xc7   :  { %v11939_v28 = vpop.permute.xlu0 %1348  ;;  %v11153_v29 = vpack.c.bf16 %v1435_v21, %v1431_v17  ;;  %v1374_v30 = vsel %vm1364_vm1, %v11937_v27, %v1359_v62 }
  0xc8   :  { %v1371_v34 = vsel %vm1364_vm1, %v11939_v28, %v1351_v57  ;;  %1194 = vrot.lane.b32.xlu1 %v11680_v0, %s11620_s30  ;;  %v1434_v36 = vmul.f32 %v11935_v22, %v1374_v30 }
  0xc9   :  { %1186 = vrot.lane.b32.xlu0 %v11682_v1, %s11620_s30  ;;  %v1430_v35 = vmul.f32 %v11935_v22, %v1371_v34  ;;  %2048 = vmatprep.subr.bf16.mxu1 %v11153_v29 }
  0xca   :  { %v11953_v38 = vpop.permute.xlu1 %492 }
  0xcb   :  { %v491_v40 = vpop.permute.xlu0 %490  ;;  %v11152_v41 = vpack.c.bf16 %v1434_v36, %v1430_v35 }
  0xcc   :  { %326 = vrot.lane.b32.xlu1 %v11762_v15, %s11618_s28  ;;  %v509_v44 = vsel %vm502_vm2, %v491_v40, %v11953_v38 }
  0xcd   :  { %320 = vrot.lane.b32.xlu0 %v11756_v14, %s11618_s28  ;;  %2049 = vmatpush1.bf16.msra.mxu1 %v11152_v41  ;;  %v565_v50 = vmul.f32 %v11957_v42, %v509_v44 }
  0xce   :  { %v11965_v45 = vpop.permute.xlu1 %498 }
  0xcf   :  { %v497_v46 = vpop.permute.xlu0 %496 }
  0xd0   :  { %v512_v47 = vsel %vm502_vm2, %v497_v46, %v11965_v45  ;;  %1174 = vrot.lane.b32.xlu1 %v11756_v14, %s11620_s30 }
  0xd1   :  { %v569_v51 = vmul.f32 %v11957_v42, %v512_v47  ;;  %1172 = vrot.lane.b32.xlu0 %v11700_v6, %s11620_s30 }
  0xd2   :  { %v11979_v53 = vpop.permute.xlu1 %472 }
  0xd3   :  { %v11981_v54 = vpop.permute.xlu0 %470  ;;  %v11105_v55 = vpack.c.bf16 %v569_v51, %v565_v50  ;;  %v534_v57 = vsel %vm502_vm2, %v11979_v53, %v497_v46 }
  0xd4   :  { %v533_v58 = vsel %vm502_vm2, %v11981_v54, %v491_v40  ;;  %v568_v60 = vmul.f32 %v11977_v52, %v534_v57  ;;  %1182 = vrot.lane.b32.xlu1 %v11762_v15, %s11620_s30 }
  0xd5   :  { %v564_v62 = vmul.f32 %v11977_v52, %v533_v58  ;;  %1180 = vrot.lane.b32.xlu0 %v11708_v8, %s11620_s30  ;;  %1987 = vmatprep.subr.bf16.mxu0 %v11105_v55 }
  0xd6   :  { %v11993_v63 = vpop.permute.xlu1 %1336 }
  0xd7   :  { %v1335_v17 = vpop.permute.xlu0 %1334  ;;  %v11104_v21 = vpack.c.bf16 %v568_v60, %v564_v62 }
  0xd8   :  { %1178 = vrot.lane.b32.xlu1 %v11714_v9, %s11620_s30  ;;  %v1366_v29 = vsel %vm1364_vm1, %v1335_v17, %v11993_v63 }
  0xd9   :  { %1170 = vrot.lane.b32.xlu0 %v11702_v7, %s11620_s30  ;;  %1988 = vmatpush1.bf16.msra.mxu0 %v11104_v21  ;;  %v1423_v36 = vmul.f32 %v11920_v59, %v1366_v29 }
  0xda   :  { %v12001_v30 = vpop.permute.xlu1 %1344 }
  0xdb   :  { %v1343_v34 = vpop.permute.xlu0 %1342 }
  0xdc   :  { %v1369_v35 = vsel %vm1364_vm1, %v1343_v34, %v12001_v30  ;;  %176 = vrot.lane.b32.xlu1 %v11734_v13, %s11619_s29 }
  0xdd   :  { %v1427_v40 = vmul.f32 %v11920_v59, %v1369_v35  ;;  %170 = vrot.lane.b32.xlu0 %v11728_v12, %s11619_s29  ;;  %v12038_v35 = vsub.s32 2, %v11827_v18 }
  0xde   :  { %v12011_v41 = vpop.permute.xlu1 %1340 }
  0xdf   :  { %v12013_v44 = vpop.permute.xlu0 %1332  ;;  %v11149_v46 = vpack.c.bf16 %v1427_v40, %v1423_v36  ;;  %v1368_v47 = vsel %vm1364_vm1, %v12011_v41, %v1343_v34 }
  0xe0   :  { %v1365_v50 = vsel %vm1364_vm1, %v12013_v44, %v1335_v17  ;;  %v1426_v51 = vmul.f32 %v11935_v22, %v1368_v47  ;;  %1028 = vrot.lane.b32.xlu1 %v11728_v12, %s11621_s9  ;;  %v11463_v17 = vld [vmem:[#allocation7 + $0x8] ss:$12 sps:$4 sm:$0xff]  }
  0xe1   :  { %v1422_v55 = vmul.f32 %v11935_v22, %v1365_v50  ;;  %1026 = vrot.lane.b32.xlu0 %v11690_v3, %s11621_s9  ;;  %2050 = vmatprep.subr.bf16.mxu1 %v11149_v46  ;;  %v12047_v46 = vsub.s32 3, %v11827_v18 }
  0xe2   :  { %v12025_v57 = vpop.permute.xlu1 %480 }
  0xe3   :  { %v479_v58 = vpop.permute.xlu0 %478  ;;  %v11148_v60 = vpack.c.bf16 %v1426_v51, %v1422_v55 }
  0xe4   :  { %1036 = vrot.lane.b32.xlu1 %v11734_v13, %s11621_s9  ;;  %v503_v62 = vsel %vm502_vm2, %v479_v58, %v12025_v57 }
  0xe5   :  { %1034 = vrot.lane.b32.xlu0 %v11688_v2, %s11621_s9  ;;  %2051 = vmatpush1.bf16.msra.mxu1 %v11148_v60  ;;  %v557_v36 = vmul.f32 %v11957_v42, %v503_v62  ;;  %v12061_v62 = vrot.slane %v11836_v20, %v12038_v35 }
  0xe6   :  { %v12033_v21 = vpop.permute.xlu1 %486 }
  0xe7   :  { %v485_v29 = vpop.permute.xlu0 %484  ;;  %17503 = vst [vmem:[#allocation19_spill] sm:$0xff] %v12061_v62 }
  0xe8   :  { %v506_v34 = vsel %vm502_vm2, %v485_v29, %v12033_v21  ;;  %1032 = vrot.lane.b32.xlu1 %v11680_v0, %s11621_s9  ;;  %10084 = vmatmul.mubr.msk.bf16.vlgmr.msra.gmra.mxu1 %vm1976_vm3, %v11463_v17 }
  0xe9   :  { %v561_v40 = vmul.f32 %v11957_v42, %v506_v34  ;;  %1024 = vrot.lane.b32.xlu0 %v11682_v1, %s11621_s9  ;;  %2078 = vmatprep.mubr.bf16.mxu1 %v17074_v16 }
  0xea   :  { %v12050_v47 = vpop.permute.xlu1 %468 }
  0xeb   :  { %v12052_v50 = vpop.permute.xlu0 %466  ;;  %v11101_v51 = vpack.c.bf16 %v561_v40, %v557_v36  ;;  %v532_v55 = vsel %vm502_vm2, %v12050_v47, %v485_v29  ;;  %v12071_v29 = vrot.slane %v11836_v20, %v12047_v46 }
  0xec   :  { %v531_v60 = vsel %vm502_vm2, %v12052_v50, %v479_v58  ;;  %v560_v18 = vmul.f32 %v11977_v52, %v532_v55  ;;  %164 = vrot.lane.b32.xlu1 %v11762_v15, %s11619_s29 }
  0xed   :  { %v556_v17 = vmul.f32 %v11977_v52, %v531_v60  ;;  %158 = vrot.lane.b32.xlu0 %v11756_v14, %s11619_s29  ;;  %17504 = vst [vmem:[#allocation20_spill] sm:$0xff] %v12071_v29  ;;  %1989 = vmatprep.subr.bf16.mxu0 %v11101_v51 }
  0xee   :  { %v663_v58 = vpop.permute.xlu1 %662 }
  0xef   :  { %v657_v34 = vpop.permute.xlu0 %656  ;;  %v11100_v36 = vpack.c.bf16 %v560_v18, %v556_v17  ;;  %v675_v40 = vsel %vm664_vm0, %v11849_v25, %v663_v58  ;;  %v676_v55 = vsel %vm664_vm0, %v663_v58, %v11867_v32  ;;  %v12089_v25 = vld [vmem:[#allocation5 + $0x1] ss:$8 sm:$0xf] }
  0xf0   :  { %v672_v60 = vsel %vm664_vm0, %v11851_v26, %v657_v34  ;;  %v673_v16 = vsel %vm664_vm0, %v657_v34, %v11869_v33  ;;  %v732_v52 = vmul.f32 %v12061_v62, %v675_v40  ;;  %v733_v20 = vmul.f32 %v12071_v29, %v676_v55  ;;  %1012 = vrot.lane.b32.xlu1 %v11756_v14, %s11621_s9 }
  0xf1   :  { %v728_v51 = vmul.f32 %v12061_v62, %v672_v60  ;;  %v729_v18 = vmul.f32 %v12071_v29, %v673_v16  ;;  %1010 = vrot.lane.b32.xlu0 %v11700_v6, %s11621_s9  ;;  %1990 = vmatpush1.bf16.msra.mxu0 %v11100_v36  ;;  %v12095_v58 = vrot.slane %v12089_v25, %v11834_v19 }
  0xf2   :  { %v12091_v32 = vpop.permute.xlu1 %330  ;;  %v12113_v60 = vrot.slane %v12089_v25, %v11847_v24 }
  0xf3   :  { %v11114_v26 = vpack.c.bf16 %v732_v52, %v728_v51  ;;  %v329_v33 = vpop.permute.xlu0 %328  ;;  %v11115_v17 = vpack.c.bf16 %v733_v20, %v729_v18  ;;  %17505 = vst [vmem:[#allocation21_spill] sm:$0xff] %v12095_v58 }
  0xf4   :  { %1020 = vrot.lane.b32.xlu1 %v11762_v15, %s11621_s9  ;;  %v347_v16 = vsel %vm340_vm4, %v329_v33, %v12091_v32  ;;  %17506 = vst [vmem:[#allocation22_spill] sm:$0xff] %v12113_v60 }
  0xf5   :  { %2089 = vmatprep.subr.bf16.mxu1 %v11115_v17  ;;  %1018 = vrot.lane.b32.xlu0 %v11708_v8, %s11621_s9  ;;  %v403_v40 = vmul.f32 %v12095_v58, %v347_v16 }
  0xf6   :  { %2090 = vmatpush1.bf16.msra.mxu1 %v11114_v26  ;;  %v12103_v52 = vpop.permute.xlu1 %336 }
  0xf7   :  { %v335_v34 = vpop.permute.xlu0 %334 }
  0xf8   :  { %v350_v36 = vsel %vm340_vm4, %v335_v34, %v12103_v52  ;;  %1016 = vrot.lane.b32.xlu1 %v11714_v9, %s11621_s9 }
  0xf9   :  { %v407_v55 = vmul.f32 %v12095_v58, %v350_v36  ;;  %1008 = vrot.lane.b32.xlu0 %v11702_v7, %s11621_s9 }
  0xfa   :  { %v12117_v20 = vpop.permute.xlu1 %310 }
  0xfb   :  { %v12119_v51 = vpop.permute.xlu0 %308  ;;  %v11097_v18 = vpack.c.bf16 %v407_v55, %v403_v40  ;;  %v372_v26 = vsel %vm340_vm4, %v12117_v20, %v335_v34 }
  0xfc   :  { %v371_v17 = vsel %vm340_vm4, %v12119_v51, %v329_v33  ;;  %v406_v16 = vmul.f32 %v12113_v60, %v372_v26  ;;  %1200 = vrot.lane.b32.xlu1 %v11696_v4, %s11620_s30 }
  0xfd   :  { %v402_v36 = vmul.f32 %v12113_v60, %v371_v17  ;;  %1991 = vmatprep.subr.bf16.mxu0 %v11097_v18  ;;  %1192 = vrot.lane.b32.xlu0 %v11698_v5, %s11620_s30 }
  0xfe   :  { %v651_v31 = vpop.permute.xlu1 %650 }
  0xff   :  { %v645_v42 = vpop.permute.xlu0 %644  ;;  %v11096_v40 = vpack.c.bf16 %v406_v16, %v402_v36  ;;  %v669_v34 = vsel %vm664_vm0, %v11889_v43, %v651_v31  ;;  %v670_v33 = vsel %vm664_vm0, %v651_v31, %v11899_v48 }
 0x100   :  { %v666_v55 = vsel %vm664_vm0, %v11881_v39, %v645_v42  ;;  %v667_v26 = vsel %vm664_vm0, %v645_v42, %v11901_v49  ;;  %v724_v18 = vmul.f32 %v12061_v62, %v669_v34  ;;  %v725_v17 = vmul.f32 %v12071_v29, %v670_v33  ;;  %866 = vrot.lane.b32.xlu1 %v11728_v12, %s11622_s10 }
 0x101   :  { %v720_v59 = vmul.f32 %v12061_v62, %v666_v55  ;;  %v721_v16 = vmul.f32 %v12071_v29, %v667_v26  ;;  %864 = vrot.lane.b32.xlu0 %v11690_v3, %s11622_s10  ;;  %1992 = vmatpush1.bf16.msra.mxu0 %v11096_v40  ;;  %v12175_v55 = vrot.slane %v11951_v37, %v12038_v35 }
 0x102   :  { %v12147_v39 = vpop.permute.xlu1 %318 }
 0x103   :  { %v11110_v31 = vpack.c.bf16 %v724_v18, %v720_v59  ;;  %v317_v43 = vpop.permute.xlu0 %316  ;;  %v11111_v48 = vpack.c.bf16 %v725_v17, %v721_v16  ;;  %17507 = vst [vmem:[#allocation23_spill] sm:$0xff] %v12175_v55 }
 0x104   :  { %874 = vrot.lane.b32.xlu1 %v11734_v13, %s11622_s10  ;;  %v341_v49 = vsel %vm340_vm4, %v317_v43, %v12147_v39 }
 0x105   :  { %2091 = vmatprep.subr.bf16.mxu1 %v11111_v48  ;;  %872 = vrot.lane.b32.xlu0 %v11688_v2, %s11622_s10  ;;  %v395_v42 = vmul.f32 %v12095_v58, %v341_v49 }
 0x106   :  { %2092 = vmatpush1.bf16.msra.mxu1 %v11110_v31  ;;  %v12155_v12 = vpop.permute.xlu1 %324 }
 0x107   :  { %v323_v3 = vpop.permute.xlu0 %322 }
 0x108   :  { %v344_v59 = vsel %vm340_vm4, %v323_v3, %v12155_v12  ;;  %870 = vrot.lane.b32.xlu1 %v11680_v0, %s11622_s10 }
 0x109   :  { %v399_v36 = vmul.f32 %v12095_v58, %v344_v59  ;;  %862 = vrot.lane.b32.xlu0 %v11682_v1, %s11622_s10  ;;  %v12183_v1 = vrot.slane %v11951_v37, %v12047_v46 }
 0x10a   :  { %v12165_v13 = vpop.permute.xlu1 %306 }
 0x10b   :  { %v12167_v2 = vpop.permute.xlu0 %304  ;;  %v11093_v40 = vpack.c.bf16 %v399_v36, %v395_v42  ;;  %v370_v34 = vsel %vm340_vm4, %v12165_v13, %v323_v3  ;;  %17508 = vst [vmem:[#allocation24_spill] sm:$0xff] %v12183_v1 }
 0x10c   :  { %v369_v33 = vsel %vm340_vm4, %v12167_v2, %v317_v43  ;;  %v398_v0 = vmul.f32 %v12113_v60, %v370_v34  ;;  %1184 = vrot.lane.b32.xlu1 %v11720_v10, %s11620_s30 }
 0x10d   :  { %v394_v26 = vmul.f32 %v12113_v60, %v369_v33  ;;  %1993 = vmatprep.subr.bf16.mxu0 %v11093_v40  ;;  %1176 = vrot.lane.b32.xlu0 %v11722_v11, %s11620_s30 }
 0x10e   :  { %v501_v18 = vpop.permute.xlu1 %500 }
 0x10f   :  { %v495_v17 = vpop.permute.xlu0 %494  ;;  %v11092_v16 = vpack.c.bf16 %v398_v0, %v394_v26  ;;  %v513_v31 = vsel %vm502_vm2, %v11965_v45, %v501_v18  ;;  %v514_v43 = vsel %vm502_vm2, %v501_v18, %v11979_v53  ;;  %v12203_v45 = vld [vmem:[#allocation5] ss:$8 sm:$0xf] }
 0x110   :  { %v510_v48 = vsel %vm502_vm2, %v11953_v38, %v495_v17  ;;  %v511_v49 = vsel %vm502_vm2, %v495_v17, %v11981_v54  ;;  %v570_v37 = vmul.f32 %v12175_v55, %v513_v31  ;;  %v571_v3 = vmul.f32 %v12183_v1, %v514_v43  ;;  %850 = vrot.lane.b32.xlu1 %v11756_v14, %s11622_s10 }
 0x111   :  { %v566_v59 = vmul.f32 %v12175_v55, %v510_v48  ;;  %v567_v42 = vmul.f32 %v12183_v1, %v511_v49  ;;  %848 = vrot.lane.b32.xlu0 %v11700_v6, %s11622_s10  ;;  %1994 = vmatpush1.bf16.msra.mxu0 %v11092_v16  ;;  %v12209_v40 = vrot.slane %v12203_v45, %v11834_v19 }
 0x112   :  { %v12205_v53 = vpop.permute.xlu1 %168 }
 0x113   :  { %v11106_v38 = vpack.c.bf16 %v570_v37, %v566_v59  ;;  %v167_v54 = vpop.permute.xlu0 %166  ;;  %v11107_v36 = vpack.c.bf16 %v571_v3, %v567_v42  ;;  %17509 = vst [vmem:[#allocation25_spill] sm:$0xff] %v12209_v40 }
 0x114   :  { %858 = vrot.lane.b32.xlu1 %v11762_v15, %s11622_s10  ;;  %v185_v6 = vsel %vm178_vm5, %v167_v54, %v12205_v53  ;;  %v12227_v15 = vrot.slane %v12203_v45, %v11847_v24 }
 0x115   :  { %2093 = vmatprep.subr.bf16.mxu1 %v11107_v36  ;;  %856 = vrot.lane.b32.xlu0 %v11708_v8, %s11622_s10  ;;  %v241_v0 = vmul.f32 %v12209_v40, %v185_v6  ;;  %v11466_v8 = vld [vmem:[#allocation7 + $0x4] ss:$12 sps:$4 sm:$0xff]  }
 0x116   :  { %2094 = vmatpush1.bf16.msra.mxu1 %v11106_v38  ;;  %v12217_v14 = vpop.permute.xlu1 %174  ;;  %17510 = vst [vmem:[#allocation26_spill] sm:$0xff] %v12227_v15  ;;  %2015 = vmatprep.mubr.bf16.mxu0 %v11466_v8 }
 0x117   :  { %v173_v34 = vpop.permute.xlu0 %172 }
 0x118   :  { %v188_v33 = vsel %vm178_vm5, %v173_v34, %v12217_v14  ;;  %854 = vrot.lane.b32.xlu1 %v11714_v9, %s11622_s10 }
 0x119   :  { %v245_v26 = vmul.f32 %v12209_v40, %v188_v33  ;;  %846 = vrot.lane.b32.xlu0 %v11702_v7, %s11622_s10  ;;  %v12263_v33 = vld [vmem:[#allocation7 + $0x20] ss:$12 sps:$4 sm:$0xff]  }
 0x11a   :  { %v12231_v18 = vpop.permute.xlu1 %136  ;;  %10085 = vmatmul.mubr.msk.bf16.gmra.mxu1 %vm1976_vm3, %v12263_v33 }
 0x11b   :  { %v12233_v17 = vpop.permute.xlu0 %134  ;;  %v11089_v16 = vpack.c.bf16 %v245_v26, %v241_v0  ;;  %v210_v31 = vsel %vm178_vm5, %v12231_v18, %v173_v34  ;;  %2121 = vmatprep.mubr.bf16.mxu1 %v11466_v8 }
 0x11c   :  { %v209_v43 = vsel %vm178_vm5, %v12233_v17, %v167_v54  ;;  %v244_v9 = vmul.f32 %v12227_v15, %v210_v31  ;;  %1038 = vrot.lane.b32.xlu1 %v11696_v4, %s11621_s9 }
 0x11d   :  { %v240_v48 = vmul.f32 %v12227_v15, %v209_v43  ;;  %1995 = vmatprep.subr.bf16.mxu0 %v11089_v16  ;;  %1030 = vrot.lane.b32.xlu0 %v11698_v5, %s11621_s9 }
 0x11e   :  { %v489_v7 = vpop.permute.xlu1 %488 }
 0x11f   :  { %v483_v49 = vpop.permute.xlu0 %482  ;;  %v11088_v37 = vpack.c.bf16 %v244_v9, %v240_v48  ;;  %v507_v3 = vsel %vm502_vm2, %v12033_v21, %v489_v7  ;;  %v508_v59 = vsel %vm502_vm2, %v489_v7, %v12050_v47 }
 0x120   :  { %v504_v42 = vsel %vm502_vm2, %v12025_v57, %v483_v49  ;;  %v505_v38 = vsel %vm502_vm2, %v483_v49, %v12052_v50  ;;  %v562_v54 = vmul.f32 %v12175_v55, %v507_v3  ;;  %v563_v36 = vmul.f32 %v12183_v1, %v508_v59  ;;  %1022 = vrot.lane.b32.xlu1 %v11720_v10, %s11621_s9 }
 0x121   :  { %v558_v6 = vmul.f32 %v12175_v55, %v504_v42  ;;  %v559_v34 = vmul.f32 %v12183_v1, %v505_v38  ;;  %1014 = vrot.lane.b32.xlu0 %v11722_v11, %s11621_s9  ;;  %1996 = vmatpush1.bf16.msra.mxu0 %v11088_v37  ;;  %v12293_v3 = vrot.slane %v12089_v25, %v12038_v35 }
 0x122   :  { %v12261_v57 = vpop.permute.xlu1 %156  ;;  %v12301_v38 = vrot.slane %v12089_v25, %v12047_v46 }
 0x123   :  { %v11102_v21 = vpack.c.bf16 %v562_v54, %v558_v6  ;;  %v155_v47 = vpop.permute.xlu0 %154  ;;  %v11103_v50 = vpack.c.bf16 %v563_v36, %v559_v34  ;;  %17511 = vst [vmem:[#allocation27_spill] sm:$0xff] %v12293_v3 }
 0x124   :  { %876 = vrot.lane.b32.xlu1 %v11696_v4, %s11622_s10  ;;  %v179_v0 = vsel %vm178_vm5, %v155_v47, %v12261_v57  ;;  %17512 = vst [vmem:[#allocation28_spill] sm:$0xff] %v12301_v38 }
 0x125   :  { %2095 = vmatprep.subr.bf16.mxu1 %v11103_v50  ;;  %868 = vrot.lane.b32.xlu0 %v11698_v5, %s11622_s10  ;;  %v233_v43 = vmul.f32 %v12209_v40, %v179_v0 }
 0x126   :  { %2096 = vmatpush1.bf16.msra.mxu1 %v11102_v21  ;;  %v12271_v26 = vpop.permute.xlu1 %162 }
 0x127   :  { %v161_v16 = vpop.permute.xlu0 %160 }
 0x128   :  { %v182_v31 = vsel %vm178_vm5, %v161_v16, %v12271_v26  ;;  %860 = vrot.lane.b32.xlu1 %v11720_v10, %s11622_s10 }
 0x129   :  { %v237_v9 = vmul.f32 %v12209_v40, %v182_v31  ;;  %852 = vrot.lane.b32.xlu0 %v11722_v11, %s11622_s10 }
 0x12a   :  { %v12283_v48 = vpop.permute.xlu1 %132 }
 0x12b   :  { %v12285_v7 = vpop.permute.xlu0 %130  ;;  %v11085_v49 = vpack.c.bf16 %v237_v9, %v233_v43  ;;  %v208_v37 = vsel %vm178_vm5, %v12283_v48, %v161_v16  ;;  %v124_v43 = vld [vmem:[%s17068_s3 + $0x10] sm:$0xff] }
 0x12c   :  { %v207_v8 = vsel %vm178_vm5, %v12285_v7, %v155_v47  ;;  %v236_v59 = vmul.f32 %v12227_v15, %v208_v37  ;;  %1362 = vrot.lane.b32.xlu1 %v11696_v4, %s11615_s6 }
 0x12d   :  { %v232_v42 = vmul.f32 %v12227_v15, %v207_v8  ;;  %1997 = vmatprep.subr.bf16.mxu0 %v11085_v49  ;;  %1354 = vrot.lane.b32.xlu0 %v11698_v5, %s11615_s6  ;;  %v122_v8 = vld [vmem:[%s17068_s3] sm:$0xff] }
 0x12e   :  { %v339_v54 = vpop.permute.xlu1 %338 }
 0x12f   :  { %v333_v36 = vpop.permute.xlu0 %332  ;;  %v11084_v6 = vpack.c.bf16 %v236_v59, %v232_v42  ;;  %v351_v34 = vsel %vm340_vm4, %v12103_v52, %v339_v54  ;;  %v352_v21 = vsel %vm340_vm4, %v339_v54, %v12117_v20  ;;  %v12321_v52 = vld [vmem:[#allocation5 + $0x7] ss:$8 sm:$0xf] }
 0x130   :  { %v348_v4 = vsel %vm340_vm4, %v12091_v32, %v333_v36  ;;  %v349_v47 = vsel %vm340_vm4, %v333_v36, %v12119_v51  ;;  %v408_v25 = vmul.f32 %v12293_v3, %v351_v34  ;;  %v409_v50 = vmul.f32 %v12301_v38, %v352_v21  ;;  %1346 = vrot.lane.b32.xlu1 %v11720_v10, %s11615_s6  ;;  %v123_v59 = vld [vmem:[%s17068_s3 + $0x8] sm:$0xff] }
 0x131   :  { %v404_v5 = vmul.f32 %v12293_v3, %v348_v4  ;;  %v405_v0 = vmul.f32 %v12301_v38, %v349_v47  ;;  %1338 = vrot.lane.b32.xlu0 %v11722_v11, %s11615_s6  ;;  %1998 = vmatpush1.bf16.msra.mxu0 %v11084_v6  ;;  %v12327_v31 = vrot.slane %v12321_v52, %v11834_v19  ;;  %v125_v11 = vld [vmem:[%s17068_s3 + $0x18] sm:$0xff] }
 0x132   :  { %v12323_v20 = vpop.permute.xlu1 %1190  ;;  %v12351_v36 = vrot.slane %v12321_v52, %v11847_v24 }
 0x133   :  { %v11098_v32 = vpack.c.bf16 %v408_v25, %v404_v5  ;;  %v1189_v51 = vpop.permute.xlu0 %1188  ;;  %v11099_v16 = vpack.c.bf16 %v409_v50, %v405_v0  ;;  %17513 = vst [vmem:[#allocation29_spill] sm:$0xff] %v12327_v31 }
 0x134   :  { %v1210_v10 = vsel %vm1202_vm6, %v1189_v51, %v12323_v20  ;;  %1583 = vperm.xlu1 %11462, %v125_v11   ;;  %17514 = vst [vmem:[#allocation30_spill] sm:$0xff] %v12351_v36 }
 0x135   :  { %2097 = vmatprep.subr.bf16.mxu1 %v11099_v16  ;;  %1578 = vperm.xlu0 %11461, %v124_v43   ;;  %v1269_v42 = vmul.f32 %v12327_v31, %v1210_v10 }
 0x136   :  { %2098 = vmatpush1.bf16.msra.mxu1 %v11098_v32  ;;  %v12337_v9 = vpop.permute.xlu1 %1198 }
 0x137   :  { %v1197_v49 = vpop.permute.xlu0 %1196 }
 0x138   :  { %v1213_v37 = vsel %vm1202_vm6, %v1197_v49, %v12337_v9  ;;  %1568 = vperm.xlu1 %11462, %v122_v8  }
 0x139   :  { %v1273_v54 = vmul.f32 %v12327_v31, %v1213_v37  ;;  %1573 = vperm.xlu0 %11461, %v123_v59  }
 0x13a   :  { %v12353_v6 = vpop.permute.xlu1 %1194 }
 0x13b   :  { %v12355_v34 = vpop.permute.xlu0 %1186  ;;  %v11145_v21 = vpack.c.bf16 %v1273_v54, %v1269_v42  ;;  %v1212_v4 = vsel %vm1202_vm6, %v12353_v6, %v1197_v49 }
 0x13c   :  { %v1209_v47 = vsel %vm1202_vm6, %v12355_v34, %v1189_v51  ;;  %v1272_v25 = vmul.f32 %v12351_v36, %v1212_v4 }
 0x13d   :  { %v1268_v50 = vmul.f32 %v12351_v36, %v1209_v47  ;;  %1999 = vmatprep.subr.bf16.mxu0 %v11145_v21 }
 0x13e   :  { %v327_v5 = vpop.permute.xlu1 %326 }
 0x13f   :  { %v321_v0 = vpop.permute.xlu0 %320  ;;  %v11144_v32 = vpack.c.bf16 %v1272_v25, %v1268_v50  ;;  %v345_v16 = vsel %vm340_vm4, %v12155_v12, %v327_v5  ;;  %v346_v10 = vsel %vm340_vm4, %v327_v5, %v12165_v13 }
 0x140   :  { %v342_v11 = vsel %vm340_vm4, %v12147_v39, %v321_v0  ;;  %v343_v51 = vsel %vm340_vm4, %v321_v0, %v12167_v2  ;;  %v400_v43 = vmul.f32 %v12293_v3, %v345_v16  ;;  %v401_v49 = vmul.f32 %v12301_v38, %v346_v10 }
 0x141   :  { %v396_v37 = vmul.f32 %v12293_v3, %v342_v11  ;;  %v397_v8 = vmul.f32 %v12301_v38, %v343_v51  ;;  %2000 = vmatpush2.bf16.msra.mxu0 %v11144_v32  ;;  %v12397_v11 = vrot.slane %v12203_v45, %v12038_v35  ;;  %v12401_v51 = vrot.slane %v12203_v45, %v12047_v46 }
 0x142   :  { %v12375_v12 = vpop.permute.xlu1 %1174 }
 0x143   :  { %v11094_v59 = vpack.c.bf16 %v400_v43, %v396_v37  ;;  %v1173_v42 = vpop.permute.xlu0 %1172  ;;  %v11095_v13 = vpack.c.bf16 %v401_v49, %v397_v8  ;;  %17515 = vst [vmem:[#allocation31_spill] sm:$0xff] %v12397_v11  ;;  %17516 = vst [vmem:[#allocation32_spill] sm:$0xff] %v12401_v51 }
 0x144   :  { %v1204_v39 = vsel %vm1202_vm6, %v1173_v42, %v12375_v12 }
 0x145   :  { %2099 = vmatprep.subr.bf16.mxu1 %v11095_v13  ;;  %v1261_v4 = vmul.f32 %v12327_v31, %v1204_v39 }
 0x146   :  { %2100 = vmatpush1.bf16.msra.mxu1 %v11094_v59  ;;  %v12379_v2 = vpop.permute.xlu1 %1182 }
 0x147   :  { %v1181_v54 = vpop.permute.xlu0 %1180 }
 0x148   :  { %v1207_v21 = vsel %vm1202_vm6, %v1181_v54, %v12379_v2 }
 0x149   :  { %v1265_v47 = vmul.f32 %v12327_v31, %v1207_v21 }
 0x14a   :  { %v12385_v25 = vpop.permute.xlu1 %1178 }
 0x14b   :  { %v12387_v50 = vpop.permute.xlu0 %1170  ;;  %v11141_v5 = vpack.c.bf16 %v1265_v47, %v1261_v4  ;;  %v1206_v0 = vsel %vm1202_vm6, %v12385_v25, %v1181_v54  ;;  %v12415_v4 = vld [vmem:[#allocation5 + $0x6] ss:$8 sm:$0xf] }
 0x14c   :  { %v1203_v32 = vsel %vm1202_vm6, %v12387_v50, %v1173_v42  ;;  %v1264_v16 = vmul.f32 %v12351_v36, %v1206_v0 }
 0x14d   :  { %v1260_v10 = vmul.f32 %v12351_v36, %v1203_v32  ;;  %2001 = vmatprep.subr.bf16.mxu0 %v11141_v5 }
 0x14e   :  { %v177_v43 = vpop.permute.xlu1 %176 }
 0x14f   :  { %v171_v49 = vpop.permute.xlu0 %170  ;;  %v11140_v37 = vpack.c.bf16 %v1264_v16, %v1260_v10  ;;  %v189_v8 = vsel %vm178_vm5, %v12217_v14, %v177_v43  ;;  %v190_v59 = vsel %vm178_vm5, %v177_v43, %v12231_v18 }
 0x150   :  { %v186_v42 = vsel %vm178_vm5, %v12205_v53, %v171_v49  ;;  %v187_v13 = vsel %vm178_vm5, %v171_v49, %v12233_v17  ;;  %v246_v39 = vmul.f32 %v12397_v11, %v189_v8  ;;  %v247_v45 = vmul.f32 %v12401_v51, %v190_v59 }
 0x151   :  { %v242_v54 = vmul.f32 %v12397_v11, %v186_v42  ;;  %v243_v21 = vmul.f32 %v12401_v51, %v187_v13  ;;  %2002 = vmatpush2.bf16.msra.mxu0 %v11140_v37  ;;  %v12421_v17 = vrot.slane %v12415_v4, %v11834_v19  ;;  %v12433_v49 = vrot.slane %v12415_v4, %v11847_v24 }
 0x152   :  { %v12417_v47 = vpop.permute.xlu1 %1028 }
 0x153   :  { %v11090_v14 = vpack.c.bf16 %v246_v39, %v242_v54  ;;  %v1027_v18 = vpop.permute.xlu0 %1026  ;;  %v11091_v53 = vpack.c.bf16 %v247_v45, %v243_v21  ;;  %17517 = vst [vmem:[#allocation33_spill] sm:$0xff] %v12421_v17  ;;  %17518 = vst [vmem:[#allocation34_spill] sm:$0xff] %v12433_v49 }
 0x154   :  { %v1048_v5 = vsel %vm1040_vm7, %v1027_v18, %v12417_v47 }
 0x155   :  { %2101 = vmatprep.subr.bf16.mxu1 %v11091_v53  ;;  %v1107_v10 = vmul.f32 %v12421_v17, %v1048_v5 }
 0x156   :  { %2102 = vmatpush1.bf16.msra.mxu1 %v11090_v14  ;;  %v12425_v0 = vpop.permute.xlu1 %1036 }
 0x157   :  { %v1035_v32 = vpop.permute.xlu0 %1034 }
 0x158   :  { %v1051_v16 = vsel %vm1040_vm7, %v1035_v32, %v12425_v0 }
 0x159   :  { %v1111_v43 = vmul.f32 %v12421_v17, %v1051_v16 }
 0x15a   :  { %v12435_v37 = vpop.permute.xlu1 %1032 }
 0x15b   :  { %v12437_v8 = vpop.permute.xlu0 %1024  ;;  %v11137_v59 = vpack.c.bf16 %v1111_v43, %v1107_v10  ;;  %v1050_v42 = vsel %vm1040_vm7, %v12435_v37, %v1035_v32 }
 0x15c   :  { %v1047_v13 = vsel %vm1040_vm7, %v12437_v8, %v1027_v18  ;;  %v1110_v39 = vmul.f32 %v12433_v49, %v1050_v42 }
 0x15d   :  { %v1106_v45 = vmul.f32 %v12433_v49, %v1047_v13  ;;  %2003 = vmatprep.subr.bf16.mxu0 %v11137_v59 }
 0x15e   :  { %v165_v54 = vpop.permute.xlu1 %164 }
 0x15f   :  { %v159_v21 = vpop.permute.xlu0 %158  ;;  %v11136_v14 = vpack.c.bf16 %v1110_v39, %v1106_v45  ;;  %v183_v53 = vsel %vm178_vm5, %v12271_v26, %v165_v54  ;;  %v184_v5 = vsel %vm178_vm5, %v165_v54, %v12283_v48 }
 0x160   :  { %v180_v32 = vsel %vm178_vm5, %v12261_v57, %v159_v21  ;;  %v181_v18 = vsel %vm178_vm5, %v159_v21, %v12285_v7  ;;  %v238_v16 = vmul.f32 %v12397_v11, %v183_v53  ;;  %v239_v10 = vmul.f32 %v12401_v51, %v184_v5 }
 0x161   :  { %v234_v43 = vmul.f32 %v12397_v11, %v180_v32  ;;  %v235_v59 = vmul.f32 %v12401_v51, %v181_v18  ;;  %2004 = vmatpush2.bf16.msra.mxu0 %v11136_v14 }
 0x162   :  { %v12457_v26 = vpop.permute.xlu1 %1012 }
 0x163   :  { %v11086_v42 = vpack.c.bf16 %v238_v16, %v234_v43  ;;  %v11087_v13 = vpack.c.bf16 %v239_v10, %v235_v59  ;;  %v1011_v48 = vpop.permute.xlu0 %1010  ;;  %v12478_v10 = vrot.slane %v12321_v52, %v12038_v35  ;;  %v12482_v43 = vrot.slane %v12321_v52, %v12047_v46 }
 0x164   :  { %v1042_v57 = vsel %vm1040_vm7, %v1011_v48, %v12457_v26 }
 0x165   :  { %2103 = vmatprep.subr.bf16.mxu1 %v11087_v13  ;;  %v1099_v54 = vmul.f32 %v12421_v17, %v1042_v57  ;;  %17519 = vst [vmem:[#allocation35_spill] sm:$0xff] %v12478_v10  ;;  %17520 = vst [vmem:[#allocation36_spill] sm:$0xff] %v12482_v43 }
 0x166   :  { %2104 = vmatpush1.bf16.msra.mxu1 %v11086_v42  ;;  %v12461_v7 = vpop.permute.xlu1 %1020 }
 0x167   :  { %v1019_v39 = vpop.permute.xlu0 %1018 }
 0x168   :  { %v1045_v45 = vsel %vm1040_vm7, %v1019_v39, %v12461_v7 }
 0x169   :  { %v1103_v21 = vmul.f32 %v12421_v17, %v1045_v45 }
 0x16a   :  { %v12467_v14 = vpop.permute.xlu1 %1016 }
 0x16b   :  { %v1044_v53 = vsel %vm1040_vm7, %v12467_v14, %v1019_v39  ;;  %v12471_v5 = vpop.permute.xlu0 %1008  ;;  %v11133_v32 = vpack.c.bf16 %v1103_v21, %v1099_v54 }
 0x16c   :  { %v1102_v18 = vmul.f32 %v12433_v49, %v1044_v53  ;;  %v1041_v16 = vsel %vm1040_vm7, %v12471_v5, %v1011_v48 }
 0x16d   :  { %v1098_v59 = vmul.f32 %v12433_v49, %v1041_v16  ;;  %2005 = vmatprep.subr.bf16.mxu0 %v11133_v32 }
 0x16e   :  { %v1201_v42 = vpop.permute.xlu1 %1200 }
 0x16f   :  { %v1214_v13 = vsel %vm1202_vm6, %v12337_v9, %v1201_v42  ;;  %v1238_v57 = vsel %vm1202_vm6, %v1201_v42, %v12353_v6  ;;  %v1193_v39 = vpop.permute.xlu0 %1192  ;;  %v11132_v48 = vpack.c.bf16 %v1102_v18, %v1098_v59  ;;  %v12499_v6 = vld [vmem:[#allocation5 + $0x5] ss:$8 sm:$0xf] }
 0x170   :  { %v1274_v45 = vmul.f32 %v12478_v10, %v1214_v13  ;;  %v1275_v54 = vmul.f32 %v12482_v43, %v1238_v57  ;;  %v1211_v52 = vsel %vm1202_vm6, %v12323_v20, %v1193_v39  ;;  %v1237_v21 = vsel %vm1202_vm6, %v1193_v39, %v12355_v34 }
 0x171   :  { %v1270_v53 = vmul.f32 %v12478_v10, %v1211_v52  ;;  %v1271_v32 = vmul.f32 %v12482_v43, %v1237_v21  ;;  %2006 = vmatpush2.bf16.msra.mxu0 %v11132_v48  ;;  %v12503_v42 = vrot.slane %v12499_v6, %v11834_v19  ;;  %v12513_v39 = vrot.slane %v12499_v6, %v11847_v24 }
 0x172   :  { %v12497_v9 = vpop.permute.xlu1 %866 }
 0x173   :  { %v11146_v18 = vpack.c.bf16 %v1274_v45, %v1270_v53  ;;  %v865_v16 = vpop.permute.xlu0 %864  ;;  %v11147_v59 = vpack.c.bf16 %v1275_v54, %v1271_v32  ;;  %17521 = vst [vmem:[#allocation37_spill] sm:$0xff] %v12503_v42  ;;  %17522 = vst [vmem:[#allocation38_spill] sm:$0xff] %v12513_v39 }
 0x174   :  { %v886_v20 = vsel %vm878_vm8, %v865_v16, %v12497_v9 }
 0x175   :  { %2105 = vmatprep.subr.bf16.mxu1 %v11147_v59  ;;  %v945_v48 = vmul.f32 %v12503_v42, %v886_v20 }
 0x176   :  { %2106 = vmatpush2.bf16.msra.mxu1 %v11146_v18  ;;  %v12507_v34 = vpop.permute.xlu1 %874 }
 0x177   :  { %v873_v13 = vpop.permute.xlu0 %872 }
 0x178   :  { %v889_v57 = vsel %vm878_vm8, %v873_v13, %v12507_v34 }
 0x179   :  { %v949_v19 = vmul.f32 %v12503_v42, %v889_v57 }
 0x17a   :  { %v12517_v45 = vpop.permute.xlu1 %870 }
 0x17b   :  { %v888_v54 = vsel %vm878_vm8, %v12517_v45, %v873_v13  ;;  %v12521_v52 = vpop.permute.xlu0 %862  ;;  %v11129_v21 = vpack.c.bf16 %v949_v19, %v945_v48 }
 0x17c   :  { %v948_v53 = vmul.f32 %v12513_v39, %v888_v54  ;;  %v885_v32 = vsel %vm878_vm8, %v12521_v52, %v865_v16 }
 0x17d   :  { %v944_v24 = vmul.f32 %v12513_v39, %v885_v32  ;;  %2007 = vmatprep.subr.bf16.mxu0 %v11129_v21 }
 0x17e   :  { %v1185_v18 = vpop.permute.xlu1 %1184 }
 0x17f   :  { %v1208_v59 = vsel %vm1202_vm6, %v12379_v2, %v1185_v18  ;;  %v1236_v20 = vsel %vm1202_vm6, %v1185_v18, %v12385_v25  ;;  %v1177_v57 = vpop.permute.xlu0 %1176  ;;  %v11128_v13 = vpack.c.bf16 %v948_v53, %v944_v24 }
 0x180   :  { %v1266_v49 = vmul.f32 %v12478_v10, %v1208_v59  ;;  %v1267_v48 = vmul.f32 %v12482_v43, %v1236_v20  ;;  %v1205_v19 = vsel %vm1202_vm6, %v12375_v12, %v1177_v57  ;;  %v1235_v16 = vsel %vm1202_vm6, %v1177_v57, %v12387_v50 }
 0x181   :  { %v1262_v54 = vmul.f32 %v12478_v10, %v1205_v19  ;;  %v1263_v21 = vmul.f32 %v12482_v43, %v1235_v16  ;;  %2008 = vmatpush2.bf16.msra.mxu0 %v11128_v13 }
 0x182   :  { %v12539_v2 = vpop.permute.xlu1 %850 }
 0x183   :  { %v11142_v25 = vpack.c.bf16 %v1266_v49, %v1262_v54  ;;  %v849_v32 = vpop.permute.xlu0 %848  ;;  %v11143_v53 = vpack.c.bf16 %v1267_v48, %v1263_v21  ;;  %v12560_v54 = vrot.slane %v12415_v4, %v12038_v35  ;;  %v12564_v21 = vrot.slane %v12415_v4, %v12047_v46 }
 0x184   :  { %v880_v24 = vsel %vm878_vm8, %v849_v32, %v12539_v2 }
 0x185   :  { %2107 = vmatprep.subr.bf16.mxu1 %v11143_v53  ;;  %v937_v59 = vmul.f32 %v12503_v42, %v880_v24  ;;  %17523 = vst [vmem:[#allocation39_spill] sm:$0xff] %v12560_v54  ;;  %17524 = vst [vmem:[#allocation40_spill] sm:$0xff] %v12564_v21  ;;  %v11498_v24 = vld [vmem:[#allocation3 + $0x68] sm:$0xff] }
 0x186   :  { %2108 = vmatpush2.bf16.msra.mxu1 %v11142_v25  ;;  %v12543_v18 = vpop.permute.xlu1 %858 }
 0x187   :  { %v857_v12 = vpop.permute.xlu0 %856 }
 0x188   :  { %v883_v50 = vsel %vm878_vm8, %v857_v12, %v12543_v18 }
 0x189   :  { %v941_v20 = vmul.f32 %v12503_v42, %v883_v50 }
 0x18a   :  { %v12549_v57 = vpop.permute.xlu1 %854 }
 0x18b   :  { %v882_v49 = vsel %vm878_vm8, %v12549_v57, %v857_v12  ;;  %v12553_v13 = vpop.permute.xlu0 %846  ;;  %v11125_v48 = vpack.c.bf16 %v941_v20, %v937_v59  ;;  %v11499_v12 = vld [vmem:[#allocation3 + $0x48] sm:$0xff] }
 0x18c   :  { %v940_v19 = vmul.f32 %v12513_v39, %v882_v49  ;;  %v879_v16 = vsel %vm878_vm8, %v12553_v13, %v849_v32  ;;  %v11121_v50 = vpack.c.bf16 %v11498_v24, %v11499_v12 }
 0x18d   :  { %v936_v25 = vmul.f32 %v12513_v39, %v879_v16  ;;  %2009 = vmatprep.subr.bf16.mxu0 %v11125_v48  ;;  %v11501_v39 = vld [vmem:[#allocation3 + $0x40] sm:$0xff] }
 0x18e   :  { %v1039_v53 = vpop.permute.xlu1 %1038 }
 0x18f   :  { %v1052_v59 = vsel %vm1040_vm7, %v12425_v0, %v1039_v53  ;;  %v1076_v32 = vsel %vm1040_vm7, %v1039_v53, %v12435_v37  ;;  %v1031_v20 = vpop.permute.xlu0 %1030  ;;  %v11124_v49 = vpack.c.bf16 %v940_v19, %v936_v25  ;;  %v11500_v0 = vld [vmem:[#allocation3 + $0x60] sm:$0xff]  ;;  %v12581_v19 = vrot.slane %v12499_v6, %v12038_v35  ;;  %v11502_v25 = vld [vmem:[#allocation3 + $0x8] sm:$0xff] }
 0x190   :  { %v1112_v42 = vmul.f32 %v12560_v54, %v1052_v59  ;;  %v1113_v4 = vmul.f32 %v12564_v21, %v1076_v32  ;;  %v1049_v16 = vsel %vm1040_vm7, %v12417_v47, %v1031_v20  ;;  %v1075_v48 = vsel %vm1040_vm7, %v1031_v20, %v12437_v8  ;;  %v11503_v8 = vld [vmem:[#allocation3 + $0x28] sm:$0xff] }
 0x191   :  { %v1108_v24 = vmul.f32 %v12560_v54, %v1049_v16  ;;  %v1109_v12 = vmul.f32 %v12564_v21, %v1075_v48  ;;  %2010 = vmatpush2.bf16.msra.mxu0 %v11124_v49  ;;  %v11120_v37 = vpack.c.bf16 %v11500_v0, %v11501_v39  ;;  %17525 = vst [vmem:[#allocation41_spill] sm:$0xff] %v12581_v19 }
 0x192   :  { %v1023_v53 = vpop.permute.xlu1 %1022  ;;  %2011 = vmatprep.subr.bf16.mxu0 %v11121_v50  ;;  %v12585_v47 = vrot.slane %v12499_v6, %v12047_v46  ;;  %v11117_v59 = vpack.c.bf16 %v11503_v8, %v11502_v25 }
 0x193   :  { %v11138_v32 = vpack.c.bf16 %v1112_v42, %v1108_v24  ;;  %v1046_v20 = vsel %vm1040_vm7, %v12461_v7, %v1023_v53  ;;  %v1074_v39 = vsel %vm1040_vm7, %v1023_v53, %v12467_v14  ;;  %v1015_v49 = vpop.permute.xlu0 %1014  ;;  %v11139_v50 = vpack.c.bf16 %v1113_v4, %v1109_v12  ;;  %v11504_v7 = vld [vmem:[#allocation3] sm:$0xff] }
 0x194   :  { %17526 = vst [vmem:[#allocation42_spill] sm:$0xff] %v12585_v47  ;;  %v1104_v16 = vmul.f32 %v12560_v54, %v1046_v20  ;;  %v1105_v48 = vmul.f32 %v12564_v21, %v1074_v39  ;;  %v1043_v6 = vsel %vm1040_vm7, %v12457_v26, %v1015_v49  ;;  %v1073_v0 = vsel %vm1040_vm7, %v1015_v49, %v12471_v5  ;;  %v11505_v14 = vld [vmem:[#allocation3 + $0x20] sm:$0xff] }
 0x195   :  { %v1100_v42 = vmul.f32 %v12560_v54, %v1043_v6  ;;  %v1101_v24 = vmul.f32 %v12564_v21, %v1073_v0  ;;  %2012 = vmatpush2.bf16.msra.mxu0 %v11120_v37  ;;  %2109 = vmatprep.subr.bf16.mxu1 %v11139_v50  ;;  %v11116_v53 = vpack.c.bf16 %v11505_v14, %v11504_v7 }
 0x196   :  { %2110 = vmatpush2.bf16.msra.mxu1 %v11138_v32  ;;  %v877_v4 = vpop.permute.xlu1 %876  ;;  %2013 = vmatprep.subr.bf16.mxu0 %v11117_v59  ;;  %v12609_v59 = vld [vmem:[#allocation7] ss:$12 sps:$4 sm:$0xff]  }
 0x197   :  { %v11134_v12 = vpack.c.bf16 %v1104_v16, %v1100_v42  ;;  %v890_v25 = vsel %vm878_vm8, %v12507_v34, %v877_v4  ;;  %v914_v26 = vsel %vm878_vm8, %v877_v4, %v12517_v45  ;;  %v869_v5 = vpop.permute.xlu0 %868  ;;  %v11135_v8 = vpack.c.bf16 %v1105_v48, %v1101_v24  ;;  %v12613_v45 = vld [vmem:[#allocation7 + $0x1c] ss:$12 sps:$4 sm:$0xff]  }
 0x198   :  { %v950_v20 = vmul.f32 %v12581_v19, %v890_v25  ;;  %v951_v37 = vmul.f32 %v12585_v47, %v914_v26  ;;  %v887_v39 = vsel %vm878_vm8, %v12497_v9, %v869_v5  ;;  %v913_v32 = vsel %vm878_vm8, %v869_v5, %v12521_v52  ;;  %v11506_v16 = vld [vmem:[#allocation5 + $0x20] ss:$8 sm:$0xf] }
 0x199   :  { %v946_v49 = vmul.f32 %v12581_v19, %v887_v39  ;;  %v947_v34 = vmul.f32 %v12585_v47, %v913_v32  ;;  %2014 = vmatpush2.bf16.msra.mxu0 %v11116_v53  ;;  %2111 = vmatprep.subr.bf16.mxu1 %v11135_v8  ;;  %v12616_v48 = vrot.slane %v11506_v16, %v12038_v35  ;;  %v11507_v4 = vld [vmem:[#allocation3 + $0x78] sm:$0xff] }
 0x19a   :  { %2112 = vmatpush2.bf16.msra.mxu1 %v11134_v12  ;;  %v861_v50 = vpop.permute.xlu1 %860  ;;  %v12619_v9 = vrot.slane %v11506_v16, %v12047_v46  ;;  %v11508_v12 = vld [vmem:[#allocation3 + $0x58] sm:$0xff]  ;;  %v11510_v16 = vld [vmem:[#allocation3 + $0x70] sm:$0xff] }
 0x19b   :  { %17527 = vst [vmem:[#allocation43_spill] sm:$0xff] %v12616_v48  ;;  %v11130_v52 = vpack.c.bf16 %v950_v20, %v946_v49  ;;  %v884_v6 = vsel %vm878_vm8, %v12543_v18, %v861_v50  ;;  %v912_v0 = vsel %vm878_vm8, %v861_v50, %v12549_v57  ;;  %v853_v42 = vpop.permute.xlu0 %852  ;;  %v11131_v24 = vpack.c.bf16 %v951_v37, %v947_v34  ;;  %v11469_v49 = vld [vmem:[#allocation7 + $0x18] ss:$12 sps:$4 sm:$0xff]   ;;  %v11509_v50 = vld [vmem:[#allocation3 + $0x50] sm:$0xff] }
 0x19c   :  { %17528 = vst [vmem:[#allocation44_spill] sm:$0xff] %v12619_v9  ;;  %v942_v7 = vmul.f32 %v12581_v19, %v884_v6  ;;  %v943_v14 = vmul.f32 %v12585_v47, %v912_v0  ;;  %v881_v35 = vsel %vm878_vm8, %v12539_v2, %v853_v42  ;;  %v911_v46 = vsel %vm878_vm8, %v853_v42, %v12553_v13  ;;  %v11511_v6 = vld [vmem:[#allocation3 + $0x38] sm:$0xff] }
 0x19d   :  { %2016 = vmatmul.mubr.bf16.vlgmr.msra.gmra.mxu0 %v12609_v59  ;;  %v938_v53 = vmul.f32 %v12581_v19, %v881_v35  ;;  %v939_v18 = vmul.f32 %v12585_v47, %v911_v46  ;;  %2113 = vmatprep.subr.bf16.mxu1 %v11131_v24  ;;  %v11123_v25 = vpack.c.bf16 %v11507_v4, %v11508_v12  ;;  %v11512_v0 = vld [vmem:[#allocation3 + $0x18] sm:$0xff]  ;;  %v11513_v4 = vld [vmem:[#allocation3 + $0x10] sm:$0xff] }
 0x19e   :  { %2025 = vmatprep.mubr.bf16.mxu0 %v12613_v45  ;;  %2114 = vmatpush2.bf16.msra.mxu1 %v11130_v52  ;;  %v1363_v57 = vpop.permute.xlu1 %1362  ;;  %v11122_v52 = vpack.c.bf16 %v11510_v16, %v11509_v50  ;;  %v11119_v42 = vpack.c.bf16 %v11511_v6, %v11512_v0  ;;  %v11514_v12 = vld [vmem:[#allocation3 + $0x30] sm:$0xff] }
 0x19f   :  { %v11126_v26 = vpack.c.bf16 %v942_v7, %v938_v53  ;;  %v1376_v2 = vsel %vm1364_vm1, %v11924_v61, %v1363_v57  ;;  %v1400_v13 = vsel %vm1364_vm1, %v1363_v57, %v11937_v27  ;;  %v1355_v5 = vpop.permute.xlu0 %1354  ;;  %v11127_v8 = vpack.c.bf16 %v943_v14, %v939_v18 }
 0x1a0   :  { %v1436_v20 = vmul.f32 %v12616_v48, %v1376_v2  ;;  %v1437_v37 = vmul.f32 %v12619_v9, %v1400_v13  ;;  %v1373_v39 = vsel %vm1364_vm1, %v11913_v56, %v1355_v5  ;;  %v1399_v32 = vsel %vm1364_vm1, %v1355_v5, %v11939_v28 }
 0x1a1   :  { %v1432_v34 = vmul.f32 %v12616_v48, %v1373_v39  ;;  %v1433_v61 = vmul.f32 %v12619_v9, %v1399_v32  ;;  %2115 = vmatprep.subr.bf16.mxu1 %v11127_v8 }
 0x1a2   :  { %2116 = vmatpush2.bf16.msra.mxu1 %v11126_v26  ;;  %v1347_v27 = vpop.permute.xlu1 %1346 }
 0x1a3   :  { %v11154_v24 = vpack.c.bf16 %v1436_v20, %v1432_v34  ;;  %v1370_v56 = vsel %vm1364_vm1, %v12001_v30, %v1347_v27  ;;  %v1398_v28 = vsel %vm1364_vm1, %v1347_v27, %v12011_v41  ;;  %v1339_v7 = vpop.permute.xlu0 %1338  ;;  %2117 = vmatprep.subr.bf16.mxu1 %v11123_v25  ;;  %v11155_v14 = vpack.c.bf16 %v1437_v37, %v1433_v61 }
 0x1a4   :  { %v1428_v35 = vmul.f32 %v12616_v48, %v1370_v56  ;;  %v1429_v46 = vmul.f32 %v12619_v9, %v1398_v28  ;;  %v1367_v53 = vsel %vm1364_vm1, %v11993_v63, %v1339_v7  ;;  %v1397_v18 = vsel %vm1364_vm1, %v1339_v7, %v12013_v44  ;;  %v11515_v63 = vld [vmem:[#allocation7 + $0x8] ss:$12 sps:$4 sm:$0xff]  }
 0x1a5   :  { %2026 = vmatmul.mubr.bf16.gmra.mxu0 %v11469_v49  ;;  %v1424_v57 = vmul.f32 %v12616_v48, %v1367_v53  ;;  %v1425_v30 = vmul.f32 %v12619_v9, %v1397_v18  ;;  %2154 = vmatprep.subr.bf16.mxu0 %v11155_v14  ;;  %v17529_v41 = vmov 0   ;;  %v11118_v25 = vpack.c.bf16 %v11514_v12, %v11513_v4 }
 0x1a6   :  { %2174 = vmatprep.mubr.bf16.mxu0 %v17529_v41  ;;  %2118 = vmatpush2.bf16.msra.mxu1 %v11122_v52 }
 0x1a7   :  { %2155 = vmatpush1.bf16.msra.mxu0 %v11154_v24  ;;  %v11150_v26 = vpack.c.bf16 %v1428_v35, %v1424_v57  ;;  %2119 = vmatprep.subr.bf16.mxu1 %v11119_v42  ;;  %v11151_v2 = vpack.c.bf16 %v1429_v46, %v1425_v30 }
 0x1a8   :  { %v2070_v13 = vpop.f32.mrf.mxu1 }
 0x1a9   :  { %2156 = vmatprep.subr.bf16.mxu0 %v11151_v2 }
 0x1aa   :  { %2120 = vmatpush2.bf16.msra.mxu1 %v11118_v25  ;;  %v2072_v39 = vpop.f32.mrf.mxu1 }
 0x1ab   :  { %2157 = vmatpush1.bf16.msra.mxu0 %v11150_v26 }
 0x1ac   :  { %v2074_v0 = vpop.f32.mrf.mxu1 }
 0x1ad   :  { %2122 = vmatmul.mubr.bf16.vlgmr.msra.gmra.mxu1 %v12609_v59 }
 0x1ae   :  { %10086 = vmatmul.mubr.msk.bf16.vlgmr.msra.gmra.mxu0 %vm1976_vm3, %v11515_v63  ;;  %2131 = vmatprep.mubr.bf16.mxu1 %v12613_v45  ;;  %v2076_v56 = vpop.f32.mrf.mxu1 }
 0x1af   :  { %2184 = vmatprep.mubr.bf16.mxu0 %v17529_v41  ;;  %v12667_v44 = vpop.permute.xlu1 %1583 }
 0x1b0   :  { %v12673_v32 = vpop.permute.xlu0 %1578 }
 0x1b3   :  { %v12669_v5 = vpop.permute.xlu1 %1568 }
 0x1b4   :  { %v12681_v50 = vpop.permute.xlu0 %1573 }
 0x1b5   :  { %2132 = vmatmul.mubr.bf16.gmra.mxu1 %v11469_v49 }
 0x1b6   :  { %10087 = vmatmul.mubr.msk.bf16.gmra.mxu0 %vm1976_vm3, %v12263_v33 }
 0x1b7   :  { %4020 = vmatprep.mubr.bf16.mxu0 %v17529_v41 }
 0x1da   :  { %v2080_v18 = vpop.f32.mrf.mxu1 }
 0x1dc   :  { %v2082_v4 = vpop.f32.mrf.mxu1 }
 0x25d   :  { %v2017_v8 = vpop.f32.mrf.mxu0 }
 0x25e   :  { %v2018_v59 = vadd.f32 %v2017_v8, %v12669_v5 }
 0x25f   :  { %v2019_v20 = vpop.f32.mrf.mxu0 }
 0x260   :  { %v2071_v37 = vadd.f32 %v2070_v13, %v2018_v59  ;;  %v2020_v45 = vadd.f32 %v2019_v20, %v12669_v5  ;;  %v2084_v20 = vpop.f32.mrf.mxu1 }
 0x261   :  { %v2021_v16 = vpop.f32.mrf.mxu0 }
 0x262   :  { %vm2195_vm9 = vcmp.gt.f32.partialorder %v2071_v37, 0.0  ;;  %v2211_v49 = vmul.f32 0.01, %v2071_v37  ;;  %v2073_v33 = vadd.f32 %v2072_v39, %v2020_v45  ;;  %v2022_v52 = vadd.f32 %v2021_v16, %v12681_v50 }
 0x263   :  { %v2023_v6 = vpop.f32.mrf.mxu0 }
 0x264   :  { %v12675_v34 = vsel %vm2195_vm9, %v2071_v37, %v2211_v49  ;;  %vm2196_vm10 = vcmp.gt.f32.partialorder %v2073_v33, 0.0  ;;  %v2212_v61 = vmul.f32 0.01, %v2073_v33  ;;  %v2075_v42 = vadd.f32 %v2074_v0, %v2022_v52 }
 0x265   :  { %17530 = vst [vmem:[#allocation45_spill] sm:$0xff] %v12675_v34  ;;  %2703 = vrot.lane.b32.xlu1 %v12675_v34, %s11614_s2  ;;  %v2024_v24 = vadd.f32 %v2023_v6, %v12681_v50  ;;  %v2027_v46 = vpop.f32.mrf.mxu0 }
 0x266   :  { %v12679_v27 = vsel %vm2196_vm10, %v2073_v33, %v2212_v61  ;;  %v2215_v28 = vmul.f32 0.01, %v2075_v42  ;;  %vm2199_vm11 = vcmp.gt.f32.partialorder %v2075_v42, 0.0  ;;  %v2028_v25 = vadd.f32 %v2027_v46, %v12673_v32  ;;  %v2086_v61 = vpop.f32.mrf.mxu1 }
 0x267   :  { %17531 = vst [vmem:[#allocation46_spill] sm:$0xff] %v12679_v27  ;;  %2705 = vrot.lane.b32.xlu0 %v12679_v27, %s11614_s2  ;;  %v2077_v7 = vadd.f32 %v2076_v56, %v2024_v24  ;;  %v2029_v57 = vpop.f32.mrf.mxu0 }
 0x268   :  { %v12701_v14 = vsel %vm2199_vm11, %v2075_v42, %v2215_v28  ;;  %v2030_v30 = vadd.f32 %v2029_v57, %v12673_v32  ;;  %v2081_v2 = vadd.f32 %v2080_v18, %v2028_v25 }
 0x269   :  { %3307 = vrot.lane.b32.xlu1 %v12675_v34, %s11615_s6  ;;  %17532 = vst [vmem:[#allocation47_spill] sm:$0xff] %v12701_v14  ;;  %v2216_v35 = vmul.f32 0.01, %v2077_v7  ;;  %vm2200_vm12 = vcmp.gt.f32.partialorder %v2077_v7, 0.0  ;;  %v2031_v13 = vpop.f32.mrf.mxu0 }
 0x26a   :  { %v2083_v12 = vadd.f32 %v2082_v4, %v2030_v30  ;;  %v2219_v8 = vmul.f32 0.01, %v2081_v2  ;;  %vm2203_vm14 = vcmp.gt.f32.partialorder %v2081_v2, 0.0  ;;  %v2032_v59 = vadd.f32 %v2031_v13, %v12667_v44 }
 0x26b   :  { %2565 = vrot.lane.b32.xlu0 %v12679_v27, %s11616_s27  ;;  %v12707_v53 = vsel %vm2200_vm12, %v2077_v7, %v2216_v35  ;;  %v2033_v39 = vpop.f32.mrf.mxu0 }
 0x26c   :  { %17533 = vst [vmem:[#allocation48_spill] sm:$0xff] %v12707_v53  ;;  %v2220_v26 = vmul.f32 0.01, %v2083_v12  ;;  %vm2204_vm13 = vcmp.gt.f32.partialorder %v2083_v12, 0.0  ;;  %v12736_v37 = vsel %vm2203_vm14, %v2081_v2, %v2219_v8  ;;  %v2085_v45 = vadd.f32 %v2084_v20, %v2032_v59 }
 0x26d   :  { %2563 = vrot.lane.b32.xlu1 %v12675_v34, %s11616_s27  ;;  %17535 = vst [vmem:[#allocation50_spill] sm:$0xff] %v12736_v37  ;;  %v2034_v33 = vadd.f32 %v2033_v39, %v12667_v44  ;;  %v2123_v6 = vpop.f32.mrf.mxu1 }
 0x26e   :  { %v12727_v63 = vsel %vm2204_vm13, %v2083_v12, %v2220_v26  ;;  %v2223_v49 = vmul.f32 0.01, %v2085_v45  ;;  %vm2207_vm15 = vcmp.gt.f32.partialorder %v2085_v45, 0.0  ;;  %v2124_v42 = vadd.f32 %v2123_v6, %v12669_v5  ;;  %v2176_v24 = vpop.f32.mrf.mxu0 }
 0x26f   :  { %2425 = vrot.lane.b32.xlu0 %v12679_v27, %s11618_s28  ;;  %17534 = vst [vmem:[#allocation49_spill] sm:$0xff] %v12727_v63  ;;  %v2087_v52 = vadd.f32 %v2086_v61, %v2034_v33  ;;  %v2125_v7 = vpop.f32.mrf.mxu1 }
 0x270   :  { %v12749_v16 = vsel %vm2207_vm15, %v2085_v45, %v2223_v49  ;;  %v2177_v28 = vadd.f32 %v2176_v24, %v2124_v42  ;;  %v2178_v18 = vpop.f32.mrf.mxu0  ;;  %v2126_v39 = vadd.f32 %v2125_v7, %v12669_v5 }
 0x271   :  { %2423 = vrot.lane.b32.xlu1 %v12675_v34, %s11618_s28  ;;  %17536 = vst [vmem:[#allocation51_spill] sm:$0xff] %v12749_v16  ;;  %v2224_v0 = vmul.f32 0.01, %v2087_v52  ;;  %vm2208_vm9 = vcmp.gt.f32.partialorder %v2087_v52, 0.0  ;;  %v2127_v46 = vpop.f32.mrf.mxu1 }
 0x272   :  { %v2213_v35 = vmul.f32 0.01, %v2177_v28  ;;  %vm2197_vm10 = vcmp.gt.f32.partialorder %v2177_v28, 0.0  ;;  %v2128_v30 = vadd.f32 %v2127_v46, %v12681_v50  ;;  %v2180_v4 = vpop.f32.mrf.mxu0 }
 0x273   :  { %2285 = vrot.lane.b32.xlu0 %v12679_v27, %s11619_s29  ;;  %v12760_v56 = vsel %vm2208_vm9, %v2087_v52, %v2224_v0  ;;  %v2129_v2 = vpop.f32.mrf.mxu1  ;;  %v2179_v52 = vadd.f32 %v2178_v18, %v2126_v39 }
 0x274   :  { %17537 = vst [vmem:[#allocation52_spill] sm:$0xff] %v12760_v56  ;;  %v12770_v57 = vsel %vm2197_vm10, %v2177_v28, %v2213_v35  ;;  %v2181_v12 = vadd.f32 %v2180_v4, %v2128_v30  ;;  %v2130_v13 = vadd.f32 %v2129_v2, %v12681_v50  ;;  %v2182_v8 = vpop.f32.mrf.mxu0 }
 0x275   :  { %2283 = vrot.lane.b32.xlu1 %v12675_v34, %s11619_s29  ;;  %17538 = vst [vmem:[#allocation53_spill] sm:$0xff] %v12770_v57  ;;  %v2133_v45 = vpop.f32.mrf.mxu1  ;;  %v2214_v5 = vmul.f32 0.01, %v2179_v52  ;;  %vm2198_vm13 = vcmp.gt.f32.partialorder %v2179_v52, 0.0 }
 0x276   :  { %v2217_v25 = vmul.f32 0.01, %v2181_v12  ;;  %vm2201_vm11 = vcmp.gt.f32.partialorder %v2181_v12, 0.0  ;;  %v2183_v59 = vadd.f32 %v2182_v8, %v2130_v13  ;;  %v2134_v49 = vadd.f32 %v2133_v45, %v12673_v32  ;;  %v2186_v61 = vpop.f32.mrf.mxu0 }
 0x277   :  { %3315 = vrot.lane.b32.xlu0 %v12701_v14, %s11615_s6  ;;  %v2135_v33 = vpop.f32.mrf.mxu1  ;;  %v12823_v35 = vsel %vm2198_vm13, %v2179_v52, %v2214_v5 }
 0x278   :  { %v12785_v26 = vsel %vm2201_vm11, %v2181_v12, %v2217_v25  ;;  %v2218_v20 = vmul.f32 0.01, %v2183_v59  ;;  %vm2202_vm12 = vcmp.gt.f32.partialorder %v2183_v59, 0.0  ;;  %v2187_v6 = vadd.f32 %v2186_v61, %v2134_v49  ;;  %v2188_v42 = vpop.f32.mrf.mxu0  ;;  %17541 = vst [vmem:[#allocation56_spill] sm:$0xff] %v12823_v35 }
 0x279   :  { %3309 = vrot.lane.b32.xlu1 %v12679_v27, %s11615_s6  ;;  %17539 = vst [vmem:[#allocation54_spill] sm:$0xff] %v12785_v26  ;;  %v2137_v0 = vpop.f32.mrf.mxu1  ;;  %v2136_v39 = vadd.f32 %v2135_v33, %v12673_v32 }
 0x27a   :  { %v12804_v50 = vsel %vm2202_vm12, %v2183_v59, %v2218_v20  ;;  %v2221_v24 = vmul.f32 0.01, %v2187_v6  ;;  %v2138_v28 = vadd.f32 %v2137_v0, %v12667_v44  ;;  %vm2205_vm14 = vcmp.gt.f32.partialorder %v2187_v6, 0.0  ;;  %v2190_v7 = vpop.f32.mrf.mxu0 }
 0x27b   :  { %2711 = vrot.lane.b32.xlu0 %v12707_v53, %s11614_s2  ;;  %17540 = vst [vmem:[#allocation55_spill] sm:$0xff] %v12804_v50  ;;  %v2139_v20 = vpop.f32.mrf.mxu1  ;;  %v2189_v0 = vadd.f32 %v2188_v42, %v2136_v39 }
 0x27c   :  { %v12827_v46 = vsel %vm2205_vm14, %v2187_v6, %v2221_v24  ;;  %v2191_v18 = vadd.f32 %v2190_v7, %v2138_v28  ;;  %v2140_v61 = vadd.f32 %v2139_v20, %v12667_v44  ;;  %v2192_v52 = vpop.f32.mrf.mxu0 }
 0x27d   :  { %2709 = vrot.lane.b32.xlu1 %v12701_v14, %s11614_s2  ;;  %17542 = vst [vmem:[#allocation57_spill] sm:$0xff] %v12827_v46  ;;  %v2222_v24 = vmul.f32 0.01, %v2189_v0  ;;  %vm2206_vm9 = vcmp.gt.f32.partialorder %v2189_v0, 0.0 }
 0x27e   :  { %v2225_v12 = vmul.f32 0.01, %v2191_v18  ;;  %vm2209_vm15 = vcmp.gt.f32.partialorder %v2191_v18, 0.0  ;;  %v2193_v32 = vadd.f32 %v2192_v52, %v2140_v61 }
 0x27f   :  { %2571 = vrot.lane.b32.xlu0 %v12707_v53, %s11616_s27  ;;  %v12885_v7 = vsel %vm2206_vm9, %v2189_v0, %v2222_v24 }
 0x280   :  { %v12845_v13 = vsel %vm2209_vm15, %v2191_v18, %v2225_v12  ;;  %v2226_v28 = vmul.f32 0.01, %v2193_v32  ;;  %vm2210_vm10 = vcmp.gt.f32.partialorder %v2193_v32, 0.0  ;;  %17548 = vst [vmem:[#allocation63_spill] sm:$0xff] %v12885_v7 }
 0x281   :  { %2569 = vrot.lane.b32.xlu1 %v12701_v14, %s11616_s27  ;;  %17544 = vst [vmem:[#allocation59_spill] sm:$0xff] %v12845_v13 }
 0x282   :  { %v12891_v12 = vsel %vm2210_vm10, %v2193_v32, %v2226_v28 }
 0x283   :  { %2431 = vrot.lane.b32.xlu0 %v12707_v53, %s11618_s28  ;;  %17549 = vst [vmem:[#allocation64_spill] sm:$0xff] %v12891_v12 }
 0x285   :  { %2429 = vrot.lane.b32.xlu1 %v12701_v14, %s11618_s28 }
 0x287   :  { %2291 = vrot.lane.b32.xlu0 %v12707_v53, %s11619_s29 }
 0x289   :  { %2289 = vrot.lane.b32.xlu1 %v12701_v14, %s11619_s29 }
 0x28b   :  { %2717 = vrot.lane.b32.xlu0 %v12727_v63, %s11614_s2 }
 0x28d   :  { %3317 = vrot.lane.b32.xlu1 %v12707_v53, %s11615_s6 }
 0x28f   :  { %2577 = vrot.lane.b32.xlu0 %v12727_v63, %s11616_s27 }
 0x291   :  { %2715 = vrot.lane.b32.xlu1 %v12736_v37, %s11614_s2 }
 0x293   :  { %2437 = vrot.lane.b32.xlu0 %v12727_v63, %s11618_s28 }
 0x295   :  { %3323 = vrot.lane.b32.xlu1 %v12736_v37, %s11615_s6 }
 0x297   :  { %2297 = vrot.lane.b32.xlu0 %v12727_v63, %s11619_s29 }
 0x299   :  { %2575 = vrot.lane.b32.xlu1 %v12736_v37, %s11616_s27 }
 0x29b   :  { %3331 = vrot.lane.b32.xlu0 %v12749_v16, %s11615_s6 }
 0x29d   :  { %2435 = vrot.lane.b32.xlu1 %v12736_v37, %s11618_s28 }
 0x29f   :  { %3191 = vrot.lane.b32.xlu0 %v12749_v16, %s11620_s30 }
 0x2a1   :  { %2295 = vrot.lane.b32.xlu1 %v12736_v37, %s11619_s29 }
 0x2a3   :  { %2723 = vrot.lane.b32.xlu0 %v12760_v56, %s11614_s2 }
 0x2a5   :  { %3183 = vrot.lane.b32.xlu1 %v12736_v37, %s11620_s30 }
 0x2a7   :  { %2583 = vrot.lane.b32.xlu0 %v12760_v56, %s11616_s27 }
 0x2a9   :  { %3325 = vrot.lane.b32.xlu1 %v12727_v63, %s11615_s6 }
 0x2ab   :  { %3311 = vrot.lane.b32.xlu0 %v12770_v57, %s11615_s6 }
 0x2ad   :  { %3185 = vrot.lane.b32.xlu1 %v12727_v63, %s11620_s30 }
 0x2af   :  { %2443 = vrot.lane.b32.xlu0 %v12760_v56, %s11618_s28 }
 0x2b1   :  { %2721 = vrot.lane.b32.xlu1 %v12749_v16, %s11614_s2 }
 0x2b3   :  { %2303 = vrot.lane.b32.xlu0 %v12760_v56, %s11619_s29 }
 0x2b5   :  { %2581 = vrot.lane.b32.xlu1 %v12749_v16, %s11616_s27 }
 0x2b7   :  { %3319 = vrot.lane.b32.xlu0 %v12785_v26, %s11615_s6 }
 0x2b9   :  { %2441 = vrot.lane.b32.xlu1 %v12749_v16, %s11618_s28 }
 0x2bb   :  { %2713 = vrot.lane.b32.xlu0 %v12785_v26, %s11614_s2 }
 0x2bd   :  { %2301 = vrot.lane.b32.xlu1 %v12749_v16, %s11619_s29 }
 0x2bf   :  { %2573 = vrot.lane.b32.xlu0 %v12785_v26, %s11616_s27 }
 0x2c1   :  { %3333 = vrot.lane.b32.xlu1 %v12760_v56, %s11615_s6 }
 0x2c3   :  { %2433 = vrot.lane.b32.xlu0 %v12785_v26, %s11618_s28 }
 0x2c5   :  { %2707 = vrot.lane.b32.xlu1 %v12770_v57, %s11614_s2 }
 0x2c7   :  { %2693 = vrot.lane.b32.xlu0 %v12804_v50, %s11614_s2 }
 0x2c9   :  { %2567 = vrot.lane.b32.xlu1 %v12770_v57, %s11616_s27 }
 0x2cb   :  { %2553 = vrot.lane.b32.xlu0 %v12804_v50, %s11616_s27 }
 0x2cd   :  { %3193 = vrot.lane.b32.xlu1 %v12760_v56, %s11620_s30 }
 0x2cf   :  { %2413 = vrot.lane.b32.xlu0 %v12804_v50, %s11618_s28 }
 0x2d1   :  { %2427 = vrot.lane.b32.xlu1 %v12770_v57, %s11618_s28 }
 0x2d3   :  { %2261 = vrot.lane.b32.xlu0 %v12804_v50, %s11619_s29 }
 0x2d5   :  { %2691 = vrot.lane.b32.xlu1 %v12823_v35, %s11614_s2 }
 0x2d7   :  { %3327 = vrot.lane.b32.xlu0 %v12827_v46, %s11615_s6  ;;  %v12831_v30 = vpop.permute.xlu1 %2703 }
 0x2d9   :  { %v12833_v4 = vpop.permute.xlu0 %2705  ;;  %2551 = vrot.lane.b32.xlu1 %v12823_v35, %s11616_s27 }
 0x2db   :  { %3187 = vrot.lane.b32.xlu0 %v12827_v46, %s11620_s30  ;;  %v12839_v25 = vpop.permute.xlu1 %3307 }
 0x2dc   :  { %17543 = vst [vmem:[#allocation58_spill] sm:$0xff] %v12839_v25 }
 0x2dd   :  { %v12841_v2 = vpop.permute.xlu0 %2565  ;;  %2411 = vrot.lane.b32.xlu1 %v12823_v35, %s11618_s28 }
 0x2df   :  { %3335 = vrot.lane.b32.xlu0 %v12845_v13, %s11615_s6  ;;  %v12849_v8 = vpop.permute.xlu1 %2563 }
 0x2e1   :  { %v12851_v59 = vpop.permute.xlu0 %2425  ;;  %2259 = vrot.lane.b32.xlu1 %v12823_v35, %s11619_s29 }
 0x2e3   :  { %2725 = vrot.lane.b32.xlu0 %v12845_v13, %s11614_s2  ;;  %v12857_v45 = vpop.permute.xlu1 %2423 }
 0x2e5   :  { %v12860_v49 = vpop.permute.xlu0 %2285  ;;  %2719 = vrot.lane.b32.xlu1 %v12827_v46, %s11614_s2 }
 0x2e6   :  { %17545 = vst [vmem:[#allocation60_spill] sm:$0xff] %v12860_v49 }
 0x2e7   :  { %2585 = vrot.lane.b32.xlu0 %v12845_v13, %s11616_s27  ;;  %v12867_v6 = vpop.permute.xlu1 %2283 }
 0x2e8   :  { %17546 = vst [vmem:[#allocation61_spill] sm:$0xff] %v12867_v6 }
 0x2e9   :  { %v12869_v5 = vpop.permute.xlu0 %3315  ;;  %2579 = vrot.lane.b32.xlu1 %v12827_v46, %s11616_s27 }
 0x2ea   :  { %17547 = vst [vmem:[#allocation62_spill] sm:$0xff] %v12869_v5 }
 0x2eb   :  { %2445 = vrot.lane.b32.xlu0 %v12845_v13, %s11618_s28  ;;  %v12875_v33 = vpop.permute.xlu1 %3309 }
 0x2ed   :  { %v12877_v44 = vpop.permute.xlu0 %2711  ;;  %2439 = vrot.lane.b32.xlu1 %v12827_v46, %s11618_s28 }
 0x2ef   :  { %3195 = vrot.lane.b32.xlu0 %v12845_v13, %s11620_s30  ;;  %v12883_v42 = vpop.permute.xlu1 %2709 }
 0x2f1   :  { %v12887_v18 = vpop.permute.xlu0 %2571  ;;  %2695 = vrot.lane.b32.xlu1 %v12885_v7, %s11614_s2 }
 0x2f3   :  { %2697 = vrot.lane.b32.xlu0 %v12891_v12, %s11614_s2  ;;  %v12895_v20 = vpop.permute.xlu1 %2569 }
 0x2f5   :  { %v12897_v39 = vpop.permute.xlu0 %2431  ;;  %2555 = vrot.lane.b32.xlu1 %v12885_v7, %s11616_s27 }
 0x2f7   :  { %2557 = vrot.lane.b32.xlu0 %v12891_v12, %s11616_s27  ;;  %v12903_v61 = vpop.permute.xlu1 %2429 }
 0x2f9   :  { %v12905_v52 = vpop.permute.xlu0 %2291  ;;  %2415 = vrot.lane.b32.xlu1 %v12885_v7, %s11618_s28 }
 0x2fa   :  { %17550 = vst [vmem:[#allocation65_spill] sm:$0xff] %v12905_v52 }
 0x2fb   :  { %2417 = vrot.lane.b32.xlu0 %v12891_v12, %s11618_s28  ;;  %v12911_v0 = vpop.permute.xlu1 %2289 }
 0x2fd   :  { %v12913_v32 = vpop.permute.xlu0 %2717  ;;  %2263 = vrot.lane.b32.xlu1 %v12885_v7, %s11619_s29 }
 0x2ff   :  { %2265 = vrot.lane.b32.xlu0 %v12891_v12, %s11619_s29  ;;  %v12919_v24 = vpop.permute.xlu1 %3317 }
 0x301   :  { %v12921_v28 = vpop.permute.xlu0 %2577  ;;  %3169 = vrot.lane.b32.xlu1 %v12679_v27, %s11620_s30 }
 0x303   :  { %3171 = vrot.lane.b32.xlu0 %v12770_v57, %s11620_s30  ;;  %v12927_v9 = vpop.permute.xlu1 %2715 }
 0x304   :  { %v2733_v6 = vsel %vm664_vm0, %v12927_v9, %v12913_v32 }
 0x305   :  { %v12929_v48 = vpop.permute.xlu0 %2437  ;;  %3177 = vrot.lane.b32.xlu1 %v12707_v53, %s11620_s30 }
 0x307   :  { %3179 = vrot.lane.b32.xlu0 %v12785_v26, %s11620_s30  ;;  %v12935_v47 = vpop.permute.xlu1 %3323 }
 0x308   :  { %17551 = vst [vmem:[#allocation66_spill] sm:$0xff] %v12935_v47 }
 0x309   :  { %v12937_v19 = vpop.permute.xlu0 %2297  ;;  %3167 = vrot.lane.b32.xlu1 %v12675_v34, %s11620_s30 }
 0x30a   :  { %17552 = vst [vmem:[#allocation67_spill] sm:$0xff] %v12937_v19 }
 0x30b   :  { %3175 = vrot.lane.b32.xlu0 %v12701_v14, %s11620_s30  ;;  %v12943_v21 = vpop.permute.xlu1 %2575 }
 0x30d   :  { %v12945_v54 = vpop.permute.xlu0 %3331  ;;  %2299 = vrot.lane.b32.xlu1 %v12827_v46, %s11619_s29 }
 0x30e   :  { %17553 = vst [vmem:[#allocation68_spill] sm:$0xff] %v12945_v54 }
 0x30f   :  { %2305 = vrot.lane.b32.xlu0 %v12845_v13, %s11619_s29  ;;  %v12951_v43 = vpop.permute.xlu1 %2435 }
 0x311   :  { %v12953_v10 = vpop.permute.xlu0 %3191  ;;  %3045 = vrot.lane.b32.xlu1 %v12727_v63, %s11621_s9 }
 0x312   :  { %17554 = vst [vmem:[#allocation69_spill] sm:$0xff] %v12953_v10 }
 0x313   :  { %3047 = vrot.lane.b32.xlu0 %v12827_v46, %s11621_s9  ;;  %v12959_v17 = vpop.permute.xlu1 %2295 }
 0x314   :  { %17555 = vst [vmem:[#allocation70_spill] sm:$0xff] %v12959_v17 }
 0x315   :  { %v12961_v36 = vpop.permute.xlu0 %2723  ;;  %3053 = vrot.lane.b32.xlu1 %v12760_v56, %s11621_s9 }
 0x317   :  { %3055 = vrot.lane.b32.xlu0 %v12845_v13, %s11621_s9  ;;  %v12967_v51 = vpop.permute.xlu1 %3183 }
 0x318   :  { %17556 = vst [vmem:[#allocation71_spill] sm:$0xff] %v12967_v51 }
 0x319   :  { %v12969_v11 = vpop.permute.xlu0 %2583  ;;  %3043 = vrot.lane.b32.xlu1 %v12736_v37, %s11621_s9 }
 0x31b   :  { %3051 = vrot.lane.b32.xlu0 %v12749_v16, %s11621_s9  ;;  %v12975_v31 = vpop.permute.xlu1 %3325 }
 0x31d   :  { %v12977_v10 = vpop.permute.xlu0 %3311  ;;  %2287 = vrot.lane.b32.xlu1 %v12770_v57, %s11619_s29 }
 0x31e   :  { %17557 = vst [vmem:[#allocation72_spill] sm:$0xff] %v12977_v10 }
 0x31f   :  { %2293 = vrot.lane.b32.xlu0 %v12785_v26, %s11619_s29  ;;  %v12983_v15 = vpop.permute.xlu1 %3185 }
 0x320   :  { %17558 = vst [vmem:[#allocation73_spill] sm:$0xff] %v12983_v15  ;;  %v2768_v15 = vmul.f32 %v2733_v6, %v11844_v23 }
 0x321   :  { %v12985_v51 = vpop.permute.xlu0 %2443  ;;  %3029 = vrot.lane.b32.xlu1 %v12679_v27, %s11621_s9 }
 0x323   :  { %3031 = vrot.lane.b32.xlu0 %v12770_v57, %s11621_s9  ;;  %v12994_v49 = vpop.permute.xlu1 %2721 }
 0x324   :  { %v2736_v40 = vsel %vm664_vm0, %v12994_v49, %v12961_v36 }
 0x325   :  { %v2772_v17 = vmul.f32 %v2736_v40, %v11844_v23  ;;  %v13001_v19 = vpop.permute.xlu0 %2303  ;;  %3037 = vrot.lane.b32.xlu1 %v12707_v53, %s11621_s9 }
 0x326   :  { %17559 = vst [vmem:[#allocation74_spill] sm:$0xff] %v13001_v19 }
 0x327   :  { %3039 = vrot.lane.b32.xlu0 %v12785_v26, %s11621_s9  ;;  %v13007_v3 = vpop.permute.xlu1 %2581  ;;  %v11185_v60 = vpack.c.bf16 %v2772_v17, %v2768_v15 }
 0x329   :  { %v13009_v38 = vpop.permute.xlu0 %3319  ;;  %3027 = vrot.lane.b32.xlu1 %v12675_v34, %s11621_s9  ;;  %3935 = vmatprep.subr.bf16.mxu1 %v11185_v60 }
 0x32a   :  { %17560 = vst [vmem:[#allocation75_spill] sm:$0xff] %v13009_v38 }
 0x32b   :  { %3035 = vrot.lane.b32.xlu0 %v12701_v14, %s11621_s9  ;;  %v13015_v40 = vpop.permute.xlu1 %2441 }
 0x32d   :  { %v13017_v6 = vpop.permute.xlu0 %2713  ;;  %3189 = vrot.lane.b32.xlu1 %v12885_v7, %s11620_s30 }
 0x32f   :  { %3197 = vrot.lane.b32.xlu0 %v12891_v12, %s11620_s30  ;;  %v13023_v15 = vpop.permute.xlu1 %2301 }
 0x330   :  { %17561 = vst [vmem:[#allocation76_spill] sm:$0xff] %v13023_v15 }
 0x331   :  { %v13025_v17 = vpop.permute.xlu0 %2573  ;;  %2905 = vrot.lane.b32.xlu1 %v12727_v63, %s11622_s10 }
 0x332   :  { %17562 = vst [vmem:[#allocation77_spill] sm:$0xff] %v13025_v17 }
 0x333   :  { %2907 = vrot.lane.b32.xlu0 %v12827_v46, %s11622_s10  ;;  %v3334_v60 = vpop.permute.xlu1 %3333 }
 0x335   :  { %v13031_v19 = vpop.permute.xlu0 %2433  ;;  %2913 = vrot.lane.b32.xlu1 %v12760_v56, %s11622_s10 }
 0x336   :  { %17563 = vst [vmem:[#allocation78_spill] sm:$0xff] %v13031_v19 }
 0x337   :  { %2915 = vrot.lane.b32.xlu0 %v12845_v13, %s11622_s10  ;;  %v13037_v55 = vpop.permute.xlu1 %2707 }
 0x339   :  { %v13039_v15 = vpop.permute.xlu0 %2693  ;;  %2903 = vrot.lane.b32.xlu1 %v12736_v37, %s11622_s10 }
 0x33b   :  { %2911 = vrot.lane.b32.xlu0 %v12749_v16, %s11622_s10  ;;  %v13045_v46 = vpop.permute.xlu1 %2567 }
 0x33d   :  { %v13047_v63 = vpop.permute.xlu0 %2553  ;;  %3173 = vrot.lane.b32.xlu1 %v12823_v35, %s11620_s30 }
 0x33e   :  { %17564 = vst [vmem:[#allocation79_spill] sm:$0xff] %v13047_v63 }
 0x33f   :  { %3181 = vrot.lane.b32.xlu0 %v12804_v50, %s11620_s30  ;;  %v13053_v13 = vpop.permute.xlu1 %3193 }
 0x340   :  { %17565 = vst [vmem:[#allocation80_spill] sm:$0xff] %v13053_v13 }
 0x341   :  { %v13055_v56 = vpop.permute.xlu0 %2413  ;;  %2889 = vrot.lane.b32.xlu1 %v12679_v27, %s11622_s10 }
 0x342   :  { %17566 = vst [vmem:[#allocation81_spill] sm:$0xff] %v13055_v56  ;;  %v3340_v56 = vsel %vm1364_vm1, %v12875_v33, %v12977_v10 }
 0x343   :  { %2891 = vrot.lane.b32.xlu0 %v12770_v57, %s11622_s10  ;;  %v13061_v16 = vpop.permute.xlu1 %2427 }
 0x344   :  { %17567 = vst [vmem:[#allocation82_spill] sm:$0xff] %v13061_v16 }
 0x345   :  { %v13063_v37 = vpop.permute.xlu0 %2261  ;;  %2897 = vrot.lane.b32.xlu1 %v12707_v53, %s11622_s10  ;;  %v3348_v53 = vsel %vm1364_vm1, %v12945_v54, %v3334_v60 }
 0x346   :  { %17568 = vst [vmem:[#allocation83_spill] sm:$0xff] %v13063_v37  ;;  %v3345_v37 = vsel %vm1364_vm1, %v12935_v47, %v12975_v31  ;;  %v3387_v16 = vmul.f32 %v3348_v53, %v11935_v22 }
 0x347   :  { %2899 = vrot.lane.b32.xlu0 %v12785_v26, %s11622_s10  ;;  %v13069_v19 = vpop.permute.xlu1 %2691  ;;  %v13086_v26 = vld [vmem:[%s17069_s4 + $0x4] ss:$12 sps:$4 sm:$0xff]   ;;  %v3383_v53 = vmul.f32 %v3345_v37, %v11935_v22 }
 0x348   :  { %3967 = vmatprep.mubr.bf16.mxu1 %v13086_v26 }
 0x349   :  { %v13071_v13 = vpop.permute.xlu0 %3327  ;;  %2887 = vrot.lane.b32.xlu1 %v12675_v34, %s11622_s10 }
 0x34a   :  { %17569 = vst [vmem:[#allocation84_spill] sm:$0xff] %v13071_v13 }
 0x34b   :  { %2895 = vrot.lane.b32.xlu0 %v12701_v14, %s11622_s10  ;;  %v13077_v57 = vpop.permute.xlu1 %2551  ;;  %v3343_v14 = vsel %vm1364_vm1, %v12919_v24, %v13009_v38 }
 0x34d   :  { %v13079_v27 = vpop.permute.xlu0 %3187  ;;  %3049 = vrot.lane.b32.xlu1 %v12885_v7, %s11621_s9 }
 0x34e   :  { %17570 = vst [vmem:[#allocation85_spill] sm:$0xff] %v13079_v27  ;;  %v3346_v27 = vsel %vm1364_vm1, %v12975_v31, %v13071_v13  ;;  %v3342_v13 = vsel %vm1364_vm1, %v12869_v5, %v12919_v24 }
 0x34f   :  { %3057 = vrot.lane.b32.xlu0 %v12891_v12, %s11621_s9  ;;  %v13092_v34 = vpop.permute.xlu1 %2411 }
 0x350   :  { %17571 = vst [vmem:[#allocation86_spill] sm:$0xff] %v13092_v34  ;;  %v17573_v34 = vld [vmem:[#allocation15_spill] sm:$0xff] }
 0x351   :  { %v13104_v54 = vpop.permute.xlu0 %3335  ;;  %3033 = vrot.lane.b32.xlu1 %v12823_v35, %s11621_s9  ;;  %v3380_v31 = vmul.f32 %v3343_v14, %v17573_v34  ;;  %v3384_v47 = vmul.f32 %v3346_v27, %v17573_v34  ;;  %v3376_v10 = vmul.f32 %v3340_v56, %v17573_v34  ;;  %v11224_v14 = vpack.c.bf16 %v3387_v16, %v3383_v53 }
 0x352   :  { %17572 = vst [vmem:[#allocation87_spill] sm:$0xff] %v13104_v54  ;;  %v3349_v38 = vsel %vm1364_vm1, %v3334_v60, %v13104_v54  ;;  %v3339_v60 = vsel %vm1364_vm1, %v12839_v25, %v12875_v33  ;;  %v2590_v56 = vsel %vm502_vm2, %v12895_v20, %v12887_v18  ;;  %v2254_v25 = vld [vmem:[%s17070_s5 + $0x18] sm:$0xff] }
 0x353   :  { %v3388_v17 = vmul.f32 %v3349_v38, %v17573_v34  ;;  %3041 = vrot.lane.b32.xlu0 %v12804_v50, %s11621_s9  ;;  %v13122_v63 = vpop.permute.xlu1 %2259  ;;  %v3379_v38 = vmul.f32 %v3342_v13, %v11935_v22  ;;  %v11221_v5 = vpack.c.bf16 %v3380_v31, %v3376_v10  ;;  %v3375_v54 = vmul.f32 %v3339_v60, %v11935_v22 }
 0x354   :  { %17574 = vst [vmem:[#allocation88_spill] sm:$0xff] %v13122_v63  ;;  %v2450_v10 = vsel %vm340_vm4, %v12903_v61, %v12897_v39  ;;  %v2447_v31 = vsel %vm340_vm4, %v12857_v45, %v12851_v59 }
 0x355   :  { %v13129_v24 = vpop.permute.xlu0 %2725  ;;  %2909 = vrot.lane.b32.xlu1 %v12885_v7, %s11622_s10  ;;  %v11225_v27 = vpack.c.bf16 %v3388_v17, %v3384_v47  ;;  %v2730_v47 = vsel %vm664_vm0, %v12883_v42, %v12877_v44  ;;  %v11220_v16 = vpack.c.bf16 %v3379_v38, %v3375_v54  ;;  %v2727_v54 = vsel %vm664_vm0, %v12831_v30, %v12833_v4 }
 0x356   :  { %v2587_v17 = vsel %vm502_vm2, %v12849_v8, %v12841_v2  ;;  %v13169_v53 = vmul.f32 %v2730_v47, %v11844_v23 }
 0x357   :  { %2917 = vrot.lane.b32.xlu0 %v12891_v12, %s11622_s10  ;;  %4000 = vmatprep.subr.bf16.mxu0 %v11225_v27  ;;  %v2720_v37 = vpop.permute.xlu1 %2719  ;;  %v17576_v27 = vld [vmem:[#allocation17_spill] sm:$0xff] }
 0x358   :  { %4001 = vmatpush1.bf16.msra.mxu0 %v11224_v14  ;;  %v13176_v38 = vmul.f32 %v2590_v56, %v17576_v27  ;;  %v13179_v14 = vmul.f32 %v2450_v10, %v12095_v58  ;;  %v13185_v34 = vmul.f32 %v2587_v17, %v17576_v27  ;;  %v13194_v56 = vmul.f32 %v2447_v31, %v12095_v58 }
 0x359   :  { %v13137_v33 = vpop.permute.xlu0 %2585  ;;  %2893 = vrot.lane.b32.xlu1 %v12823_v35, %s11622_s10  ;;  %4002 = vmatprep.subr.bf16.mxu0 %v11221_v5  ;;  %v13157_v5 = vld [vmem:[%s17069_s4 + $0x8] ss:$12 sps:$4 sm:$0xff]   ;;  %v2593_v10 = vsel %vm502_vm2, %v12943_v21, %v12921_v28  ;;  %v2596_v17 = vsel %vm502_vm2, %v13007_v3, %v12969_v11 }
 0x35a   :  { %17575 = vst [vmem:[#allocation89_spill] sm:$0xff] %v13157_v5 }
 0x35b   :  { %2901 = vrot.lane.b32.xlu0 %v12804_v50, %s11622_s10  ;;  %v13152_v13 = vpop.permute.xlu1 %2579 }
 0x35c   :  { %4003 = vmatpush1.bf16.msra.mxu0 %v11220_v16  ;;  %v13182_v16 = vmul.f32 %v2727_v54, %v11844_v23  ;;  %v2453_v54 = vsel %vm340_vm4, %v12951_v43, %v12929_v48  ;;  %v13215_v23 = vsel %vm178_vm5, %v12911_v0, %v12905_v52 }
 0x35d   :  { %v13171_v60 = vpop.permute.xlu0 %2445  ;;  %3329 = vrot.lane.b32.xlu1 %v12885_v7, %s11615_s6  ;;  %v2734_v7 = vsel %vm664_vm0, %v12913_v32, %v2720_v37 }
 0x35e   :  { %v11181_v31 = vpack.c.bf16 %v13169_v53, %v13182_v16  ;;  %v13228_v53 = vmul.f32 %v2593_v10, %v17576_v27  ;;  %v13231_v16 = vmul.f32 %v2453_v54, %v12095_v58  ;;  %v2728_v10 = vsel %vm664_vm0, %v12833_v4, %v13037_v55 }
 0x35f   :  { %3337 = vrot.lane.b32.xlu0 %v12891_v12, %s11615_s6  ;;  %v13189_v47 = vpop.permute.xlu1 %2439  ;;  %10238 = vmatmul.mubr.msk.bf16.vlgmr.msra.gmra.mxu0 %vm1976_vm3, %v13157_v5  ;;  %v2729_v5 = vsel %vm664_vm0, %v13037_v55, %v13069_v19  ;;  %v13234_v12 = vmul.f32 %v2596_v17, %v17576_v27  ;;  %v2732_v54 = vsel %vm664_vm0, %v13017_v6, %v13039_v15 }
 0x360   :  { %4030 = vmatprep.mubr.bf16.mxu0 %v17529_v41  ;;  %v2253_v41 = vld [vmem:[%s17070_s5 + $0x10] sm:$0xff]  ;;  %v2756_v27 = vsel %vm664_vm0, %v13039_v15, %v12883_v42  ;;  %v2755_v55 = vsel %vm664_vm0, %v13069_v19, %v12831_v30  ;;  %v2762_v4 = vmul.f32 %v2729_v5, %v12071_v29  ;;  %v2251_v19 = vld [vmem:[%s17070_s5] sm:$0xff]  ;;  %v2456_v15 = vsel %vm340_vm4, %v13015_v40, %v12985_v51 }
 0x361   :  { %v13206_v22 = vpop.permute.xlu0 %3195  ;;  %3313 = vrot.lane.b32.xlu1 %v12823_v35, %s11615_s6  ;;  %v13243_v35 = vld [vmem:[%s17069_s4 + $0x20] ss:$12 sps:$4 sm:$0xff]  }
 0x362   :  { %17577 = vst [vmem:[#allocation90_spill] sm:$0xff] %v13206_v22 }
 0x363   :  { %3321 = vrot.lane.b32.xlu0 %v12804_v50, %s11615_s6  ;;  %v2696_v52 = vpop.permute.xlu1 %2695 }
 0x364   :  { %v2735_v17 = vsel %vm664_vm0, %v2720_v37, %v2696_v52  ;;  %v2757_v32 = vsel %vm664_vm0, %v2696_v52, %v12927_v9  ;;  %v2737_v37 = vsel %vm664_vm0, %v12961_v36, %v13129_v24  ;;  %v2769_v9 = vmul.f32 %v2734_v7, %v12061_v62  ;;  %v17578_v52 = vld [vmem:[#allocation14_spill] sm:$0xff] }
 0x365   :  { %v2698_v50 = vpop.permute.xlu0 %2697  ;;  %3531 = vperm.xlu1 %11462, %v2253_v41   ;;  %v2767_v22 = vmul.f32 %v2757_v32, %v17578_v52  ;;  %v2770_v30 = vmul.f32 %v2735_v17, %v12071_v29  ;;  %v2773_v5 = vmul.f32 %v2737_v37, %v12061_v62 }
 0x366   :  { %v2738_v63 = vsel %vm664_vm0, %v13129_v24, %v2698_v50  ;;  %v2758_v42 = vsel %vm664_vm0, %v2698_v50, %v12994_v49  ;;  %v2731_v50 = vsel %vm664_vm0, %v12877_v44, %v13017_v6  ;;  %v2766_v49 = vmul.f32 %v2732_v54, %v12071_v29  ;;  %v2252_v24 = vld [vmem:[%s17070_s5 + $0x8] sm:$0xff] }
 0x367   :  { %v2771_v36 = vmul.f32 %v2758_v42, %v17578_v52  ;;  %v2774_v41 = vmul.f32 %v2738_v63, %v12071_v29  ;;  %3536 = vperm.xlu0 %11461, %v2254_v25   ;;  %v2556_v7 = vpop.permute.xlu1 %2555  ;;  %10239 = vmatmul.mubr.msk.bf16.gmra.mxu0 %vm1976_vm3, %v13243_v35  ;;  %v11177_v63 = vpack.c.bf16 %v13234_v12, %v13228_v53 }
 0x368   :  { %4073 = vmatprep.mubr.bf16.mxu0 %v13086_v26  ;;  %v2759_v25 = vmul.f32 %v2755_v55, %v17578_v52  ;;  %v2761_v44 = vmul.f32 %v2728_v10, %v12061_v62  ;;  %v2763_v6 = vmul.f32 %v2756_v27, %v17578_v52  ;;  %v11186_v53 = vpack.c.bf16 %v2773_v5, %v2769_v9 }
 0x369   :  { %v11184_v17 = vpack.c.bf16 %v2771_v36, %v2767_v22  ;;  %v2558_v32 = vpop.permute.xlu0 %2557  ;;  %3521 = vperm.xlu1 %11462, %v2251_v19   ;;  %v11187_v42 = vpack.c.bf16 %v2774_v41, %v2770_v30  ;;  %v2595_v26 = vsel %vm502_vm2, %v13152_v13, %v2556_v7  ;;  %v11183_v55 = vpack.c.bf16 %v2766_v49, %v2762_v4  ;;  %v17579_v30 = vld [vmem:[#allocation18_spill] sm:$0xff] }
 0x36a   :  { %v2598_v54 = vsel %vm502_vm2, %v13137_v33, %v2558_v32  ;;  %v2618_v12 = vsel %vm502_vm2, %v2558_v32, %v13007_v3  ;;  %v2594_v10 = vsel %vm502_vm2, %v12921_v28, %v13152_v13  ;;  %v2617_v27 = vsel %vm502_vm2, %v2556_v7, %v12943_v21  ;;  %v17580_v7 = vld [vmem:[#allocation79_spill] sm:$0xff] }
 0x36b   :  { %3526 = vperm.xlu0 %11461, %v2252_v24   ;;  %3936 = vmatpush1.bf16.msra.mxu1 %v11184_v17  ;;  %v2416_v22 = vpop.permute.xlu1 %2415  ;;  %v2634_v37 = vmul.f32 %v2598_v54, %v12183_v1  ;;  %v2765_v3 = vmul.f32 %v2731_v50, %v12061_v62  ;;  %v11180_v9 = vpack.c.bf16 %v2763_v6, %v2759_v25  ;;  %v17581_v50 = vld [vmem:[#allocation77_spill] sm:$0xff]  ;;  %v17582_v24 = vld [vmem:[#allocation23_spill] sm:$0xff] }
 0x36c   :  { %4041 = vmatprep.subr.bf16.mxu0 %v11187_v42  ;;  %3937 = vmatprep.subr.bf16.mxu1 %v11181_v31  ;;  %v2589_v19 = vsel %vm502_vm2, %v13045_v46, %v13077_v57  ;;  %v2631_v4 = vmul.f32 %v2618_v12, %v17579_v30  ;;  %v2492_v28 = vmul.f32 %v2456_v15, %v12095_v58 }
 0x36d   :  { %4042 = vmatpush1.bf16.msra.mxu0 %v11186_v53  ;;  %v2418_v36 = vpop.permute.xlu0 %2417  ;;  %v2615_v21 = vsel %vm502_vm2, %v13077_v57, %v12849_v8  ;;  %v2597_v13 = vsel %vm502_vm2, %v12969_v11, %v13137_v33  ;;  %v2630_v31 = vmul.f32 %v2595_v26, %v12183_v1  ;;  %v11182_v41 = vpack.c.bf16 %v2765_v3, %v2761_v44 }
 0x36e   :  { %4043 = vmatprep.subr.bf16.mxu0 %v11183_v55  ;;  %v2592_v49 = vsel %vm502_vm2, %v17581_v50, %v17580_v7  ;;  %v2629_v25 = vmul.f32 %v2594_v10, %v17582_v24  ;;  %v2627_v15 = vmul.f32 %v2617_v27, %v17579_v30  ;;  %v2588_v57 = vsel %vm502_vm2, %v12841_v2, %v13045_v46  ;;  %v17583_v10 = vld [vmem:[#allocation28_spill] sm:$0xff] }
 0x36f   :  { %3938 = vmatpush1.bf16.msra.mxu1 %v11180_v9  ;;  %v13328_v5 = vpop.permute.xlu1 %2263  ;;  %v2616_v11 = vsel %vm502_vm2, %v17580_v7, %v12895_v20  ;;  %v2622_v8 = vmul.f32 %v2589_v19, %v12183_v1  ;;  %v11179_v33 = vpack.c.bf16 %v2634_v37, %v2630_v31  ;;  %v2619_v17 = vmul.f32 %v2615_v21, %v17579_v30  ;;  %v17585_v19 = vld [vmem:[#allocation86_spill] sm:$0xff] }
 0x370   :  { %3939 = vmatprep.subr.bf16.mxu1 %v11177_v63  ;;  %v2633_v32 = vmul.f32 %v2597_v13, %v17582_v24  ;;  %v11176_v42 = vpack.c.bf16 %v2631_v4, %v2627_v15  ;;  %v2458_v44 = vsel %vm340_vm4, %v13171_v60, %v2418_v36  ;;  %v2591_v46 = vsel %vm502_vm2, %v12887_v18, %v17581_v50  ;;  %v17586_v4 = vld [vmem:[#allocation82_spill] sm:$0xff] }
 0x371   :  { %4044 = vmatpush1.bf16.msra.mxu0 %v11182_v41  ;;  %v13341_v6 = vpop.permute.xlu0 %2265  ;;  %v2626_v2 = vmul.f32 %v2592_v49, %v12183_v1  ;;  %v2478_v20 = vsel %vm340_vm4, %v2418_v36, %v13015_v40  ;;  %v11169_v63 = vpack.c.bf16 %v2492_v28, %v13231_v16  ;;  %v2621_v54 = vmul.f32 %v2588_v57, %v17582_v24  ;;  %v17587_v28 = vld [vmem:[#allocation22_spill] sm:$0xff]  ;;  %v17590_v41 = vld [vmem:[#allocation81_spill] sm:$0xff]  ;;  %v17592_v49 = vld [vmem:[#allocation27_spill] sm:$0xff] }
 0x372   :  { %4045 = vmatprep.subr.bf16.mxu0 %v11179_v33  ;;  %v2623_v12 = vmul.f32 %v2616_v11, %v17579_v30  ;;  %v11178_v53 = vpack.c.bf16 %v2633_v32, %v2629_v25  ;;  %v2455_v26 = vsel %vm340_vm4, %v13189_v47, %v2416_v22  ;;  %v2454_v18 = vsel %vm340_vm4, %v12929_v48, %v13189_v47  ;;  %v17589_v47 = vld [vmem:[#allocation76_spill] sm:$0xff]  ;;  %v17591_v7 = vld [vmem:[#allocation78_spill] sm:$0xff] }
 0x373   :  { %3940 = vmatpush1.bf16.msra.mxu1 %v11176_v42  ;;  %v13354_v55 = vpop.permute.xlu1 %3169  ;;  %v2477_v40 = vsel %vm340_vm4, %v2416_v22, %v12951_v43  ;;  %v2494_v16 = vmul.f32 %v2458_v44, %v17583_v10  ;;  %v17584_v27 = vpack.c.bf16 %v13176_v38, %v13185_v34  ;;  %v11175_v37 = vpack.c.bf16 %v2626_v2, %v2622_v8  ;;  %v17588_v43 = vld [vmem:[#allocation74_spill] sm:$0xff]  ;;  %v17593_v8 = vld [vmem:[#allocation67_spill] sm:$0xff] }
 0x374   :  { %v2625_v3 = vmul.f32 %v2591_v46, %v17582_v24  ;;  %v11172_v9 = vpack.c.bf16 %v2623_v12, %v2619_v17  ;;  %v2449_v36 = vsel %vm340_vm4, %v17586_v4, %v17585_v19  ;;  %v2491_v21 = vmul.f32 %v2478_v20, %v17587_v28  ;;  %v17594_v33 = vld [vmem:[#allocation70_spill] sm:$0xff]  ;;  %v17597_v12 = vld [vmem:[#allocation61_spill] sm:$0xff] }
 0x375   :  { %3941 = vmatprep.subr.bf16.mxu1 %v17584_v27  ;;  %4046 = vmatpush1.bf16.msra.mxu0 %v11178_v53  ;;  %v13370_v48 = vpop.permute.xlu0 %3171  ;;  %v2316_v22 = vsel %vm178_vm5, %v17589_v47, %v17588_v43  ;;  %v2475_v34 = vsel %vm340_vm4, %v17585_v19, %v12857_v45  ;;  %v2457_v38 = vsel %vm340_vm4, %v12985_v51, %v13171_v60 }
 0x376   :  { %v2490_v13 = vmul.f32 %v2455_v26, %v17583_v10  ;;  %4047 = vmatprep.subr.bf16.mxu0 %v11175_v37  ;;  %v11174_v31 = vpack.c.bf16 %v2625_v3, %v2621_v54  ;;  %v2452_v50 = vsel %vm340_vm4, %v17591_v7, %v17590_v41  ;;  %v2489_v25 = vmul.f32 %v2454_v18, %v17592_v49  ;;  %v17596_v54 = vld [vmem:[#allocation60_spill] sm:$0xff] }
 0x377   :  { %v2487_v15 = vmul.f32 %v2477_v40, %v17587_v28  ;;  %3942 = vmatpush1.bf16.msra.mxu1 %v11172_v9  ;;  %v13387_v57 = vpop.permute.xlu1 %3177  ;;  %v2476_v45 = vsel %vm340_vm4, %v17590_v41, %v12903_v61  ;;  %v2448_v51 = vsel %vm340_vm4, %v12851_v59, %v17586_v4  ;;  %v2482_v60 = vmul.f32 %v2449_v36, %v17583_v10  ;;  %v17595_v61 = vld [vmem:[#allocation25_spill] sm:$0xff]  ;;  %v17599_v36 = vld [vmem:[#allocation26_spill] sm:$0xff]  ;;  %v17603_v41 = vld [vmem:[#allocation80_spill] sm:$0xff] }
 0x378   :  { %3943 = vmatprep.subr.bf16.mxu1 %v11169_v63  ;;  %v11171_v11 = vpack.c.bf16 %v2494_v16, %v2490_v13  ;;  %v2313_v17 = vsel %vm178_vm5, %v17594_v33, %v17593_v8  ;;  %v2479_v32 = vmul.f32 %v2475_v34, %v17587_v28  ;;  %v2493_v42 = vmul.f32 %v2457_v38, %v17592_v49  ;;  %v17601_v38 = vld [vmem:[#allocation88_spill] sm:$0xff] }
 0x379   :  { %v11168_v44 = vpack.c.bf16 %v2491_v21, %v2487_v15  ;;  %4048 = vmatpush1.bf16.msra.mxu0 %v11174_v31  ;;  %v13401_v46 = vpop.permute.xlu0 %3179  ;;  %v2352_v2 = vmul.f32 %v2316_v22, %v17595_v61  ;;  %v2451_v59 = vsel %vm340_vm4, %v12897_v39, %v17591_v7  ;;  %v2486_v20 = vmul.f32 %v2452_v50, %v17583_v10  ;;  %v17600_v22 = vld [vmem:[#allocation83_spill] sm:$0xff]  ;;  %v17602_v31 = vld [vmem:[#allocation90_spill] sm:$0xff]  ;;  %v17604_v15 = vld [vmem:[#allocation69_spill] sm:$0xff] }
 0x37a   :  { %v2338_v63 = vsel %vm178_vm5, %v13341_v6, %v17589_v47  ;;  %4049 = vmatprep.subr.bf16.mxu0 %v11171_v11  ;;  %v2307_v53 = vsel %vm178_vm5, %v17597_v12, %v17596_v54  ;;  %v2483_v26 = vmul.f32 %v2476_v45, %v17587_v28  ;;  %v2481_v18 = vmul.f32 %v2448_v51, %v17592_v49 }
 0x37b   :  { %v11170_v40 = vpack.c.bf16 %v2493_v42, %v2489_v25  ;;  %3944 = vmatpush1.bf16.msra.mxu1 %v11168_v44  ;;  %v13416_v16 = vpop.permute.xlu1 %3167  ;;  %v2344_v39 = vmul.f32 %v13215_v23, %v17595_v61  ;;  %v2348_v27 = vmul.f32 %v2313_v17, %v17595_v61  ;;  %v2337_v37 = vsel %vm178_vm5, %v13328_v5, %v17594_v33  ;;  %v17605_v33 = vld [vmem:[#allocation85_spill] sm:$0xff] }
 0x37c   :  { %v17598_v3 = vpack.c.bf16 %v13179_v14, %v13194_v56  ;;  %v11167_v9 = vpack.c.bf16 %v2486_v20, %v2482_v60  ;;  %v2485_v19 = vmul.f32 %v2451_v59, %v17592_v49  ;;  %v11164_v4 = vpack.c.bf16 %v2483_v26, %v2479_v32  ;;  %v17606_v17 = vld [vmem:[#allocation73_spill] sm:$0xff]  ;;  %v17609_v26 = vld [vmem:[#allocation32_spill] sm:$0xff] }
 0x37d   :  { %v2351_v21 = vmul.f32 %v2338_v63, %v17599_v36  ;;  %4050 = vmatpush1.bf16.msra.mxu0 %v11170_v40  ;;  %v13429_v47 = vpop.permute.xlu0 %3175  ;;  %v2340_v23 = vmul.f32 %v2307_v53, %v17595_v61  ;;  %v2336_v34 = vsel %vm178_vm5, %v17600_v22, %v12911_v0  ;;  %v2335_v14 = vsel %vm178_vm5, %v17601_v38, %v17597_v12  ;;  %v17607_v59 = vld [vmem:[#allocation29_spill] sm:$0xff]  ;;  %v17608_v12 = vld [vmem:[#allocation31_spill] sm:$0xff] }
 0x37e   :  { %3945 = vmatprep.subr.bf16.mxu1 %v17598_v3  ;;  %4051 = vmatprep.subr.bf16.mxu0 %v11167_v9  ;;  %v11161_v56 = vpack.c.bf16 %v2352_v2, %v2348_v27  ;;  %v11166_v13 = vpack.c.bf16 %v2485_v19, %v2481_v18  ;;  %v3209_v7 = vsel %vm1202_vm6, %v17603_v41, %v17602_v31  ;;  %v17611_v9 = vld [vmem:[#allocation30_spill] sm:$0xff] }
 0x37f   :  { %v2347_v50 = vmul.f32 %v2337_v37, %v17599_v36  ;;  %3946 = vmatpush1.bf16.msra.mxu1 %v11164_v4  ;;  %v2300_v25 = vpop.permute.xlu1 %2299  ;;  %v3208_v45 = vsel %vm1202_vm6, %v17604_v15, %v17603_v41  ;;  %v11157_v60 = vpack.c.bf16 %v2344_v39, %v2340_v23  ;;  %v2343_v11 = vmul.f32 %v2336_v34, %v17599_v36  ;;  %v17610_v37 = vld [vmem:[#allocation71_spill] sm:$0xff] }
 0x380   :  { %v2314_v0 = vsel %vm178_vm5, %v17593_v8, %v2300_v25  ;;  %v2315_v51 = vsel %vm178_vm5, %v2300_v25, %v13328_v5  ;;  %3947 = vmatprep.subr.bf16.mxu1 %v11161_v56  ;;  %v3206_v32 = vsel %vm1202_vm6, %v17606_v17, %v17605_v33  ;;  %v2339_v42 = vmul.f32 %v2335_v14, %v17599_v36 }
 0x381   :  { %v11160_v44 = vpack.c.bf16 %v2351_v21, %v2347_v50  ;;  %4052 = vmatpush1.bf16.msra.mxu0 %v11166_v13  ;;  %v2306_v2 = vpop.permute.xlu0 %2305  ;;  %v3248_v20 = vmul.f32 %v3209_v7, %v17607_v59  ;;  %v3203_v8 = vsel %vm1202_vm6, %v13387_v57, %v13401_v46  ;;  %v2349_v53 = vmul.f32 %v2314_v0, %v17608_v12 }
 0x382   :  { %v2317_v5 = vsel %vm178_vm5, %v17588_v43, %v2306_v2  ;;  %v2318_v63 = vsel %vm178_vm5, %v2306_v2, %v13341_v6  ;;  %v2350_v18 = vmul.f32 %v2315_v51, %v17609_v26  ;;  %v3205_v3 = vsel %vm1202_vm6, %v17610_v37, %v17606_v17 }
 0x383   :  { %v2353_v40 = vmul.f32 %v2317_v5, %v17608_v12  ;;  %v2354_v39 = vmul.f32 %v2318_v63, %v17609_v26  ;;  %3948 = vmatpush1.bf16.msra.mxu1 %v11160_v44  ;;  %v3046_v27 = vpop.permute.xlu1 %3045  ;;  %v3247_v19 = vmul.f32 %v3208_v45, %v17611_v9  ;;  %v3244_v43 = vmul.f32 %v3206_v32, %v17607_v59  ;;  %v17612_v32 = vld [vmem:[#allocation33_spill] sm:$0xff] }
 0x384   :  { %3949 = vmatprep.subr.bf16.mxu1 %v11157_v60  ;;  %v11156_v6 = vpack.c.bf16 %v2343_v11, %v2339_v42  ;;  %v3200_v4 = vsel %vm1202_vm6, %v13354_v55, %v13370_v48  ;;  %v3240_v14 = vmul.f32 %v3203_v8, %v17607_v59  ;;  %v3202_v56 = vsel %vm1202_vm6, %v13429_v47, %v13387_v57 }
 0x385   :  { %v11162_v21 = vpack.c.bf16 %v2353_v40, %v2349_v53  ;;  %v13474_v23 = vpop.permute.xlu0 %3047  ;;  %v11163_v34 = vpack.c.bf16 %v2354_v39, %v2350_v18  ;;  %v11217_v13 = vpack.c.bf16 %v3248_v20, %v3244_v43  ;;  %v3243_v41 = vmul.f32 %v3205_v3, %v17611_v9  ;;  %v17613_v53 = vld [vmem:[#allocation34_spill] sm:$0xff] }
 0x386   :  { %v3236_v50 = vmul.f32 %v3200_v4, %v17607_v59  ;;  %v3199_v25 = vsel %vm1202_vm6, %v13416_v16, %v13354_v55  ;;  %v3066_v45 = vsel %vm1040_vm7, %v3046_v27, %v13474_v23  ;;  %v3239_v57 = vmul.f32 %v3202_v56, %v17611_v9 }
 0x387   :  { %3950 = vmatpush1.bf16.msra.mxu1 %v11156_v6  ;;  %4053 = vmatprep.subr.bf16.mxu0 %v11163_v34  ;;  %v3054_v7 = vpop.permute.xlu1 %3053  ;;  %v11216_v0 = vpack.c.bf16 %v3247_v19, %v3243_v41  ;;  %v3235_v17 = vmul.f32 %v3199_v25, %v17611_v9  ;;  %v3104_v42 = vmul.f32 %v3066_v45, %v17612_v32  ;;  %v17614_v6 = vld [vmem:[#allocation65_spill] sm:$0xff] }
 0x388   :  { %3951 = vmatprep.subr.bf16.mxu1 %v11217_v13  ;;  %4054 = vmatpush1.bf16.msra.mxu0 %v11162_v21  ;;  %v11213_v11 = vpack.c.bf16 %v3240_v14, %v3236_v50 }
 0x389   :  { %v13488_v51 = vpop.permute.xlu0 %3055  ;;  %v11212_v20 = vpack.c.bf16 %v3239_v57, %v3235_v17 }
 0x38a   :  { %v3069_v60 = vsel %vm1040_vm7, %v3054_v7, %v13488_v51 }
 0x38b   :  { %v3108_v55 = vmul.f32 %v3069_v60, %v17612_v32  ;;  %3952 = vmatpush2.bf16.msra.mxu1 %v11216_v0  ;;  %v13495_v44 = vpop.permute.xlu1 %3043 }
 0x38c   :  { %v3065_v2 = vsel %vm1040_vm7, %v13495_v44, %v3046_v27  ;;  %3953 = vmatprep.subr.bf16.mxu1 %v11213_v11 }
 0x38d   :  { %v13499_v8 = vpop.permute.xlu0 %3051  ;;  %v11209_v5 = vpack.c.bf16 %v3108_v55, %v3104_v42  ;;  %v3103_v18 = vmul.f32 %v3065_v2, %v17613_v53 }
 0x38e   :  { %v3068_v63 = vsel %vm1040_vm7, %v13499_v8, %v3054_v7 }
 0x38f   :  { %v3107_v40 = vmul.f32 %v3068_v63, %v17613_v53  ;;  %3954 = vmatpush2.bf16.msra.mxu1 %v11212_v20  ;;  %v2288_v39 = vpop.permute.xlu1 %2287 }
 0x390   :  { %v2308_v3 = vsel %vm178_vm5, %v17596_v54, %v2288_v39  ;;  %v2309_v27 = vsel %vm178_vm5, %v2288_v39, %v17601_v38  ;;  %3955 = vmatprep.subr.bf16.mxu1 %v11209_v5 }
 0x391   :  { %v11208_v19 = vpack.c.bf16 %v3107_v40, %v3103_v18  ;;  %v2294_v43 = vpop.permute.xlu0 %2293  ;;  %v2341_v34 = vmul.f32 %v2308_v3, %v17608_v12  ;;  %v2342_v14 = vmul.f32 %v2309_v27, %v17609_v26 }
 0x392   :  { %v2311_v4 = vsel %vm178_vm5, %v17614_v6, %v2294_v43  ;;  %v2312_v21 = vsel %vm178_vm5, %v2294_v43, %v17600_v22  ;;  %v17616_v6 = vld [vmem:[#allocation36_spill] sm:$0xff] }
 0x393   :  { %v2345_v56 = vmul.f32 %v2311_v4, %v17608_v12  ;;  %v2346_v54 = vmul.f32 %v2312_v21, %v17609_v26  ;;  %3956 = vmatpush2.bf16.msra.mxu1 %v11208_v19  ;;  %v3030_v13 = vpop.permute.xlu1 %3029  ;;  %v17615_v19 = vld [vmem:[#allocation35_spill] sm:$0xff] }
 0x395   :  { %v11158_v38 = vpack.c.bf16 %v2345_v56, %v2341_v34  ;;  %v13517_v41 = vpop.permute.xlu0 %3031  ;;  %v11159_v7 = vpack.c.bf16 %v2346_v54, %v2342_v14 }
 0x396   :  { %v3060_v25 = vsel %vm1040_vm7, %v3030_v13, %v13517_v41 }
 0x397   :  { %4055 = vmatprep.subr.bf16.mxu0 %v11159_v7  ;;  %v3038_v50 = vpop.permute.xlu1 %3037  ;;  %v3096_v0 = vmul.f32 %v3060_v25, %v17612_v32 }
 0x398   :  { %4056 = vmatpush1.bf16.msra.mxu0 %v11158_v38  ;;  %v17617_v38 = vld [vmem:[#allocation37_spill] sm:$0xff] }
 0x399   :  { %v13521_v22 = vpop.permute.xlu0 %3039 }
 0x39a   :  { %v3063_v45 = vsel %vm1040_vm7, %v3038_v50, %v13521_v22 }
 0x39b   :  { %v3100_v57 = vmul.f32 %v3063_v45, %v17612_v32  ;;  %v13527_v60 = vpop.permute.xlu1 %3027 }
 0x39c   :  { %v3059_v11 = vsel %vm1040_vm7, %v13527_v60, %v3030_v13 }
 0x39d   :  { %v13531_v17 = vpop.permute.xlu0 %3035  ;;  %v11205_v42 = vpack.c.bf16 %v3100_v57, %v3096_v0  ;;  %v3095_v2 = vmul.f32 %v3059_v11, %v17613_v53 }
 0x39e   :  { %v3062_v55 = vsel %vm1040_vm7, %v13531_v17, %v3038_v50 }
 0x39f   :  { %v3099_v20 = vmul.f32 %v3062_v55, %v17613_v53  ;;  %3957 = vmatprep.subr.bf16.mxu1 %v11205_v42  ;;  %v3190_v5 = vpop.permute.xlu1 %3189  ;;  %v17618_v42 = vld [vmem:[#allocation38_spill] sm:$0xff] }
 0x3a0   :  { %v3207_v63 = vsel %vm1202_vm6, %v17605_v33, %v3190_v5  ;;  %v3233_v18 = vsel %vm1202_vm6, %v3190_v5, %v17610_v37 }
 0x3a1   :  { %v11204_v40 = vpack.c.bf16 %v3099_v20, %v3095_v2  ;;  %v3198_v39 = vpop.permute.xlu0 %3197  ;;  %v3245_v43 = vmul.f32 %v3207_v63, %v17615_v19  ;;  %v3246_v4 = vmul.f32 %v3233_v18, %v17616_v6 }
 0x3a2   :  { %v3210_v3 = vsel %vm1202_vm6, %v17602_v31, %v3198_v39  ;;  %v3234_v27 = vsel %vm1202_vm6, %v3198_v39, %v17604_v15 }
 0x3a3   :  { %v3249_v21 = vmul.f32 %v3210_v3, %v17615_v19  ;;  %v3250_v34 = vmul.f32 %v3234_v27, %v17616_v6  ;;  %3958 = vmatpush2.bf16.msra.mxu1 %v11204_v40  ;;  %v2906_v33 = vpop.permute.xlu1 %2905 }
 0x3a5   :  { %v11218_v14 = vpack.c.bf16 %v3249_v21, %v3245_v43  ;;  %v13549_v37 = vpop.permute.xlu0 %2907  ;;  %v11219_v56 = vpack.c.bf16 %v3250_v34, %v3246_v4 }
 0x3a6   :  { %v2926_v31 = vsel %vm878_vm8, %v2906_v33, %v13549_v37 }
 0x3a7   :  { %4057 = vmatprep.subr.bf16.mxu0 %v11219_v56  ;;  %v2914_v54 = vpop.permute.xlu1 %2913  ;;  %v2964_v7 = vmul.f32 %v2926_v31, %v17617_v38 }
 0x3a8   :  { %4058 = vmatpush2.bf16.msra.mxu0 %v11218_v14 }
 0x3a9   :  { %v13553_v15 = vpop.permute.xlu0 %2915 }
 0x3aa   :  { %v2929_v13 = vsel %vm878_vm8, %v2914_v54, %v13553_v15 }
 0x3ab   :  { %v2968_v50 = vmul.f32 %v2929_v13, %v17617_v38  ;;  %v13559_v25 = vpop.permute.xlu1 %2903 }
 0x3ac   :  { %v2925_v45 = vsel %vm878_vm8, %v13559_v25, %v2906_v33 }
 0x3ad   :  { %v13563_v0 = vpop.permute.xlu0 %2911  ;;  %v11201_v57 = vpack.c.bf16 %v2968_v50, %v2964_v7  ;;  %v2963_v55 = vmul.f32 %v2925_v45, %v17618_v42 }
 0x3ae   :  { %v2928_v11 = vsel %vm878_vm8, %v13563_v0, %v2914_v54 }
 0x3af   :  { %v2967_v2 = vmul.f32 %v2928_v11, %v17618_v42  ;;  %3959 = vmatprep.subr.bf16.mxu1 %v11201_v57  ;;  %v3174_v20 = vpop.permute.xlu1 %3173 }
 0x3b0   :  { %v3201_v5 = vsel %vm1202_vm6, %v13370_v48, %v3174_v20  ;;  %v3231_v63 = vsel %vm1202_vm6, %v3174_v20, %v13416_v16 }
 0x3b1   :  { %v11200_v18 = vpack.c.bf16 %v2967_v2, %v2963_v55  ;;  %v3182_v40 = vpop.permute.xlu0 %3181  ;;  %v3237_v27 = vmul.f32 %v3201_v5, %v17615_v19  ;;  %v3238_v43 = vmul.f32 %v3231_v63, %v17616_v6 }
 0x3b2   :  { %v3204_v39 = vsel %vm1202_vm6, %v13401_v46, %v3182_v40  ;;  %v3232_v3 = vsel %vm1202_vm6, %v3182_v40, %v13429_v47 }
 0x3b3   :  { %v3241_v4 = vmul.f32 %v3204_v39, %v17615_v19  ;;  %v3242_v21 = vmul.f32 %v3232_v3, %v17616_v6  ;;  %3960 = vmatpush2.bf16.msra.mxu1 %v11200_v18  ;;  %v2890_v48 = vpop.permute.xlu1 %2889  ;;  %v17619_v3 = vld [vmem:[#allocation49_spill] sm:$0xff] }
 0x3b5   :  { %v11214_v34 = vpack.c.bf16 %v3241_v4, %v3237_v27  ;;  %v13581_v16 = vpop.permute.xlu0 %2891  ;;  %v11215_v33 = vpack.c.bf16 %v3242_v21, %v3238_v43  ;;  %v17620_v27 = vld [vmem:[#allocation52_spill] sm:$0xff]  ;;  %v17621_v4 = vld [vmem:[#allocation39_spill] sm:$0xff] }
 0x3b6   :  { %v2920_v46 = vsel %vm878_vm8, %v2890_v48, %v13581_v16  ;;  %v11193_v43 = vpack.c.bf16 %v17620_v27, %v17619_v3  ;;  %v17627_v3 = vld [vmem:[#allocation45_spill] sm:$0xff]  ;;  %v17628_v27 = vld [vmem:[#allocation47_spill] sm:$0xff] }
 0x3b7   :  { %4059 = vmatprep.subr.bf16.mxu0 %v11215_v33  ;;  %v2898_v14 = vpop.permute.xlu1 %2897  ;;  %v2956_v54 = vmul.f32 %v2920_v46, %v17617_v38 }
 0x3b8   :  { %4060 = vmatpush2.bf16.msra.mxu0 %v11214_v34 }
 0x3b9   :  { %v13585_v47 = vpop.permute.xlu0 %2899 }
 0x3ba   :  { %v2923_v56 = vsel %vm878_vm8, %v2898_v14, %v13585_v47 }
 0x3bb   :  { %v2960_v31 = vmul.f32 %v2923_v56, %v17617_v38  ;;  %v2888_v13 = vpop.permute.xlu1 %2887  ;;  %v17623_v56 = vld [vmem:[#allocation50_spill] sm:$0xff] }
 0x3bc   :  { %v2919_v7 = vsel %vm878_vm8, %v2888_v13, %v2890_v48  ;;  %v17622_v48 = vld [vmem:[#allocation40_spill] sm:$0xff] }
 0x3bd   :  { %v13592_v50 = vpop.permute.xlu0 %2895  ;;  %v11197_v45 = vpack.c.bf16 %v2960_v31, %v2956_v54  ;;  %v2955_v11 = vmul.f32 %v2919_v7, %v17618_v42  ;;  %v17624_v54 = vld [vmem:[#allocation51_spill] sm:$0xff] }
 0x3be   :  { %v2922_v57 = vsel %vm878_vm8, %v13592_v50, %v2898_v14  ;;  %v11192_v31 = vpack.c.bf16 %v17624_v54, %v17623_v56 }
 0x3bf   :  { %v2959_v55 = vmul.f32 %v2922_v57, %v17618_v42  ;;  %3961 = vmatprep.subr.bf16.mxu1 %v11197_v45  ;;  %v3050_v2 = vpop.permute.xlu1 %3049 }
 0x3c0   :  { %v3067_v20 = vsel %vm1040_vm7, %v13474_v23, %v3050_v2  ;;  %v3093_v5 = vsel %vm1040_vm7, %v3050_v2, %v13495_v44 }
 0x3c1   :  { %v11196_v63 = vpack.c.bf16 %v2959_v55, %v2955_v11  ;;  %v3058_v18 = vpop.permute.xlu0 %3057  ;;  %v3105_v21 = vmul.f32 %v3067_v20, %v17621_v4  ;;  %v3106_v34 = vmul.f32 %v3093_v5, %v17622_v48  ;;  %v17625_v55 = vld [vmem:[#allocation46_spill] sm:$0xff] }
 0x3c2   :  { %v3070_v40 = vsel %vm1040_vm7, %v13488_v51, %v3058_v18  ;;  %v3094_v39 = vsel %vm1040_vm7, %v3058_v18, %v13499_v8 }
 0x3c3   :  { %v3109_v23 = vmul.f32 %v3070_v40, %v17621_v4  ;;  %v3110_v33 = vmul.f32 %v3094_v39, %v17622_v48  ;;  %3962 = vmatpush2.bf16.msra.mxu1 %v11196_v63  ;;  %v3034_v44 = vpop.permute.xlu1 %3033 }
 0x3c4   :  { %v3061_v14 = vsel %vm1040_vm7, %v13517_v41, %v3034_v44  ;;  %v3091_v51 = vsel %vm1040_vm7, %v3034_v44, %v13527_v60  ;;  %3963 = vmatprep.subr.bf16.mxu1 %v11193_v43  ;;  %v17626_v41 = vld [vmem:[#allocation48_spill] sm:$0xff]  ;;  %v11188_v43 = vpack.c.bf16 %v17628_v27, %v17627_v3 }
 0x3c5   :  { %v11210_v8 = vpack.c.bf16 %v3109_v23, %v3105_v21  ;;  %v3042_v46 = vpop.permute.xlu0 %3041  ;;  %v11211_v7 = vpack.c.bf16 %v3110_v33, %v3106_v34  ;;  %v3097_v45 = vmul.f32 %v3061_v14, %v17621_v4  ;;  %v11189_v2 = vpack.c.bf16 %v17626_v41, %v17625_v55  ;;  %v17629_v21 = vld [vmem:[#allocation41_spill] sm:$0xff]  ;;  %v17631_v41 = vld [vmem:[#allocation84_spill] sm:$0xff] }
 0x3c6   :  { %v3064_v57 = vsel %vm1040_vm7, %v13521_v22, %v3042_v46  ;;  %v3092_v11 = vsel %vm1040_vm7, %v3042_v46, %v13531_v17  ;;  %v3098_v60 = vmul.f32 %v3091_v51, %v17622_v48  ;;  %v11477_v27 = vld [vmem:[%s17069_s4 + $0x18] ss:$12 sps:$4 sm:$0xff]  }
 0x3c7   :  { %v3101_v20 = vmul.f32 %v3064_v57, %v17621_v4  ;;  %v3102_v5 = vmul.f32 %v3092_v11, %v17622_v48  ;;  %3964 = vmatpush2.bf16.msra.mxu1 %v11192_v31  ;;  %4061 = vmatprep.subr.bf16.mxu0 %v11211_v7  ;;  %v2910_v63 = vpop.permute.xlu1 %2909 }
 0x3c8   :  { %v2927_v18 = vsel %vm878_vm8, %v13549_v37, %v2910_v63  ;;  %v2953_v22 = vsel %vm878_vm8, %v2910_v63, %v13559_v25  ;;  %3965 = vmatprep.subr.bf16.mxu1 %v11189_v2  ;;  %4062 = vmatpush2.bf16.msra.mxu0 %v11210_v8  ;;  %v13642_v37 = vld [vmem:[%s17069_s4] ss:$12 sps:$4 sm:$0xff]   ;;  %v17630_v25 = vld [vmem:[#allocation42_spill] sm:$0xff] }
 0x3c9   :  { %v11206_v17 = vpack.c.bf16 %v3101_v20, %v3097_v45  ;;  %v2918_v40 = vpop.permute.xlu0 %2917  ;;  %v11207_v39 = vpack.c.bf16 %v3102_v5, %v3098_v60  ;;  %v2965_v34 = vmul.f32 %v2927_v18, %v17629_v21  ;;  %v2966_v44 = vmul.f32 %v2953_v22, %v17630_v25  ;;  %v17632_v60 = vld [vmem:[#allocation66_spill] sm:$0xff]  ;;  %v17633_v63 = vld [vmem:[#allocation87_spill] sm:$0xff]  ;;  %v17634_v22 = vld [vmem:[#allocation68_spill] sm:$0xff] }
 0x3ca   :  { %v2930_v23 = vsel %vm878_vm8, %v13553_v15, %v2918_v40  ;;  %v2954_v33 = vsel %vm878_vm8, %v2918_v40, %v13563_v0  ;;  %v11475_v15 = vld [vmem:[%s17069_s4 + $0x1c] ss:$12 sps:$4 sm:$0xff]   ;;  %v17635_v40 = vld [vmem:[#allocation63_spill] sm:$0xff] }
 0x3cb   :  { %v2969_v14 = vmul.f32 %v2930_v23, %v17629_v21  ;;  %v2970_v51 = vmul.f32 %v2954_v33, %v17630_v25  ;;  %4063 = vmatprep.subr.bf16.mxu0 %v11207_v39  ;;  %v2894_v8 = vpop.permute.xlu1 %2893  ;;  %3966 = vmatpush2.bf16.msra.mxu1 %v11188_v43  ;;  %v17636_v39 = vld [vmem:[#allocation64_spill] sm:$0xff]  ;;  %v17637_v43 = vld [vmem:[#allocation43_spill] sm:$0xff] }
 0x3cc   :  { %v2921_v0 = vsel %vm878_vm8, %v13581_v16, %v2894_v8  ;;  %v2951_v46 = vsel %vm878_vm8, %v2894_v8, %v2888_v13  ;;  %4064 = vmatpush2.bf16.msra.mxu0 %v11206_v17  ;;  %v11195_v3 = vpack.c.bf16 %v17636_v39, %v17635_v40  ;;  %v17638_v23 = vld [vmem:[#allocation44_spill] sm:$0xff]  ;;  %v17648_v40 = vld [vmem:[#allocation53_spill] sm:$0xff]  ;;  %v17649_v39 = vld [vmem:[#allocation54_spill] sm:$0xff] }
 0x3cd   :  { %v11202_v56 = vpack.c.bf16 %v2969_v14, %v2965_v34  ;;  %v2902_v54 = vpop.permute.xlu0 %2901  ;;  %v11203_v31 = vpack.c.bf16 %v2970_v51, %v2966_v44  ;;  %v2957_v7 = vmul.f32 %v2921_v0, %v17629_v21  ;;  %v2958_v11 = vmul.f32 %v2951_v46, %v17630_v25  ;;  %v17639_v8 = vld [vmem:[#allocation72_spill] sm:$0xff]  ;;  %v17640_v46 = vld [vmem:[#allocation58_spill] sm:$0xff] }
 0x3ce   :  { %v2924_v45 = vsel %vm878_vm8, %v13585_v47, %v2902_v54  ;;  %v2952_v57 = vsel %vm878_vm8, %v2902_v54, %v13592_v50  ;;  %3968 = vmatmul.mubr.bf16.vlgmr.msra.gmra.mxu1 %v13642_v37 }
 0x3cf   :  { %v2961_v16 = vmul.f32 %v2924_v45, %v17629_v21  ;;  %v2962_v13 = vmul.f32 %v2952_v57, %v17630_v25  ;;  %4065 = vmatprep.subr.bf16.mxu0 %v11203_v31  ;;  %v3330_v55 = vpop.permute.xlu1 %3329  ;;  %3977 = vmatprep.mubr.bf16.mxu1 %v11475_v15  ;;  %v17641_v45 = vld [vmem:[#allocation56_spill] sm:$0xff]  ;;  %v17642_v57 = vld [vmem:[#allocation55_spill] sm:$0xff] }
 0x3d0   :  { %v3347_v2 = vsel %vm1364_vm1, %v17631_v41, %v3330_v55  ;;  %v3373_v47 = vsel %vm1364_vm1, %v3330_v55, %v17632_v60  ;;  %4066 = vmatpush2.bf16.msra.mxu0 %v11202_v56  ;;  %v17644_v41 = vld [vmem:[#allocation62_spill] sm:$0xff]  ;;  %v17645_v60 = vld [vmem:[#allocation57_spill] sm:$0xff] }
 0x3d1   :  { %v11198_v20 = vpack.c.bf16 %v2961_v16, %v2957_v7  ;;  %v3338_v50 = vpop.permute.xlu0 %3337  ;;  %v11199_v5 = vpack.c.bf16 %v2962_v13, %v2958_v11  ;;  %v3385_v34 = vmul.f32 %v3347_v2, %v17637_v43  ;;  %v3386_v33 = vmul.f32 %v3373_v47, %v17638_v23  ;;  %v17643_v13 = vld [vmem:[#allocation75_spill] sm:$0xff] }
 0x3d2   :  { %v3350_v18 = vsel %vm1364_vm1, %v17633_v63, %v3338_v50  ;;  %v3374_v17 = vsel %vm1364_vm1, %v3338_v50, %v17634_v22  ;;  %v11191_v11 = vpack.c.bf16 %v17642_v57, %v17641_v45  ;;  %v17646_v47 = vld [vmem:[#allocation59_spill] sm:$0xff] }
 0x3d3   :  { %v3389_v44 = vmul.f32 %v3350_v18, %v17637_v43  ;;  %v3390_v14 = vmul.f32 %v3374_v17, %v17638_v23  ;;  %4067 = vmatprep.subr.bf16.mxu0 %v11199_v5  ;;  %v3314_v51 = vpop.permute.xlu1 %3313  ;;  %v11194_v50 = vpack.c.bf16 %v17646_v47, %v17645_v60  ;;  %v17647_v18 = vmov 0  }
 0x3d4   :  { %v3341_v0 = vsel %vm1364_vm1, %v17639_v8, %v3314_v51  ;;  %v3371_v56 = vsel %vm1364_vm1, %v3314_v51, %v17640_v46  ;;  %4068 = vmatpush2.bf16.msra.mxu0 %v11198_v20 }
 0x3d5   :  { %v11226_v54 = vpack.c.bf16 %v3389_v44, %v3385_v34  ;;  %v3322_v31 = vpop.permute.xlu0 %3321  ;;  %4069 = vmatprep.subr.bf16.mxu0 %v11195_v3  ;;  %v11227_v7 = vpack.c.bf16 %v3390_v14, %v3386_v33  ;;  %v3377_v16 = vmul.f32 %v3341_v0, %v17637_v43  ;;  %v3378_v20 = vmul.f32 %v3371_v56, %v17638_v23  ;;  %v17650_v34 = vld [vmem:[#allocation89_spill] sm:$0xff] }
 0x3d6   :  { %v3344_v55 = vsel %vm1364_vm1, %v17643_v13, %v3322_v31  ;;  %v3372_v2 = vsel %vm1364_vm1, %v3322_v31, %v17644_v41  ;;  %3978 = vmatmul.mubr.bf16.gmra.mxu1 %v11477_v27  ;;  %v11190_v3 = vpack.c.bf16 %v17649_v39, %v17648_v40 }
 0x3d7   :  { %v3381_v5 = vmul.f32 %v3344_v55, %v17637_v43  ;;  %v3382_v63 = vmul.f32 %v3372_v2, %v17638_v23  ;;  %4106 = vmatprep.subr.bf16.mxu1 %v11227_v7  ;;  %4126 = vmatprep.mubr.bf16.mxu1 %v17647_v18 }
 0x3d8   :  { %4070 = vmatpush2.bf16.msra.mxu0 %v11194_v50  ;;  %4107 = vmatpush1.bf16.msra.mxu1 %v11226_v54 }
 0x3d9   :  { %v11222_v22 = vpack.c.bf16 %v3381_v5, %v3377_v16  ;;  %4071 = vmatprep.subr.bf16.mxu0 %v11191_v11  ;;  %v11223_v17 = vpack.c.bf16 %v3382_v63, %v3378_v20 }
 0x3db   :  { %4108 = vmatprep.subr.bf16.mxu1 %v11223_v17 }
 0x3dc   :  { %4072 = vmatpush2.bf16.msra.mxu0 %v11190_v3  ;;  %4109 = vmatpush1.bf16.msra.mxu1 %v11222_v22 }
 0x3df   :  { %4074 = vmatmul.mubr.bf16.vlgmr.msra.gmra.mxu0 %v13642_v37  ;;  %10240 = vmatmul.mubr.msk.bf16.vlgmr.msra.gmra.mxu1 %vm1976_vm3, %v17650_v34 }
 0x3e0   :  { %4083 = vmatprep.mubr.bf16.mxu0 %v11475_v15  ;;  %4136 = vmatprep.mubr.bf16.mxu1 %v17647_v18  ;;  %v13705_v33 = vpop.permute.xlu1 %3531 }
 0x3e2   :  { %v13711_v54 = vpop.permute.xlu0 %3536 }
 0x3e4   :  { %v13707_v44 = vpop.permute.xlu1 %3521 }
 0x3e6   :  { %v13721_v57 = vpop.permute.xlu0 %3526 }
 0x3e7   :  { %4084 = vmatmul.mubr.bf16.gmra.mxu0 %v11477_v27  ;;  %10241 = vmatmul.mubr.msk.bf16.gmra.mxu1 %vm1976_vm3, %v13243_v35 }
 0x3e8   :  { %5974 = vmatprep.mubr.bf16.mxu0 %v17647_v18 }
 0x41f   :  { %v4022_v14 = vpop.f32.mrf.mxu0 }
 0x421   :  { %v4024_v46 = vpop.f32.mrf.mxu0 }
 0x423   :  { %v4026_v16 = vpop.f32.mrf.mxu0 }
 0x425   :  { %v4028_v60 = vpop.f32.mrf.mxu0 }
 0x427   :  { %v4032_v22 = vpop.f32.mrf.mxu0 }
 0x429   :  { %v4034_v39 = vpop.f32.mrf.mxu0 }
 0x48e   :  { %v3969_v51 = vpop.f32.mrf.mxu1 }
 0x48f   :  { %v3970_v37 = vadd.f32 %v3969_v51, %v13707_v44 }
 0x490   :  { %v3971_v8 = vpop.f32.mrf.mxu1 }
 0x491   :  { %v4023_v0 = vadd.f32 %v4022_v14, %v3970_v37  ;;  %v3972_v15 = vadd.f32 %v3971_v8, %v13707_v44  ;;  %v4036_v8 = vpop.f32.mrf.mxu0 }
 0x492   :  { %v3973_v45 = vpop.f32.mrf.mxu1 }
 0x493   :  { %vm4147_vm11 = vcmp.gt.f32.partialorder %v4023_v0, 0.0  ;;  %v4163_v27 = vmul.f32 0.01, %v4023_v0  ;;  %v4025_v56 = vadd.f32 %v4024_v46, %v3972_v15  ;;  %v3974_v11 = vadd.f32 %v3973_v45, %v13721_v57 }
 0x494   :  { %v3975_v55 = vpop.f32.mrf.mxu1 }
 0x495   :  { %v13713_v35 = vsel %vm4147_vm11, %v4023_v0, %v4163_v27  ;;  %vm4148_vm12 = vcmp.gt.f32.partialorder %v4025_v56, 0.0  ;;  %v4164_v31 = vmul.f32 0.01, %v4025_v56  ;;  %v4027_v13 = vadd.f32 %v4026_v16, %v3974_v11  ;;  %v4038_v16 = vpop.f32.mrf.mxu0 }
 0x496   :  { %17651 = vst [vmem:[#allocation79_spill] sm:$0xff] %v13713_v35  ;;  %4657 = vrot.lane.b32.xlu1 %v13713_v35, %s11614_s2  ;;  %v3976_v2 = vadd.f32 %v3975_v55, %v13721_v57  ;;  %v3979_v5 = vpop.f32.mrf.mxu1 }
 0x497   :  { %v13717_v7 = vsel %vm4148_vm12, %v4025_v56, %v4164_v31  ;;  %v4167_v41 = vmul.f32 0.01, %v4027_v13  ;;  %vm4151_vm13 = vcmp.gt.f32.partialorder %v4027_v13, 0.0  ;;  %v3980_v0 = vadd.f32 %v3979_v5, %v13705_v33 }
 0x498   :  { %17652 = vst [vmem:[#allocation77_spill] sm:$0xff] %v13717_v7  ;;  %4659 = vrot.lane.b32.xlu0 %v13717_v7, %s11614_s2  ;;  %v4029_v50 = vadd.f32 %v4028_v60, %v3976_v2  ;;  %v3981_v17 = vpop.f32.mrf.mxu1 }
 0x499   :  { %v13739_v47 = vsel %vm4151_vm13, %v4027_v13, %v4167_v41  ;;  %v3982_v40 = vadd.f32 %v3981_v17, %v13705_v33  ;;  %v4033_v46 = vadd.f32 %v4032_v22, %v3980_v0 }
 0x49a   :  { %5261 = vrot.lane.b32.xlu1 %v13713_v35, %s11615_s6  ;;  %17653 = vst [vmem:[#allocation86_spill] sm:$0xff] %v13739_v47  ;;  %v4168_v20 = vmul.f32 0.01, %v4029_v50  ;;  %vm4152_vm14 = vcmp.gt.f32.partialorder %v4029_v50, 0.0  ;;  %v3983_v51 = vpop.f32.mrf.mxu1 }
 0x49b   :  { %v4035_v3 = vadd.f32 %v4034_v39, %v3982_v40  ;;  %v3984_v37 = vadd.f32 %v3983_v51, %v13711_v54  ;;  %v4171_v31 = vmul.f32 0.01, %v4033_v46  ;;  %vm4155_vm10 = vcmp.gt.f32.partialorder %v4033_v46, 0.0 }
 0x49c   :  { %4519 = vrot.lane.b32.xlu0 %v13717_v7, %s11616_s27  ;;  %v13749_v63 = vsel %vm4152_vm14, %v4029_v50, %v4168_v20  ;;  %v3985_v56 = vpop.f32.mrf.mxu1 }
 0x49d   :  { %17654 = vst [vmem:[#allocation82_spill] sm:$0xff] %v13749_v63  ;;  %v4172_v34 = vmul.f32 0.01, %v4035_v3  ;;  %vm4156_vm15 = vcmp.gt.f32.partialorder %v4035_v3, 0.0  ;;  %v4037_v15 = vadd.f32 %v4036_v8, %v3984_v37  ;;  %v3986_v11 = vadd.f32 %v3985_v56, %v13711_v54 }
 0x49e   :  { %4517 = vrot.lane.b32.xlu1 %v13713_v35, %s11616_s27  ;;  %v13793_v13 = vsel %vm4155_vm10, %v4033_v46, %v4171_v31 }
 0x49f   :  { %v13768_v14 = vsel %vm4156_vm15, %v4035_v3, %v4172_v34  ;;  %v4175_v27 = vmul.f32 0.01, %v4037_v15  ;;  %vm4159_vm9 = vcmp.gt.f32.partialorder %v4037_v15, 0.0  ;;  %17657 = vst [vmem:[#allocation81_spill] sm:$0xff] %v13793_v13  ;;  %v4039_v55 = vadd.f32 %v4038_v16, %v3986_v11  ;;  %v4075_v41 = vpop.f32.mrf.mxu0  ;;  %v4128_v50 = vpop.f32.mrf.mxu1 }
 0x4a0   :  { %4379 = vrot.lane.b32.xlu0 %v13717_v7, %s11618_s28  ;;  %17655 = vst [vmem:[#allocation74_spill] sm:$0xff] %v13768_v14  ;;  %v4076_v60 = vadd.f32 %v4075_v41, %v13707_v44 }
 0x4a1   :  { %v13788_v45 = vsel %vm4159_vm9, %v4037_v15, %v4175_v27  ;;  %v4176_v2 = vmul.f32 0.01, %v4039_v55  ;;  %vm4160_vm11 = vcmp.gt.f32.partialorder %v4039_v55, 0.0  ;;  %v4077_v40 = vpop.f32.mrf.mxu0  ;;  %v4130_v3 = vpop.f32.mrf.mxu1 }
 0x4a2   :  { %4377 = vrot.lane.b32.xlu1 %v13713_v35, %s11618_s28  ;;  %17656 = vst [vmem:[#allocation76_spill] sm:$0xff] %v13788_v45  ;;  %v4129_v5 = vadd.f32 %v4128_v50, %v4076_v60 }
 0x4a3   :  { %v13806_v20 = vsel %vm4160_vm11, %v4039_v55, %v4176_v2  ;;  %v4079_v39 = vpop.f32.mrf.mxu0  ;;  %v4132_v51 = vpop.f32.mrf.mxu1 }
 0x4a4   :  { %4239 = vrot.lane.b32.xlu0 %v13717_v7, %s11619_s29  ;;  %17658 = vst [vmem:[#allocation78_spill] sm:$0xff] %v13806_v20  ;;  %v4165_v22 = vmul.f32 0.01, %v4129_v5  ;;  %vm4149_vm12 = vcmp.gt.f32.partialorder %v4129_v5, 0.0  ;;  %v4080_v34 = vadd.f32 %v4079_v39, %v13721_v57 }
 0x4a5   :  { %v4081_v15 = vpop.f32.mrf.mxu0  ;;  %v4134_v27 = vpop.f32.mrf.mxu1 }
 0x4a6   :  { %4237 = vrot.lane.b32.xlu1 %v13713_v35, %s11619_s29  ;;  %v13816_v17 = vsel %vm4149_vm12, %v4129_v5, %v4165_v22  ;;  %v4133_v37 = vadd.f32 %v4132_v51, %v4080_v34  ;;  %v4082_v46 = vadd.f32 %v4081_v15, %v13721_v57  ;;  %v4078_v15 = vadd.f32 %v4077_v40, %v13707_v44 }
 0x4a7   :  { %17659 = vst [vmem:[#allocation67_spill] sm:$0xff] %v13816_v17  ;;  %v4085_v2 = vpop.f32.mrf.mxu0  ;;  %v4138_v22 = vpop.f32.mrf.mxu1 }
 0x4a8   :  { %5269 = vrot.lane.b32.xlu0 %v13739_v47, %s11615_s6  ;;  %v4169_v8 = vmul.f32 0.01, %v4133_v37  ;;  %vm4153_vm13 = vcmp.gt.f32.partialorder %v4133_v37, 0.0  ;;  %v4135_v56 = vadd.f32 %v4134_v27, %v4082_v46  ;;  %v4086_v5 = vadd.f32 %v4085_v2, %v13705_v33 }
 0x4aa   :  { %5121 = vrot.lane.b32.xlu1 %v13713_v35, %s11620_s30  ;;  %v13839_v0 = vsel %vm4153_vm13, %v4133_v37, %v4169_v8  ;;  %v4170_v16 = vmul.f32 0.01, %v4135_v56  ;;  %vm4154_vm14 = vcmp.gt.f32.partialorder %v4135_v56, 0.0  ;;  %v4139_v51 = vadd.f32 %v4138_v22, %v4086_v5  ;;  %v4087_v37 = vpop.f32.mrf.mxu0 }
 0x4ab   :  { %17660 = vst [vmem:[#allocation70_spill] sm:$0xff] %v13839_v0  ;;  %v4131_v5 = vadd.f32 %v4130_v3, %v4078_v15  ;;  %v4088_v38 = vadd.f32 %v4087_v37, %v13705_v33 }
 0x4ac   :  { %5129 = vrot.lane.b32.xlu0 %v13739_v47, %s11620_s30  ;;  %v13874_v41 = vsel %vm4154_vm14, %v4135_v56, %v4170_v16  ;;  %v4173_v27 = vmul.f32 0.01, %v4139_v51  ;;  %v4140_v56 = vpop.f32.mrf.mxu1  ;;  %vm4157_vm15 = vcmp.gt.f32.partialorder %v4139_v51, 0.0  ;;  %v4089_v16 = vpop.f32.mrf.mxu0 }
 0x4ad   :  { %17662 = vst [vmem:[#allocation61_spill] sm:$0xff] %v13874_v41  ;;  %v4090_v40 = vadd.f32 %v4089_v16, %v13711_v54  ;;  %v4166_v25 = vmul.f32 0.01, %v4131_v5  ;;  %vm4150_vm9 = vcmp.gt.f32.partialorder %v4131_v5, 0.0 }
 0x4ae   :  { %5263 = vrot.lane.b32.xlu1 %v13717_v7, %s11615_s6  ;;  %v13910_v44 = vsel %vm4157_vm15, %v4139_v51, %v4173_v27  ;;  %v4142_v23 = vpop.f32.mrf.mxu1  ;;  %v4091_v6 = vpop.f32.mrf.mxu0 }
 0x4af   :  { %17668 = vst [vmem:[#allocation85_spill] sm:$0xff] %v13910_v44  ;;  %v4143_v3 = vadd.f32 %v4142_v23, %v4090_v40  ;;  %v13925_v15 = vsel %vm4150_vm9, %v4131_v5, %v4166_v25  ;;  %v4092_v53 = vadd.f32 %v4091_v6, %v13711_v54 }
 0x4b0   :  { %4665 = vrot.lane.b32.xlu0 %v13749_v63, %s11614_s2  ;;  %17670 = vst [vmem:[#allocation71_spill] sm:$0xff] %v13925_v15  ;;  %v4144_v32 = vpop.f32.mrf.mxu1 }
 0x4b1   :  { %v4177_v16 = vmul.f32 0.01, %v4143_v3  ;;  %vm4161_vm10 = vcmp.gt.f32.partialorder %v4143_v3, 0.0  ;;  %v4145_v33 = vadd.f32 %v4144_v32, %v4092_v53 }
 0x4b2   :  { %5123 = vrot.lane.b32.xlu1 %v13717_v7, %s11620_s30 }
 0x4b3   :  { %v13939_v40 = vsel %vm4161_vm10, %v4143_v3, %v4177_v16  ;;  %v4178_v54 = vmul.f32 0.01, %v4145_v33  ;;  %vm4162_vm12 = vcmp.gt.f32.partialorder %v4145_v33, 0.0 }
 0x4b4   :  { %4525 = vrot.lane.b32.xlu0 %v13749_v63, %s11616_s27  ;;  %17672 = vst [vmem:[#allocation49_spill] sm:$0xff] %v13939_v40 }
 0x4b6   :  { %4983 = vrot.lane.b32.xlu1 %v13717_v7, %s11621_s9 }
 0x4b8   :  { %4385 = vrot.lane.b32.xlu0 %v13749_v63, %s11618_s28 }
 0x4ba   :  { %4663 = vrot.lane.b32.xlu1 %v13739_v47, %s11614_s2 }
 0x4bc   :  { %4245 = vrot.lane.b32.xlu0 %v13749_v63, %s11619_s29 }
 0x4be   :  { %4523 = vrot.lane.b32.xlu1 %v13739_v47, %s11616_s27 }
 0x4c0   :  { %4671 = vrot.lane.b32.xlu0 %v13768_v14, %s11614_s2 }
 0x4c2   :  { %4383 = vrot.lane.b32.xlu1 %v13739_v47, %s11618_s28 }
 0x4c4   :  { %4531 = vrot.lane.b32.xlu0 %v13768_v14, %s11616_s27 }
 0x4c6   :  { %4243 = vrot.lane.b32.xlu1 %v13739_v47, %s11619_s29 }
 0x4c8   :  { %4391 = vrot.lane.b32.xlu0 %v13768_v14, %s11618_s28 }
 0x4ca   :  { %5271 = vrot.lane.b32.xlu1 %v13749_v63, %s11615_s6 }
 0x4cc   :  { %4251 = vrot.lane.b32.xlu0 %v13768_v14, %s11619_s29 }
 0x4ce   :  { %5131 = vrot.lane.b32.xlu1 %v13749_v63, %s11620_s30 }
 0x4d0   :  { %5285 = vrot.lane.b32.xlu0 %v13788_v45, %s11615_s6 }
 0x4d2   :  { %4669 = vrot.lane.b32.xlu1 %v13793_v13, %s11614_s2 }
 0x4d4   :  { %5145 = vrot.lane.b32.xlu0 %v13788_v45, %s11620_s30 }
 0x4d6   :  { %5277 = vrot.lane.b32.xlu1 %v13793_v13, %s11615_s6 }
 0x4d8   :  { %5005 = vrot.lane.b32.xlu0 %v13788_v45, %s11621_s9 }
 0x4da   :  { %4529 = vrot.lane.b32.xlu1 %v13793_v13, %s11616_s27 }
 0x4dc   :  { %4677 = vrot.lane.b32.xlu0 %v13806_v20, %s11614_s2 }
 0x4de   :  { %4389 = vrot.lane.b32.xlu1 %v13793_v13, %s11618_s28 }
 0x4e0   :  { %4537 = vrot.lane.b32.xlu0 %v13806_v20, %s11616_s27 }
 0x4e2   :  { %4249 = vrot.lane.b32.xlu1 %v13793_v13, %s11619_s29 }
 0x4e4   :  { %5265 = vrot.lane.b32.xlu0 %v13816_v17, %s11615_s6 }
 0x4e6   :  { %5137 = vrot.lane.b32.xlu1 %v13793_v13, %s11620_s30 }
 0x4e8   :  { %4397 = vrot.lane.b32.xlu0 %v13806_v20, %s11618_s28 }
 0x4ea   :  { %4997 = vrot.lane.b32.xlu1 %v13793_v13, %s11621_s9 }
 0x4ec   :  { %4257 = vrot.lane.b32.xlu0 %v13806_v20, %s11619_s29 }
 0x4ee   :  { %5279 = vrot.lane.b32.xlu1 %v13768_v14, %s11615_s6 }
 0x4f0   :  { %5125 = vrot.lane.b32.xlu0 %v13816_v17, %s11620_s30 }
 0x4f2   :  { %5139 = vrot.lane.b32.xlu1 %v13768_v14, %s11620_s30 }
 0x4f4   :  { %4985 = vrot.lane.b32.xlu0 %v13816_v17, %s11621_s9 }
 0x4f6   :  { %4999 = vrot.lane.b32.xlu1 %v13768_v14, %s11621_s9 }
 0x4f8   :  { %5273 = vrot.lane.b32.xlu0 %v13839_v0, %s11615_s6 }
 0x4fa   :  { %4675 = vrot.lane.b32.xlu1 %v13788_v45, %s11614_s2 }
 0x4fc   :  { %4667 = vrot.lane.b32.xlu0 %v13839_v0, %s11614_s2 }
 0x4fe   :  { %4535 = vrot.lane.b32.xlu1 %v13788_v45, %s11616_s27 }
 0x500   :  { %4527 = vrot.lane.b32.xlu0 %v13839_v0, %s11616_s27 }
 0x502   :  { %4395 = vrot.lane.b32.xlu1 %v13788_v45, %s11618_s28 }
 0x504   :  { %4387 = vrot.lane.b32.xlu0 %v13839_v0, %s11618_s28 }
 0x506   :  { %4255 = vrot.lane.b32.xlu1 %v13788_v45, %s11619_s29 }
 0x508   :  { %5133 = vrot.lane.b32.xlu0 %v13839_v0, %s11620_s30  ;;  %v13860_v31 = vpop.permute.xlu1 %4657 }
 0x50a   :  { %v13862_v11 = vpop.permute.xlu0 %4659  ;;  %5287 = vrot.lane.b32.xlu1 %v13806_v20, %s11615_s6 }
 0x50c   :  { %4247 = vrot.lane.b32.xlu0 %v13839_v0, %s11619_s29  ;;  %v13868_v57 = vpop.permute.xlu1 %5261 }
 0x50d   :  { %17661 = vst [vmem:[#allocation60_spill] sm:$0xff] %v13868_v57 }
 0x50e   :  { %v13870_v55 = vpop.permute.xlu0 %4519  ;;  %4661 = vrot.lane.b32.xlu1 %v13816_v17, %s11614_s2 }
 0x510   :  { %4647 = vrot.lane.b32.xlu0 %v13874_v41, %s11614_s2  ;;  %v13878_v60 = vpop.permute.xlu1 %4517 }
 0x512   :  { %v13880_v50 = vpop.permute.xlu0 %4379  ;;  %4521 = vrot.lane.b32.xlu1 %v13816_v17, %s11616_s27 }
 0x514   :  { %4507 = vrot.lane.b32.xlu0 %v13874_v41, %s11616_s27  ;;  %v13887_v39 = vpop.permute.xlu1 %4377 }
 0x516   :  { %v13889_v34 = vpop.permute.xlu0 %4239  ;;  %5147 = vrot.lane.b32.xlu1 %v13806_v20, %s11620_s30 }
 0x517   :  { %17663 = vst [vmem:[#allocation83_spill] sm:$0xff] %v13889_v34 }
 0x518   :  { %4367 = vrot.lane.b32.xlu0 %v13874_v41, %s11618_s28  ;;  %v13895_v8 = vpop.permute.xlu1 %4237 }
 0x519   :  { %17664 = vst [vmem:[#allocation88_spill] sm:$0xff] %v13895_v8 }
 0x51a   :  { %v13898_v46 = vpop.permute.xlu0 %5269  ;;  %4381 = vrot.lane.b32.xlu1 %v13816_v17, %s11618_s28 }
 0x51b   :  { %17665 = vst [vmem:[#allocation90_spill] sm:$0xff] %v13898_v46 }
 0x51c   :  { %4215 = vrot.lane.b32.xlu0 %v13874_v41, %s11619_s29  ;;  %v13904_v2 = vpop.permute.xlu1 %5121 }
 0x51d   :  { %17666 = vst [vmem:[#allocation80_spill] sm:$0xff] %v13904_v2 }
 0x51e   :  { %v13906_v22 = vpop.permute.xlu0 %5129  ;;  %5007 = vrot.lane.b32.xlu1 %v13806_v20, %s11621_s9 }
 0x51f   :  { %17667 = vst [vmem:[#allocation69_spill] sm:$0xff] %v13906_v22  ;;  %v4141_v22 = vadd.f32 %v4140_v56, %v4088_v38  ;;  %v14001_v56 = vsel %vm4162_vm12, %v4145_v33, %v4178_v54 }
 0x520   :  { %5281 = vrot.lane.b32.xlu0 %v13910_v44, %s11615_s6  ;;  %v13915_v43 = vpop.permute.xlu1 %5263  ;;  %17679 = vst [vmem:[#allocation47_spill] sm:$0xff] %v14001_v56 }
 0x521   :  { %vm4158_vm11 = vcmp.gt.f32.partialorder %v4141_v22, 0.0 }
 0x522   :  { %v13917_v21 = vpop.permute.xlu0 %4665  ;;  %4241 = vrot.lane.b32.xlu1 %v13816_v17, %s11619_s29 }
 0x524   :  { %5141 = vrot.lane.b32.xlu0 %v13910_v44, %s11620_s30  ;;  %v13923_v51 = vpop.permute.xlu1 %5123 }
 0x525   :  { %17669 = vst [vmem:[#allocation73_spill] sm:$0xff] %v13923_v51  ;;  %v4174_v51 = vmul.f32 0.01, %v4141_v22 }
 0x526   :  { %v13927_v27 = vpop.permute.xlu0 %4525  ;;  %4645 = vrot.lane.b32.xlu1 %v13925_v15, %s11614_s2 }
 0x527   :  { %v13995_v32 = vsel %vm4158_vm11, %v4141_v22, %v4174_v51 }
 0x528   :  { %5001 = vrot.lane.b32.xlu0 %v13910_v44, %s11621_s9  ;;  %v13933_v48 = vpop.permute.xlu1 %4983  ;;  %17677 = vst [vmem:[#allocation48_spill] sm:$0xff] %v13995_v32 }
 0x529   :  { %17671 = vst [vmem:[#allocation65_spill] sm:$0xff] %v13933_v48 }
 0x52a   :  { %v13935_v23 = vpop.permute.xlu0 %4385  ;;  %4505 = vrot.lane.b32.xlu1 %v13925_v15, %s11616_s27 }
 0x52c   :  { %5289 = vrot.lane.b32.xlu0 %v13939_v40, %s11615_s6  ;;  %v13943_v25 = vpop.permute.xlu1 %4663 }
 0x52e   :  { %v13945_v5 = vpop.permute.xlu0 %4245  ;;  %4365 = vrot.lane.b32.xlu1 %v13925_v15, %s11618_s28 }
 0x530   :  { %4679 = vrot.lane.b32.xlu0 %v13939_v40, %s11614_s2  ;;  %v13951_v4 = vpop.permute.xlu1 %4523 }
 0x532   :  { %v13953_v42 = vpop.permute.xlu0 %4671  ;;  %4213 = vrot.lane.b32.xlu1 %v13925_v15, %s11619_s29 }
 0x534   :  { %4539 = vrot.lane.b32.xlu0 %v13939_v40, %s11616_s27  ;;  %v13959_v3 = vpop.permute.xlu1 %4383 }
 0x536   :  { %v13961_v16 = vpop.permute.xlu0 %4531  ;;  %4673 = vrot.lane.b32.xlu1 %v13910_v44, %s11614_s2 }
 0x538   :  { %4399 = vrot.lane.b32.xlu0 %v13939_v40, %s11618_s28  ;;  %v13967_v19 = vpop.permute.xlu1 %4243 }
 0x539   :  { %17673 = vst [vmem:[#allocation52_spill] sm:$0xff] %v13967_v19 }
 0x53a   :  { %v13970_v48 = vpop.permute.xlu0 %4391  ;;  %4533 = vrot.lane.b32.xlu1 %v13910_v44, %s11616_s27 }
 0x53c   :  { %5149 = vrot.lane.b32.xlu0 %v13939_v40, %s11620_s30  ;;  %v13977_v2 = vpop.permute.xlu1 %5271 }
 0x53e   :  { %v13979_v9 = vpop.permute.xlu0 %4251  ;;  %4393 = vrot.lane.b32.xlu1 %v13910_v44, %s11618_s28 }
 0x53f   :  { %17674 = vst [vmem:[#allocation50_spill] sm:$0xff] %v13979_v9 }
 0x540   :  { %4259 = vrot.lane.b32.xlu0 %v13939_v40, %s11619_s29  ;;  %v13985_v37 = vpop.permute.xlu1 %5131 }
 0x541   :  { %17675 = vst [vmem:[#allocation51_spill] sm:$0xff] %v13985_v37 }
 0x542   :  { %v13987_v6 = vpop.permute.xlu0 %5285  ;;  %4253 = vrot.lane.b32.xlu1 %v13910_v44, %s11619_s29 }
 0x543   :  { %17676 = vst [vmem:[#allocation46_spill] sm:$0xff] %v13987_v6 }
 0x544   :  { %5009 = vrot.lane.b32.xlu0 %v13939_v40, %s11621_s9  ;;  %v13993_v38 = vpop.permute.xlu1 %4669 }
 0x546   :  { %v13997_v53 = vpop.permute.xlu0 %5145  ;;  %4649 = vrot.lane.b32.xlu1 %v13995_v32, %s11614_s2 }
 0x547   :  { %17678 = vst [vmem:[#allocation45_spill] sm:$0xff] %v13997_v53 }
 0x548   :  { %4651 = vrot.lane.b32.xlu0 %v14001_v56, %s11614_s2  ;;  %v14005_v37 = vpop.permute.xlu1 %5277 }
 0x549   :  { %17680 = vst [vmem:[#allocation84_spill] sm:$0xff] %v14005_v37 }
 0x54a   :  { %v14007_v59 = vpop.permute.xlu0 %5005  ;;  %4991 = vrot.lane.b32.xlu1 %v13749_v63, %s11621_s9 }
 0x54b   :  { %17681 = vst [vmem:[#allocation66_spill] sm:$0xff] %v14007_v59 }
 0x54c   :  { %4993 = vrot.lane.b32.xlu0 %v13839_v0, %s11621_s9  ;;  %v14013_v22 = vpop.permute.xlu1 %4529 }
 0x54e   :  { %v14015_v51 = vpop.permute.xlu0 %4677  ;;  %4509 = vrot.lane.b32.xlu1 %v13995_v32, %s11616_s27 }
 0x54f   :  { %17682 = vst [vmem:[#allocation87_spill] sm:$0xff] %v14015_v51 }
 0x550   :  { %4511 = vrot.lane.b32.xlu0 %v14001_v56, %s11616_s27  ;;  %v14021_v33 = vpop.permute.xlu1 %4389 }
 0x552   :  { %v14023_v54 = vpop.permute.xlu0 %4537  ;;  %4369 = vrot.lane.b32.xlu1 %v13995_v32, %s11618_s28 }
 0x554   :  { %4989 = vrot.lane.b32.xlu0 %v13739_v47, %s11621_s9  ;;  %v14029_v59 = vpop.permute.xlu1 %4249 }
 0x555   :  { %17683 = vst [vmem:[#allocation68_spill] sm:$0xff] %v14029_v59 }
 0x556   :  { %v14031_v53 = vpop.permute.xlu0 %5265  ;;  %4217 = vrot.lane.b32.xlu1 %v13995_v32, %s11619_s29 }
 0x557   :  { %17684 = vst [vmem:[#allocation63_spill] sm:$0xff] %v14031_v53 }
 0x558   :  { %4371 = vrot.lane.b32.xlu0 %v14001_v56, %s11618_s28  ;;  %v14037_v36 = vpop.permute.xlu1 %5137 }
 0x559   :  { %17685 = vst [vmem:[#allocation64_spill] sm:$0xff] %v14037_v36 }
 0x55a   :  { %v14039_v12 = vpop.permute.xlu0 %4397  ;;  %4981 = vrot.lane.b32.xlu1 %v13713_v35, %s11621_s9 }
 0x55c   :  { %4861 = vrot.lane.b32.xlu0 %v13910_v44, %s11622_s10  ;;  %v14045_v26 = vpop.permute.xlu1 %4997 }
 0x55d   :  { %17686 = vst [vmem:[#allocation72_spill] sm:$0xff] %v14045_v26 }
 0x55e   :  { %v14047_v28 = vpop.permute.xlu0 %4257  ;;  %5143 = vrot.lane.b32.xlu1 %v13995_v32, %s11620_s30 }
 0x55f   :  { %17687 = vst [vmem:[#allocation58_spill] sm:$0xff] %v14047_v28 }
 0x560   :  { %4219 = vrot.lane.b32.xlu0 %v14001_v56, %s11619_s29  ;;  %v14053_v10 = vpop.permute.xlu1 %5279 }
 0x561   :  { %v5299_v52 = vsel %vm1364_vm1, %v14005_v37, %v14053_v10 }
 0x562   :  { %v14055_v36 = vpop.permute.xlu0 %5125  ;;  %4859 = vrot.lane.b32.xlu1 %v13768_v14, %s11622_s10 }
 0x563   :  { %17688 = vst [vmem:[#allocation56_spill] sm:$0xff] %v14055_v36 }
 0x564   :  { %4869 = vrot.lane.b32.xlu0 %v13939_v40, %s11622_s10  ;;  %v14061_v44 = vpop.permute.xlu1 %5139  ;;  %v4687_v40 = vsel %vm664_vm0, %v13993_v38, %v13953_v42 }
 0x565   :  { %17689 = vst [vmem:[#allocation55_spill] sm:$0xff] %v14061_v44 }
 0x566   :  { %v14063_v26 = vpop.permute.xlu0 %4985  ;;  %4867 = vrot.lane.b32.xlu1 %v13806_v20, %s11622_s10  ;;  %v17694_v20 = vld [vmem:[#allocation13_spill] sm:$0xff] }
 0x567   :  { %17690 = vst [vmem:[#allocation75_spill] sm:$0xff] %v14063_v26  ;;  %v4722_v26 = vmul.f32 %v4687_v40, %v17694_v20 }
 0x568   :  { %4865 = vrot.lane.b32.xlu0 %v13788_v45, %s11622_s10  ;;  %v14069_v30 = vpop.permute.xlu1 %4999 }
 0x569   :  { %17691 = vst [vmem:[#allocation62_spill] sm:$0xff] %v14069_v30 }
 0x56a   :  { %v14071_v1 = vpop.permute.xlu0 %5273  ;;  %4857 = vrot.lane.b32.xlu1 %v13793_v13, %s11622_s10 }
 0x56b   :  { %17692 = vst [vmem:[#allocation57_spill] sm:$0xff] %v14071_v1 }
 0x56c   :  { %5135 = vrot.lane.b32.xlu0 %v13874_v41, %s11620_s30  ;;  %v14080_v14 = vpop.permute.xlu1 %4675 }
 0x56d   :  { %17693 = vst [vmem:[#allocation59_spill] sm:$0xff] %v14080_v14  ;;  %v4690_v45 = vsel %vm664_vm0, %v14080_v14, %v14015_v51 }
 0x56e   :  { %v4726_v30 = vmul.f32 %v4690_v45, %v17694_v20  ;;  %v14087_v36 = vpop.permute.xlu0 %4667  ;;  %5127 = vrot.lane.b32.xlu1 %v13925_v15, %s11620_s30 }
 0x570   :  { %4845 = vrot.lane.b32.xlu0 %v13816_v17, %s11622_s10  ;;  %v14093_v13 = vpop.permute.xlu1 %4535  ;;  %v11257_v44 = vpack.c.bf16 %v4726_v30, %v4722_v26  ;;  %v14124_v17 = vld [vmem:[%s17069_s4 + $0x34] ss:$12 sps:$4 sm:$0xff]  }
 0x571   :  { %5921 = vmatprep.mubr.bf16.mxu1 %v14124_v17 }
 0x572   :  { %v14095_v28 = vpop.permute.xlu0 %4527  ;;  %4843 = vrot.lane.b32.xlu1 %v13717_v7, %s11622_s10  ;;  %5889 = vmatprep.subr.bf16.mxu1 %v11257_v44 }
 0x574   :  { %4853 = vrot.lane.b32.xlu0 %v13839_v0, %s11622_s10  ;;  %v14101_v45 = vpop.permute.xlu1 %4395 }
 0x576   :  { %v14103_v40 = vpop.permute.xlu0 %4387  ;;  %4851 = vrot.lane.b32.xlu1 %v13749_v63, %s11622_s10 }
 0x578   :  { %5151 = vrot.lane.b32.xlu0 %v14001_v56, %s11620_s30  ;;  %v14109_v30 = vpop.permute.xlu1 %4255 }
 0x579   :  { %17695 = vst [vmem:[#allocation53_spill] sm:$0xff] %v14109_v30 }
 0x57a   :  { %v14111_v26 = vpop.permute.xlu0 %5133  ;;  %4841 = vrot.lane.b32.xlu1 %v13713_v35, %s11622_s10 }
 0x57b   :  { %17696 = vst [vmem:[#allocation54_spill] sm:$0xff] %v14111_v26 }
 0x57c   :  { %4849 = vrot.lane.b32.xlu0 %v13739_v47, %s11622_s10  ;;  %v5288_v44 = vpop.permute.xlu1 %5287 }
 0x57e   :  { %v14117_v0 = vpop.permute.xlu0 %4247  ;;  %5003 = vrot.lane.b32.xlu1 %v13995_v32, %s11621_s9 }
 0x57f   :  { %17697 = vst [vmem:[#allocation89_spill] sm:$0xff] %v14117_v0 }
 0x580   :  { %5011 = vrot.lane.b32.xlu0 %v14001_v56, %s11621_s9  ;;  %v14128_v63 = vpop.permute.xlu1 %4661 }
 0x582   :  { %v14131_v35 = vpop.permute.xlu0 %4647  ;;  %4987 = vrot.lane.b32.xlu1 %v13925_v15, %s11621_s9 }
 0x584   :  { %4995 = vrot.lane.b32.xlu0 %v13874_v41, %s11621_s9  ;;  %v14137_v47 = vpop.permute.xlu1 %4521 }
 0x586   :  { %v14139_v7 = vpop.permute.xlu0 %4507  ;;  %4863 = vrot.lane.b32.xlu1 %v13995_v32, %s11622_s10 }
 0x587   :  { %17698 = vst [vmem:[#allocation91_spill] sm:$0xff] %v14139_v7 }
 0x588   :  { %4871 = vrot.lane.b32.xlu0 %v14001_v56, %s11622_s10  ;;  %v14145_v26 = vpop.permute.xlu1 %5147 }
 0x589   :  { %17699 = vst [vmem:[#allocation92_spill] sm:$0xff] %v14145_v26 }
 0x58a   :  { %v14147_v0 = vpop.permute.xlu0 %4367  ;;  %4847 = vrot.lane.b32.xlu1 %v13925_v15, %s11622_s10 }
 0x58b   :  { %17700 = vst [vmem:[#allocation93_spill] sm:$0xff] %v14147_v0  ;;  %v10252_v0 = vld [vmem:[%s17070_s5 + $0x30] sm:$0xff] }
 0x58c   :  { %4855 = vrot.lane.b32.xlu0 %v13874_v41, %s11622_s10  ;;  %v14153_v30 = vpop.permute.xlu1 %4381 }
 0x58d   :  { %17701 = vst [vmem:[#allocation94_spill] sm:$0xff] %v14153_v30 }
 0x58e   :  { %v14155_v49 = vpop.permute.xlu0 %4215  ;;  %5283 = vrot.lane.b32.xlu1 %v13995_v32, %s11615_s6 }
 0x58f   :  { %17702 = vst [vmem:[#allocation95_spill] sm:$0xff] %v14155_v49 }
 0x590   :  { %5291 = vrot.lane.b32.xlu0 %v14001_v56, %s11615_s6  ;;  %v14161_v7 = vpop.permute.xlu1 %5007  ;;  %v10253_v56 = vld [vmem:[%s17070_s5 + $0x38] sm:$0xff] }
 0x591   :  { %17703 = vst [vmem:[#allocation96_spill] sm:$0xff] %v14161_v7 }
 0x592   :  { %v14163_v26 = vpop.permute.xlu0 %5281  ;;  %5267 = vrot.lane.b32.xlu1 %v13925_v15, %s11615_s6  ;;  %v10250_v15 = vld [vmem:[%s17070_s5 + $0x20] sm:$0xff] }
 0x593   :  { %17704 = vst [vmem:[#allocation97_spill] sm:$0xff] %v14163_v26 }
 0x594   :  { %5275 = vrot.lane.b32.xlu0 %v13874_v41, %s11615_s6  ;;  %v14172_v49 = vpop.permute.xlu1 %4241  ;;  %v10251_v41 = vld [vmem:[%s17070_s5 + $0x28] sm:$0xff] }
 0x595   :  { %17705 = vst [vmem:[#allocation98_spill] sm:$0xff] %v14172_v49  ;;  %v5302_v49 = vsel %vm1364_vm1, %v13987_v6, %v5288_v44 }
 0x596   :  { %v14177_v32 = vpop.permute.xlu0 %5141  ;;  %5485 = vperm.xlu1 %11462, %v10252_v0   ;;  %v5297_v0 = vsel %vm1364_vm1, %v13977_v2, %v14071_v1  ;;  %v5296_v1 = vsel %vm1364_vm1, %v13898_v46, %v13977_v2 }
 0x597   :  { %17706 = vst [vmem:[#allocation99_spill] sm:$0xff] %v14177_v32 }
 0x598   :  { %5490 = vperm.xlu0 %11461, %v10253_v56   ;;  %v14182_v7 = vpop.permute.xlu1 %4645  ;;  %v5300_v56 = vsel %vm1364_vm1, %v14053_v10, %v14163_v26  ;;  %v17711_v26 = vld [vmem:[#allocation15_spill] sm:$0xff] }
 0x599   :  { %v5334_v14 = vmul.f32 %v5297_v0, %v17711_v26  ;;  %v5338_v29 = vmul.f32 %v5300_v56, %v17711_v26 }
 0x59a   :  { %v14187_v30 = vpop.permute.xlu0 %5001  ;;  %5475 = vperm.xlu1 %11462, %v10250_v15   ;;  %v17710_v15 = vld [vmem:[#allocation16_spill] sm:$0xff] }
 0x59b   :  { %17707 = vst [vmem:[#allocation100_spill] sm:$0xff] %v14187_v30  ;;  %v5341_v6 = vmul.f32 %v5302_v49, %v17710_v15  ;;  %v5337_v51 = vmul.f32 %v5299_v52, %v17710_v15  ;;  %v5293_v49 = vsel %vm1364_vm1, %v13868_v57, %v13915_v43  ;;  %v5333_v2 = vmul.f32 %v5296_v1, %v17710_v15 }
 0x59c   :  { %5480 = vperm.xlu0 %11461, %v10251_v41   ;;  %v14191_v32 = vpop.permute.xlu1 %4505  ;;  %v5294_v41 = vsel %vm1364_vm1, %v13915_v43, %v14031_v53  ;;  %v5329_v46 = vmul.f32 %v5293_v49, %v17710_v15  ;;  %v4401_v49 = vsel %vm340_vm4, %v13887_v39, %v13880_v50  ;;  %v17716_v15 = vld [vmem:[#allocation17_spill] sm:$0xff] }
 0x59d   :  { %17708 = vst [vmem:[#allocation101_spill] sm:$0xff] %v14191_v32  ;;  %v11296_v0 = vpack.c.bf16 %v5341_v6, %v5337_v51  ;;  %v4404_v51 = vsel %vm340_vm4, %v13959_v3, %v13935_v23 }
 0x59e   :  { %v14202_v30 = vpop.permute.xlu0 %5289  ;;  %v14289_v57 = vmul.f32 %v4404_v51, %v12095_v58 }
 0x59f   :  { %17709 = vst [vmem:[#allocation102_spill] sm:$0xff] %v14202_v30  ;;  %v5303_v32 = vsel %vm1364_vm1, %v5288_v44, %v14202_v30  ;;  %v5330_v44 = vmul.f32 %v5294_v41, %v17711_v26  ;;  %v14234_v41 = vld [vmem:[%s17069_s4 + $0x38] ss:$12 sps:$4 sm:$0xff]  }
 0x5a0   :  { %v5342_v10 = vmul.f32 %v5303_v32, %v17711_v26  ;;  %v14216_v37 = vpop.permute.xlu1 %4365  ;;  %17713 = vst [vmem:[#allocation104_spill] sm:$0xff] %v14234_v41  ;;  %17717 = vst [vmem:[#allocation107_spill] sm:$0xff] %v14289_v57  ;;  %v17729_v57 = vld [vmem:[#allocation27_spill] sm:$0xff] }
 0x5a1   :  { %17712 = vst [vmem:[#allocation103_spill] sm:$0xff] %v14216_v37  ;;  %v11293_v32 = vpack.c.bf16 %v5334_v14, %v5330_v44  ;;  %v11292_v37 = vpack.c.bf16 %v5333_v2, %v5329_v46  ;;  %v4684_v14 = vsel %vm664_vm0, %v13943_v25, %v13917_v21  ;;  %v4544_v46 = vsel %vm502_vm2, %v13951_v4, %v13927_v27 }
 0x5a2   :  { %v14223_v53 = vpop.permute.xlu0 %4679  ;;  %v11297_v30 = vpack.c.bf16 %v5342_v10, %v5338_v29  ;;  %v4541_v10 = vsel %vm502_vm2, %v13878_v60, %v13870_v55  ;;  %v4550_v44 = vsel %vm502_vm2, %v14093_v13, %v14023_v54  ;;  %v14280_v26 = vmul.f32 %v4684_v14, %v17694_v20 }
 0x5a3   :  { %v14300_v14 = vmul.f32 %v4541_v10, %v17716_v15  ;;  %v14309_v51 = vmul.f32 %v4550_v44, %v17716_v15  ;;  %v4685_v10 = vsel %vm664_vm0, %v13917_v21, %v14087_v36 }
 0x5a4   :  { %5954 = vmatprep.subr.bf16.mxu0 %v11297_v30  ;;  %v14226_v56 = vpop.permute.xlu1 %4213  ;;  %v4264_v30 = vsel %vm178_vm5, %v13967_v19, %v13945_v5 }
 0x5a5   :  { %5955 = vmatpush1.bf16.msra.mxu0 %v11296_v0  ;;  %v14274_v0 = vld [vmem:[%s17069_s4 + $0x50] ss:$12 sps:$4 sm:$0xff]   ;;  %v14292_v19 = vmul.f32 %v4264_v30, %v17595_v61 }
 0x5a6   :  { %v14229_v52 = vpop.permute.xlu0 %4539  ;;  %5956 = vmatprep.subr.bf16.mxu0 %v11293_v32  ;;  %17715 = vst [vmem:[#allocation106_spill] sm:$0xff] %v14274_v0  ;;  %v4261_v32 = vsel %vm178_vm5, %v13895_v8, %v13889_v34  ;;  %v17731_v34 = vld [vmem:[#allocation53_spill] sm:$0xff] }
 0x5a7   :  { %17718 = vst [vmem:[#allocation108_spill] sm:$0xff] %v14292_v19  ;;  %v14312_v30 = vmul.f32 %v4261_v32, %v17595_v61  ;;  %v4410_v32 = vsel %vm340_vm4, %v14101_v45, %v14039_v12 }
 0x5a8   :  { %v4674_v43 = vpop.permute.xlu1 %4673  ;;  %v14362_v21 = vmul.f32 %v4410_v32, %v12095_v58 }
 0x5a9   :  { %5957 = vmatpush1.bf16.msra.mxu0 %v11292_v37  ;;  %v4681_v37 = vsel %vm664_vm0, %v13860_v31, %v13862_v11  ;;  %17721 = vst [vmem:[#allocation111_spill] sm:$0xff] %v14312_v30 }
 0x5aa   :  { %v14236_v29 = vpop.permute.xlu0 %4399 }
 0x5ac   :  { %v14238_v1 = vpop.permute.xlu1 %4533  ;;  %10404 = vmatmul.mubr.msk.bf16.vlgmr.msra.gmra.mxu0 %vm1976_vm3, %v14234_v41  ;;  %v14283_v41 = vmul.f32 %v4544_v46, %v17716_v15  ;;  %v14303_v46 = vmul.f32 %v4401_v49, %v12095_v58  ;;  %v4545_v49 = vsel %vm502_vm2, %v13927_v27, %v14095_v28 }
 0x5ad   :  { %5984 = vmatprep.mubr.bf16.mxu0 %v17647_v18  ;;  %v14286_v18 = vmul.f32 %v4681_v37, %v17694_v20  ;;  %v4407_v37 = vsel %vm340_vm4, %v14021_v33, %v13970_v48  ;;  %v4267_v20 = vsel %vm178_vm5, %v14029_v59, %v13979_v9 }
 0x5ae   :  { %v14249_v6 = vpop.permute.xlu0 %5149  ;;  %17720 = vst [vmem:[#allocation110_spill] sm:$0xff] %v14303_v46  ;;  %v14339_v27 = vmul.f32 %v4407_v37, %v12095_v58  ;;  %v14357_v37 = vmul.f32 %v4545_v49, %v17582_v24 }
 0x5af   :  { %17714 = vst [vmem:[#allocation105_spill] sm:$0xff] %v14249_v6  ;;  %v4547_v6 = vsel %vm502_vm2, %v14013_v22, %v13961_v16  ;;  %v11253_v59 = vpack.c.bf16 %v14280_v26, %v14286_v18  ;;  %v14351_v26 = vmul.f32 %v4267_v20, %v17595_v61  ;;  %v4683_v20 = vsel %vm664_vm0, %v14128_v63, %v14182_v7 }
 0x5b0   :  { %v14269_v2 = vpop.permute.xlu1 %4393  ;;  %v14328_v44 = vmul.f32 %v4547_v6, %v17716_v15  ;;  %v4682_v6 = vsel %vm664_vm0, %v13862_v11, %v14128_v63  ;;  %v4686_v11 = vsel %vm664_vm0, %v14087_v36, %v14131_v35  ;;  %v4709_v63 = vsel %vm664_vm0, %v14182_v7, %v13860_v31 }
 0x5b1   :  { %v4715_v49 = vmul.f32 %v4682_v6, %v12061_v62  ;;  %v17724_v6 = vld [vmem:[#allocation87_spill] sm:$0xff] }
 0x5b2   :  { %v14297_v8 = vpop.permute.xlu0 %4259  ;;  %v4691_v36 = vsel %vm664_vm0, %v17724_v6, %v14223_v53 }
 0x5b3   :  { %17719 = vst [vmem:[#allocation109_spill] sm:$0xff] %v14297_v8  ;;  %v4727_v9 = vmul.f32 %v4691_v36, %v12061_v62  ;;  %v17732_v36 = vld [vmem:[#allocation101_spill] sm:$0xff] }
 0x5b4   :  { %v14323_v8 = vpop.permute.xlu1 %4253  ;;  %10405 = vmatmul.mubr.msk.bf16.gmra.mxu0 %vm1976_vm3, %v14274_v0  ;;  %v4405_v0 = vsel %vm340_vm4, %v13935_v23, %v14103_v40  ;;  %v4710_v23 = vsel %vm664_vm0, %v14131_v35, %v13943_v25  ;;  %v17726_v25 = vld [vmem:[#allocation59_spill] sm:$0xff] }
 0x5b5   :  { %17722 = vst [vmem:[#allocation112_spill] sm:$0xff] %v14323_v8  ;;  %6027 = vmatprep.mubr.bf16.mxu0 %v14124_v17  ;;  %v14354_v17 = vmul.f32 %v4685_v10, %v12061_v62  ;;  %v4688_v10 = vsel %vm664_vm0, %v13953_v42, %v4674_v43  ;;  %v4542_v42 = vsel %vm502_vm2, %v13870_v55, %v14137_v47  ;;  %v17727_v55 = vld [vmem:[#allocation14_spill] sm:$0xff] }
 0x5b6   :  { %v14344_v15 = vpop.permute.xlu0 %5009  ;;  %v14419_v8 = vmul.f32 %v4542_v42, %v17582_v24 }
 0x5b7   :  { %17723 = vst [vmem:[#allocation113_spill] sm:$0xff] %v14344_v15  ;;  %v17725_v15 = vld [vmem:[#allocation20_spill] sm:$0xff] }
 0x5b8   :  { %v4650_v18 = vpop.permute.xlu1 %4649  ;;  %v4716_v30 = vmul.f32 %v4683_v20, %v17725_v15  ;;  %v14404_v20 = vmul.f32 %v4405_v0, %v17729_v57  ;;  %v11254_v0 = vpack.c.bf16 %v14354_v17, %v4715_v49 }
 0x5b9   :  { %v4689_v32 = vsel %vm664_vm0, %v4674_v43, %v4650_v18  ;;  %v4711_v58 = vsel %vm664_vm0, %v4650_v18, %v13993_v38  ;;  %v4723_v38 = vmul.f32 %v4688_v10, %v12061_v62  ;;  %v17730_v10 = vld [vmem:[#allocation58_spill] sm:$0xff] }
 0x5ba   :  { %v4652_v43 = vpop.permute.xlu0 %4651  ;;  %v4721_v19 = vmul.f32 %v4711_v58, %v17727_v55  ;;  %v4724_v46 = vmul.f32 %v4689_v32, %v17725_v15  ;;  %v4720_v32 = vmul.f32 %v4686_v11, %v17725_v15  ;;  %v4543_v58 = vsel %vm502_vm2, %v14137_v47, %v17732_v36 }
 0x5bb   :  { %v4692_v35 = vsel %vm664_vm0, %v14223_v53, %v4652_v43  ;;  %v4712_v18 = vsel %vm664_vm0, %v4652_v43, %v17726_v25  ;;  %v4270_v53 = vsel %vm178_vm5, %v17731_v34, %v17730_v10  ;;  %v4713_v43 = vmul.f32 %v4709_v63, %v17727_v55  ;;  %v17733_v63 = vld [vmem:[#allocation91_spill] sm:$0xff] }
 0x5bc   :  { %v4725_v7 = vmul.f32 %v4712_v18, %v17727_v55  ;;  %v4728_v31 = vmul.f32 %v4692_v35, %v17725_v15  ;;  %v14401_v6 = vpop.permute.xlu1 %4991  ;;  %v11258_v34 = vpack.c.bf16 %v4727_v9, %v4723_v38  ;;  %v4548_v11 = vsel %vm502_vm2, %v13961_v16, %v14238_v1 }
 0x5bd   :  { %17728 = vst [vmem:[#allocation87_spill] sm:$0xff] %v14401_v6  ;;  %v4717_v6 = vmul.f32 %v4710_v23, %v17727_v55  ;;  %v4546_v17 = vsel %vm502_vm2, %v14095_v28, %v17733_v63  ;;  %v4570_v47 = vsel %vm502_vm2, %v17733_v63, %v13951_v4  ;;  %v4551_v28 = vsel %vm502_vm2, %v14023_v54, %v14229_v52 }
 0x5be   :  { %v11256_v25 = vpack.c.bf16 %v4725_v7, %v4721_v19  ;;  %v14414_v35 = vpop.permute.xlu0 %4993  ;;  %v11259_v18 = vpack.c.bf16 %v4728_v31, %v4724_v46  ;;  %v11255_v46 = vpack.c.bf16 %v4720_v32, %v4716_v30  ;;  %v4569_v30 = vsel %vm502_vm2, %v17732_v36, %v13878_v60 }
 0x5bf   :  { %v11252_v16 = vpack.c.bf16 %v4717_v6, %v4713_v43  ;;  %v14454_v6 = vmul.f32 %v4270_v53, %v17595_v61 }
 0x5c0   :  { %5890 = vmatpush1.bf16.msra.mxu1 %v11256_v25  ;;  %5995 = vmatprep.subr.bf16.mxu0 %v11259_v18  ;;  %v4510_v19 = vpop.permute.xlu1 %4509 }
 0x5c1   :  { %v4549_v49 = vsel %vm502_vm2, %v14238_v1, %v4510_v19  ;;  %v4571_v9 = vsel %vm502_vm2, %v4510_v19, %v14013_v22  ;;  %5891 = vmatprep.subr.bf16.mxu1 %v11253_v59  ;;  %5996 = vmatpush1.bf16.msra.mxu0 %v11258_v34  ;;  %v17734_v1 = vld [vmem:[#allocation24_spill] sm:$0xff]  ;;  %v4583_v59 = vmul.f32 %v4548_v11, %v17582_v24  ;;  %v17735_v22 = vld [vmem:[#allocation18_spill] sm:$0xff]  ;;  %v17737_v11 = vld [vmem:[#allocation93_spill] sm:$0xff] }
 0x5c2   :  { %v4512_v23 = vpop.permute.xlu0 %4511  ;;  %5997 = vmatprep.subr.bf16.mxu0 %v11255_v46  ;;  %v4576_v42 = vmul.f32 %v4543_v58, %v17734_v1  ;;  %v4581_v38 = vmul.f32 %v4571_v9, %v17735_v22  ;;  %v4584_v60 = vmul.f32 %v4549_v49, %v17734_v1  ;;  %v11246_v58 = vpack.c.bf16 %v14357_v37, %v14419_v8  ;;  %v17738_v37 = vld [vmem:[#allocation94_spill] sm:$0xff] }
 0x5c3   :  { %v4552_v34 = vsel %vm502_vm2, %v14229_v52, %v4512_v23  ;;  %v4572_v4 = vsel %vm502_vm2, %v4512_v23, %v14093_v13  ;;  %v4587_v52 = vmul.f32 %v4551_v28, %v17582_v24  ;;  %v17736_v13 = vpack.c.bf16 %v14309_v51, %v14328_v44  ;;  %v17742_v23 = vld [vmem:[#allocation22_spill] sm:$0xff] }
 0x5c4   :  { %v4585_v7 = vmul.f32 %v4572_v4, %v17735_v22  ;;  %v4588_v54 = vmul.f32 %v4552_v34, %v17734_v1  ;;  %5892 = vmatpush1.bf16.msra.mxu1 %v11252_v16  ;;  %v4370_v31 = vpop.permute.xlu1 %4369  ;;  %v4580_v32 = vmul.f32 %v4546_v17, %v17734_v1  ;;  %v4573_v43 = vmul.f32 %v4569_v30, %v17735_v22  ;;  %v17741_v30 = vld [vmem:[#allocation28_spill] sm:$0xff]  ;;  %v17743_v4 = vld [vmem:[#allocation89_spill] sm:$0xff] }
 0x5c5   :  { %5893 = vmatprep.subr.bf16.mxu1 %v17736_v13  ;;  %5998 = vmatpush1.bf16.msra.mxu0 %v11254_v0  ;;  %v4577_v53 = vmul.f32 %v4570_v47, %v17735_v22  ;;  %v4406_v8 = vsel %vm340_vm4, %v14103_v40, %v17737_v11  ;;  %v4402_v51 = vsel %vm340_vm4, %v13880_v50, %v17738_v37  ;;  %v17739_v0 = vld [vmem:[#allocation103_spill] sm:$0xff] }
 0x5c6   :  { %v11248_v25 = vpack.c.bf16 %v4585_v7, %v4581_v38  ;;  %v14464_v18 = vpop.permute.xlu0 %4989  ;;  %v11251_v36 = vpack.c.bf16 %v4588_v54, %v4584_v60  ;;  %v11250_v44 = vpack.c.bf16 %v4587_v52, %v4583_v59  ;;  %v4403_v19 = vsel %vm340_vm4, %v17738_v37, %v17739_v0 }
 0x5c7   :  { %v4408_v46 = vsel %vm340_vm4, %v13970_v48, %v14269_v2  ;;  %v11247_v17 = vpack.c.bf16 %v4580_v32, %v4576_v42  ;;  %v4430_v40 = vsel %vm340_vm4, %v17737_v11, %v13959_v3  ;;  %v4409_v50 = vsel %vm340_vm4, %v14269_v2, %v4370_v31  ;;  %v17745_v32 = vld [vmem:[#allocation95_spill] sm:$0xff] }
 0x5c8   :  { %5894 = vmatpush1.bf16.msra.mxu1 %v11248_v25  ;;  %5999 = vmatprep.subr.bf16.mxu0 %v11251_v36  ;;  %v4218_v63 = vpop.permute.xlu1 %4217  ;;  %v4431_v49 = vsel %vm340_vm4, %v4370_v31, %v14021_v33  ;;  %v17740_v9 = vpack.c.bf16 %v14283_v41, %v14300_v14  ;;  %v4435_v48 = vmul.f32 %v4402_v51, %v17729_v57  ;;  %v17748_v25 = vld [vmem:[#allocation50_spill] sm:$0xff] }
 0x5c9   :  { %6000 = vmatpush1.bf16.msra.mxu0 %v11250_v44  ;;  %v11244_v47 = vpack.c.bf16 %v4577_v53, %v4573_v43  ;;  %v4429_v16 = vsel %vm340_vm4, %v17739_v0, %v13887_v39  ;;  %v4411_v3 = vsel %vm340_vm4, %v14039_v12, %v14236_v29  ;;  %v4436_v33 = vmul.f32 %v4403_v19, %v17741_v30  ;;  %v17750_v44 = vld [vmem:[#allocation68_spill] sm:$0xff]  ;;  %v17752_v19 = vld [vmem:[#allocation110_spill] sm:$0xff] }
 0x5ca   :  { %5895 = vmatprep.subr.bf16.mxu1 %v17740_v9  ;;  %v4372_v2 = vpop.permute.xlu0 %4371  ;;  %6001 = vmatprep.subr.bf16.mxu0 %v11247_v17  ;;  %v4443_v28 = vmul.f32 %v4408_v46, %v17729_v57  ;;  %v4441_v42 = vmul.f32 %v4431_v49, %v17742_v23  ;;  %v4444_v39 = vmul.f32 %v4409_v50, %v17741_v30  ;;  %v17755_v49 = vld [vmem:[#allocation32_spill] sm:$0xff] }
 0x5cb   :  { %v4412_v41 = vsel %vm340_vm4, %v14236_v29, %v4372_v2  ;;  %v4432_v14 = vsel %vm340_vm4, %v4372_v2, %v14101_v45  ;;  %v14511_v38 = vsel %vm178_vm5, %v13945_v5, %v17743_v4  ;;  %v4447_v29 = vmul.f32 %v4411_v3, %v17729_v57  ;;  %v17757_v3 = vld [vmem:[#allocation105_spill] sm:$0xff] }
 0x5cc   :  { %v4445_v59 = vmul.f32 %v4432_v14, %v17742_v23  ;;  %v4448_v12 = vmul.f32 %v4412_v41, %v17741_v30  ;;  %5896 = vmatpush1.bf16.msra.mxu1 %v11244_v47  ;;  %v14506_v34 = vpop.permute.xlu1 %4981  ;;  %v17744_v45 = vpack.c.bf16 %v14362_v21, %v14339_v27  ;;  %v11233_v60 = vpack.c.bf16 %v14454_v6, %v14351_v26  ;;  %v17746_v21 = vld [vmem:[#allocation98_spill] sm:$0xff]  ;;  %v17747_v6 = vld [vmem:[#allocation112_spill] sm:$0xff]  ;;  %v17760_v14 = vld [vmem:[#allocation53_spill] sm:$0xff] }
 0x5cd   :  { %6002 = vmatpush1.bf16.msra.mxu0 %v11246_v58  ;;  %v4440_v7 = vmul.f32 %v4406_v8, %v17741_v30  ;;  %v4433_v54 = vmul.f32 %v4429_v16, %v17742_v23  ;;  %v4437_v5 = vmul.f32 %v4430_v40, %v17742_v23  ;;  %v4266_v43 = vsel %vm178_vm5, %v17743_v4, %v17745_v32  ;;  %v17749_v8 = vld [vmem:[#allocation83_spill] sm:$0xff]  ;;  %v17754_v40 = vld [vmem:[#allocation88_spill] sm:$0xff] }
 0x5ce   :  { %5897 = vmatprep.subr.bf16.mxu1 %v17744_v45  ;;  %v11240_v31 = vpack.c.bf16 %v4445_v59, %v4441_v42  ;;  %v14521_v52 = vpop.permute.xlu0 %4861  ;;  %v11243_v13 = vpack.c.bf16 %v4448_v12, %v4444_v39  ;;  %v4263_v27 = vsel %vm178_vm5, %v17746_v21, %v14226_v56  ;;  %v11242_v58 = vpack.c.bf16 %v4447_v29, %v4443_v28  ;;  %v17761_v42 = vld [vmem:[#allocation26_spill] sm:$0xff]  ;;  %v17762_v29 = vld [vmem:[#allocation52_spill] sm:$0xff] }
 0x5cf   :  { %v11238_v26 = vpack.c.bf16 %v14404_v20, %v4435_v48  ;;  %v4268_v36 = vsel %vm178_vm5, %v17748_v25, %v17747_v6  ;;  %v11239_v11 = vpack.c.bf16 %v4440_v7, %v4436_v33  ;;  %v4262_v37 = vsel %vm178_vm5, %v17749_v8, %v17746_v21  ;;  %v17751_v20 = vld [vmem:[#allocation107_spill] sm:$0xff]  ;;  %v17756_v48 = vld [vmem:[#allocation109_spill] sm:$0xff] }
 0x5d0   :  { %5898 = vmatpush1.bf16.msra.mxu1 %v11240_v31  ;;  %6003 = vmatprep.subr.bf16.mxu0 %v11243_v13  ;;  %v14534_v53 = vpop.permute.xlu1 %5143  ;;  %v4269_v51 = vsel %vm178_vm5, %v17747_v6, %v4218_v63  ;;  %v4291_v0 = vsel %vm178_vm5, %v4218_v63, %v17750_v44  ;;  %v17753_v46 = vpack.c.bf16 %v17751_v20, %v17752_v19  ;;  %v17758_v63 = vld [vmem:[#allocation92_spill] sm:$0xff]  ;;  %v17759_v33 = vld [vmem:[#allocation31_spill] sm:$0xff]  ;;  %v17765_v25 = vld [vmem:[#allocation45_spill] sm:$0xff] }
 0x5d1   :  { %6004 = vmatpush1.bf16.msra.mxu0 %v11242_v58  ;;  %v11236_v17 = vpack.c.bf16 %v4437_v5, %v4433_v54  ;;  %v4289_v50 = vsel %vm178_vm5, %v14226_v56, %v17754_v40  ;;  %v4296_v9 = vmul.f32 %v4263_v27, %v17755_v49  ;;  %v4271_v47 = vsel %vm178_vm5, %v17730_v10, %v17756_v48  ;;  %v17763_v31 = vld [vmem:[#allocation99_spill] sm:$0xff]  ;;  %v17769_v19 = vld [vmem:[#allocation64_spill] sm:$0xff] }
 0x5d2   :  { %5899 = vmatprep.subr.bf16.mxu1 %v17753_v46  ;;  %v4220_v16 = vpop.permute.xlu0 %4219  ;;  %6005 = vmatprep.subr.bf16.mxu0 %v11239_v11  ;;  %v5163_v2 = vsel %vm1202_vm6, %v17758_v63, %v17757_v3  ;;  %v4303_v28 = vmul.f32 %v4268_v36, %v17759_v33  ;;  %v4301_v39 = vmul.f32 %v4291_v0, %v17761_v42  ;;  %v17764_v13 = vld [vmem:[#allocation55_spill] sm:$0xff]  ;;  %v17766_v36 = vld [vmem:[#allocation29_spill] sm:$0xff]  ;;  %v17770_v40 = vld [vmem:[#allocation108_spill] sm:$0xff] }
 0x5d3   :  { %v4272_v41 = vsel %vm178_vm5, %v17756_v48, %v4220_v16  ;;  %v4292_v56 = vsel %vm178_vm5, %v4220_v16, %v17760_v14  ;;  %v4304_v59 = vmul.f32 %v4269_v51, %v17755_v49  ;;  %v4290_v45 = vsel %vm178_vm5, %v17745_v32, %v17762_v29  ;;  %v17768_v8 = vld [vmem:[#allocation51_spill] sm:$0xff]  ;;  %v17774_v16 = vld [vmem:[#allocation73_spill] sm:$0xff]  ;;  %v17778_v29 = vld [vmem:[#allocation96_spill] sm:$0xff] }
 0x5d4   :  { %v4305_v10 = vmul.f32 %v4292_v56, %v17761_v42  ;;  %v4308_v12 = vmul.f32 %v4272_v41, %v17755_v49  ;;  %5900 = vmatpush1.bf16.msra.mxu1 %v11236_v17  ;;  %v14565_v4 = vpop.permute.xlu1 %4859  ;;  %v4300_v7 = vmul.f32 %v4266_v43, %v17755_v49  ;;  %v4307_v54 = vmul.f32 %v4271_v47, %v17759_v33  ;;  %v17773_v47 = vld [vmem:[#allocation56_spill] sm:$0xff]  ;;  %v17776_v14 = vld [vmem:[#allocation69_spill] sm:$0xff] }
 0x5d5   :  { %5901 = vmatprep.subr.bf16.mxu1 %v11233_v60  ;;  %6006 = vmatpush1.bf16.msra.mxu0 %v11238_v26  ;;  %v5160_v5 = vsel %vm1202_vm6, %v17764_v13, %v17763_v31  ;;  %v4293_v21 = vmul.f32 %v4289_v50, %v17761_v42  ;;  %v5162_v32 = vsel %vm1202_vm6, %v17765_v25, %v17758_v63  ;;  %v17767_v26 = vld [vmem:[#allocation54_spill] sm:$0xff]  ;;  %v17771_v50 = vld [vmem:[#allocation111_spill] sm:$0xff] }
 0x5d6   :  { %v11232_v27 = vpack.c.bf16 %v4305_v10, %v4301_v39  ;;  %v14576_v58 = vpop.permute.xlu0 %4869  ;;  %v11235_v6 = vpack.c.bf16 %v4308_v12, %v4304_v59  ;;  %v4295_v43 = vmul.f32 %v4262_v37, %v17759_v33  ;;  %v5202_v11 = vmul.f32 %v5163_v2, %v17766_v36  ;;  %v17775_v2 = vld [vmem:[#allocation30_spill] sm:$0xff]  ;;  %v17777_v12 = vld [vmem:[#allocation113_spill] sm:$0xff] }
 0x5d7   :  { %v11234_v60 = vpack.c.bf16 %v4307_v54, %v4303_v28  ;;  %v5157_v51 = vsel %vm1202_vm6, %v17768_v8, %v17767_v26  ;;  %v4297_v44 = vmul.f32 %v4290_v45, %v17761_v42  ;;  %v11231_v20 = vpack.c.bf16 %v4300_v7, %v4296_v9  ;;  %v17779_v54 = vld [vmem:[#allocation80_spill] sm:$0xff] }
 0x5d8   :  { %5902 = vmatpush1.bf16.msra.mxu1 %v11232_v27  ;;  %6007 = vmatprep.subr.bf16.mxu0 %v11235_v6  ;;  %v4868_v0 = vpop.permute.xlu1 %4867  ;;  %v5159_v46 = vsel %vm1202_vm6, %v17769_v19, %v17764_v13  ;;  %v4299_v37 = vmul.f32 %v14511_v38, %v17759_v33  ;;  %v5198_v17 = vmul.f32 %v5160_v5, %v17766_v36  ;;  %v17780_v6 = vld [vmem:[#allocation66_spill] sm:$0xff] }
 0x5d9   :  { %v17772_v48 = vpack.c.bf16 %v17770_v40, %v17771_v50  ;;  %6008 = vmatpush1.bf16.msra.mxu0 %v11234_v60  ;;  %v5154_v63 = vsel %vm1202_vm6, %v17774_v16, %v17773_v47  ;;  %v5201_v9 = vmul.f32 %v5162_v32, %v17775_v2  ;;  %v11228_v28 = vpack.c.bf16 %v4297_v44, %v4293_v21  ;;  %v17785_v40 = vld [vmem:[#allocation87_spill] sm:$0xff] }
 0x5da   :  { %v14600_v41 = vpop.permute.xlu0 %4865  ;;  %6009 = vmatprep.subr.bf16.mxu0 %v11231_v20  ;;  %v5156_v38 = vsel %vm1202_vm6, %v17776_v14, %v17768_v8  ;;  %v5194_v56 = vmul.f32 %v5157_v51, %v17766_v36  ;;  %v11230_v39 = vpack.c.bf16 %v4299_v37, %v4295_v43  ;;  %v11289_v59 = vpack.c.bf16 %v5202_v11, %v5198_v17  ;;  %v17781_v43 = vld [vmem:[#allocation100_spill] sm:$0xff]  ;;  %v17782_v11 = vld [vmem:[#allocation62_spill] sm:$0xff]  ;;  %v17784_v20 = vld [vmem:[#allocation33_spill] sm:$0xff] }
 0x5db   :  { %5903 = vmatprep.subr.bf16.mxu1 %v17772_v48  ;;  %v5197_v10 = vmul.f32 %v5159_v46, %v17775_v2  ;;  %v5023_v45 = vsel %vm1040_vm7, %v17778_v29, %v17777_v12  ;;  %v5153_v13 = vsel %vm1202_vm6, %v17779_v54, %v17774_v16  ;;  %v5190_v5 = vmul.f32 %v5154_v63, %v17766_v36  ;;  %v17783_v51 = vld [vmem:[#allocation72_spill] sm:$0xff]  ;;  %v17786_v16 = vld [vmem:[#allocation34_spill] sm:$0xff] }
 0x5dc   :  { %5904 = vmatpush1.bf16.msra.mxu1 %v11228_v28  ;;  %v14610_v7 = vpop.permute.xlu1 %4857  ;;  %v5193_v21 = vmul.f32 %v5156_v38, %v17775_v2  ;;  %v5022_v32 = vsel %vm1040_vm7, %v17780_v6, %v17778_v29  ;;  %v5020_v60 = vsel %vm1040_vm7, %v17782_v11, %v17781_v43  ;;  %v5019_v44 = vsel %vm1040_vm7, %v17783_v51, %v17782_v11  ;;  %v17787_v28 = vld [vmem:[#allocation65_spill] sm:$0xff] }
 0x5dd   :  { %5905 = vmatprep.subr.bf16.mxu1 %v11289_v59  ;;  %6010 = vmatpush1.bf16.msra.mxu0 %v11230_v39  ;;  %v11288_v27 = vpack.c.bf16 %v5201_v9, %v5197_v10  ;;  %v5062_v46 = vmul.f32 %v5023_v45, %v17784_v20  ;;  %v11285_v37 = vpack.c.bf16 %v5194_v56, %v5190_v5  ;;  %v17788_v59 = vld [vmem:[#allocation75_spill] sm:$0xff] }
 0x5de   :  { %v5136_v8 = vpop.permute.xlu0 %5135  ;;  %v5189_v17 = vmul.f32 %v5153_v13, %v17775_v2  ;;  %v5017_v50 = vsel %vm1040_vm7, %v17785_v40, %v14414_v35  ;;  %v5061_v63 = vmul.f32 %v5022_v32, %v17786_v16  ;;  %v5058_v9 = vmul.f32 %v5020_v60, %v17784_v20 }
 0x5df   :  { %v5013_v38 = vsel %vm1040_vm7, %v14506_v34, %v17787_v28  ;;  %v5014_v56 = vsel %vm1040_vm7, %v17787_v28, %v17788_v59  ;;  %v5057_v10 = vmul.f32 %v5019_v44, %v17786_v16  ;;  %v5054_v45 = vmul.f32 %v5017_v50, %v17784_v20 }
 0x5e0   :  { %5906 = vmatpush2.bf16.msra.mxu1 %v11288_v27  ;;  %v5128_v48 = vpop.permute.xlu1 %5127  ;;  %v11284_v39 = vpack.c.bf16 %v5193_v21, %v5189_v17  ;;  %v5016_v13 = vsel %vm1040_vm7, %v14464_v18, %v17785_v40  ;;  %v4883_v5 = vsel %vm878_vm8, %v4868_v0, %v14576_v58  ;;  %v11281_v27 = vpack.c.bf16 %v5062_v46, %v5058_v9  ;;  %v17789_v40 = vld [vmem:[#allocation37_spill] sm:$0xff] }
 0x5e1   :  { %5907 = vmatprep.subr.bf16.mxu1 %v11285_v37  ;;  %v5049_v21 = vmul.f32 %v5013_v38, %v17786_v16  ;;  %v5050_v11 = vmul.f32 %v5014_v56, %v17784_v20  ;;  %v11280_v60 = vpack.c.bf16 %v5061_v63, %v5057_v10  ;;  %v4880_v44 = vsel %vm878_vm8, %v14565_v4, %v14521_v52  ;;  %v17790_v10 = vld [vmem:[#allocation35_spill] sm:$0xff] }
 0x5e2   :  { %v14640_v29 = vpop.permute.xlu0 %4845  ;;  %v5053_v37 = vmul.f32 %v5016_v13, %v17786_v16  ;;  %v5161_v17 = vsel %vm1202_vm6, %v17763_v31, %v14534_v53  ;;  %v5187_v46 = vsel %vm1202_vm6, %v14534_v53, %v17769_v19  ;;  %v4922_v50 = vmul.f32 %v4883_v5, %v17789_v40  ;;  %v17791_v53 = vld [vmem:[#allocation36_spill] sm:$0xff] }
 0x5e3   :  { %v4882_v63 = vsel %vm878_vm8, %v14600_v41, %v4868_v0  ;;  %v4879_v28 = vsel %vm878_vm8, %v14610_v7, %v14565_v4  ;;  %v11277_v38 = vpack.c.bf16 %v5054_v45, %v5050_v11  ;;  %v4918_v56 = vmul.f32 %v4880_v44, %v17789_v40 }
 0x5e4   :  { %5908 = vmatpush2.bf16.msra.mxu1 %v11284_v39  ;;  %v4844_v32 = vpop.permute.xlu1 %4843  ;;  %v11276_v39 = vpack.c.bf16 %v5053_v37, %v5049_v21  ;;  %v5199_v13 = vmul.f32 %v5161_v17, %v17790_v10  ;;  %v5200_v19 = vmul.f32 %v5187_v46, %v17791_v53  ;;  %v5185_v5 = vsel %vm1202_vm6, %v5128_v48, %v17779_v54 }
 0x5e5   :  { %5909 = vmatprep.subr.bf16.mxu1 %v11281_v27  ;;  %v17792_v27 = vld [vmem:[#allocation38_spill] sm:$0xff]  ;;  %v4874_v45 = vsel %vm878_vm8, %v4844_v32, %v14640_v29  ;;  %v11273_v11 = vpack.c.bf16 %v4922_v50, %v4918_v56  ;;  %v5155_v17 = vsel %vm1202_vm6, %v17773_v47, %v5128_v48  ;;  %v5192_v46 = vmul.f32 %v5185_v5, %v17791_v53 }
 0x5e6   :  { %v14661_v9 = vpop.permute.xlu0 %4853  ;;  %v4921_v16 = vmul.f32 %v4882_v63, %v17792_v27  ;;  %v4917_v4 = vmul.f32 %v4879_v28, %v17792_v27 }
 0x5e8   :  { %5910 = vmatpush2.bf16.msra.mxu1 %v11280_v60  ;;  %v4852_v31 = vpop.permute.xlu1 %4851  ;;  %v5186_v60 = vsel %vm1202_vm6, %v5136_v8, %v17776_v14  ;;  %v5158_v14 = vsel %vm1202_vm6, %v17767_v26, %v5136_v8 }
 0x5e9   :  { %v4877_v0 = vsel %vm878_vm8, %v4852_v31, %v14661_v9  ;;  %5911 = vmatprep.subr.bf16.mxu1 %v11277_v38  ;;  %v11272_v38 = vpack.c.bf16 %v4921_v16, %v4917_v4  ;;  %v5196_v47 = vmul.f32 %v5186_v60, %v17791_v53  ;;  %v5195_v4 = vmul.f32 %v5158_v14, %v17790_v10 }
 0x5ea   :  { %v5152_v21 = vpop.permute.xlu0 %5151  ;;  %v4914_v44 = vmul.f32 %v4877_v0, %v17789_v40 }
 0x5eb   :  { %v5164_v54 = vsel %vm1202_vm6, %v17757_v3, %v5152_v21  ;;  %v5188_v37 = vsel %vm1202_vm6, %v5152_v21, %v17765_v25  ;;  %v4910_v3 = vmul.f32 %v4874_v45, %v17789_v40  ;;  %v11287_v16 = vpack.c.bf16 %v5196_v47, %v5192_v46  ;;  %v17795_v46 = vld [vmem:[#allocation39_spill] sm:$0xff]  ;;  %v17797_v47 = vld [vmem:[#allocation81_spill] sm:$0xff] }
 0x5ec   :  { %v5203_v63 = vmul.f32 %v5164_v54, %v17790_v10  ;;  %v5204_v50 = vmul.f32 %v5188_v37, %v17791_v53  ;;  %5912 = vmatpush2.bf16.msra.mxu1 %v11276_v39  ;;  %v14691_v28 = vpop.permute.xlu1 %4841  ;;  %v5191_v39 = vmul.f32 %v5155_v17, %v17790_v10  ;;  %v17793_v54 = vld [vmem:[#allocation74_spill] sm:$0xff] }
 0x5ed   :  { %v4873_v25 = vsel %vm878_vm8, %v14691_v28, %v4844_v32  ;;  %5913 = vmatprep.subr.bf16.mxu1 %v11273_v11  ;;  %v11269_v21 = vpack.c.bf16 %v4914_v44, %v4910_v3  ;;  %v17794_v37 = vld [vmem:[#allocation78_spill] sm:$0xff] }
 0x5ee   :  { %v11290_v48 = vpack.c.bf16 %v5203_v63, %v5199_v13  ;;  %v14699_v56 = vpop.permute.xlu0 %4849  ;;  %v11291_v5 = vpack.c.bf16 %v5204_v50, %v5200_v19  ;;  %v4909_v26 = vmul.f32 %v4873_v25, %v17792_v27  ;;  %v11286_v11 = vpack.c.bf16 %v5195_v4, %v5191_v39  ;;  %v17796_v63 = vld [vmem:[#allocation40_spill] sm:$0xff] }
 0x5ef   :  { %v4876_v0 = vsel %vm878_vm8, %v14699_v56, %v4852_v31  ;;  %v11265_v17 = vpack.c.bf16 %v17794_v37, %v17793_v54  ;;  %v17803_v54 = vld [vmem:[#allocation41_spill] sm:$0xff] }
 0x5f0   :  { %v4913_v8 = vmul.f32 %v4876_v0, %v17792_v27  ;;  %5914 = vmatpush2.bf16.msra.mxu1 %v11272_v38  ;;  %6011 = vmatprep.subr.bf16.mxu0 %v11291_v5  ;;  %v5004_v32 = vpop.permute.xlu1 %5003 }
 0x5f1   :  { %v5021_v13 = vsel %vm1040_vm7, %v17781_v43, %v5004_v32  ;;  %v5047_v19 = vsel %vm1040_vm7, %v5004_v32, %v17783_v51  ;;  %5915 = vmatprep.subr.bf16.mxu1 %v11269_v21  ;;  %6012 = vmatpush2.bf16.msra.mxu0 %v11290_v48  ;;  %v17798_v48 = vld [vmem:[#allocation76_spill] sm:$0xff] }
 0x5f2   :  { %v11268_v31 = vpack.c.bf16 %v4913_v8, %v4909_v26  ;;  %v5012_v45 = vpop.permute.xlu0 %5011  ;;  %6013 = vmatprep.subr.bf16.mxu0 %v11287_v16  ;;  %v5059_v43 = vmul.f32 %v5021_v13, %v17795_v46  ;;  %v5060_v50 = vmul.f32 %v5047_v19, %v17796_v63  ;;  %v11264_v5 = vpack.c.bf16 %v17798_v48, %v17797_v47  ;;  %v17800_v8 = vld [vmem:[#allocation82_spill] sm:$0xff] }
 0x5f3   :  { %v5024_v60 = vsel %vm1040_vm7, %v17777_v12, %v5012_v45  ;;  %v5048_v44 = vsel %vm1040_vm7, %v5012_v45, %v17780_v6 }
 0x5f4   :  { %v5063_v51 = vmul.f32 %v5024_v60, %v17795_v46  ;;  %v5064_v14 = vmul.f32 %v5048_v44, %v17796_v63  ;;  %5916 = vmatpush2.bf16.msra.mxu1 %v11268_v31  ;;  %v4988_v3 = vpop.permute.xlu1 %4987  ;;  %v17802_v60 = vld [vmem:[#allocation86_spill] sm:$0xff] }
 0x5f5   :  { %v5015_v25 = vsel %vm1040_vm7, %v17788_v59, %v4988_v3  ;;  %v5045_v12 = vsel %vm1040_vm7, %v4988_v3, %v14506_v34  ;;  %5917 = vmatprep.subr.bf16.mxu1 %v11265_v17  ;;  %6014 = vmatpush2.bf16.msra.mxu0 %v11286_v11  ;;  %v17799_v59 = vld [vmem:[#allocation77_spill] sm:$0xff]  ;;  %v17801_v11 = vld [vmem:[#allocation79_spill] sm:$0xff] }
 0x5f6   :  { %v11282_v6 = vpack.c.bf16 %v5063_v51, %v5059_v43  ;;  %v4996_v38 = vpop.permute.xlu0 %4995  ;;  %v11283_v39 = vpack.c.bf16 %v5064_v14, %v5060_v50  ;;  %v5051_v0 = vmul.f32 %v5015_v25, %v17795_v46  ;;  %v11261_v32 = vpack.c.bf16 %v17800_v8, %v17799_v59  ;;  %v17806_v59 = vld [vmem:[#allocation84_spill] sm:$0xff] }
 0x5f7   :  { %v5018_v21 = vsel %vm1040_vm7, %v14414_v35, %v4996_v38  ;;  %v5046_v26 = vsel %vm1040_vm7, %v4996_v38, %v14464_v18  ;;  %v5052_v34 = vmul.f32 %v5045_v12, %v17796_v63  ;;  %v11260_v44 = vpack.c.bf16 %v17802_v60, %v17801_v11  ;;  %v17812_v60 = vld [vmem:[#allocation44_spill] sm:$0xff] }
 0x5f8   :  { %v5055_v16 = vmul.f32 %v5018_v21, %v17795_v46  ;;  %v5056_v4 = vmul.f32 %v5046_v26, %v17796_v63  ;;  %5918 = vmatpush2.bf16.msra.mxu1 %v11264_v5  ;;  %6015 = vmatprep.subr.bf16.mxu0 %v11283_v39  ;;  %v4864_v13 = vpop.permute.xlu1 %4863  ;;  %v17805_v21 = vld [vmem:[#allocation97_spill] sm:$0xff] }
 0x5f9   :  { %v4881_v19 = vsel %vm878_vm8, %v14521_v52, %v4864_v13  ;;  %v4907_v35 = vsel %vm878_vm8, %v4864_v13, %v14610_v7  ;;  %5919 = vmatprep.subr.bf16.mxu1 %v11261_v32  ;;  %6016 = vmatpush2.bf16.msra.mxu0 %v11282_v6  ;;  %v14751_v52 = vld [vmem:[%s17069_s4 + $0x30] ss:$12 sps:$4 sm:$0xff]   ;;  %v17804_v7 = vld [vmem:[#allocation42_spill] sm:$0xff] }
 0x5fa   :  { %v11278_v18 = vpack.c.bf16 %v5055_v16, %v5051_v0  ;;  %v4872_v31 = vpop.permute.xlu0 %4871  ;;  %v11279_v45 = vpack.c.bf16 %v5056_v4, %v5052_v34  ;;  %v4919_v37 = vmul.f32 %v4881_v19, %v17803_v54  ;;  %v4920_v50 = vmul.f32 %v4907_v35, %v17804_v7  ;;  %v17807_v34 = vld [vmem:[#allocation102_spill] sm:$0xff]  ;;  %v17809_v19 = vld [vmem:[#allocation48_spill] sm:$0xff]  ;;  %v17810_v35 = vld [vmem:[#allocation47_spill] sm:$0xff] }
 0x5fb   :  { %v4884_v17 = vsel %vm878_vm8, %v14576_v58, %v4872_v31  ;;  %v4908_v43 = vsel %vm878_vm8, %v4872_v31, %v14600_v41  ;;  %v11483_v58 = vld [vmem:[%s17069_s4 + $0x4c] ss:$12 sps:$4 sm:$0xff]   ;;  %v17808_v4 = vld [vmem:[#allocation46_spill] sm:$0xff] }
 0x5fc   :  { %v4923_v51 = vmul.f32 %v4884_v17, %v17803_v54  ;;  %v4924_v14 = vmul.f32 %v4908_v43, %v17804_v7  ;;  %6017 = vmatprep.subr.bf16.mxu0 %v11279_v45  ;;  %v4848_v3 = vpop.permute.xlu1 %4847  ;;  %5920 = vmatpush2.bf16.msra.mxu1 %v11260_v44  ;;  %v11485_v31 = vld [vmem:[%s17069_s4 + $0x48] ss:$12 sps:$4 sm:$0xff]   ;;  %v17811_v45 = vld [vmem:[#allocation43_spill] sm:$0xff] }
 0x5fd   :  { %v4875_v41 = vsel %vm878_vm8, %v14640_v29, %v4848_v3  ;;  %v4905_v25 = vsel %vm878_vm8, %v4848_v3, %v14691_v28  ;;  %6018 = vmatpush2.bf16.msra.mxu0 %v11278_v18  ;;  %v11267_v18 = vpack.c.bf16 %v17810_v35, %v17809_v19  ;;  %v17824_v19 = vld [vmem:[#allocation104_spill] sm:$0xff]  ;;  %v17825_v35 = vld [vmem:[#allocation106_spill] sm:$0xff] }
 0x5fe   :  { %v11274_v12 = vpack.c.bf16 %v4923_v51, %v4919_v37  ;;  %v4856_v6 = vpop.permute.xlu0 %4855  ;;  %v11275_v38 = vpack.c.bf16 %v4924_v14, %v4920_v50  ;;  %v4911_v47 = vmul.f32 %v4875_v41, %v17803_v54  ;;  %v4912_v39 = vmul.f32 %v4905_v25, %v17804_v7  ;;  %v17813_v50 = vld [vmem:[#allocation63_spill] sm:$0xff]  ;;  %v17814_v14 = vld [vmem:[#allocation60_spill] sm:$0xff] }
 0x5ff   :  { %v4878_v48 = vsel %vm878_vm8, %v14661_v9, %v4856_v6  ;;  %v4906_v5 = vsel %vm878_vm8, %v4856_v6, %v14699_v56  ;;  %5922 = vmatmul.mubr.bf16.vlgmr.msra.gmra.mxu1 %v14751_v52  ;;  %v17815_v6 = vld [vmem:[#allocation71_spill] sm:$0xff] }
 0x600   :  { %v4915_v29 = vmul.f32 %v4878_v48, %v17803_v54  ;;  %v4916_v28 = vmul.f32 %v4906_v5, %v17804_v7  ;;  %6019 = vmatprep.subr.bf16.mxu0 %v11275_v38  ;;  %v5284_v0 = vpop.permute.xlu1 %5283  ;;  %5931 = vmatprep.mubr.bf16.mxu1 %v11483_v58  ;;  %v17816_v38 = vld [vmem:[#allocation61_spill] sm:$0xff] }
 0x601   :  { %v5301_v26 = vsel %vm1364_vm1, %v17805_v21, %v5284_v0  ;;  %v5327_v9 = vsel %vm1364_vm1, %v5284_v0, %v17806_v59  ;;  %6020 = vmatpush2.bf16.msra.mxu0 %v11274_v12  ;;  %v17817_v5 = vld [vmem:[#allocation57_spill] sm:$0xff] }
 0x602   :  { %v11270_v8 = vpack.c.bf16 %v4915_v29, %v4911_v47  ;;  %v5292_v56 = vpop.permute.xlu0 %5291  ;;  %v11271_v32 = vpack.c.bf16 %v4916_v28, %v4912_v39  ;;  %v5339_v11 = vmul.f32 %v5301_v26, %v17811_v45  ;;  %v5340_v44 = vmul.f32 %v5327_v9, %v17812_v60  ;;  %v17818_v29 = vld [vmem:[#allocation90_spill] sm:$0xff]  ;;  %v17819_v0 = vld [vmem:[#allocation85_spill] sm:$0xff] }
 0x603   :  { %v5304_v16 = vsel %vm1364_vm1, %v17807_v34, %v5292_v56  ;;  %v5328_v13 = vsel %vm1364_vm1, %v5292_v56, %v17808_v4  ;;  %v11263_v47 = vpack.c.bf16 %v17816_v38, %v17815_v6  ;;  %v17820_v21 = vld [vmem:[#allocation49_spill] sm:$0xff]  ;;  %v17821_v56 = vmov 0   ;;  %v17823_v4 = vld [vmem:[#allocation70_spill] sm:$0xff] }
 0x604   :  { %v5343_v37 = vmul.f32 %v5304_v16, %v17811_v45  ;;  %v5344_v17 = vmul.f32 %v5328_v13, %v17812_v60  ;;  %6021 = vmatprep.subr.bf16.mxu0 %v11271_v32  ;;  %v5268_v43 = vpop.permute.xlu1 %5267  ;;  %v11266_v26 = vpack.c.bf16 %v17820_v21, %v17819_v0  ;;  %v17822_v16 = vld [vmem:[#allocation67_spill] sm:$0xff] }
 0x605   :  { %v5295_v51 = vsel %vm1364_vm1, %v17813_v50, %v5268_v43  ;;  %v5325_v3 = vsel %vm1364_vm1, %v5268_v43, %v17814_v14  ;;  %6022 = vmatpush2.bf16.msra.mxu0 %v11270_v8  ;;  %v11262_v13 = vpack.c.bf16 %v17823_v4, %v17822_v16 }
 0x606   :  { %v11298_v41 = vpack.c.bf16 %v5343_v37, %v5339_v11  ;;  %v5276_v25 = vpop.permute.xlu0 %5275  ;;  %6023 = vmatprep.subr.bf16.mxu0 %v11267_v18  ;;  %v11299_v12 = vpack.c.bf16 %v5344_v17, %v5340_v44  ;;  %v5331_v48 = vmul.f32 %v5295_v51, %v17811_v45  ;;  %v5332_v59 = vmul.f32 %v5325_v3, %v17812_v60 }
 0x607   :  { %v5298_v39 = vsel %vm1364_vm1, %v17817_v5, %v5276_v25  ;;  %v5326_v28 = vsel %vm1364_vm1, %v5276_v25, %v17818_v29  ;;  %5932 = vmatmul.mubr.bf16.gmra.mxu1 %v11485_v31 }
 0x608   :  { %v5335_v9 = vmul.f32 %v5298_v39, %v17811_v45  ;;  %v5336_v8 = vmul.f32 %v5326_v28, %v17812_v60  ;;  %6060 = vmatprep.subr.bf16.mxu1 %v11299_v12  ;;  %6080 = vmatprep.mubr.bf16.mxu1 %v17821_v56 }
 0x609   :  { %6024 = vmatpush2.bf16.msra.mxu0 %v11266_v26  ;;  %6061 = vmatpush1.bf16.msra.mxu1 %v11298_v41 }
 0x60a   :  { %v11294_v32 = vpack.c.bf16 %v5335_v9, %v5331_v48  ;;  %6025 = vmatprep.subr.bf16.mxu0 %v11263_v47  ;;  %v11295_v34 = vpack.c.bf16 %v5336_v8, %v5332_v59 }
 0x60c   :  { %6062 = vmatprep.subr.bf16.mxu1 %v11295_v34 }
 0x60d   :  { %6026 = vmatpush2.bf16.msra.mxu0 %v11262_v13  ;;  %6063 = vmatpush1.bf16.msra.mxu1 %v11294_v32 }
 0x610   :  { %6028 = vmatmul.mubr.bf16.vlgmr.msra.gmra.mxu0 %v14751_v52  ;;  %10406 = vmatmul.mubr.msk.bf16.vlgmr.msra.gmra.mxu1 %vm1976_vm3, %v17824_v19 }
 0x611   :  { %6037 = vmatprep.mubr.bf16.mxu0 %v11483_v58  ;;  %6090 = vmatprep.mubr.bf16.mxu1 %v17821_v56  ;;  %v14815_v18 = vpop.permute.xlu1 %5485 }
 0x613   :  { %v14821_v14 = vpop.permute.xlu0 %5490 }
 0x615   :  { %v14817_v11 = vpop.permute.xlu1 %5475 }
 0x617   :  { %v14831_v6 = vpop.permute.xlu0 %5480 }
 0x618   :  { %6038 = vmatmul.mubr.bf16.gmra.mxu0 %v11485_v31  ;;  %10407 = vmatmul.mubr.msk.bf16.gmra.mxu1 %vm1976_vm3, %v17825_v35 }
 0x619   :  { %7928 = vmatprep.mubr.bf16.mxu0 %v17821_v56 }
 0x66c   :  { %v5976_v44 = vpop.f32.mrf.mxu0 }
 0x66e   :  { %v5978_v50 = vpop.f32.mrf.mxu0 }
 0x670   :  { %v5980_v47 = vpop.f32.mrf.mxu0 }
 0x672   :  { %v5982_v28 = vpop.f32.mrf.mxu0 }
 0x674   :  { %v5986_v8 = vpop.f32.mrf.mxu0 }
 0x676   :  { %v5988_v16 = vpop.f32.mrf.mxu0 }
 0x6bf   :  { %v5923_v37 = vpop.f32.mrf.mxu1 }
 0x6c0   :  { %v5924_v52 = vadd.f32 %v5923_v37, %v14817_v11  ;;  %v5990_v37 = vpop.f32.mrf.mxu0 }
 0x6c1   :  { %v5925_v17 = vpop.f32.mrf.mxu1 }
 0x6c2   :  { %v5977_v43 = vadd.f32 %v5976_v44, %v5924_v52  ;;  %v5926_v58 = vadd.f32 %v5925_v17, %v14817_v11 }
 0x6c3   :  { %v5927_v12 = vpop.f32.mrf.mxu1 }
 0x6c4   :  { %vm6101_vm13 = vcmp.gt.f32.partialorder %v5977_v43, 0.0  ;;  %v6117_v31 = vmul.f32 0.01, %v5977_v43  ;;  %v5979_v51 = vadd.f32 %v5978_v50, %v5926_v58  ;;  %v5928_v38 = vadd.f32 %v5927_v12, %v14831_v6  ;;  %v5992_v12 = vpop.f32.mrf.mxu0 }
 0x6c5   :  { %v5929_v5 = vpop.f32.mrf.mxu1 }
 0x6c6   :  { %v14823_v3 = vsel %vm6101_vm13, %v5977_v43, %v6117_v31  ;;  %vm6102_vm14 = vcmp.gt.f32.partialorder %v5979_v51, 0.0  ;;  %v6118_v41 = vmul.f32 0.01, %v5979_v51  ;;  %v5981_v48 = vadd.f32 %v5980_v47, %v5928_v38 }
 0x6c7   :  { %17826 = vst [vmem:[#allocation59_spill] sm:$0xff] %v14823_v3  ;;  %6611 = vrot.lane.b32.xlu1 %v14823_v3, %s11614_s2  ;;  %v5930_v29 = vadd.f32 %v5929_v5, %v14831_v6  ;;  %v5933_v59 = vpop.f32.mrf.mxu1 }
 0x6c8   :  { %v14827_v25 = vsel %vm6102_vm14, %v5979_v51, %v6118_v41  ;;  %v6121_v39 = vmul.f32 0.01, %v5981_v48  ;;  %vm6105_vm15 = vcmp.gt.f32.partialorder %v5981_v48, 0.0  ;;  %v5934_v52 = vadd.f32 %v5933_v59, %v14815_v18 }
 0x6c9   :  { %17827 = vst [vmem:[#allocation58_spill] sm:$0xff] %v14827_v25  ;;  %6613 = vrot.lane.b32.xlu0 %v14827_v25, %s11614_s2  ;;  %v5983_v21 = vadd.f32 %v5982_v28, %v5930_v29  ;;  %v5935_v32 = vpop.f32.mrf.mxu1 }
 0x6ca   :  { %v14849_v0 = vsel %vm6105_vm15, %v5981_v48, %v6121_v39  ;;  %v5936_v34 = vadd.f32 %v5935_v32, %v14815_v18  ;;  %v5987_v43 = vadd.f32 %v5986_v8, %v5934_v52 }
 0x6cb   :  { %7215 = vrot.lane.b32.xlu1 %v14823_v3, %s11615_s6  ;;  %17828 = vst [vmem:[#allocation101_spill] sm:$0xff] %v14849_v0  ;;  %v6122_v26 = vmul.f32 0.01, %v5983_v21  ;;  %vm6106_vm9 = vcmp.gt.f32.partialorder %v5983_v21, 0.0  ;;  %v5937_v35 = vpop.f32.mrf.mxu1 }
 0x6cc   :  { %v5989_v4 = vadd.f32 %v5988_v16, %v5936_v34  ;;  %v5938_v44 = vadd.f32 %v5937_v35, %v14821_v14  ;;  %v6125_v31 = vmul.f32 0.01, %v5987_v43  ;;  %vm6109_vm12 = vcmp.gt.f32.partialorder %v5987_v43, 0.0 }
 0x6cd   :  { %6473 = vrot.lane.b32.xlu0 %v14827_v25, %s11616_s27  ;;  %v14859_v9 = vsel %vm6106_vm9, %v5983_v21, %v6122_v26  ;;  %v5939_v50 = vpop.f32.mrf.mxu1 }
 0x6ce   :  { %17829 = vst [vmem:[#allocation91_spill] sm:$0xff] %v14859_v9  ;;  %v6126_v13 = vmul.f32 0.01, %v5989_v4  ;;  %vm6110_vm10 = vcmp.gt.f32.partialorder %v5989_v4, 0.0  ;;  %v5991_v17 = vadd.f32 %v5990_v37, %v5938_v44  ;;  %v5940_v41 = vadd.f32 %v5939_v50, %v14821_v14 }
 0x6cf   :  { %6471 = vrot.lane.b32.xlu1 %v14823_v3, %s11616_s27  ;;  %v14903_v38 = vsel %vm6109_vm12, %v5987_v43, %v6125_v31 }
 0x6d0   :  { %v14878_v19 = vsel %vm6110_vm10, %v5989_v4, %v6126_v13  ;;  %v6129_v58 = vmul.f32 0.01, %v5991_v17  ;;  %vm6113_vm11 = vcmp.gt.f32.partialorder %v5991_v17, 0.0  ;;  %17832 = vst [vmem:[#allocation103_spill] sm:$0xff] %v14903_v38  ;;  %v5993_v47 = vadd.f32 %v5992_v12, %v5940_v41  ;;  %v6029_v48 = vpop.f32.mrf.mxu0  ;;  %v6082_v29 = vpop.f32.mrf.mxu1 }
 0x6d1   :  { %6333 = vrot.lane.b32.xlu0 %v14827_v25, %s11618_s28  ;;  %17830 = vst [vmem:[#allocation93_spill] sm:$0xff] %v14878_v19  ;;  %v6030_v39 = vadd.f32 %v6029_v48, %v14817_v11 }
 0x6d2   :  { %v14898_v51 = vsel %vm6113_vm11, %v5991_v17, %v6129_v58  ;;  %v6130_v5 = vmul.f32 0.01, %v5993_v47  ;;  %vm6114_vm13 = vcmp.gt.f32.partialorder %v5993_v47, 0.0  ;;  %v6031_v8 = vpop.f32.mrf.mxu0  ;;  %v6084_v34 = vpop.f32.mrf.mxu1 }
 0x6d3   :  { %6331 = vrot.lane.b32.xlu1 %v14823_v3, %s11618_s28  ;;  %17831 = vst [vmem:[#allocation94_spill] sm:$0xff] %v14898_v51  ;;  %v6083_v21 = vadd.f32 %v6082_v29, %v6030_v39 }
 0x6d4   :  { %v14916_v28 = vsel %vm6114_vm13, %v5993_v47, %v6130_v5  ;;  %v6033_v32 = vpop.f32.mrf.mxu0  ;;  %v6086_v4 = vpop.f32.mrf.mxu1 }
 0x6d5   :  { %6193 = vrot.lane.b32.xlu0 %v14827_v25, %s11619_s29  ;;  %17833 = vst [vmem:[#allocation89_spill] sm:$0xff] %v14916_v28  ;;  %v6119_v26 = vmul.f32 0.01, %v6083_v21  ;;  %vm6103_vm14 = vcmp.gt.f32.partialorder %v6083_v21, 0.0  ;;  %v6034_v16 = vadd.f32 %v6033_v32, %v14831_v6 }
 0x6d6   :  { %v6035_v37 = vpop.f32.mrf.mxu0  ;;  %v6088_v17 = vpop.f32.mrf.mxu1 }
 0x6d7   :  { %6191 = vrot.lane.b32.xlu1 %v14823_v3, %s11619_s29  ;;  %v14926_v59 = vsel %vm6103_vm14, %v6083_v21, %v6119_v26  ;;  %v6087_v13 = vadd.f32 %v6086_v4, %v6034_v16  ;;  %v6036_v52 = vadd.f32 %v6035_v37, %v14831_v6 }
 0x6d8   :  { %17834 = vst [vmem:[#allocation95_spill] sm:$0xff] %v14926_v59  ;;  %v6039_v47 = vpop.f32.mrf.mxu0  ;;  %v6092_v29 = vpop.f32.mrf.mxu1 }
 0x6d9   :  { %7223 = vrot.lane.b32.xlu0 %v14849_v0, %s11615_s6  ;;  %v6123_v35 = vmul.f32 0.01, %v6087_v13  ;;  %vm6107_vm15 = vcmp.gt.f32.partialorder %v6087_v13, 0.0  ;;  %v6089_v43 = vadd.f32 %v6088_v17, %v6036_v52  ;;  %v6040_v39 = vadd.f32 %v6039_v47, %v14815_v18 }
 0x6da   :  { %v6041_v16 = vpop.f32.mrf.mxu0  ;;  %v6094_v52 = vpop.f32.mrf.mxu1 }
 0x6db   :  { %7075 = vrot.lane.b32.xlu1 %v14823_v3, %s11620_s30  ;;  %v14949_v44 = vsel %vm6107_vm15, %v6087_v13, %v6123_v35  ;;  %v6124_v31 = vmul.f32 0.01, %v6089_v43  ;;  %vm6108_vm9 = vcmp.gt.f32.partialorder %v6089_v43, 0.0  ;;  %v6093_v32 = vadd.f32 %v6092_v29, %v6040_v39 }
 0x6dc   :  { %17835 = vst [vmem:[#allocation98_spill] sm:$0xff] %v14949_v44  ;;  %v6032_v13 = vadd.f32 %v6031_v8, %v14817_v11  ;;  %v6043_v17 = vpop.f32.mrf.mxu0  ;;  %v6096_v39 = vpop.f32.mrf.mxu1  ;;  %v6042_v53 = vadd.f32 %v6041_v16, %v14815_v18 }
 0x6dd   :  { %7083 = vrot.lane.b32.xlu0 %v14849_v0, %s11620_s30  ;;  %v14984_v12 = vsel %vm6108_vm9, %v6089_v43, %v6124_v31  ;;  %v6127_v37 = vmul.f32 0.01, %v6093_v32  ;;  %vm6111_vm10 = vcmp.gt.f32.partialorder %v6093_v32, 0.0  ;;  %v6044_v8 = vadd.f32 %v6043_v17, %v14821_v14 }
 0x6de   :  { %17837 = vst [vmem:[#allocation50_spill] sm:$0xff] %v14984_v12  ;;  %v6085_v31 = vadd.f32 %v6084_v34, %v6032_v13  ;;  %v6045_v46 = vpop.f32.mrf.mxu0 }
 0x6df   :  { %7217 = vrot.lane.b32.xlu1 %v14827_v25, %s11615_s6  ;;  %v15020_v11 = vsel %vm6111_vm10, %v6093_v32, %v6127_v37  ;;  %v6097_v34 = vadd.f32 %v6096_v39, %v6044_v8  ;;  %v6046_v40 = vadd.f32 %v6045_v46, %v14821_v14 }
 0x6e0   :  { %17843 = vst [vmem:[#allocation109_spill] sm:$0xff] %v15020_v11  ;;  %v6120_v60 = vmul.f32 0.01, %v6085_v31  ;;  %vm6104_vm11 = vcmp.gt.f32.partialorder %v6085_v31, 0.0 }
 0x6e1   :  { %6619 = vrot.lane.b32.xlu0 %v14859_v9, %s11614_s2  ;;  %v6131_v17 = vmul.f32 0.01, %v6097_v34  ;;  %vm6115_vm12 = vcmp.gt.f32.partialorder %v6097_v34, 0.0 }
 0x6e2   :  { %v15035_v13 = vsel %vm6104_vm11, %v6085_v31, %v6120_v60 }
 0x6e3   :  { %7077 = vrot.lane.b32.xlu1 %v14827_v25, %s11620_s30  ;;  %17845 = vst [vmem:[#allocation92_spill] sm:$0xff] %v15035_v13  ;;  %v15049_v39 = vsel %vm6115_vm12, %v6097_v34, %v6131_v17 }
 0x6e4   :  { %17847 = vst [vmem:[#allocation52_spill] sm:$0xff] %v15049_v39 }
 0x6e5   :  { %6479 = vrot.lane.b32.xlu0 %v14859_v9, %s11616_s27 }
 0x6e7   :  { %6937 = vrot.lane.b32.xlu1 %v14827_v25, %s11621_s9 }
 0x6e9   :  { %6339 = vrot.lane.b32.xlu0 %v14859_v9, %s11618_s28 }
 0x6eb   :  { %6617 = vrot.lane.b32.xlu1 %v14849_v0, %s11614_s2 }
 0x6ed   :  { %6199 = vrot.lane.b32.xlu0 %v14859_v9, %s11619_s29 }
 0x6ef   :  { %6477 = vrot.lane.b32.xlu1 %v14849_v0, %s11616_s27 }
 0x6f1   :  { %6625 = vrot.lane.b32.xlu0 %v14878_v19, %s11614_s2 }
 0x6f3   :  { %6337 = vrot.lane.b32.xlu1 %v14849_v0, %s11618_s28 }
 0x6f5   :  { %6485 = vrot.lane.b32.xlu0 %v14878_v19, %s11616_s27 }
 0x6f7   :  { %6197 = vrot.lane.b32.xlu1 %v14849_v0, %s11619_s29 }
 0x6f9   :  { %6345 = vrot.lane.b32.xlu0 %v14878_v19, %s11618_s28 }
 0x6fb   :  { %7225 = vrot.lane.b32.xlu1 %v14859_v9, %s11615_s6 }
 0x6fd   :  { %6205 = vrot.lane.b32.xlu0 %v14878_v19, %s11619_s29 }
 0x6ff   :  { %7085 = vrot.lane.b32.xlu1 %v14859_v9, %s11620_s30 }
 0x701   :  { %7239 = vrot.lane.b32.xlu0 %v14898_v51, %s11615_s6 }
 0x703   :  { %6623 = vrot.lane.b32.xlu1 %v14903_v38, %s11614_s2 }
 0x705   :  { %7099 = vrot.lane.b32.xlu0 %v14898_v51, %s11620_s30 }
 0x707   :  { %7231 = vrot.lane.b32.xlu1 %v14903_v38, %s11615_s6 }
 0x709   :  { %6959 = vrot.lane.b32.xlu0 %v14898_v51, %s11621_s9 }
 0x70b   :  { %6483 = vrot.lane.b32.xlu1 %v14903_v38, %s11616_s27 }
 0x70d   :  { %6631 = vrot.lane.b32.xlu0 %v14916_v28, %s11614_s2 }
 0x70f   :  { %6343 = vrot.lane.b32.xlu1 %v14903_v38, %s11618_s28 }
 0x711   :  { %6491 = vrot.lane.b32.xlu0 %v14916_v28, %s11616_s27 }
 0x713   :  { %6203 = vrot.lane.b32.xlu1 %v14903_v38, %s11619_s29 }
 0x715   :  { %7219 = vrot.lane.b32.xlu0 %v14926_v59, %s11615_s6 }
 0x717   :  { %7091 = vrot.lane.b32.xlu1 %v14903_v38, %s11620_s30 }
 0x719   :  { %6351 = vrot.lane.b32.xlu0 %v14916_v28, %s11618_s28 }
 0x71b   :  { %6951 = vrot.lane.b32.xlu1 %v14903_v38, %s11621_s9 }
 0x71d   :  { %6211 = vrot.lane.b32.xlu0 %v14916_v28, %s11619_s29 }
 0x71f   :  { %7233 = vrot.lane.b32.xlu1 %v14878_v19, %s11615_s6 }
 0x721   :  { %7079 = vrot.lane.b32.xlu0 %v14926_v59, %s11620_s30 }
 0x723   :  { %7093 = vrot.lane.b32.xlu1 %v14878_v19, %s11620_s30 }
 0x725   :  { %6939 = vrot.lane.b32.xlu0 %v14926_v59, %s11621_s9 }
 0x727   :  { %6953 = vrot.lane.b32.xlu1 %v14878_v19, %s11621_s9 }
 0x729   :  { %7227 = vrot.lane.b32.xlu0 %v14949_v44, %s11615_s6 }
 0x72b   :  { %6629 = vrot.lane.b32.xlu1 %v14898_v51, %s11614_s2 }
 0x72d   :  { %6621 = vrot.lane.b32.xlu0 %v14949_v44, %s11614_s2 }
 0x72f   :  { %6489 = vrot.lane.b32.xlu1 %v14898_v51, %s11616_s27 }
 0x731   :  { %6481 = vrot.lane.b32.xlu0 %v14949_v44, %s11616_s27 }
 0x733   :  { %6349 = vrot.lane.b32.xlu1 %v14898_v51, %s11618_s28 }
 0x735   :  { %6341 = vrot.lane.b32.xlu0 %v14949_v44, %s11618_s28 }
 0x737   :  { %6209 = vrot.lane.b32.xlu1 %v14898_v51, %s11619_s29 }
 0x739   :  { %7087 = vrot.lane.b32.xlu0 %v14949_v44, %s11620_s30  ;;  %v14970_v58 = vpop.permute.xlu1 %6611 }
 0x73b   :  { %v14972_v50 = vpop.permute.xlu0 %6613  ;;  %7241 = vrot.lane.b32.xlu1 %v14916_v28, %s11615_s6 }
 0x73d   :  { %6201 = vrot.lane.b32.xlu0 %v14949_v44, %s11619_s29  ;;  %v14978_v6 = vpop.permute.xlu1 %7215 }
 0x73e   :  { %17836 = vst [vmem:[#allocation112_spill] sm:$0xff] %v14978_v6 }
 0x73f   :  { %v14980_v41 = vpop.permute.xlu0 %6473  ;;  %6615 = vrot.lane.b32.xlu1 %v14926_v59, %s11614_s2 }
 0x741   :  { %6601 = vrot.lane.b32.xlu0 %v14984_v12, %s11614_s2  ;;  %v14988_v48 = vpop.permute.xlu1 %6471 }
 0x743   :  { %v14990_v5 = vpop.permute.xlu0 %6333  ;;  %6475 = vrot.lane.b32.xlu1 %v14926_v59, %s11616_s27 }
 0x745   :  { %6461 = vrot.lane.b32.xlu0 %v14984_v12, %s11616_s27  ;;  %v14997_v21 = vpop.permute.xlu1 %6331 }
 0x747   :  { %v14999_v26 = vpop.permute.xlu0 %6193  ;;  %7101 = vrot.lane.b32.xlu1 %v14916_v28, %s11620_s30 }
 0x748   :  { %17838 = vst [vmem:[#allocation83_spill] sm:$0xff] %v14999_v26 }
 0x749   :  { %6321 = vrot.lane.b32.xlu0 %v14984_v12, %s11618_s28  ;;  %v15005_v4 = vpop.permute.xlu1 %6191 }
 0x74a   :  { %17839 = vst [vmem:[#allocation68_spill] sm:$0xff] %v15005_v4 }
 0x74b   :  { %v15008_v35 = vpop.permute.xlu0 %7223  ;;  %6335 = vrot.lane.b32.xlu1 %v14926_v59, %s11618_s28 }
 0x74c   :  { %17840 = vst [vmem:[#allocation107_spill] sm:$0xff] %v15008_v35 }
 0x74d   :  { %6169 = vrot.lane.b32.xlu0 %v14984_v12, %s11619_s29  ;;  %v15014_v43 = vpop.permute.xlu1 %7075 }
 0x74e   :  { %17841 = vst [vmem:[#allocation110_spill] sm:$0xff] %v15014_v43  ;;  %v6095_v43 = vadd.f32 %v6094_v52, %v6042_v53 }
 0x74f   :  { %v15016_v47 = vpop.permute.xlu0 %7083  ;;  %6961 = vrot.lane.b32.xlu1 %v14916_v28, %s11621_s9 }
 0x750   :  { %17842 = vst [vmem:[#allocation88_spill] sm:$0xff] %v15016_v47  ;;  %v6128_v2 = vmul.f32 0.01, %v6095_v43  ;;  %vm6112_vm13 = vcmp.gt.f32.partialorder %v6095_v43, 0.0 }
 0x751   :  { %7235 = vrot.lane.b32.xlu0 %v15020_v11, %s11615_s6  ;;  %v15025_v29 = vpop.permute.xlu1 %7217 }
 0x753   :  { %v15027_v45 = vpop.permute.xlu0 %6619  ;;  %6195 = vrot.lane.b32.xlu1 %v14926_v59, %s11619_s29 }
 0x755   :  { %7095 = vrot.lane.b32.xlu0 %v15020_v11, %s11620_s30  ;;  %v15033_v32 = vpop.permute.xlu1 %7077 }
 0x756   :  { %17844 = vst [vmem:[#allocation105_spill] sm:$0xff] %v15033_v32 }
 0x757   :  { %v15037_v37 = vpop.permute.xlu0 %6479  ;;  %6599 = vrot.lane.b32.xlu1 %v15035_v13, %s11614_s2 }
 0x759   :  { %6955 = vrot.lane.b32.xlu0 %v15020_v11, %s11621_s9  ;;  %v15043_v7 = vpop.permute.xlu1 %6937 }
 0x75a   :  { %17846 = vst [vmem:[#allocation53_spill] sm:$0xff] %v15043_v7  ;;  %v6098_v7 = vpop.f32.mrf.mxu1 }
 0x75b   :  { %v15045_v8 = vpop.permute.xlu0 %6339  ;;  %6459 = vrot.lane.b32.xlu1 %v15035_v13, %s11616_s27  ;;  %v6099_v18 = vadd.f32 %v6098_v7, %v6046_v40  ;;  %v15105_v40 = vsel %vm6112_vm13, %v6095_v43, %v6128_v2 }
 0x75c   :  { %17852 = vst [vmem:[#allocation51_spill] sm:$0xff] %v15105_v40 }
 0x75d   :  { %7243 = vrot.lane.b32.xlu0 %v15049_v39, %s11615_s6  ;;  %v15053_v60 = vpop.permute.xlu1 %6617  ;;  %v6132_v14 = vmul.f32 0.01, %v6099_v18  ;;  %vm6116_vm14 = vcmp.gt.f32.partialorder %v6099_v18, 0.0 }
 0x75f   :  { %v15055_v31 = vpop.permute.xlu0 %6199  ;;  %6319 = vrot.lane.b32.xlu1 %v15035_v13, %s11618_s28  ;;  %v15111_v52 = vsel %vm6116_vm14, %v6099_v18, %v6132_v14 }
 0x760   :  { %17854 = vst [vmem:[#allocation108_spill] sm:$0xff] %v15111_v52 }
 0x761   :  { %6633 = vrot.lane.b32.xlu0 %v15049_v39, %s11614_s2  ;;  %v15061_v54 = vpop.permute.xlu1 %6477 }
 0x763   :  { %v15063_v63 = vpop.permute.xlu0 %6625  ;;  %6167 = vrot.lane.b32.xlu1 %v15035_v13, %s11619_s29 }
 0x765   :  { %6493 = vrot.lane.b32.xlu0 %v15049_v39, %s11616_s27  ;;  %v15069_v34 = vpop.permute.xlu1 %6337 }
 0x767   :  { %v15071_v17 = vpop.permute.xlu0 %6485  ;;  %6627 = vrot.lane.b32.xlu1 %v15020_v11, %s11614_s2 }
 0x769   :  { %6353 = vrot.lane.b32.xlu0 %v15049_v39, %s11618_s28  ;;  %v15077_v27 = vpop.permute.xlu1 %6197 }
 0x76a   :  { %17848 = vst [vmem:[#allocation99_spill] sm:$0xff] %v15077_v27 }
 0x76b   :  { %v15080_v10 = vpop.permute.xlu0 %6345  ;;  %6487 = vrot.lane.b32.xlu1 %v15020_v11, %s11616_s27 }
 0x76d   :  { %7103 = vrot.lane.b32.xlu0 %v15049_v39, %s11620_s30  ;;  %v15087_v20 = vpop.permute.xlu1 %7225 }
 0x76f   :  { %v15089_v47 = vpop.permute.xlu0 %6205  ;;  %6347 = vrot.lane.b32.xlu1 %v15020_v11, %s11618_s28 }
 0x770   :  { %17849 = vst [vmem:[#allocation55_spill] sm:$0xff] %v15089_v47 }
 0x771   :  { %6213 = vrot.lane.b32.xlu0 %v15049_v39, %s11619_s29  ;;  %v15095_v16 = vpop.permute.xlu1 %7085 }
 0x772   :  { %17850 = vst [vmem:[#allocation45_spill] sm:$0xff] %v15095_v16 }
 0x773   :  { %v15097_v46 = vpop.permute.xlu0 %7239  ;;  %6207 = vrot.lane.b32.xlu1 %v15020_v11, %s11619_s29 }
 0x774   :  { %17851 = vst [vmem:[#allocation54_spill] sm:$0xff] %v15097_v46 }
 0x775   :  { %6963 = vrot.lane.b32.xlu0 %v15049_v39, %s11621_s9  ;;  %v15103_v53 = vpop.permute.xlu1 %6623 }
 0x777   :  { %v15107_v7 = vpop.permute.xlu0 %7099  ;;  %6603 = vrot.lane.b32.xlu1 %v15105_v40, %s11614_s2 }
 0x778   :  { %17853 = vst [vmem:[#allocation64_spill] sm:$0xff] %v15107_v7 }
 0x779   :  { %6605 = vrot.lane.b32.xlu0 %v15111_v52, %s11614_s2  ;;  %v15115_v32 = vpop.permute.xlu1 %7231 }
 0x77a   :  { %17855 = vst [vmem:[#allocation111_spill] sm:$0xff] %v15115_v32 }
 0x77b   :  { %v15117_v16 = vpop.permute.xlu0 %6959  ;;  %6945 = vrot.lane.b32.xlu1 %v14859_v9, %s11621_s9 }
 0x77c   :  { %17856 = vst [vmem:[#allocation56_spill] sm:$0xff] %v15117_v16 }
 0x77d   :  { %6947 = vrot.lane.b32.xlu0 %v14949_v44, %s11621_s9  ;;  %v15123_v2 = vpop.permute.xlu1 %6483 }
 0x77f   :  { %v15125_v43 = vpop.permute.xlu0 %6631  ;;  %6463 = vrot.lane.b32.xlu1 %v15105_v40, %s11616_s27 }
 0x781   :  { %6465 = vrot.lane.b32.xlu0 %v15111_v52, %s11616_s27  ;;  %v15131_v18 = vpop.permute.xlu1 %6343 }
 0x783   :  { %v15133_v14 = vpop.permute.xlu0 %6491  ;;  %6323 = vrot.lane.b32.xlu1 %v15105_v40, %s11618_s28 }
 0x785   :  { %6943 = vrot.lane.b32.xlu0 %v14849_v0, %s11621_s9  ;;  %v15139_v16 = vpop.permute.xlu1 %6203 }
 0x786   :  { %17857 = vst [vmem:[#allocation73_spill] sm:$0xff] %v15139_v16 }
 0x787   :  { %v15141_v36 = vpop.permute.xlu0 %7219  ;;  %6171 = vrot.lane.b32.xlu1 %v15105_v40, %s11619_s29 }
 0x788   :  { %17858 = vst [vmem:[#allocation69_spill] sm:$0xff] %v15141_v36 }
 0x789   :  { %6325 = vrot.lane.b32.xlu0 %v15111_v52, %s11618_s28  ;;  %v15147_v7 = vpop.permute.xlu1 %7091 }
 0x78a   :  { %17859 = vst [vmem:[#allocation113_spill] sm:$0xff] %v15147_v7 }
 0x78b   :  { %v15149_v42 = vpop.permute.xlu0 %6351  ;;  %6935 = vrot.lane.b32.xlu1 %v14823_v3, %s11621_s9 }
 0x78d   :  { %6815 = vrot.lane.b32.xlu0 %v15020_v11, %s11622_s10  ;;  %v15155_v33 = vpop.permute.xlu1 %6951 }
 0x78e   :  { %17860 = vst [vmem:[#allocation96_spill] sm:$0xff] %v15155_v33 }
 0x78f   :  { %v15157_v49 = vpop.permute.xlu0 %6211  ;;  %7097 = vrot.lane.b32.xlu1 %v15105_v40, %s11620_s30 }
 0x790   :  { %17861 = vst [vmem:[#allocation80_spill] sm:$0xff] %v15157_v49 }
 0x791   :  { %6173 = vrot.lane.b32.xlu0 %v15111_v52, %s11619_s29  ;;  %v15163_v23 = vpop.permute.xlu1 %7233 }
 0x792   :  { %v7253_v57 = vsel %vm1364_vm1, %v15115_v32, %v15163_v23 }
 0x793   :  { %v15165_v7 = vpop.permute.xlu0 %7079  ;;  %6813 = vrot.lane.b32.xlu1 %v14878_v19, %s11622_s10 }
 0x794   :  { %17862 = vst [vmem:[#allocation66_spill] sm:$0xff] %v15165_v7 }
 0x795   :  { %6823 = vrot.lane.b32.xlu0 %v15049_v39, %s11622_s10  ;;  %v15171_v11 = vpop.permute.xlu1 %7093  ;;  %v6641_v39 = vsel %vm664_vm0, %v15103_v53, %v15063_v63 }
 0x796   :  { %17863 = vst [vmem:[#allocation100_spill] sm:$0xff] %v15171_v11 }
 0x797   :  { %v15173_v33 = vpop.permute.xlu0 %6939  ;;  %6821 = vrot.lane.b32.xlu1 %v14916_v28, %s11622_s10  ;;  %v17868_v28 = vld [vmem:[#allocation13_spill] sm:$0xff] }
 0x798   :  { %17864 = vst [vmem:[#allocation62_spill] sm:$0xff] %v15173_v33  ;;  %v6676_v33 = vmul.f32 %v6641_v39, %v17868_v28 }
 0x799   :  { %6819 = vrot.lane.b32.xlu0 %v14898_v51, %s11622_s10  ;;  %v15179_v30 = vpop.permute.xlu1 %6953 }
 0x79a   :  { %17865 = vst [vmem:[#allocation72_spill] sm:$0xff] %v15179_v30 }
 0x79b   :  { %v15181_v22 = vpop.permute.xlu0 %7227  ;;  %6811 = vrot.lane.b32.xlu1 %v14903_v38, %s11622_s10 }
 0x79c   :  { %17866 = vst [vmem:[#allocation87_spill] sm:$0xff] %v15181_v22 }
 0x79d   :  { %7089 = vrot.lane.b32.xlu0 %v14984_v12, %s11620_s30  ;;  %v15190_v19 = vpop.permute.xlu1 %6629 }
 0x79e   :  { %17867 = vst [vmem:[#allocation65_spill] sm:$0xff] %v15190_v19  ;;  %v6644_v51 = vsel %vm664_vm0, %v15190_v19, %v15125_v43 }
 0x79f   :  { %v6680_v30 = vmul.f32 %v6644_v51, %v17868_v28  ;;  %v15197_v7 = vpop.permute.xlu0 %6621  ;;  %7081 = vrot.lane.b32.xlu1 %v15035_v13, %s11620_s30 }
 0x7a1   :  { %6799 = vrot.lane.b32.xlu0 %v14926_v59, %s11622_s10  ;;  %v15203_v38 = vpop.permute.xlu1 %6489  ;;  %v11329_v11 = vpack.c.bf16 %v6680_v30, %v6676_v33  ;;  %v15234_v59 = vld [vmem:[%s17069_s4 + $0x64] ss:$12 sps:$4 sm:$0xff]  }
 0x7a2   :  { %7875 = vmatprep.mubr.bf16.mxu1 %v15234_v59 }
 0x7a3   :  { %v15205_v1 = vpop.permute.xlu0 %6481  ;;  %6797 = vrot.lane.b32.xlu1 %v14827_v25, %s11622_s10  ;;  %7843 = vmatprep.subr.bf16.mxu1 %v11329_v11 }
 0x7a5   :  { %6807 = vrot.lane.b32.xlu0 %v14949_v44, %s11622_s10  ;;  %v15211_v51 = vpop.permute.xlu1 %6349 }
 0x7a7   :  { %v15213_v39 = vpop.permute.xlu0 %6341  ;;  %6805 = vrot.lane.b32.xlu1 %v14859_v9, %s11622_s10 }
 0x7a9   :  { %7105 = vrot.lane.b32.xlu0 %v15111_v52, %s11620_s30  ;;  %v15219_v30 = vpop.permute.xlu1 %6209 }
 0x7aa   :  { %17869 = vst [vmem:[#allocation75_spill] sm:$0xff] %v15219_v30 }
 0x7ab   :  { %v15221_v33 = vpop.permute.xlu0 %7087  ;;  %6795 = vrot.lane.b32.xlu1 %v14823_v3, %s11622_s10 }
 0x7ac   :  { %17870 = vst [vmem:[#allocation74_spill] sm:$0xff] %v15221_v33 }
 0x7ad   :  { %6803 = vrot.lane.b32.xlu0 %v14849_v0, %s11622_s10  ;;  %v7242_v11 = vpop.permute.xlu1 %7241 }
 0x7af   :  { %v15227_v44 = vpop.permute.xlu0 %6201  ;;  %6957 = vrot.lane.b32.xlu1 %v15105_v40, %s11621_s9 }
 0x7b0   :  { %17871 = vst [vmem:[#allocation78_spill] sm:$0xff] %v15227_v44 }
 0x7b1   :  { %6965 = vrot.lane.b32.xlu0 %v15111_v52, %s11621_s9  ;;  %v15238_v9 = vpop.permute.xlu1 %6615 }
 0x7b3   :  { %v15241_v3 = vpop.permute.xlu0 %6601  ;;  %6941 = vrot.lane.b32.xlu1 %v15035_v13, %s11621_s9 }
 0x7b5   :  { %6949 = vrot.lane.b32.xlu0 %v14984_v12, %s11621_s9  ;;  %v15247_v0 = vpop.permute.xlu1 %6475 }
 0x7b7   :  { %v15249_v25 = vpop.permute.xlu0 %6461  ;;  %6817 = vrot.lane.b32.xlu1 %v15105_v40, %s11622_s10 }
 0x7b8   :  { %17872 = vst [vmem:[#allocation81_spill] sm:$0xff] %v15249_v25 }
 0x7b9   :  { %6825 = vrot.lane.b32.xlu0 %v15111_v52, %s11622_s10  ;;  %v15255_v33 = vpop.permute.xlu1 %7101 }
 0x7ba   :  { %17873 = vst [vmem:[#allocation76_spill] sm:$0xff] %v15255_v33 }
 0x7bb   :  { %v15257_v44 = vpop.permute.xlu0 %6321  ;;  %6801 = vrot.lane.b32.xlu1 %v15035_v13, %s11622_s10 }
 0x7bc   :  { %17874 = vst [vmem:[#allocation77_spill] sm:$0xff] %v15257_v44  ;;  %v10418_v44 = vld [vmem:[%s17070_s5 + $0x50] sm:$0xff] }
 0x7bd   :  { %6809 = vrot.lane.b32.xlu0 %v14984_v12, %s11622_s10  ;;  %v15263_v30 = vpop.permute.xlu1 %6335 }
 0x7be   :  { %17875 = vst [vmem:[#allocation82_spill] sm:$0xff] %v15263_v30 }
 0x7bf   :  { %v15265_v49 = vpop.permute.xlu0 %6169  ;;  %7237 = vrot.lane.b32.xlu1 %v15105_v40, %s11615_s6 }
 0x7c0   :  { %17876 = vst [vmem:[#allocation79_spill] sm:$0xff] %v15265_v49 }
 0x7c1   :  { %7245 = vrot.lane.b32.xlu0 %v15111_v52, %s11615_s6  ;;  %v15271_v25 = vpop.permute.xlu1 %6961  ;;  %v10419_v52 = vld [vmem:[%s17070_s5 + $0x58] sm:$0xff] }
 0x7c2   :  { %17877 = vst [vmem:[#allocation86_spill] sm:$0xff] %v15271_v25 }
 0x7c3   :  { %v15273_v33 = vpop.permute.xlu0 %7235  ;;  %7221 = vrot.lane.b32.xlu1 %v15035_v13, %s11615_s6  ;;  %v10416_v13 = vld [vmem:[%s17070_s5 + $0x40] sm:$0xff] }
 0x7c4   :  { %17878 = vst [vmem:[#allocation97_spill] sm:$0xff] %v15273_v33 }
 0x7c5   :  { %7229 = vrot.lane.b32.xlu0 %v14984_v12, %s11615_s6  ;;  %v15282_v49 = vpop.permute.xlu1 %6195  ;;  %v10417_v12 = vld [vmem:[%s17070_s5 + $0x48] sm:$0xff] }
 0x7c6   :  { %17879 = vst [vmem:[#allocation84_spill] sm:$0xff] %v15282_v49  ;;  %v7256_v49 = vsel %vm1364_vm1, %v15097_v46, %v7242_v11 }
 0x7c7   :  { %v15287_v40 = vpop.permute.xlu0 %7095  ;;  %7439 = vperm.xlu1 %11462, %v10418_v44   ;;  %v7251_v44 = vsel %vm1364_vm1, %v15087_v20, %v15181_v22  ;;  %v7250_v22 = vsel %vm1364_vm1, %v15008_v35, %v15087_v20 }
 0x7c8   :  { %17880 = vst [vmem:[#allocation102_spill] sm:$0xff] %v15287_v40 }
 0x7c9   :  { %7444 = vperm.xlu0 %11461, %v10419_v52   ;;  %v15292_v25 = vpop.permute.xlu1 %6599  ;;  %v7254_v52 = vsel %vm1364_vm1, %v15163_v23, %v15273_v33  ;;  %v17885_v33 = vld [vmem:[#allocation15_spill] sm:$0xff] }
 0x7ca   :  { %v7288_v55 = vmul.f32 %v7251_v44, %v17885_v33  ;;  %v7292_v19 = vmul.f32 %v7254_v52, %v17885_v33 }
 0x7cb   :  { %v15297_v30 = vpop.permute.xlu0 %6955  ;;  %7429 = vperm.xlu1 %11462, %v10416_v13   ;;  %v17884_v13 = vld [vmem:[#allocation16_spill] sm:$0xff] }
 0x7cc   :  { %17881 = vst [vmem:[#allocation46_spill] sm:$0xff] %v15297_v30  ;;  %v7295_v46 = vmul.f32 %v7256_v49, %v17884_v13  ;;  %v7291_v15 = vmul.f32 %v7253_v57, %v17884_v13  ;;  %v7247_v49 = vsel %vm1364_vm1, %v14978_v6, %v15025_v29  ;;  %v7287_v20 = vmul.f32 %v7250_v22, %v17884_v13  ;;  %v17892_v6 = vld [vmem:[#allocation21_spill] sm:$0xff] }
 0x7cd   :  { %7434 = vperm.xlu0 %11461, %v10417_v12   ;;  %v15301_v40 = vpop.permute.xlu1 %6459  ;;  %v7248_v12 = vsel %vm1364_vm1, %v15025_v29, %v15141_v36  ;;  %v7283_v35 = vmul.f32 %v7247_v49, %v17884_v13  ;;  %v6355_v49 = vsel %vm340_vm4, %v14997_v21, %v14990_v5 }
 0x7ce   :  { %17882 = vst [vmem:[#allocation48_spill] sm:$0xff] %v15301_v40  ;;  %v11368_v44 = vpack.c.bf16 %v7295_v46, %v7291_v15  ;;  %v6358_v46 = vsel %vm340_vm4, %v15069_v34, %v15045_v8 }
 0x7cf   :  { %v15312_v30 = vpop.permute.xlu0 %7243 }
 0x7d0   :  { %17883 = vst [vmem:[#allocation47_spill] sm:$0xff] %v15312_v30  ;;  %v7257_v40 = vsel %vm1364_vm1, %v7242_v11, %v15312_v30  ;;  %v7284_v11 = vmul.f32 %v7248_v12, %v17885_v33  ;;  %v15344_v12 = vld [vmem:[%s17069_s4 + $0x68] ss:$12 sps:$4 sm:$0xff]  }
 0x7d1   :  { %v7296_v23 = vmul.f32 %v7257_v40, %v17885_v33  ;;  %v15326_v32 = vpop.permute.xlu1 %6319  ;;  %17888 = vst [vmem:[#allocation71_spill] sm:$0xff] %v15344_v12  ;;  %v17891_v33 = vld [vmem:[#allocation17_spill] sm:$0xff] }
 0x7d2   :  { %17886 = vst [vmem:[#allocation63_spill] sm:$0xff] %v15326_v32  ;;  %v11365_v40 = vpack.c.bf16 %v7288_v55, %v7284_v11  ;;  %v11364_v32 = vpack.c.bf16 %v7287_v20, %v7283_v35  ;;  %v6638_v55 = vsel %vm664_vm0, %v15053_v60, %v15027_v45  ;;  %v6504_v11 = vsel %vm502_vm2, %v15203_v38, %v15133_v14 }
 0x7d3   :  { %v15333_v36 = vpop.permute.xlu0 %6633  ;;  %v11369_v30 = vpack.c.bf16 %v7296_v23, %v7292_v19  ;;  %v6498_v19 = vsel %vm502_vm2, %v15061_v54, %v15037_v37  ;;  %v6495_v23 = vsel %vm502_vm2, %v14988_v48, %v14980_v41  ;;  %v15390_v13 = vmul.f32 %v6638_v55, %v17868_v28 }
 0x7d4   :  { %v15410_v55 = vmul.f32 %v6495_v23, %v17891_v33  ;;  %v6639_v23 = vsel %vm664_vm0, %v15027_v45, %v15197_v7 }
 0x7d5   :  { %7908 = vmatprep.subr.bf16.mxu0 %v11369_v30  ;;  %v15336_v52 = vpop.permute.xlu1 %6167  ;;  %v6218_v30 = vsel %vm178_vm5, %v15077_v27, %v15055_v31  ;;  %v15399_v27 = vmul.f32 %v6358_v46, %v17892_v6  ;;  %v15419_v46 = vmul.f32 %v6504_v11, %v17891_v33 }
 0x7d6   :  { %17887 = vst [vmem:[#allocation60_spill] sm:$0xff] %v15336_v52  ;;  %7909 = vmatpush1.bf16.msra.mxu0 %v11368_v44  ;;  %v15384_v44 = vld [vmem:[%s17069_s4 + $0x80] ss:$12 sps:$4 sm:$0xff]   ;;  %v6501_v52 = vsel %vm502_vm2, %v15123_v2, %v15071_v17 }
 0x7d7   :  { %v15339_v57 = vpop.permute.xlu0 %6493  ;;  %7910 = vmatprep.subr.bf16.mxu0 %v11365_v40  ;;  %17890 = vst [vmem:[#allocation57_spill] sm:$0xff] %v15384_v44  ;;  %v6215_v40 = vsel %vm178_vm5, %v15005_v4, %v14999_v26  ;;  %17893 = vst [vmem:[#allocation90_spill] sm:$0xff] %v15399_v27  ;;  %v15438_v11 = vmul.f32 %v6501_v52, %v17891_v33  ;;  %v6636_v52 = vsel %vm664_vm0, %v14972_v50, %v15238_v9  ;;  %v17905_v27 = vld [vmem:[#allocation75_spill] sm:$0xff] }
 0x7d9   :  { %v6628_v29 = vpop.permute.xlu1 %6627 }
 0x7da   :  { %7911 = vmatpush1.bf16.msra.mxu0 %v11364_v32  ;;  %v6635_v32 = vsel %vm664_vm0, %v14970_v58, %v14972_v50  ;;  %v6640_v50 = vsel %vm664_vm0, %v15197_v7, %v15241_v3  ;;  %v6645_v7 = vsel %vm664_vm0, %v15125_v43, %v15333_v36 }
 0x7db   :  { %v15346_v22 = vpop.permute.xlu0 %6353  ;;  %v6681_v26 = vmul.f32 %v6645_v7, %v12061_v62  ;;  %v17906_v7 = vld [vmem:[#allocation48_spill] sm:$0xff] }
 0x7dd   :  { %v15348_v15 = vpop.permute.xlu1 %6487  ;;  %10570 = vmatmul.mubr.msk.bf16.vlgmr.msra.gmra.mxu0 %vm1976_vm3, %v15344_v12  ;;  %v15393_v12 = vmul.f32 %v6498_v19, %v17891_v33  ;;  %v15413_v19 = vmul.f32 %v6355_v49, %v17892_v6  ;;  %v6499_v49 = vsel %vm502_vm2, %v15037_v37, %v15205_v1 }
 0x7de   :  { %7938 = vmatprep.mubr.bf16.mxu0 %v17821_v56  ;;  %v15396_v56 = vmul.f32 %v6635_v32, %v17868_v28  ;;  %v6361_v32 = vsel %vm340_vm4, %v15131_v18, %v15080_v10  ;;  %v6221_v28 = vsel %vm178_vm5, %v15139_v16, %v15089_v47 }
 0x7df   :  { %v15359_v35 = vpop.permute.xlu0 %7103  ;;  %17896 = vst [vmem:[#allocation67_spill] sm:$0xff] %v15413_v19  ;;  %v15449_v37 = vmul.f32 %v6361_v32, %v17892_v6  ;;  %v15467_v32 = vmul.f32 %v6499_v49, %v17582_v24  ;;  %v6669_v49 = vmul.f32 %v6636_v52, %v12061_v62  ;;  %v17899_v52 = vld [vmem:[#allocation20_spill] sm:$0xff]  ;;  %v17903_v19 = vld [vmem:[#allocation27_spill] sm:$0xff] }
 0x7e0   :  { %17889 = vst [vmem:[#allocation61_spill] sm:$0xff] %v15359_v35  ;;  %v15402_v35 = vmul.f32 %v6218_v30, %v17595_v61  ;;  %v15422_v30 = vmul.f32 %v6215_v40, %v17595_v61  ;;  %v6364_v40 = vsel %vm340_vm4, %v15211_v51, %v15149_v42  ;;  %v11325_v16 = vpack.c.bf16 %v15390_v13, %v15396_v56 }
 0x7e1   :  { %v15379_v20 = vpop.permute.xlu1 %6347  ;;  %v15461_v13 = vmul.f32 %v6221_v28, %v17595_v61  ;;  %v15472_v45 = vmul.f32 %v6364_v40, %v17892_v6  ;;  %v6637_v28 = vsel %vm664_vm0, %v15238_v9, %v15292_v25  ;;  %v6663_v9 = vsel %vm664_vm0, %v15292_v25, %v14970_v58 }
 0x7e2   :  { %17894 = vst [vmem:[#allocation85_spill] sm:$0xff] %v15402_v35  ;;  %17897 = vst [vmem:[#allocation70_spill] sm:$0xff] %v15422_v30 }
 0x7e3   :  { %v15407_v4 = vpop.permute.xlu0 %6213 }
 0x7e4   :  { %17895 = vst [vmem:[#allocation49_spill] sm:$0xff] %v15407_v4 }
 0x7e5   :  { %v15433_v4 = vpop.permute.xlu1 %6207  ;;  %10571 = vmatmul.mubr.msk.bf16.gmra.mxu0 %vm1976_vm3, %v15384_v44  ;;  %v6359_v44 = vsel %vm340_vm4, %v15045_v8, %v15213_v39  ;;  %v6664_v8 = vsel %vm664_vm0, %v15241_v3, %v15053_v60  ;;  %v17900_v60 = vld [vmem:[#allocation65_spill] sm:$0xff] }
 0x7e6   :  { %7981 = vmatprep.mubr.bf16.mxu0 %v15234_v59  ;;  %v15464_v59 = vmul.f32 %v6639_v23, %v12061_v62  ;;  %v6642_v23 = vsel %vm664_vm0, %v15063_v63, %v6628_v29  ;;  %v6496_v63 = vsel %vm502_vm2, %v14980_v41, %v15247_v0  ;;  %v17901_v41 = vld [vmem:[#allocation14_spill] sm:$0xff] }
 0x7e7   :  { %v15454_v33 = vpop.permute.xlu0 %6963  ;;  %v15529_v47 = vmul.f32 %v6496_v63, %v17582_v24 }
 0x7e8   :  { %17898 = vst [vmem:[#allocation104_spill] sm:$0xff] %v15454_v33  ;;  %v6670_v33 = vmul.f32 %v6637_v28, %v17899_v52  ;;  %v15514_v28 = vmul.f32 %v6359_v44, %v17903_v19  ;;  %v11326_v44 = vpack.c.bf16 %v15464_v59, %v6669_v49 }
 0x7e9   :  { %v6604_v56 = vpop.permute.xlu1 %6603 }
 0x7ea   :  { %v6643_v40 = vsel %vm664_vm0, %v6628_v29, %v6604_v56  ;;  %v6665_v6 = vsel %vm664_vm0, %v6604_v56, %v15103_v53  ;;  %v6677_v53 = vmul.f32 %v6642_v23, %v12061_v62  ;;  %v17904_v23 = vld [vmem:[#allocation80_spill] sm:$0xff] }
 0x7eb   :  { %v6606_v29 = vpop.permute.xlu0 %6605  ;;  %v6675_v30 = vmul.f32 %v6665_v6, %v17901_v41  ;;  %v6678_v35 = vmul.f32 %v6643_v40, %v17899_v52  ;;  %v6674_v40 = vmul.f32 %v6640_v50, %v17899_v52  ;;  %v6497_v6 = vsel %vm502_vm2, %v15247_v0, %v17906_v7 }
 0x7ec   :  { %v6646_v3 = vsel %vm664_vm0, %v15333_v36, %v6606_v29  ;;  %v6666_v56 = vsel %vm664_vm0, %v6606_v29, %v17900_v60  ;;  %v6224_v36 = vsel %vm178_vm5, %v17905_v27, %v17904_v23  ;;  %v6667_v29 = vmul.f32 %v6663_v9, %v17901_v41  ;;  %v17907_v9 = vld [vmem:[#allocation81_spill] sm:$0xff] }
 0x7ed   :  { %v6679_v25 = vmul.f32 %v6666_v56, %v17901_v41  ;;  %v6682_v58 = vmul.f32 %v6646_v3, %v17899_v52  ;;  %v15511_v43 = vpop.permute.xlu1 %6945  ;;  %v11330_v27 = vpack.c.bf16 %v6681_v26, %v6677_v53  ;;  %v6502_v50 = vsel %vm502_vm2, %v15071_v17, %v15348_v15 }
 0x7ee   :  { %17902 = vst [vmem:[#allocation106_spill] sm:$0xff] %v15511_v43  ;;  %v6671_v43 = vmul.f32 %v6664_v8, %v17901_v41  ;;  %v6500_v59 = vsel %vm502_vm2, %v15205_v1, %v17907_v9  ;;  %v6524_v0 = vsel %vm502_vm2, %v17907_v9, %v15061_v54  ;;  %v6505_v1 = vsel %vm502_vm2, %v15133_v14, %v15339_v57 }
 0x7ef   :  { %v11328_v60 = vpack.c.bf16 %v6679_v25, %v6675_v30  ;;  %v15524_v3 = vpop.permute.xlu0 %6947  ;;  %v11331_v56 = vpack.c.bf16 %v6682_v58, %v6678_v35  ;;  %v11327_v35 = vpack.c.bf16 %v6674_v40, %v6670_v33  ;;  %v6523_v33 = vsel %vm502_vm2, %v17906_v7, %v14988_v48 }
 0x7f0   :  { %v11324_v17 = vpack.c.bf16 %v6671_v43, %v6667_v29  ;;  %v15564_v43 = vmul.f32 %v6224_v36, %v17595_v61 }
 0x7f1   :  { %7844 = vmatpush1.bf16.msra.mxu1 %v11328_v60  ;;  %7949 = vmatprep.subr.bf16.mxu0 %v11331_v56  ;;  %v6464_v30 = vpop.permute.xlu1 %6463 }
 0x7f2   :  { %v6503_v49 = vsel %vm502_vm2, %v15348_v15, %v6464_v30  ;;  %v6525_v26 = vsel %vm502_vm2, %v6464_v30, %v15123_v2  ;;  %7845 = vmatprep.subr.bf16.mxu1 %v11325_v16  ;;  %7950 = vmatpush1.bf16.msra.mxu0 %v11330_v27  ;;  %v17908_v15 = vld [vmem:[#allocation24_spill] sm:$0xff]  ;;  %v6537_v16 = vmul.f32 %v6502_v50, %v17582_v24  ;;  %v17909_v2 = vld [vmem:[#allocation18_spill] sm:$0xff]  ;;  %v17911_v50 = vld [vmem:[#allocation77_spill] sm:$0xff] }
 0x7f3   :  { %v6466_v8 = vpop.permute.xlu0 %6465  ;;  %7951 = vmatprep.subr.bf16.mxu0 %v11327_v35  ;;  %v6530_v63 = vmul.f32 %v6497_v6, %v17908_v15  ;;  %v6535_v53 = vmul.f32 %v6525_v26, %v17909_v2  ;;  %v6538_v48 = vmul.f32 %v6503_v49, %v17908_v15  ;;  %v11318_v6 = vpack.c.bf16 %v15467_v32, %v15529_v47  ;;  %v17912_v32 = vld [vmem:[#allocation82_spill] sm:$0xff] }
 0x7f4   :  { %v6506_v27 = vsel %vm502_vm2, %v15339_v57, %v6466_v8  ;;  %v6526_v54 = vsel %vm502_vm2, %v6466_v8, %v15203_v38  ;;  %v6541_v57 = vmul.f32 %v6505_v1, %v17582_v24  ;;  %v17910_v38 = vpack.c.bf16 %v15419_v46, %v15438_v11  ;;  %v17916_v8 = vld [vmem:[#allocation22_spill] sm:$0xff] }
 0x7f5   :  { %v6539_v25 = vmul.f32 %v6526_v54, %v17909_v2  ;;  %v6542_v14 = vmul.f32 %v6506_v27, %v17908_v15  ;;  %7846 = vmatpush1.bf16.msra.mxu1 %v11324_v17  ;;  %v6324_v58 = vpop.permute.xlu1 %6323  ;;  %v6534_v40 = vmul.f32 %v6500_v59, %v17908_v15  ;;  %v6527_v29 = vmul.f32 %v6523_v33, %v17909_v2  ;;  %v17915_v33 = vld [vmem:[#allocation28_spill] sm:$0xff]  ;;  %v17917_v54 = vld [vmem:[#allocation78_spill] sm:$0xff] }
 0x7f6   :  { %7847 = vmatprep.subr.bf16.mxu1 %v17910_v38  ;;  %7952 = vmatpush1.bf16.msra.mxu0 %v11326_v44  ;;  %v6531_v36 = vmul.f32 %v6524_v0, %v17909_v2  ;;  %v6360_v47 = vsel %vm340_vm4, %v15213_v39, %v17911_v50  ;;  %v6356_v46 = vsel %vm340_vm4, %v14990_v5, %v17912_v32  ;;  %v17913_v44 = vld [vmem:[#allocation63_spill] sm:$0xff] }
 0x7f7   :  { %v11320_v60 = vpack.c.bf16 %v6539_v25, %v6535_v53  ;;  %v15574_v56 = vpop.permute.xlu0 %6943  ;;  %v11323_v7 = vpack.c.bf16 %v6542_v14, %v6538_v48  ;;  %v11322_v11 = vpack.c.bf16 %v6541_v57, %v6537_v16  ;;  %v6357_v30 = vsel %vm340_vm4, %v17912_v32, %v17913_v44 }
 0x7f8   :  { %v6362_v35 = vsel %vm340_vm4, %v15080_v10, %v15379_v20  ;;  %v11319_v59 = vpack.c.bf16 %v6534_v40, %v6530_v63  ;;  %v6384_v39 = vsel %vm340_vm4, %v17911_v50, %v15069_v34  ;;  %v6363_v5 = vsel %vm340_vm4, %v15379_v20, %v6324_v58  ;;  %v17919_v40 = vld [vmem:[#allocation79_spill] sm:$0xff] }
 0x7f9   :  { %7848 = vmatpush1.bf16.msra.mxu1 %v11320_v60  ;;  %7953 = vmatprep.subr.bf16.mxu0 %v11323_v7  ;;  %v6172_v9 = vpop.permute.xlu1 %6171  ;;  %v6385_v49 = vsel %vm340_vm4, %v6324_v58, %v15131_v18  ;;  %v17914_v26 = vpack.c.bf16 %v15393_v12, %v15410_v55  ;;  %v6389_v10 = vmul.f32 %v6356_v46, %v17903_v19 }
 0x7fa   :  { %7954 = vmatpush1.bf16.msra.mxu0 %v11322_v11  ;;  %v11316_v0 = vpack.c.bf16 %v6531_v36, %v6527_v29  ;;  %v6383_v17 = vsel %vm340_vm4, %v17913_v44, %v14997_v21  ;;  %v6365_v34 = vsel %vm340_vm4, %v15149_v42, %v15346_v22  ;;  %v6390_v18 = vmul.f32 %v6357_v30, %v17915_v33  ;;  %v17924_v11 = vld [vmem:[#allocation73_spill] sm:$0xff]  ;;  %v17926_v30 = vld [vmem:[#allocation67_spill] sm:$0xff] }
 0x7fb   :  { %7849 = vmatprep.subr.bf16.mxu1 %v17914_v26  ;;  %v6326_v20 = vpop.permute.xlu0 %6325  ;;  %7955 = vmatprep.subr.bf16.mxu0 %v11319_v59  ;;  %v6397_v1 = vmul.f32 %v6362_v35, %v17903_v19  ;;  %v6395_v63 = vmul.f32 %v6385_v49, %v17916_v8  ;;  %v6398_v21 = vmul.f32 %v6363_v5, %v17915_v33  ;;  %v17929_v49 = vld [vmem:[#allocation32_spill] sm:$0xff] }
 0x7fc   :  { %v6366_v12 = vsel %vm340_vm4, %v15346_v22, %v6326_v20  ;;  %v6386_v55 = vsel %vm340_vm4, %v6326_v20, %v15211_v51  ;;  %v15621_v53 = vsel %vm178_vm5, %v15055_v31, %v17917_v54  ;;  %v6401_v22 = vmul.f32 %v6365_v34, %v17903_v19  ;;  %v17933_v20 = vld [vmem:[#allocation31_spill] sm:$0xff] }
 0x7fd   :  { %v6399_v16 = vmul.f32 %v6386_v55, %v17916_v8  ;;  %v6402_v42 = vmul.f32 %v6366_v12, %v17915_v33  ;;  %7850 = vmatpush1.bf16.msra.mxu1 %v11316_v0  ;;  %v15616_v27 = vpop.permute.xlu1 %6935  ;;  %v17918_v51 = vpack.c.bf16 %v15472_v45, %v15449_v37  ;;  %v11305_v48 = vpack.c.bf16 %v15564_v43, %v15461_v13  ;;  %v17920_v45 = vld [vmem:[#allocation60_spill] sm:$0xff]  ;;  %v17922_v43 = vld [vmem:[#allocation55_spill] sm:$0xff] }
 0x7fe   :  { %7956 = vmatpush1.bf16.msra.mxu0 %v11318_v6  ;;  %v6394_v25 = vmul.f32 %v6360_v47, %v17915_v33  ;;  %v6387_v14 = vmul.f32 %v6383_v17, %v17916_v8  ;;  %v6391_v31 = vmul.f32 %v6384_v39, %v17916_v8  ;;  %v6220_v29 = vsel %vm178_vm5, %v17917_v54, %v17919_v40  ;;  %v17921_v37 = vld [vmem:[#allocation84_spill] sm:$0xff]  ;;  %v17923_v47 = vld [vmem:[#allocation83_spill] sm:$0xff]  ;;  %v17931_v17 = vld [vmem:[#allocation61_spill] sm:$0xff] }
 0x7ff   :  { %7851 = vmatprep.subr.bf16.mxu1 %v17918_v51  ;;  %v11312_v58 = vpack.c.bf16 %v6399_v16, %v6395_v63  ;;  %v15631_v57 = vpop.permute.xlu0 %6815  ;;  %v11315_v38 = vpack.c.bf16 %v6402_v42, %v6398_v21  ;;  %v6217_v6 = vsel %vm178_vm5, %v17921_v37, %v17920_v45  ;;  %v11314_v60 = vpack.c.bf16 %v6401_v22, %v6397_v1  ;;  %v17928_v39 = vld [vmem:[#allocation68_spill] sm:$0xff]  ;;  %v17934_v12 = vld [vmem:[#allocation75_spill] sm:$0xff]  ;;  %v17935_v63 = vld [vmem:[#allocation26_spill] sm:$0xff] }
 0x800   :  { %v11310_v13 = vpack.c.bf16 %v15514_v28, %v6389_v10  ;;  %v6222_v7 = vsel %vm178_vm5, %v17922_v43, %v15433_v4  ;;  %v11311_v50 = vpack.c.bf16 %v6394_v25, %v6390_v18  ;;  %v6216_v32 = vsel %vm178_vm5, %v17923_v47, %v17921_v37  ;;  %v17925_v28 = vld [vmem:[#allocation90_spill] sm:$0xff]  ;;  %v17930_v10 = vld [vmem:[#allocation49_spill] sm:$0xff]  ;;  %v17936_v22 = vld [vmem:[#allocation99_spill] sm:$0xff] }
 0x801   :  { %7852 = vmatpush1.bf16.msra.mxu1 %v11312_v58  ;;  %7957 = vmatprep.subr.bf16.mxu0 %v11315_v38  ;;  %v15644_v36 = vpop.permute.xlu1 %7097  ;;  %v6223_v46 = vsel %vm178_vm5, %v15433_v4, %v6172_v9  ;;  %v6245_v44 = vsel %vm178_vm5, %v6172_v9, %v17924_v11  ;;  %v17927_v35 = vpack.c.bf16 %v17925_v28, %v17926_v30  ;;  %v17932_v9 = vld [vmem:[#allocation76_spill] sm:$0xff]  ;;  %v17937_v58 = vld [vmem:[#allocation102_spill] sm:$0xff]  ;;  %v17942_v47 = vld [vmem:[#allocation45_spill] sm:$0xff] }
 0x802   :  { %7958 = vmatpush1.bf16.msra.mxu0 %v11314_v60  ;;  %v11308_v59 = vpack.c.bf16 %v6391_v31, %v6387_v14  ;;  %v6243_v5 = vsel %vm178_vm5, %v17920_v45, %v17928_v39  ;;  %v6250_v26 = vmul.f32 %v6217_v6, %v17929_v49  ;;  %v6225_v0 = vsel %vm178_vm5, %v17904_v23, %v17930_v10  ;;  %v17938_v38 = vld [vmem:[#allocation100_spill] sm:$0xff]  ;;  %v17943_v30 = vld [vmem:[#allocation113_spill] sm:$0xff] }
 0x803   :  { %7853 = vmatprep.subr.bf16.mxu1 %v17927_v35  ;;  %v6174_v4 = vpop.permute.xlu0 %6173  ;;  %7959 = vmatprep.subr.bf16.mxu0 %v11311_v50  ;;  %v7117_v34 = vsel %vm1202_vm6, %v17932_v9, %v17931_v17  ;;  %v6257_v18 = vmul.f32 %v6222_v7, %v17933_v20  ;;  %v6255_v21 = vmul.f32 %v6245_v44, %v17935_v63  ;;  %v17939_v43 = vld [vmem:[#allocation64_spill] sm:$0xff]  ;;  %v17940_v7 = vld [vmem:[#allocation29_spill] sm:$0xff] }
 0x804   :  { %v6226_v1 = vsel %vm178_vm5, %v17930_v10, %v6174_v4  ;;  %v6246_v55 = vsel %vm178_vm5, %v6174_v4, %v17934_v12  ;;  %v6258_v16 = vmul.f32 %v6223_v46, %v17929_v49  ;;  %v6244_v51 = vsel %vm178_vm5, %v17919_v40, %v17936_v22  ;;  %v17944_v39 = vld [vmem:[#allocation85_spill] sm:$0xff]  ;;  %v17950_v12 = vld [vmem:[#allocation88_spill] sm:$0xff]  ;;  %v17952_v22 = vld [vmem:[#allocation86_spill] sm:$0xff] }
 0x805   :  { %v6259_v23 = vmul.f32 %v6246_v55, %v17935_v63  ;;  %v6262_v42 = vmul.f32 %v6226_v1, %v17929_v49  ;;  %7854 = vmatpush1.bf16.msra.mxu1 %v11308_v59  ;;  %v15675_v54 = vpop.permute.xlu1 %6813  ;;  %v6254_v25 = vmul.f32 %v6220_v29, %v17929_v49  ;;  %v6261_v14 = vmul.f32 %v6225_v0, %v17933_v20  ;;  %v17947_v0 = vld [vmem:[#allocation66_spill] sm:$0xff]  ;;  %v17948_v4 = vld [vmem:[#allocation105_spill] sm:$0xff] }
 0x806   :  { %7855 = vmatprep.subr.bf16.mxu1 %v11305_v48  ;;  %7960 = vmatpush1.bf16.msra.mxu0 %v11310_v13  ;;  %v7114_v31 = vsel %vm1202_vm6, %v17938_v38, %v17937_v58  ;;  %v6247_v45 = vmul.f32 %v6243_v5, %v17935_v63  ;;  %v7116_v40 = vsel %vm1202_vm6, %v17939_v43, %v17932_v9  ;;  %v17941_v13 = vld [vmem:[#allocation74_spill] sm:$0xff] }
 0x807   :  { %v11304_v37 = vpack.c.bf16 %v6259_v23, %v6255_v21  ;;  %v15686_v6 = vpop.permute.xlu0 %6823  ;;  %v11307_v60 = vpack.c.bf16 %v6262_v42, %v6258_v16  ;;  %v6249_v29 = vmul.f32 %v6216_v32, %v17933_v20  ;;  %v7156_v50 = vmul.f32 %v7117_v34, %v17940_v7  ;;  %v17945_v5 = vld [vmem:[#allocation70_spill] sm:$0xff]  ;;  %v17951_v42 = vld [vmem:[#allocation104_spill] sm:$0xff] }
 0x808   :  { %v11306_v48 = vpack.c.bf16 %v6261_v14, %v6257_v18  ;;  %v7111_v46 = vsel %vm1202_vm6, %v17942_v47, %v17941_v13  ;;  %v6251_v11 = vmul.f32 %v6244_v51, %v17935_v63  ;;  %v11303_v28 = vpack.c.bf16 %v6254_v25, %v6250_v26  ;;  %v17949_v34 = vld [vmem:[#allocation30_spill] sm:$0xff] }
 0x809   :  { %7856 = vmatpush1.bf16.msra.mxu1 %v11304_v37  ;;  %7961 = vmatprep.subr.bf16.mxu0 %v11307_v60  ;;  %v6822_v44 = vpop.permute.xlu1 %6821  ;;  %v7113_v35 = vsel %vm1202_vm6, %v17943_v30, %v17938_v38  ;;  %v6253_v32 = vmul.f32 %v15621_v53, %v17933_v20  ;;  %v7152_v59 = vmul.f32 %v7114_v31, %v17940_v7  ;;  %v17953_v14 = vld [vmem:[#allocation110_spill] sm:$0xff]  ;;  %v17954_v60 = vld [vmem:[#allocation56_spill] sm:$0xff] }
 0x80a   :  { %v17946_v10 = vpack.c.bf16 %v17944_v39, %v17945_v5  ;;  %7962 = vmatpush1.bf16.msra.mxu0 %v11306_v48  ;;  %v7108_v9 = vsel %vm1202_vm6, %v17948_v4, %v17947_v0  ;;  %v7155_v26 = vmul.f32 %v7116_v40, %v17949_v34  ;;  %v11300_v18 = vpack.c.bf16 %v6251_v11, %v6247_v45  ;;  %v17959_v39 = vld [vmem:[#allocation106_spill] sm:$0xff] }
 0x80b   :  { %v15710_v1 = vpop.permute.xlu0 %6819  ;;  %7963 = vmatprep.subr.bf16.mxu0 %v11303_v28  ;;  %v7110_v53 = vsel %vm1202_vm6, %v17950_v12, %v17942_v47  ;;  %v7148_v55 = vmul.f32 %v7111_v46, %v17940_v7  ;;  %v11302_v21 = vpack.c.bf16 %v6253_v32, %v6249_v29  ;;  %v11361_v16 = vpack.c.bf16 %v7156_v50, %v7152_v59  ;;  %v17955_v29 = vld [vmem:[#allocation46_spill] sm:$0xff]  ;;  %v17956_v50 = vld [vmem:[#allocation72_spill] sm:$0xff]  ;;  %v17958_v28 = vld [vmem:[#allocation33_spill] sm:$0xff] }
 0x80c   :  { %7857 = vmatprep.subr.bf16.mxu1 %v17946_v10  ;;  %v7151_v23 = vmul.f32 %v7113_v35, %v17949_v34  ;;  %v6977_v51 = vsel %vm1040_vm7, %v17952_v22, %v17951_v42  ;;  %v7107_v38 = vsel %vm1202_vm6, %v17953_v14, %v17948_v4  ;;  %v7144_v31 = vmul.f32 %v7108_v9, %v17940_v7  ;;  %v17957_v46 = vld [vmem:[#allocation96_spill] sm:$0xff]  ;;  %v17960_v4 = vld [vmem:[#allocation34_spill] sm:$0xff] }
 0x80d   :  { %7858 = vmatpush1.bf16.msra.mxu1 %v11300_v18  ;;  %v15720_v25 = vpop.permute.xlu1 %6811  ;;  %v7147_v45 = vmul.f32 %v7110_v53, %v17949_v34  ;;  %v6976_v40 = vsel %vm1040_vm7, %v17954_v60, %v17952_v22  ;;  %v6974_v48 = vsel %vm1040_vm7, %v17956_v50, %v17955_v29  ;;  %v6973_v11 = vsel %vm1040_vm7, %v17957_v46, %v17956_v50  ;;  %v17961_v18 = vld [vmem:[#allocation53_spill] sm:$0xff] }
 0x80e   :  { %7859 = vmatprep.subr.bf16.mxu1 %v11361_v16  ;;  %7964 = vmatpush1.bf16.msra.mxu0 %v11302_v21  ;;  %v11360_v37 = vpack.c.bf16 %v7155_v26, %v7151_v23  ;;  %v7016_v35 = vmul.f32 %v6977_v51, %v17958_v28  ;;  %v11357_v32 = vpack.c.bf16 %v7148_v55, %v7144_v31  ;;  %v17962_v16 = vld [vmem:[#allocation62_spill] sm:$0xff] }
 0x80f   :  { %v7090_v47 = vpop.permute.xlu0 %7089  ;;  %v7143_v59 = vmul.f32 %v7107_v38, %v17949_v34  ;;  %v6971_v5 = vsel %vm1040_vm7, %v17959_v39, %v15524_v3  ;;  %v7015_v9 = vmul.f32 %v6976_v40, %v17960_v4  ;;  %v7012_v26 = vmul.f32 %v6974_v48, %v17958_v28 }
 0x810   :  { %v6967_v53 = vsel %vm1040_vm7, %v15616_v27, %v17961_v18  ;;  %v6968_v55 = vsel %vm1040_vm7, %v17961_v18, %v17962_v16  ;;  %v7011_v23 = vmul.f32 %v6973_v11, %v17960_v4  ;;  %v7008_v51 = vmul.f32 %v6971_v5, %v17958_v28 }
 0x811   :  { %7860 = vmatpush2.bf16.msra.mxu1 %v11360_v37  ;;  %v7082_v10 = vpop.permute.xlu1 %7081  ;;  %v11356_v21 = vpack.c.bf16 %v7147_v45, %v7143_v59  ;;  %v6970_v38 = vsel %vm1040_vm7, %v15574_v56, %v17959_v39  ;;  %v6837_v31 = vsel %vm878_vm8, %v6822_v44, %v15686_v6  ;;  %v11353_v37 = vpack.c.bf16 %v7016_v35, %v7012_v26  ;;  %v17963_v39 = vld [vmem:[#allocation37_spill] sm:$0xff] }
 0x812   :  { %7861 = vmatprep.subr.bf16.mxu1 %v11357_v32  ;;  %v7003_v45 = vmul.f32 %v6967_v53, %v17960_v4  ;;  %v7004_v50 = vmul.f32 %v6968_v55, %v17958_v28  ;;  %v11352_v48 = vpack.c.bf16 %v7015_v9, %v7011_v23  ;;  %v6834_v11 = vsel %vm878_vm8, %v15675_v54, %v15631_v57  ;;  %v17964_v23 = vld [vmem:[#allocation35_spill] sm:$0xff] }
 0x813   :  { %v15750_v22 = vpop.permute.xlu0 %6799  ;;  %v7007_v32 = vmul.f32 %v6970_v38, %v17960_v4  ;;  %v7115_v59 = vsel %vm1202_vm6, %v17937_v58, %v15644_v36  ;;  %v7141_v35 = vsel %vm1202_vm6, %v15644_v36, %v17943_v30  ;;  %v6876_v5 = vmul.f32 %v6837_v31, %v17963_v39  ;;  %v17965_v36 = vld [vmem:[#allocation36_spill] sm:$0xff] }
 0x814   :  { %v6836_v9 = vsel %vm878_vm8, %v15710_v1, %v6822_v44  ;;  %v6833_v18 = vsel %vm878_vm8, %v15720_v25, %v15675_v54  ;;  %v11349_v53 = vpack.c.bf16 %v7008_v51, %v7004_v50  ;;  %v6872_v55 = vmul.f32 %v6834_v11, %v17963_v39 }
 0x815   :  { %7862 = vmatpush2.bf16.msra.mxu1 %v11356_v21  ;;  %v6798_v40 = vpop.permute.xlu1 %6797  ;;  %v11348_v21 = vpack.c.bf16 %v7007_v32, %v7003_v45  ;;  %v7153_v38 = vmul.f32 %v7115_v59, %v17964_v23  ;;  %v7154_v30 = vmul.f32 %v7141_v35, %v17965_v36  ;;  %v7139_v31 = vsel %vm1202_vm6, %v7082_v10, %v17953_v14 }
 0x816   :  { %7863 = vmatprep.subr.bf16.mxu1 %v11353_v37  ;;  %v17966_v37 = vld [vmem:[#allocation38_spill] sm:$0xff]  ;;  %v6828_v51 = vsel %vm878_vm8, %v6798_v40, %v15750_v22  ;;  %v11345_v50 = vpack.c.bf16 %v6876_v5, %v6872_v55  ;;  %v7109_v59 = vsel %vm1202_vm6, %v17947_v0, %v7082_v10  ;;  %v7146_v35 = vmul.f32 %v7139_v31, %v17965_v36 }
 0x817   :  { %v15771_v26 = vpop.permute.xlu0 %6807  ;;  %v6875_v63 = vmul.f32 %v6836_v9, %v17966_v37  ;;  %v6871_v54 = vmul.f32 %v6833_v18, %v17966_v37 }
 0x819   :  { %7864 = vmatpush2.bf16.msra.mxu1 %v11352_v48  ;;  %v6806_v58 = vpop.permute.xlu1 %6805  ;;  %v7140_v48 = vsel %vm1202_vm6, %v7090_v47, %v17950_v12  ;;  %v7112_v12 = vsel %vm1202_vm6, %v17941_v13, %v7090_v47 }
 0x81a   :  { %v6831_v44 = vsel %vm878_vm8, %v6806_v58, %v15771_v26  ;;  %7865 = vmatprep.subr.bf16.mxu1 %v11349_v53  ;;  %v11344_v53 = vpack.c.bf16 %v6875_v63, %v6871_v54  ;;  %v7150_v0 = vmul.f32 %v7140_v48, %v17965_v36  ;;  %v7149_v54 = vmul.f32 %v7112_v12, %v17964_v23 }
 0x81b   :  { %v7106_v45 = vpop.permute.xlu0 %7105  ;;  %v6868_v11 = vmul.f32 %v6831_v44, %v17963_v39 }
 0x81c   :  { %v7118_v14 = vsel %vm1202_vm6, %v17931_v17, %v7106_v45  ;;  %v7142_v32 = vsel %vm1202_vm6, %v7106_v45, %v17939_v43  ;;  %v6864_v17 = vmul.f32 %v6828_v51, %v17963_v39  ;;  %v11359_v63 = vpack.c.bf16 %v7150_v0, %v7146_v35  ;;  %v17969_v35 = vld [vmem:[#allocation39_spill] sm:$0xff] }
 0x81d   :  { %v7157_v9 = vmul.f32 %v7118_v14, %v17964_v23  ;;  %v7158_v5 = vmul.f32 %v7142_v32, %v17965_v36  ;;  %7866 = vmatpush2.bf16.msra.mxu1 %v11348_v21  ;;  %v15801_v18 = vpop.permute.xlu1 %6795  ;;  %v7145_v21 = vmul.f32 %v7109_v59, %v17964_v23  ;;  %v17967_v14 = vld [vmem:[#allocation93_spill] sm:$0xff]  ;;  %v17971_v0 = vld [vmem:[#allocation103_spill] sm:$0xff] }
 0x81e   :  { %v6827_v43 = vsel %vm878_vm8, %v15801_v18, %v6798_v40  ;;  %7867 = vmatprep.subr.bf16.mxu1 %v11345_v50  ;;  %v11341_v45 = vpack.c.bf16 %v6868_v11, %v6864_v17  ;;  %v17968_v32 = vld [vmem:[#allocation89_spill] sm:$0xff] }
 0x81f   :  { %v11362_v10 = vpack.c.bf16 %v7157_v9, %v7153_v38  ;;  %v15809_v55 = vpop.permute.xlu0 %6803  ;;  %v11363_v31 = vpack.c.bf16 %v7158_v5, %v7154_v30  ;;  %v6863_v13 = vmul.f32 %v6827_v43, %v17966_v37  ;;  %v11358_v50 = vpack.c.bf16 %v7149_v54, %v7145_v21  ;;  %v17970_v9 = vld [vmem:[#allocation40_spill] sm:$0xff] }
 0x820   :  { %v6830_v44 = vsel %vm878_vm8, %v15809_v55, %v6806_v58  ;;  %v11337_v59 = vpack.c.bf16 %v17968_v32, %v17967_v14  ;;  %v17977_v14 = vld [vmem:[#allocation41_spill] sm:$0xff] }
 0x821   :  { %v6867_v47 = vmul.f32 %v6830_v44, %v17966_v37  ;;  %7868 = vmatpush2.bf16.msra.mxu1 %v11344_v53  ;;  %7965 = vmatprep.subr.bf16.mxu0 %v11363_v31  ;;  %v6958_v40 = vpop.permute.xlu1 %6957 }
 0x822   :  { %v6975_v38 = vsel %vm1040_vm7, %v17955_v29, %v6958_v40  ;;  %v7001_v30 = vsel %vm1040_vm7, %v6958_v40, %v17957_v46  ;;  %7869 = vmatprep.subr.bf16.mxu1 %v11341_v45  ;;  %7966 = vmatpush2.bf16.msra.mxu0 %v11362_v10  ;;  %v17972_v10 = vld [vmem:[#allocation94_spill] sm:$0xff] }
 0x823   :  { %v11340_v58 = vpack.c.bf16 %v6867_v47, %v6863_v13  ;;  %v6966_v51 = vpop.permute.xlu0 %6965  ;;  %7967 = vmatprep.subr.bf16.mxu0 %v11359_v63  ;;  %v7013_v29 = vmul.f32 %v6975_v38, %v17969_v35  ;;  %v7014_v5 = vmul.f32 %v7001_v30, %v17970_v9  ;;  %v11336_v31 = vpack.c.bf16 %v17972_v10, %v17971_v0  ;;  %v17974_v47 = vld [vmem:[#allocation91_spill] sm:$0xff] }
 0x824   :  { %v6978_v48 = vsel %vm1040_vm7, %v17951_v42, %v6966_v51  ;;  %v7002_v11 = vsel %vm1040_vm7, %v6966_v51, %v17954_v60 }
 0x825   :  { %v7017_v46 = vmul.f32 %v6978_v48, %v17969_v35  ;;  %v7018_v12 = vmul.f32 %v7002_v11, %v17970_v9  ;;  %7870 = vmatpush2.bf16.msra.mxu1 %v11340_v58  ;;  %v6942_v17 = vpop.permute.xlu1 %6941  ;;  %v17976_v48 = vld [vmem:[#allocation101_spill] sm:$0xff] }
 0x826   :  { %v6969_v43 = vsel %vm1040_vm7, %v17962_v16, %v6942_v17  ;;  %v6999_v42 = vsel %vm1040_vm7, %v6942_v17, %v15616_v27  ;;  %7871 = vmatprep.subr.bf16.mxu1 %v11337_v59  ;;  %7968 = vmatpush2.bf16.msra.mxu0 %v11358_v50  ;;  %v17973_v16 = vld [vmem:[#allocation58_spill] sm:$0xff]  ;;  %v17975_v50 = vld [vmem:[#allocation59_spill] sm:$0xff] }
 0x827   :  { %v11354_v60 = vpack.c.bf16 %v7017_v46, %v7013_v29  ;;  %v6950_v53 = vpop.permute.xlu0 %6949  ;;  %v11355_v21 = vpack.c.bf16 %v7018_v12, %v7014_v5  ;;  %v7005_v44 = vmul.f32 %v6969_v43, %v17969_v35  ;;  %v11333_v40 = vpack.c.bf16 %v17974_v47, %v17973_v16  ;;  %v17980_v16 = vld [vmem:[#allocation111_spill] sm:$0xff] }
 0x828   :  { %v6972_v45 = vsel %vm1040_vm7, %v15524_v3, %v6950_v53  ;;  %v7000_v13 = vsel %vm1040_vm7, %v6950_v53, %v15574_v56  ;;  %v7006_v27 = vmul.f32 %v6999_v42, %v17970_v9  ;;  %v11332_v11 = vpack.c.bf16 %v17976_v48, %v17975_v50  ;;  %v17986_v48 = vld [vmem:[#allocation44_spill] sm:$0xff] }
 0x829   :  { %v7009_v63 = vmul.f32 %v6972_v45, %v17969_v35  ;;  %v7010_v54 = vmul.f32 %v7000_v13, %v17970_v9  ;;  %7872 = vmatpush2.bf16.msra.mxu1 %v11336_v31  ;;  %7969 = vmatprep.subr.bf16.mxu0 %v11355_v21  ;;  %v6818_v38 = vpop.permute.xlu1 %6817  ;;  %v17979_v45 = vld [vmem:[#allocation97_spill] sm:$0xff] }
 0x82a   :  { %v6835_v30 = vsel %vm878_vm8, %v15631_v57, %v6818_v38  ;;  %v6861_v3 = vsel %vm878_vm8, %v6818_v38, %v15720_v25  ;;  %7873 = vmatprep.subr.bf16.mxu1 %v11333_v40  ;;  %7970 = vmatpush2.bf16.msra.mxu0 %v11354_v60  ;;  %v15861_v57 = vld [vmem:[%s17069_s4 + $0x60] ss:$12 sps:$4 sm:$0xff]   ;;  %v17978_v25 = vld [vmem:[#allocation42_spill] sm:$0xff] }
 0x82b   :  { %v11350_v56 = vpack.c.bf16 %v7009_v63, %v7005_v44  ;;  %v6826_v58 = vpop.permute.xlu0 %6825  ;;  %v11351_v51 = vpack.c.bf16 %v7010_v54, %v7006_v27  ;;  %v6873_v32 = vmul.f32 %v6835_v30, %v17977_v14  ;;  %v6874_v5 = vmul.f32 %v6861_v3, %v17978_v25  ;;  %v17981_v27 = vld [vmem:[#allocation47_spill] sm:$0xff]  ;;  %v17982_v54 = vld [vmem:[#allocation54_spill] sm:$0xff]  ;;  %v17984_v3 = vld [vmem:[#allocation108_spill] sm:$0xff] }
 0x82c   :  { %v6838_v59 = vsel %vm878_vm8, %v15686_v6, %v6826_v58  ;;  %v6862_v29 = vsel %vm878_vm8, %v6826_v58, %v15710_v1  ;;  %v11491_v6 = vld [vmem:[%s17069_s4 + $0x7c] ss:$12 sps:$4 sm:$0xff]   ;;  %v17983_v30 = vld [vmem:[#allocation51_spill] sm:$0xff]  ;;  %v11493_v58 = vld [vmem:[%s17069_s4 + $0x78] ss:$12 sps:$4 sm:$0xff]  }
 0x82d   :  { %v6877_v46 = vmul.f32 %v6838_v59, %v17977_v14  ;;  %v6878_v12 = vmul.f32 %v6862_v29, %v17978_v25  ;;  %7971 = vmatprep.subr.bf16.mxu0 %v11351_v51  ;;  %v6802_v17 = vpop.permute.xlu1 %6801  ;;  %7874 = vmatpush2.bf16.msra.mxu1 %v11332_v11  ;;  %v17985_v51 = vld [vmem:[#allocation43_spill] sm:$0xff] }
 0x82e   :  { %v6829_v1 = vsel %vm878_vm8, %v15750_v22, %v6802_v17  ;;  %v6859_v43 = vsel %vm878_vm8, %v6802_v17, %v15801_v18  ;;  %7972 = vmatpush2.bf16.msra.mxu0 %v11350_v56  ;;  %v11339_v56 = vpack.c.bf16 %v17984_v3, %v17983_v30  ;;  %v17998_v30 = vld [vmem:[#allocation71_spill] sm:$0xff]  ;;  %v17999_v3 = vld [vmem:[#allocation57_spill] sm:$0xff] }
 0x82f   :  { %v11346_v42 = vpack.c.bf16 %v6877_v46, %v6873_v32  ;;  %v6810_v60 = vpop.permute.xlu0 %6809  ;;  %v11347_v53 = vpack.c.bf16 %v6878_v12, %v6874_v5  ;;  %v6865_v0 = vmul.f32 %v6829_v1, %v17977_v14  ;;  %v6866_v21 = vmul.f32 %v6859_v43, %v17978_v25  ;;  %v17987_v5 = vld [vmem:[#allocation69_spill] sm:$0xff]  ;;  %v17988_v12 = vld [vmem:[#allocation112_spill] sm:$0xff] }
 0x830   :  { %v6832_v10 = vsel %vm878_vm8, %v15771_v26, %v6810_v60  ;;  %v6860_v31 = vsel %vm878_vm8, %v6810_v60, %v15809_v55  ;;  %7876 = vmatmul.mubr.bf16.vlgmr.msra.gmra.mxu1 %v15861_v57  ;;  %v17989_v60 = vld [vmem:[#allocation92_spill] sm:$0xff] }
 0x831   :  { %v6869_v22 = vmul.f32 %v6832_v10, %v17977_v14  ;;  %v6870_v18 = vmul.f32 %v6860_v31, %v17978_v25  ;;  %7973 = vmatprep.subr.bf16.mxu0 %v11347_v53  ;;  %v7238_v44 = vpop.permute.xlu1 %7237  ;;  %7885 = vmatprep.mubr.bf16.mxu1 %v11491_v6  ;;  %v17990_v53 = vld [vmem:[#allocation50_spill] sm:$0xff]  ;;  %v17991_v31 = vld [vmem:[#allocation87_spill] sm:$0xff] }
 0x832   :  { %v7255_v13 = vsel %vm1364_vm1, %v17979_v45, %v7238_v44  ;;  %v7281_v26 = vsel %vm1364_vm1, %v7238_v44, %v17980_v16  ;;  %7974 = vmatpush2.bf16.msra.mxu0 %v11346_v42  ;;  %v17993_v44 = vld [vmem:[#allocation109_spill] sm:$0xff]  ;;  %v17994_v45 = vld [vmem:[#allocation52_spill] sm:$0xff] }
 0x833   :  { %v11342_v47 = vpack.c.bf16 %v6869_v22, %v6865_v0  ;;  %v7246_v55 = vpop.permute.xlu0 %7245  ;;  %v11343_v40 = vpack.c.bf16 %v6870_v18, %v6866_v21  ;;  %v7293_v50 = vmul.f32 %v7255_v13, %v17985_v51  ;;  %v7294_v11 = vmul.f32 %v7281_v26, %v17986_v48  ;;  %v17992_v22 = vld [vmem:[#allocation107_spill] sm:$0xff] }
 0x834   :  { %v7258_v63 = vsel %vm1364_vm1, %v17981_v27, %v7246_v55  ;;  %v7282_v38 = vsel %vm1364_vm1, %v7246_v55, %v17982_v54  ;;  %v11335_v0 = vpack.c.bf16 %v17990_v53, %v17989_v60  ;;  %v11338_v13 = vpack.c.bf16 %v17994_v45, %v17993_v44  ;;  %v17997_v54 = vld [vmem:[#allocation98_spill] sm:$0xff] }
 0x835   :  { %v7297_v32 = vmul.f32 %v7258_v63, %v17985_v51  ;;  %v7298_v59 = vmul.f32 %v7282_v38, %v17986_v48  ;;  %7975 = vmatprep.subr.bf16.mxu0 %v11343_v40  ;;  %v7222_v29 = vpop.permute.xlu1 %7221  ;;  %v17995_v55 = vmov 0   ;;  %v17996_v63 = vld [vmem:[#allocation95_spill] sm:$0xff] }
 0x836   :  { %v7249_v46 = vsel %vm1364_vm1, %v17987_v5, %v7222_v29  ;;  %v7279_v17 = vsel %vm1364_vm1, %v7222_v29, %v17988_v12  ;;  %7976 = vmatpush2.bf16.msra.mxu0 %v11342_v47  ;;  %v11334_v38 = vpack.c.bf16 %v17997_v54, %v17996_v63 }
 0x837   :  { %v11370_v1 = vpack.c.bf16 %v7297_v32, %v7293_v50  ;;  %v7230_v43 = vpop.permute.xlu0 %7229  ;;  %7977 = vmatprep.subr.bf16.mxu0 %v11339_v56  ;;  %v11371_v42 = vpack.c.bf16 %v7298_v59, %v7294_v11  ;;  %v7285_v10 = vmul.f32 %v7249_v46, %v17985_v51  ;;  %v7286_v16 = vmul.f32 %v7279_v17, %v17986_v48 }
 0x838   :  { %v7252_v21 = vsel %vm1364_vm1, %v17991_v31, %v7230_v43  ;;  %v7280_v18 = vsel %vm1364_vm1, %v7230_v43, %v17992_v22  ;;  %7886 = vmatmul.mubr.bf16.gmra.mxu1 %v11493_v58 }
 0x839   :  { %v7289_v26 = vmul.f32 %v7252_v21, %v17985_v51  ;;  %v7290_v47 = vmul.f32 %v7280_v18, %v17986_v48  ;;  %8014 = vmatprep.subr.bf16.mxu1 %v11371_v42  ;;  %8034 = vmatprep.mubr.bf16.mxu1 %v17995_v55 }
 0x83a   :  { %7978 = vmatpush2.bf16.msra.mxu0 %v11338_v13  ;;  %8015 = vmatpush1.bf16.msra.mxu1 %v11370_v1 }
 0x83b   :  { %v11366_v40 = vpack.c.bf16 %v7289_v26, %v7285_v10  ;;  %7979 = vmatprep.subr.bf16.mxu0 %v11335_v0  ;;  %v11367_v27 = vpack.c.bf16 %v7290_v47, %v7286_v16 }
 0x83d   :  { %8016 = vmatprep.subr.bf16.mxu1 %v11367_v27 }
 0x83e   :  { %7980 = vmatpush2.bf16.msra.mxu0 %v11334_v38  ;;  %8017 = vmatpush1.bf16.msra.mxu1 %v11366_v40 }
 0x841   :  { %7982 = vmatmul.mubr.bf16.vlgmr.msra.gmra.mxu0 %v15861_v57  ;;  %10572 = vmatmul.mubr.msk.bf16.vlgmr.msra.gmra.mxu1 %vm1976_vm3, %v17998_v30 }
 0x842   :  { %7991 = vmatprep.mubr.bf16.mxu0 %v11491_v6  ;;  %8044 = vmatprep.mubr.bf16.mxu1 %v17995_v55  ;;  %v15924_v56 = vpop.permute.xlu1 %7439 }
 0x846   :  { %v15926_v50 = vpop.permute.xlu1 %7429 }
 0x849   :  { %7992 = vmatmul.mubr.bf16.gmra.mxu0 %v11493_v58  ;;  %10573 = vmatmul.mubr.msk.bf16.gmra.mxu1 %vm1976_vm3, %v17999_v3  ;;  %v15930_v58 = vpop.permute.xlu0 %7444 }
 0x84d   :  { %v15940_v60 = vpop.permute.xlu0 %7434 }
 0x89d   :  { %v7930_v11 = vpop.f32.mrf.mxu0 }
 0x89f   :  { %v7932_v46 = vpop.f32.mrf.mxu0 }
 0x8a1   :  { %v7934_v0 = vpop.f32.mrf.mxu0 }
 0x8a3   :  { %v7936_v18 = vpop.f32.mrf.mxu0 }
 0x8a5   :  { %v7940_v47 = vpop.f32.mrf.mxu0 }
 0x8a7   :  { %v7942_v63 = vpop.f32.mrf.mxu0 }
 0x8f0   :  { %v7877_v32 = vpop.f32.mrf.mxu1 }
 0x8f1   :  { %v7878_v59 = vadd.f32 %v7877_v32, %v15926_v50 }
 0x8f2   :  { %v7879_v29 = vpop.f32.mrf.mxu1 }
 0x8f3   :  { %v7931_v57 = vadd.f32 %v7930_v11, %v7878_v59  ;;  %v7880_v5 = vadd.f32 %v7879_v29, %v15926_v50  ;;  %v7944_v59 = vpop.f32.mrf.mxu0 }
 0x8f4   :  { %v7881_v42 = vpop.f32.mrf.mxu1 }
 0x8f5   :  { %vm8055_vm15 = vcmp.gt.f32.partialorder %v7931_v57, 0.0  ;;  %v8071_v6 = vmul.f32 0.01, %v7931_v57  ;;  %v7933_v12 = vadd.f32 %v7932_v46, %v7880_v5  ;;  %v7882_v53 = vadd.f32 %v7881_v42, %v15940_v60 }
 0x8f6   :  { %v7883_v31 = vpop.f32.mrf.mxu1 }
 0x8f7   :  { %v15932_v17 = vsel %vm8055_vm15, %v7931_v57, %v8071_v6  ;;  %vm8056_vm9 = vcmp.gt.f32.partialorder %v7933_v12, 0.0  ;;  %v8072_v1 = vmul.f32 0.01, %v7933_v12  ;;  %v7935_v10 = vadd.f32 %v7934_v0, %v7882_v53  ;;  %v7946_v53 = vpop.f32.mrf.mxu0 }
 0x8f8   :  { %18000 = vst [vmem:[#allocation20_spill] sm:$0xff] %v15932_v17  ;;  %8554 = vrot.lane.b32.xlu1 %v15932_v17, %s11614_s2  ;;  %v7884_v22 = vadd.f32 %v7883_v31, %v15940_v60  ;;  %v7887_v16 = vpop.f32.mrf.mxu1 }
 0x8f9   :  { %v15936_v43 = vsel %vm8056_vm9, %v7933_v12, %v8072_v1  ;;  %v8075_v21 = vmul.f32 0.01, %v7935_v10  ;;  %vm8059_vm10 = vcmp.gt.f32.partialorder %v7935_v10, 0.0  ;;  %v7888_v11 = vadd.f32 %v7887_v16, %v15924_v56 }
 0x8fa   :  { %18001 = vst [vmem:[#allocation65_spill] sm:$0xff] %v15936_v43  ;;  %8556 = vrot.lane.b32.xlu0 %v15936_v43, %s11614_s2  ;;  %v7937_v45 = vadd.f32 %v7936_v18, %v7884_v22  ;;  %v7889_v40 = vpop.f32.mrf.mxu1 }
 0x8fb   :  { %v15958_v44 = vsel %vm8059_vm10, %v7935_v10, %v8075_v21  ;;  %v7890_v27 = vadd.f32 %v7889_v40, %v15924_v56  ;;  %v7941_v29 = vadd.f32 %v7940_v47, %v7888_v11 }
 0x8fc   :  { %8414 = vrot.lane.b32.xlu1 %v15932_v17, %s11616_s27  ;;  %18002 = vst [vmem:[#allocation27_spill] sm:$0xff] %v15958_v44  ;;  %v8076_v13 = vmul.f32 0.01, %v7937_v45  ;;  %vm8060_vm11 = vcmp.gt.f32.partialorder %v7937_v45, 0.0  ;;  %v7891_v3 = vpop.f32.mrf.mxu1 }
 0x8fd   :  { %v7943_v54 = vadd.f32 %v7942_v63, %v7890_v27  ;;  %v7892_v32 = vadd.f32 %v7891_v3, %v15930_v58  ;;  %v8079_v5 = vmul.f32 0.01, %v7941_v29  ;;  %vm8063_vm13 = vcmp.gt.f32.partialorder %v7941_v29, 0.0 }
 0x8fe   :  { %8416 = vrot.lane.b32.xlu0 %v15936_v43, %s11616_s27  ;;  %v15968_v26 = vsel %vm8060_vm11, %v7937_v45, %v8076_v13  ;;  %v7893_v6 = vpop.f32.mrf.mxu1 }
 0x8ff   :  { %18003 = vst [vmem:[#allocation80_spill] sm:$0xff] %v15968_v26  ;;  %v8080_v38 = vmul.f32 0.01, %v7943_v54  ;;  %vm8064_vm12 = vcmp.gt.f32.partialorder %v7943_v54, 0.0  ;;  %v7945_v57 = vadd.f32 %v7944_v59, %v7892_v32  ;;  %v16005_v12 = vsel %vm8063_vm13, %v7941_v29, %v8079_v5 }
 0x900   :  { %8274 = vrot.lane.b32.xlu1 %v15932_v17, %s11618_s28  ;;  %18005 = vst [vmem:[#allocation81_spill] sm:$0xff] %v16005_v12  ;;  %v7894_v42 = vadd.f32 %v7893_v6, %v15930_v58 }
 0x901   :  { %v15987_v30 = vsel %vm8064_vm12, %v7943_v54, %v8080_v38  ;;  %v8083_v46 = vmul.f32 0.01, %v7945_v57  ;;  %vm8067_vm14 = vcmp.gt.f32.partialorder %v7945_v57, 0.0  ;;  %v7983_v21 = vpop.f32.mrf.mxu0  ;;  %v8036_v45 = vpop.f32.mrf.mxu1 }
 0x902   :  { %8276 = vrot.lane.b32.xlu0 %v15936_v43, %s11618_s28  ;;  %18004 = vst [vmem:[#allocation48_spill] sm:$0xff] %v15987_v30  ;;  %v7947_v0 = vadd.f32 %v7946_v53, %v7894_v42  ;;  %v7984_v22 = vadd.f32 %v7983_v21, %v15926_v50 }
 0x903   :  { %v16009_v1 = vsel %vm8067_vm14, %v7945_v57, %v8083_v46  ;;  %v7985_v18 = vpop.f32.mrf.mxu0  ;;  %v8038_v47 = vpop.f32.mrf.mxu1 }
 0x904   :  { %8134 = vrot.lane.b32.xlu1 %v15932_v17, %s11619_s29  ;;  %18006 = vst [vmem:[#allocation24_spill] sm:$0xff] %v16009_v1  ;;  %v8084_v10 = vmul.f32 0.01, %v7947_v0  ;;  %vm8068_vm15 = vcmp.gt.f32.partialorder %v7947_v0, 0.0  ;;  %v8037_v13 = vadd.f32 %v8036_v45, %v7984_v22 }
 0x905   :  { %v7987_v16 = vpop.f32.mrf.mxu0  ;;  %v8040_v63 = vpop.f32.mrf.mxu1 }
 0x906   :  { %8136 = vrot.lane.b32.xlu0 %v15936_v43, %s11619_s29  ;;  %v16024_v31 = vsel %vm8068_vm15, %v7947_v0, %v8084_v10  ;;  %v8073_v40 = vmul.f32 0.01, %v8037_v13  ;;  %v7988_v27 = vadd.f32 %v7987_v16, %v15940_v60  ;;  %vm8057_vm9 = vcmp.gt.f32.partialorder %v8037_v13, 0.0 }
 0x907   :  { %18007 = vst [vmem:[#allocation77_spill] sm:$0xff] %v16024_v31  ;;  %v7989_v32 = vpop.f32.mrf.mxu0  ;;  %v8042_v29 = vpop.f32.mrf.mxu1  ;;  %v7986_v16 = vadd.f32 %v7985_v18, %v15926_v50 }
 0x908   :  { %9018 = vrot.lane.b32.xlu1 %v15932_v17, %s11620_s30  ;;  %v16044_v54 = vsel %vm8057_vm9, %v8037_v13, %v8073_v40  ;;  %v8041_v38 = vadd.f32 %v8040_v63, %v7988_v27  ;;  %v7990_v59 = vadd.f32 %v7989_v32, %v15940_v60 }
 0x909   :  { %18008 = vst [vmem:[#allocation82_spill] sm:$0xff] %v16044_v54  ;;  %v7993_v0 = vpop.f32.mrf.mxu0  ;;  %v8046_v45 = vpop.f32.mrf.mxu1 }
 0x90a   :  { %9026 = vrot.lane.b32.xlu0 %v15958_v44, %s11620_s30  ;;  %v8077_v3 = vmul.f32 0.01, %v8041_v38  ;;  %vm8061_vm10 = vcmp.gt.f32.partialorder %v8041_v38, 0.0  ;;  %v8043_v57 = vadd.f32 %v8042_v29, %v7990_v59  ;;  %v7994_v22 = vadd.f32 %v7993_v0, %v15924_v56 }
 0x90b   :  { %v7995_v63 = vpop.f32.mrf.mxu0  ;;  %v8048_v50 = vpop.f32.mrf.mxu1 }
 0x90c   :  { %8878 = vrot.lane.b32.xlu1 %v15932_v17, %s11621_s9  ;;  %v16054_v11 = vsel %vm8061_vm10, %v8041_v38, %v8077_v3  ;;  %v8078_v5 = vmul.f32 0.01, %v8043_v57  ;;  %vm8062_vm11 = vcmp.gt.f32.partialorder %v8043_v57, 0.0  ;;  %v8047_v27 = vadd.f32 %v8046_v45, %v7994_v22 }
 0x90d   :  { %18009 = vst [vmem:[#allocation63_spill] sm:$0xff] %v16054_v11  ;;  %v8039_v3 = vadd.f32 %v8038_v47, %v7986_v16  ;;  %v7997_v18 = vpop.f32.mrf.mxu0  ;;  %v8050_v22 = vpop.f32.mrf.mxu1 }
 0x90e   :  { %8886 = vrot.lane.b32.xlu0 %v15958_v44, %s11621_s9  ;;  %v16085_v6 = vsel %vm8062_vm11, %v8043_v57, %v8078_v5  ;;  %v8081_v59 = vmul.f32 0.01, %v8047_v27  ;;  %vm8065_vm12 = vcmp.gt.f32.partialorder %v8047_v27, 0.0  ;;  %v7998_v0 = vadd.f32 %v7997_v18, %v15930_v58 }
 0x90f   :  { %18010 = vst [vmem:[#allocation28_spill] sm:$0xff] %v16085_v6  ;;  %v8074_v57 = vmul.f32 0.01, %v8039_v3  ;;  %vm8058_vm13 = vcmp.gt.f32.partialorder %v8039_v3, 0.0  ;;  %v7999_v9 = vpop.f32.mrf.mxu0 }
 0x910   :  { %9020 = vrot.lane.b32.xlu1 %v15936_v43, %s11620_s30  ;;  %v16129_v47 = vsel %vm8065_vm12, %v8047_v27, %v8081_v59  ;;  %v8051_v51 = vadd.f32 %v8050_v22, %v7998_v0 }
 0x911   :  { %18018 = vst [vmem:[#allocation90_spill] sm:$0xff] %v16129_v47  ;;  %v16136_v16 = vsel %vm8058_vm13, %v8039_v3, %v8074_v57 }
 0x912   :  { %8562 = vrot.lane.b32.xlu0 %v15968_v26, %s11614_s2  ;;  %18020 = vst [vmem:[#allocation68_spill] sm:$0xff] %v16136_v16  ;;  %v8085_v18 = vmul.f32 0.01, %v8051_v51  ;;  %vm8069_vm14 = vcmp.gt.f32.partialorder %v8051_v51, 0.0 }
 0x914   :  { %8880 = vrot.lane.b32.xlu1 %v15936_v43, %s11621_s9  ;;  %v16158_v0 = vsel %vm8069_vm14, %v8051_v51, %v8085_v18 }
 0x915   :  { %18022 = vst [vmem:[#allocation49_spill] sm:$0xff] %v16158_v0 }
 0x916   :  { %8422 = vrot.lane.b32.xlu0 %v15968_v26, %s11616_s27 }
 0x918   :  { %8560 = vrot.lane.b32.xlu1 %v15958_v44, %s11614_s2 }
 0x91a   :  { %8282 = vrot.lane.b32.xlu0 %v15968_v26, %s11618_s28 }
 0x91c   :  { %8420 = vrot.lane.b32.xlu1 %v15958_v44, %s11616_s27 }
 0x91e   :  { %8142 = vrot.lane.b32.xlu0 %v15968_v26, %s11619_s29 }
 0x920   :  { %8280 = vrot.lane.b32.xlu1 %v15958_v44, %s11618_s28 }
 0x922   :  { %8568 = vrot.lane.b32.xlu0 %v15987_v30, %s11614_s2 }
 0x924   :  { %8140 = vrot.lane.b32.xlu1 %v15958_v44, %s11619_s29 }
 0x926   :  { %8428 = vrot.lane.b32.xlu0 %v15987_v30, %s11616_s27 }
 0x928   :  { %9028 = vrot.lane.b32.xlu1 %v15968_v26, %s11620_s30 }
 0x92a   :  { %8288 = vrot.lane.b32.xlu0 %v15987_v30, %s11618_s28 }
 0x92c   :  { %8888 = vrot.lane.b32.xlu1 %v15968_v26, %s11621_s9 }
 0x92e   :  { %8148 = vrot.lane.b32.xlu0 %v15987_v30, %s11619_s29 }
 0x930   :  { %8566 = vrot.lane.b32.xlu1 %v16005_v12, %s11614_s2 }
 0x932   :  { %9042 = vrot.lane.b32.xlu0 %v16009_v1, %s11620_s30 }
 0x934   :  { %8426 = vrot.lane.b32.xlu1 %v16005_v12, %s11616_s27 }
 0x936   :  { %8902 = vrot.lane.b32.xlu0 %v16009_v1, %s11621_s9 }
 0x938   :  { %8286 = vrot.lane.b32.xlu1 %v16005_v12, %s11618_s28 }
 0x93a   :  { %8762 = vrot.lane.b32.xlu0 %v16009_v1, %s11622_s10 }
 0x93c   :  { %8146 = vrot.lane.b32.xlu1 %v16005_v12, %s11619_s29 }
 0x93e   :  { %8574 = vrot.lane.b32.xlu0 %v16024_v31, %s11614_s2 }
 0x940   :  { %9034 = vrot.lane.b32.xlu1 %v16005_v12, %s11620_s30 }
 0x942   :  { %8434 = vrot.lane.b32.xlu0 %v16024_v31, %s11616_s27 }
 0x944   :  { %8894 = vrot.lane.b32.xlu1 %v16005_v12, %s11621_s9 }
 0x946   :  { %8294 = vrot.lane.b32.xlu0 %v16024_v31, %s11618_s28 }
 0x948   :  { %8754 = vrot.lane.b32.xlu1 %v16005_v12, %s11622_s10 }
 0x94a   :  { %8154 = vrot.lane.b32.xlu0 %v16024_v31, %s11619_s29 }
 0x94c   :  { %9036 = vrot.lane.b32.xlu1 %v15987_v30, %s11620_s30 }
 0x94e   :  { %9022 = vrot.lane.b32.xlu0 %v16044_v54, %s11620_s30 }
 0x950   :  { %8896 = vrot.lane.b32.xlu1 %v15987_v30, %s11621_s9 }
 0x952   :  { %8882 = vrot.lane.b32.xlu0 %v16044_v54, %s11621_s9 }
 0x954   :  { %8756 = vrot.lane.b32.xlu1 %v15987_v30, %s11622_s10 }
 0x956   :  { %8564 = vrot.lane.b32.xlu0 %v16054_v11, %s11614_s2 }
 0x958   :  { %8572 = vrot.lane.b32.xlu1 %v16009_v1, %s11614_s2 }
 0x95a   :  { %8424 = vrot.lane.b32.xlu0 %v16054_v11, %s11616_s27 }
 0x95c   :  { %8432 = vrot.lane.b32.xlu1 %v16009_v1, %s11616_s27 }
 0x95e   :  { %8284 = vrot.lane.b32.xlu0 %v16054_v11, %s11618_s28 }
 0x960   :  { %8292 = vrot.lane.b32.xlu1 %v16009_v1, %s11618_s28 }
 0x962   :  { %9030 = vrot.lane.b32.xlu0 %v16054_v11, %s11620_s30 }
 0x964   :  { %8152 = vrot.lane.b32.xlu1 %v16009_v1, %s11619_s29 }
 0x966   :  { %8144 = vrot.lane.b32.xlu0 %v16054_v11, %s11619_s29 }
 0x968   :  { %8558 = vrot.lane.b32.xlu1 %v16044_v54, %s11614_s2 }
 0x96a   :  { %8890 = vrot.lane.b32.xlu0 %v16054_v11, %s11621_s9  ;;  %v16079_v60 = vpop.permute.xlu1 %8554 }
 0x96c   :  { %v16081_v46 = vpop.permute.xlu0 %8556  ;;  %8418 = vrot.lane.b32.xlu1 %v16044_v54, %s11616_s27 }
 0x96e   :  { %8544 = vrot.lane.b32.xlu0 %v16085_v6, %s11614_s2  ;;  %v16089_v42 = vpop.permute.xlu1 %8414 }
 0x96f   :  { %18011 = vst [vmem:[#allocation78_spill] sm:$0xff] %v16089_v42 }
 0x970   :  { %v16091_v53 = vpop.permute.xlu0 %8416  ;;  %9044 = vrot.lane.b32.xlu1 %v16024_v31, %s11620_s30 }
 0x972   :  { %8404 = vrot.lane.b32.xlu0 %v16085_v6, %s11616_s27  ;;  %v16097_v10 = vpop.permute.xlu1 %8274 }
 0x973   :  { %18012 = vst [vmem:[#allocation79_spill] sm:$0xff] %v16097_v10 }
 0x974   :  { %v16099_v21 = vpop.permute.xlu0 %8276  ;;  %8278 = vrot.lane.b32.xlu1 %v16044_v54, %s11618_s28 }
 0x976   :  { %8264 = vrot.lane.b32.xlu0 %v16085_v6, %s11618_s28  ;;  %v16106_v13 = vpop.permute.xlu1 %8134 }
 0x977   :  { %18013 = vst [vmem:[#allocation60_spill] sm:$0xff] %v16106_v13 }
 0x978   :  { %v16109_v40 = vpop.permute.xlu0 %8136  ;;  %8904 = vrot.lane.b32.xlu1 %v16024_v31, %s11621_s9 }
 0x97a   :  { %8112 = vrot.lane.b32.xlu0 %v16085_v6, %s11619_s29  ;;  %v16115_v38 = vpop.permute.xlu1 %9018 }
 0x97b   :  { %18014 = vst [vmem:[#allocation84_spill] sm:$0xff] %v16115_v38 }
 0x97c   :  { %v16117_v32 = vpop.permute.xlu0 %9026  ;;  %8138 = vrot.lane.b32.xlu1 %v16044_v54, %s11619_s29 }
 0x97d   :  { %18015 = vst [vmem:[#allocation55_spill] sm:$0xff] %v16117_v32 }
 0x97e   :  { %9032 = vrot.lane.b32.xlu0 %v16085_v6, %s11620_s30  ;;  %v16123_v29 = vpop.permute.xlu1 %8878 }
 0x97f   :  { %18016 = vst [vmem:[#allocation83_spill] sm:$0xff] %v16123_v29  ;;  %v7996_v29 = vadd.f32 %v7995_v63, %v15924_v56 }
 0x980   :  { %v16125_v5 = vpop.permute.xlu0 %8886  ;;  %8764 = vrot.lane.b32.xlu1 %v16024_v31, %s11622_s10 }
 0x981   :  { %18017 = vst [vmem:[#allocation73_spill] sm:$0xff] %v16125_v5  ;;  %v8000_v5 = vadd.f32 %v7999_v9, %v15930_v58 }
 0x982   :  { %9038 = vrot.lane.b32.xlu0 %v16129_v47, %s11620_s30  ;;  %v16134_v45 = vpop.permute.xlu1 %9020 }
 0x983   :  { %18019 = vst [vmem:[#allocation67_spill] sm:$0xff] %v16134_v45  ;;  %v8052_v45 = vpop.f32.mrf.mxu1 }
 0x984   :  { %v16138_v48 = vpop.permute.xlu0 %8562  ;;  %8542 = vrot.lane.b32.xlu1 %v16136_v16, %s11614_s2  ;;  %v8053_v56 = vadd.f32 %v8052_v45, %v8000_v5 }
 0x986   :  { %8898 = vrot.lane.b32.xlu0 %v16129_v47, %s11621_s9  ;;  %v16144_v27 = vpop.permute.xlu1 %8880  ;;  %v8086_v58 = vmul.f32 0.01, %v8053_v56  ;;  %vm8070_vm9 = vcmp.gt.f32.partialorder %v8053_v56, 0.0 }
 0x987   :  { %18021 = vst [vmem:[#allocation32_spill] sm:$0xff] %v16144_v27 }
 0x988   :  { %v16146_v59 = vpop.permute.xlu0 %8422  ;;  %8402 = vrot.lane.b32.xlu1 %v16136_v16, %s11616_s27  ;;  %v16220_v45 = vsel %vm8070_vm9, %v8053_v56, %v8086_v58 }
 0x989   :  { %18037 = vst [vmem:[#allocation105_spill] sm:$0xff] %v16220_v45 }
 0x98a   :  { %8758 = vrot.lane.b32.xlu0 %v16129_v47, %s11622_s10  ;;  %v16152_v3 = vpop.permute.xlu1 %8560 }
 0x98c   :  { %v16154_v57 = vpop.permute.xlu0 %8282  ;;  %8262 = vrot.lane.b32.xlu1 %v16136_v16, %s11618_s28 }
 0x98e   :  { %8576 = vrot.lane.b32.xlu0 %v16158_v0, %s11614_s2  ;;  %v16162_v22 = vpop.permute.xlu1 %8420 }
 0x98f   :  { %18023 = vst [vmem:[#allocation61_spill] sm:$0xff] %v16162_v22 }
 0x990   :  { %v16164_v55 = vpop.permute.xlu0 %8142  ;;  %8110 = vrot.lane.b32.xlu1 %v16136_v16, %s11619_s29 }
 0x992   :  { %8436 = vrot.lane.b32.xlu0 %v16158_v0, %s11616_s27  ;;  %v16170_v25 = vpop.permute.xlu1 %8280 }
 0x993   :  { %18024 = vst [vmem:[#allocation76_spill] sm:$0xff] %v16170_v25 }
 0x994   :  { %v16172_v14 = vpop.permute.xlu0 %8568  ;;  %9024 = vrot.lane.b32.xlu1 %v16136_v16, %s11620_s30 }
 0x995   :  { %18025 = vst [vmem:[#allocation31_spill] sm:$0xff] %v16172_v14 }
 0x996   :  { %8296 = vrot.lane.b32.xlu0 %v16158_v0, %s11618_s28  ;;  %v16178_v51 = vpop.permute.xlu1 %8140 }
 0x997   :  { %18026 = vst [vmem:[#allocation75_spill] sm:$0xff] %v16178_v51  ;;  %v8049_v51 = vadd.f32 %v8048_v50, %v7996_v29 }
 0x998   :  { %v16180_v18 = vpop.permute.xlu0 %8428  ;;  %8570 = vrot.lane.b32.xlu1 %v16129_v47, %s11614_s2 }
 0x999   :  { %18027 = vst [vmem:[#allocation99_spill] sm:$0xff] %v16180_v18  ;;  %vm8066_vm15 = vcmp.gt.f32.partialorder %v8049_v51, 0.0 }
 0x99a   :  { %9046 = vrot.lane.b32.xlu0 %v16158_v0, %s11620_s30  ;;  %v16186_v35 = vpop.permute.xlu1 %9028 }
 0x99b   :  { %18028 = vst [vmem:[#allocation102_spill] sm:$0xff] %v16186_v35  ;;  %v8082_v35 = vmul.f32 0.01, %v8049_v51 }
 0x99c   :  { %v16189_v27 = vpop.permute.xlu0 %8288  ;;  %8430 = vrot.lane.b32.xlu1 %v16129_v47, %s11616_s27 }
 0x99d   :  { %18029 = vst [vmem:[#allocation100_spill] sm:$0xff] %v16189_v27  ;;  %v16214_v29 = vsel %vm8066_vm15, %v8049_v51, %v8082_v35 }
 0x99e   :  { %8156 = vrot.lane.b32.xlu0 %v16158_v0, %s11619_s29  ;;  %v16196_v13 = vpop.permute.xlu1 %8888  ;;  %18035 = vst [vmem:[#allocation70_spill] sm:$0xff] %v16214_v29 }
 0x99f   :  { %18030 = vst [vmem:[#allocation64_spill] sm:$0xff] %v16196_v13 }
 0x9a0   :  { %v16198_v61 = vpop.permute.xlu0 %8148  ;;  %8290 = vrot.lane.b32.xlu1 %v16129_v47, %s11618_s28 }
 0x9a1   :  { %18031 = vst [vmem:[#allocation74_spill] sm:$0xff] %v16198_v61 }
 0x9a2   :  { %8906 = vrot.lane.b32.xlu0 %v16158_v0, %s11621_s9  ;;  %v16204_v63 = vpop.permute.xlu1 %8566 }
 0x9a3   :  { %18032 = vst [vmem:[#allocation45_spill] sm:$0xff] %v16204_v63  ;;  %v8584_v18 = vsel %vm664_vm0, %v16204_v63, %v16172_v14 }
 0x9a4   :  { %v16206_v9 = vpop.permute.xlu0 %9042  ;;  %8150 = vrot.lane.b32.xlu1 %v16129_v47, %s11619_s29 }
 0x9a5   :  { %18033 = vst [vmem:[#allocation113_spill] sm:$0xff] %v16206_v9 }
 0x9a6   :  { %8766 = vrot.lane.b32.xlu0 %v16158_v0, %s11622_s10  ;;  %v16212_v50 = vpop.permute.xlu1 %8426 }
 0x9a7   :  { %18034 = vst [vmem:[#allocation85_spill] sm:$0xff] %v16212_v50 }
 0x9a8   :  { %v16216_v5 = vpop.permute.xlu0 %8902  ;;  %8546 = vrot.lane.b32.xlu1 %v16214_v29, %s11614_s2 }
 0x9a9   :  { %18036 = vst [vmem:[#allocation66_spill] sm:$0xff] %v16216_v5 }
 0x9aa   :  { %8548 = vrot.lane.b32.xlu0 %v16220_v45, %s11614_s2  ;;  %v16224_v13 = vpop.permute.xlu1 %8286 }
 0x9ab   :  { %18038 = vst [vmem:[#allocation88_spill] sm:$0xff] %v16224_v13 }
 0x9ac   :  { %v16226_v61 = vpop.permute.xlu0 %8762  ;;  %8740 = vrot.lane.b32.xlu1 %v15936_v43, %s11622_s10 }
 0x9ad   :  { %18039 = vst [vmem:[#allocation104_spill] sm:$0xff] %v16226_v61 }
 0x9ae   :  { %8742 = vrot.lane.b32.xlu0 %v16044_v54, %s11622_s10  ;;  %v16232_v35 = vpop.permute.xlu1 %8146 }
 0x9af   :  { %18040 = vst [vmem:[#allocation86_spill] sm:$0xff] %v16232_v35 }
 0x9b0   :  { %v16234_v51 = vpop.permute.xlu0 %8574  ;;  %8406 = vrot.lane.b32.xlu1 %v16214_v29, %s11616_s27 }
 0x9b1   :  { %18041 = vst [vmem:[#allocation110_spill] sm:$0xff] %v16234_v51 }
 0x9b2   :  { %8408 = vrot.lane.b32.xlu0 %v16220_v45, %s11616_s27  ;;  %v16240_v56 = vpop.permute.xlu1 %9034 }
 0x9b3   :  { %18042 = vst [vmem:[#allocation56_spill] sm:$0xff] %v16240_v56 }
 0x9b4   :  { %v16242_v58 = vpop.permute.xlu0 %8434  ;;  %8266 = vrot.lane.b32.xlu1 %v16214_v29, %s11618_s28 }
 0x9b5   :  { %18043 = vst [vmem:[#allocation46_spill] sm:$0xff] %v16242_v58  ;;  %v18051_v58 = vld [vmem:[#allocation13_spill] sm:$0xff] }
 0x9b6   :  { %8750 = vrot.lane.b32.xlu0 %v16054_v11, %s11622_s10  ;;  %v16248_v8 = vpop.permute.xlu1 %8894  ;;  %v8619_v22 = vmul.f32 %v8584_v18, %v18051_v58 }
 0x9b7   :  { %18044 = vst [vmem:[#allocation72_spill] sm:$0xff] %v16248_v8 }
 0x9b8   :  { %v16250_v35 = vpop.permute.xlu0 %8294  ;;  %8114 = vrot.lane.b32.xlu1 %v16214_v29, %s11619_s29 }
 0x9b9   :  { %18045 = vst [vmem:[#allocation96_spill] sm:$0xff] %v16250_v35 }
 0x9ba   :  { %8268 = vrot.lane.b32.xlu0 %v16220_v45, %s11618_s28  ;;  %v16256_v13 = vpop.permute.xlu1 %8754 }
 0x9bb   :  { %18046 = vst [vmem:[#allocation106_spill] sm:$0xff] %v16256_v13 }
 0x9bc   :  { %v16258_v27 = vpop.permute.xlu0 %8154  ;;  %9040 = vrot.lane.b32.xlu1 %v16214_v29, %s11620_s30 }
 0x9bd   :  { %18047 = vst [vmem:[#allocation53_spill] sm:$0xff] %v16258_v27 }
 0x9be   :  { %8746 = vrot.lane.b32.xlu0 %v15958_v44, %s11622_s10  ;;  %v16264_v2 = vpop.permute.xlu1 %9036 }
 0x9c0   :  { %v16266_v25 = vpop.permute.xlu0 %9022  ;;  %8748 = vrot.lane.b32.xlu1 %v15968_v26, %s11622_s10 }
 0x9c1   :  { %18048 = vst [vmem:[#allocation62_spill] sm:$0xff] %v16266_v25 }
 0x9c2   :  { %8116 = vrot.lane.b32.xlu0 %v16220_v45, %s11619_s29  ;;  %v16272_v35 = vpop.permute.xlu1 %8896 }
 0x9c4   :  { %v16274_v10 = vpop.permute.xlu0 %8882  ;;  %8738 = vrot.lane.b32.xlu1 %v15932_v17, %s11622_s10 }
 0x9c5   :  { %18049 = vst [vmem:[#allocation93_spill] sm:$0xff] %v16274_v10 }
 0x9c6   :  { %8892 = vrot.lane.b32.xlu0 %v16085_v6, %s11621_s9  ;;  %v16280_v27 = vpop.permute.xlu1 %8756 }
 0x9c8   :  { %v16282_v50 = vpop.permute.xlu0 %8564  ;;  %8900 = vrot.lane.b32.xlu1 %v16214_v29, %s11621_s9 }
 0x9ca   :  { %9178 = vrot.lane.b32.xlu0 %v16129_v47, %s11615_s6  ;;  %v16291_v10 = vpop.permute.xlu1 %8572 }
 0x9cb   :  { %18050 = vst [vmem:[#allocation89_spill] sm:$0xff] %v16291_v10  ;;  %v8587_v41 = vsel %vm664_vm0, %v16291_v10, %v16234_v51 }
 0x9cc   :  { %v8623_v42 = vmul.f32 %v8587_v41, %v18051_v58  ;;  %v8425_v39 = vpop.permute.xlu0 %8424  ;;  %8884 = vrot.lane.b32.xlu1 %v16136_v16, %s11621_s9 }
 0x9ce   :  { %9186 = vrot.lane.b32.xlu0 %v16158_v0, %s11615_s6  ;;  %v16302_v63 = vpop.permute.xlu1 %8432  ;;  %v11401_v47 = vpack.c.bf16 %v8623_v42, %v8619_v22 }
 0x9d0   :  { %v8285_v14 = vpop.permute.xlu0 %8284  ;;  %8760 = vrot.lane.b32.xlu1 %v16214_v29, %s11622_s10  ;;  %9748 = vmatprep.subr.bf16.mxu1 %v11401_v47  ;;  %v8582_v47 = vsel %vm664_vm0, %v16138_v48, %v16282_v50 }
 0x9d2   :  { %9182 = vrot.lane.b32.xlu0 %v16009_v1, %s11615_s6  ;;  %v16308_v18 = vpop.permute.xlu1 %8292 }
 0x9d3   :  { %18052 = vst [vmem:[#allocation103_spill] sm:$0xff] %v16308_v18  ;;  %v8442_v18 = vsel %vm502_vm2, %v16146_v59, %v8425_v39 }
 0x9d4   :  { %v16310_v41 = vpop.permute.xlu0 %9030  ;;  %9176 = vrot.lane.b32.xlu1 %v15987_v30, %s11615_s6  ;;  %v16331_v30 = vmul.f32 %v8582_v47, %v12061_v62  ;;  %v16351_v47 = vld [vmem:[#allocation8] sm:$0xff] }
 0x9d5   :  { %18053 = vst [vmem:[#allocation94_spill] sm:$0xff] %v16310_v41  ;;  %18058 = vst [vmem:[#allocation97_spill] sm:$0xff] %v16351_v47  ;;  %v10647_v10 = vcombine.high %v16351_v47, %v16351_v47 }
 0x9d6   :  { %9048 = vrot.lane.b32.xlu0 %v16220_v45, %s11620_s30  ;;  %v16316_v0 = vpop.permute.xlu1 %8152  ;;  %18055 = vst [vmem:[#allocation91_spill] sm:$0xff] %v16331_v30  ;;  %v8302_v30 = vsel %vm340_vm4, %v16154_v57, %v8285_v14 }
 0x9d7   :  { %18054 = vst [vmem:[#allocation58_spill] sm:$0xff] %v16316_v0  ;;  %9780 = vmatprep.mubr.bf16.mxu1 %v10647_v10  ;;  %9862 = vmatprep.mubr.bf16.mxu0 %v10647_v10 }
 0x9d8   :  { %v8145_v42 = vpop.permute.xlu0 %8144  ;;  %9184 = vrot.lane.b32.xlu1 %v16024_v31, %s11615_s6 }
 0x9da   :  { %8752 = vrot.lane.b32.xlu0 %v16085_v6, %s11622_s10  ;;  %v16325_v22 = vpop.permute.xlu1 %8558 }
 0x9db   :  { %v8579_v1 = vsel %vm664_vm0, %v16081_v46, %v16325_v22 }
 0x9dc   :  { %v16334_v0 = vmul.f32 %v8579_v1, %v12061_v62  ;;  %v16336_v31 = vpop.permute.xlu0 %8890  ;;  %9174 = vrot.lane.b32.xlu1 %v16005_v12, %s11615_s6 }
 0x9dd   :  { %18057 = vst [vmem:[#allocation101_spill] sm:$0xff] %v16336_v31  ;;  %v16354_v31 = vmul.f32 %v8442_v18, %v17582_v24 }
 0x9de   :  { %18056 = vst [vmem:[#allocation59_spill] sm:$0xff] %v16334_v0  ;;  %8908 = vrot.lane.b32.xlu0 %v16220_v45, %s11621_s9  ;;  %v16346_v51 = vpop.permute.xlu1 %8418  ;;  %v9056_v0 = vsel %vm1202_vm6, %v16240_v56, %v16264_v2 }
 0x9df   :  { %v8439_v1 = vsel %vm502_vm2, %v16091_v53, %v16346_v51  ;;  %v16378_v47 = vmul.f32 %v9056_v0, %v17949_v34 }
 0x9e0   :  { %v16357_v12 = vmul.f32 %v8439_v1, %v17582_v24  ;;  %v16359_v62 = vpop.permute.xlu0 %8544  ;;  %8744 = vrot.lane.b32.xlu1 %v16136_v16, %s11622_s10 }
 0x9e1   :  { %18059 = vst [vmem:[#allocation111_spill] sm:$0xff] %v16378_v47 }
 0x9e2   :  { %9162 = vrot.lane.b32.xlu0 %v16044_v54, %s11615_s6  ;;  %v16372_v18 = vpop.permute.xlu1 %9044 }
 0x9e3   :  { %v9059_v1 = vsel %vm1202_vm6, %v16206_v9, %v16372_v18  ;;  %v16398_v9 = vmul.f32 %v8302_v30, %v17903_v19 }
 0x9e4   :  { %v16381_v24 = vmul.f32 %v9059_v1, %v17949_v34  ;;  %v16383_v56 = vpop.permute.xlu0 %8404  ;;  %9160 = vrot.lane.b32.xlu1 %v15936_v43, %s11615_s6 }
 0x9e5   :  { %v8443_v54 = vsel %vm502_vm2, %v8425_v39, %v16383_v56  ;;  %18061 = vst [vmem:[#allocation54_spill] sm:$0xff] %v16398_v9  ;;  %v8916_v39 = vsel %vm1040_vm7, %v16248_v8, %v16272_v35 }
 0x9e6   :  { %18060 = vst [vmem:[#allocation47_spill] sm:$0xff] %v16381_v24  ;;  %8768 = vrot.lane.b32.xlu0 %v16220_v45, %s11622_s10  ;;  %v8279_v0 = vpop.permute.xlu1 %8278 }
 0x9e7   :  { %v8299_v1 = vsel %vm340_vm4, %v16099_v21, %v8279_v0 }
 0x9e8   :  { %v16401_v43 = vmul.f32 %v8299_v1, %v17903_v19  ;;  %v16403_v34 = vpop.permute.xlu0 %8264  ;;  %9168 = vrot.lane.b32.xlu1 %v15968_v26, %s11615_s6  ;;  %v16422_v26 = vmul.f32 %v8916_v39, %v17960_v4 }
 0x9e9   :  { %v8303_v10 = vsel %vm340_vm4, %v8285_v14, %v16403_v34  ;;  %v8162_v14 = vsel %vm178_vm5, %v16164_v55, %v8145_v42 }
 0x9ea   :  { %18062 = vst [vmem:[#allocation51_spill] sm:$0xff] %v16401_v43  ;;  %9170 = vrot.lane.b32.xlu0 %v16054_v11, %s11615_s6  ;;  %v16416_v30 = vpop.permute.xlu1 %8904  ;;  %18063 = vst [vmem:[#allocation108_spill] sm:$0xff] %v16422_v26 }
 0x9eb   :  { %v8919_v1 = vsel %vm1040_vm7, %v16216_v5, %v16416_v30  ;;  %v16442_v5 = vmul.f32 %v8162_v14, %v17933_v20 }
 0x9ec   :  { %v16425_v8 = vmul.f32 %v8919_v1, %v17960_v4  ;;  %v16427_v24 = vpop.permute.xlu0 %8112  ;;  %9158 = vrot.lane.b32.xlu1 %v15932_v17, %s11615_s6 }
 0x9ed   :  { %18065 = vst [vmem:[#allocation112_spill] sm:$0xff] %v16427_v24  ;;  %v8163_v47 = vsel %vm178_vm5, %v8145_v42, %v16427_v24  ;;  %18066 = vst [vmem:[#allocation92_spill] sm:$0xff] %v16442_v5  ;;  %v8776_v42 = vsel %vm878_vm8, %v16256_v13, %v16280_v27 }
 0x9ee   :  { %18064 = vst [vmem:[#allocation69_spill] sm:$0xff] %v16425_v8  ;;  %9166 = vrot.lane.b32.xlu0 %v15958_v44, %s11615_s6  ;;  %v8139_v39 = vpop.permute.xlu1 %8138  ;;  %v8583_v44 = vsel %vm664_vm0, %v16282_v50, %v16359_v62 }
 0x9ef   :  { %v8159_v1 = vsel %vm178_vm5, %v16109_v40, %v8139_v39 }
 0x9f0   :  { %v16445_v17 = vmul.f32 %v8159_v1, %v17933_v20  ;;  %v9033_v4 = vpop.permute.xlu0 %9032  ;;  %9180 = vrot.lane.b32.xlu1 %v16214_v29, %s11615_s6  ;;  %v16464_v29 = vmul.f32 %v8776_v42, %v17966_v37  ;;  %v8105_v42 = vld [vmem:[%s17072_s7] sm:$0xff] }
 0x9f1   :  { %v9055_v11 = vsel %vm1202_vm6, %v16310_v41, %v9033_v4  ;;  %v8578_v41 = vsel %vm664_vm0, %v16079_v60, %v16081_v46  ;;  %v18086_v46 = vld [vmem:[#allocation37_spill] sm:$0xff] }
 0x9f2   :  { %18067 = vst [vmem:[#allocation50_spill] sm:$0xff] %v16445_v17  ;;  %9188 = vrot.lane.b32.xlu0 %v16220_v45, %s11615_s6  ;;  %v16458_v14 = vpop.permute.xlu1 %8764  ;;  %18068 = vst [vmem:[#allocation87_spill] sm:$0xff] %v16464_v29 }
 0x9f3   :  { %v8779_v1 = vsel %vm878_vm8, %v16226_v61, %v16458_v14 }
 0x9f4   :  { %v16467_v13 = vmul.f32 %v8779_v1, %v17966_v37  ;;  %v16469_v26 = vpop.permute.xlu0 %9038  ;;  %9164 = vrot.lane.b32.xlu1 %v16136_v16, %s11615_s6  ;;  %v16492_v16 = vmul.f32 %v8583_v44, %v17899_v52 }
 0x9f5   :  { %18070 = vst [vmem:[#allocation109_spill] sm:$0xff] %v16469_v26  ;;  %v9057_v45 = vsel %vm1202_vm6, %v16264_v2, %v16469_v26 }
 0x9f6   :  { %18069 = vst [vmem:[#allocation107_spill] sm:$0xff] %v16467_v13  ;;  %9172 = vrot.lane.b32.xlu0 %v16085_v6, %s11615_s6  ;;  %v16486_v61 = vpop.permute.xlu1 %8542  ;;  %v16521_v13 = vmul.f32 %v8303_v10, %v17915_v33 }
 0x9f7   :  { %v8580_v50 = vsel %vm664_vm0, %v16325_v22, %v16486_v61  ;;  %v16507_v22 = vmul.f32 %v8443_v54, %v17908_v15 }
 0x9f8   :  { %v16495_v2 = vmul.f32 %v8580_v50, %v17899_v52  ;;  %v16497_v37 = vpop.permute.xlu0 %8898  ;;  %9372 = vperm.xlu1 %11462, %v8105_v42   ;;  %v16533_v42 = vmul.f32 %v8163_v47, %v17929_v49  ;;  %v16549_v47 = vmul.f32 %v9055_v11, %v17964_v23 }
 0x9f9   :  { %18071 = vst [vmem:[#allocation52_spill] sm:$0xff] %v16497_v37 }
 0x9fa   :  { %v16499_v8 = vpop.permute.xlu1 %8402  ;;  %18073 = vst [vmem:[#allocation98_spill] sm:$0xff] %v16533_v42  ;;  %18075 = vst [vmem:[#allocation57_spill] sm:$0xff] %v16549_v47 }
 0x9fb   :  { %v8440_v6 = vsel %vm502_vm2, %v16346_v51, %v16499_v8 }
 0x9fc   :  { %v16510_v44 = vmul.f32 %v8440_v6, %v17908_v15  ;;  %v16512_v50 = vpop.permute.xlu0 %8758 }
 0x9fd   :  { %18072 = vst [vmem:[#allocation95_spill] sm:$0xff] %v16512_v50 }
 0x9fe   :  { %v16514_v29 = vpop.permute.xlu1 %8262 }
 0x9ff   :  { %v8300_v1 = vsel %vm340_vm4, %v8279_v0, %v16514_v29 }
 0xa00   :  { %v16524_v51 = vmul.f32 %v8300_v1, %v17915_v33  ;;  %v8577_v54 = vpop.permute.xlu0 %8576  ;;  %v9083_v1 = vsel %vm1202_vm6, %v9033_v4, %v16117_v32 }
 0xa02   :  { %v16526_v26 = vpop.permute.xlu1 %8110 }
 0xa03   :  { %v8160_v17 = vsel %vm178_vm5, %v8139_v39, %v16526_v26 }
 0xa04   :  { %v16536_v0 = vmul.f32 %v8160_v17, %v17929_v49  ;;  %v16538_v10 = vpop.permute.xlu0 %8436  ;;  %v16552_v17 = vmul.f32 %v9083_v1, %v17965_v36 }
 0xa06   :  { %18074 = vst [vmem:[#allocation71_spill] sm:$0xff] %v16536_v0  ;;  %v9025_v5 = vpop.permute.xlu1 %9024  ;;  %18076 = vst [vmem:[#allocation13_spill] sm:$0xff] %v16552_v17  ;;  %v8611_v17 = vmul.f32 %v8578_v41, %v18051_v58 }
 0xa07   :  { %v9052_v6 = vsel %vm1202_vm6, %v16266_v25, %v9025_v5  ;;  %v9082_v39 = vsel %vm1202_vm6, %v9025_v5, %v16115_v38  ;;  %v8917_v5 = vsel %vm1040_vm7, %v16272_v35, %v16497_v37  ;;  %v8777_v35 = vsel %vm878_vm8, %v16280_v27, %v16512_v50  ;;  %v18097_v38 = vld [vmem:[#allocation14_spill] sm:$0xff] }
 0xa08   :  { %v16555_v43 = vmul.f32 %v9052_v6, %v17964_v23  ;;  %v16558_v4 = vmul.f32 %v9082_v39, %v17965_v36  ;;  %v16560_v32 = vpop.permute.xlu0 %8296  ;;  %v16572_v6 = vmul.f32 %v9057_v45, %v17940_v7  ;;  %v16617_v37 = vmul.f32 %v8777_v35, %v18086_v46  ;;  %v18092_v35 = vld [vmem:[#allocation61_spill] sm:$0xff] }
 0xa0a   :  { %18077 = vst [vmem:[#allocation114_spill] sm:$0xff] %v16555_v43  ;;  %18078 = vst [vmem:[#allocation115_spill] sm:$0xff] %v16558_v4  ;;  %v8571_v0 = vpop.permute.xlu1 %8570 }
 0xa0b   :  { %18080 = vst [vmem:[#allocation117_spill] sm:$0xff] %v16572_v6  ;;  %18087 = vst [vmem:[#allocation123_spill] sm:$0xff] %v16617_v37  ;;  %v18099_v37 = vld [vmem:[#allocation17_spill] sm:$0xff] }
 0xa0c   :  { %v16566_v11 = vpop.permute.xlu0 %9046 }
 0xa0d   :  { %18079 = vst [vmem:[#allocation116_spill] sm:$0xff] %v16566_v11  ;;  %v9060_v1 = vsel %vm1202_vm6, %v16372_v18, %v16566_v11  ;;  %v16592_v18 = vmul.f32 %v8917_v5, %v17958_v28  ;;  %v18088_v11 = vld [vmem:[#allocation31_spill] sm:$0xff] }
 0xa0e   :  { %v16575_v39 = vmul.f32 %v9060_v1, %v17940_v7  ;;  %v8431_v36 = vpop.permute.xlu1 %8430  ;;  %v8585_v27 = vsel %vm664_vm0, %v18088_v11, %v8571_v0  ;;  %v18093_v11 = vld [vmem:[#allocation46_spill] sm:$0xff] }
 0xa0f   :  { %18083 = vst [vmem:[#allocation120_spill] sm:$0xff] %v16592_v18 }
 0xa10   :  { %18081 = vst [vmem:[#allocation118_spill] sm:$0xff] %v16575_v39  ;;  %v16577_v23 = vpop.permute.xlu0 %8156 }
 0xa12   :  { %v16581_v43 = vpop.permute.xlu1 %8290 }
 0xa14   :  { %v16586_v47 = vpop.permute.xlu0 %8906 }
 0xa15   :  { %18082 = vst [vmem:[#allocation119_spill] sm:$0xff] %v16586_v47  ;;  %v8920_v45 = vsel %vm1040_vm7, %v16416_v30, %v16586_v47  ;;  %v8581_v30 = vsel %vm664_vm0, %v16152_v3, %v16138_v48 }
 0xa16   :  { %v16595_v1 = vmul.f32 %v8920_v45, %v17958_v28  ;;  %v16597_v4 = vpop.permute.xlu1 %8150  ;;  %v18090_v28 = vld [vmem:[#allocation78_spill] sm:$0xff]  ;;  %v8615_v18 = vmul.f32 %v8581_v30, %v18051_v58  ;;  %v8606_v58 = vsel %vm664_vm0, %v16486_v61, %v16079_v60  ;;  %v18100_v61 = vld [vmem:[#allocation99_spill] sm:$0xff]  ;;  %v18101_v60 = vld [vmem:[#allocation85_spill] sm:$0xff] }
 0xa17   :  { %v8438_v5 = vsel %vm502_vm2, %v18090_v28, %v16091_v53 }
 0xa18   :  { %18084 = vst [vmem:[#allocation121_spill] sm:$0xff] %v16595_v1  ;;  %v16608_v47 = vpop.permute.xlu0 %8766  ;;  %v8441_v1 = vsel %vm502_vm2, %v18092_v35, %v16146_v59  ;;  %v18096_v59 = vld [vmem:[#allocation89_spill] sm:$0xff]  ;;  %v11397_v24 = vpack.c.bf16 %v8615_v18, %v8611_v17  ;;  %v18105_v17 = vld [vmem:[#allocation103_spill] sm:$0xff] }
 0xa19   :  { %18085 = vst [vmem:[#allocation122_spill] sm:$0xff] %v16608_v47  ;;  %v8780_v45 = vsel %vm878_vm8, %v16458_v14, %v16608_v47  ;;  %v18091_v47 = vld [vmem:[#allocation45_spill] sm:$0xff] }
 0xa1a   :  { %v16622_v50 = vmul.f32 %v8780_v45, %v18086_v46  ;;  %v8547_v48 = vpop.permute.xlu1 %8546  ;;  %v8447_v45 = vsel %vm502_vm2, %v16302_v63, %v18093_v11  ;;  %v18094_v46 = vld [vmem:[#allocation110_spill] sm:$0xff] }
 0xa1b   :  { %v8586_v14 = vsel %vm664_vm0, %v8571_v0, %v8547_v48  ;;  %v8608_v41 = vsel %vm664_vm0, %v8547_v48, %v18091_v47  ;;  %v8588_v6 = vsel %vm664_vm0, %v18094_v46, %v8577_v54  ;;  %v18095_v0 = vld [vmem:[#allocation19_spill] sm:$0xff] }
 0xa1c   :  { %18089 = vst [vmem:[#allocation31_spill] sm:$0xff] %v16622_v50  ;;  %v8549_v39 = vpop.permute.xlu0 %8548  ;;  %v8620_v47 = vmul.f32 %v8585_v27, %v18095_v0  ;;  %v8618_v7 = vmul.f32 %v8608_v41, %v18097_v38  ;;  %v8621_v42 = vmul.f32 %v8586_v14, %v17899_v52  ;;  %v16655_v50 = vmul.f32 %v8438_v5, %v18099_v37  ;;  %v18102_v5 = vld [vmem:[#allocation79_spill] sm:$0xff] }
 0xa1d   :  { %v8589_v30 = vsel %vm664_vm0, %v8577_v54, %v8549_v39  ;;  %v8609_v48 = vsel %vm664_vm0, %v8549_v39, %v18096_v59  ;;  %v8444_v54 = vsel %vm502_vm2, %v18101_v60, %v18100_v61  ;;  %v8607_v39 = vsel %vm664_vm0, %v16359_v62, %v16152_v3 }
 0xa1e   :  { %v8622_v46 = vmul.f32 %v8609_v48, %v18097_v38  ;;  %v8625_v25 = vmul.f32 %v8589_v30, %v17899_v52  ;;  %v16652_v53 = vpop.permute.xlu1 %8740  ;;  %v8624_v27 = vmul.f32 %v8588_v6, %v18095_v0  ;;  %v8483_v14 = vmul.f32 %v8447_v45, %v18099_v37 }
 0xa1f   :  { %18098 = vst [vmem:[#allocation78_spill] sm:$0xff] %v16652_v53  ;;  %v8610_v41 = vmul.f32 %v8606_v58, %v18097_v38  ;;  %v8298_v48 = vsel %vm340_vm4, %v18102_v5, %v16099_v21  ;;  %v8475_v53 = vmul.f32 %v8441_v1, %v18099_v37  ;;  %v8479_v62 = vmul.f32 %v8444_v54, %v18099_v37  ;;  %v18104_v37 = vld [vmem:[#allocation96_spill] sm:$0xff] }
 0xa20   :  { %v11400_v52 = vpack.c.bf16 %v8622_v46, %v8618_v7  ;;  %v16666_v30 = vpop.permute.xlu0 %8742  ;;  %v11403_v59 = vpack.c.bf16 %v8625_v25, %v8621_v42  ;;  %v11402_v9 = vpack.c.bf16 %v8624_v27, %v8620_v47  ;;  %v8614_v3 = vmul.f32 %v8607_v39, %v18097_v38  ;;  %v18103_v25 = vld [vmem:[#allocation76_spill] sm:$0xff]  ;;  %v18111_v27 = vld [vmem:[#allocation91_spill] sm:$0xff] }
 0xa21   :  { %v8445_v6 = vsel %vm502_vm2, %v18100_v61, %v8431_v36  ;;  %v8301_v42 = vsel %vm340_vm4, %v18103_v25, %v16154_v57  ;;  %v8307_v38 = vsel %vm340_vm4, %v18105_v17, %v18104_v37  ;;  %v8448_v45 = vsel %vm502_vm2, %v18093_v11, %v16538_v10  ;;  %v18108_v61 = vld [vmem:[#allocation18_spill] sm:$0xff]  ;;  %v18109_v39 = vld [vmem:[#allocation100_spill] sm:$0xff] }
 0xa22   :  { %9749 = vmatpush1.bf16.msra.mxu1 %v11400_v52  ;;  %9830 = vmatprep.subr.bf16.mxu0 %v11403_v59  ;;  %v8407_v7 = vpop.permute.xlu1 %8406  ;;  %v11396_v18 = vpack.c.bf16 %v8614_v3, %v8610_v41  ;;  %v18106_v57 = vpack.c.bf16 %v16492_v16, %v16495_v2  ;;  %v18114_v52 = vld [vmem:[#allocation21_spill] sm:$0xff] }
 0xa23   :  { %v8446_v21 = vsel %vm502_vm2, %v8431_v36, %v8407_v7  ;;  %v8468_v1 = vsel %vm502_vm2, %v8407_v7, %v18101_v60  ;;  %9750 = vmatprep.subr.bf16.mxu1 %v11397_v24  ;;  %9831 = vmatpush1.bf16.msra.mxu0 %v11402_v9  ;;  %v11393_v36 = vpack.c.bf16 %v8483_v14, %v8479_v62  ;;  %v18107_v9 = vld [vmem:[#allocation23_spill] sm:$0xff] }
 0xa24   :  { %v8409_v58 = vpop.permute.xlu0 %8408  ;;  %9832 = vmatprep.subr.bf16.mxu0 %v18106_v57  ;;  %v8466_v24 = vsel %vm502_vm2, %v16499_v8, %v18090_v28  ;;  %v8480_v0 = vmul.f32 %v8445_v6, %v18107_v9  ;;  %v8478_v11 = vmul.f32 %v8468_v1, %v18108_v61  ;;  %v8481_v60 = vmul.f32 %v8446_v21, %v17908_v15  ;;  %v18110_v8 = vld [vmem:[#allocation88_spill] sm:$0xff]  ;;  %v18112_v14 = vld [vmem:[#allocation59_spill] sm:$0xff] }
 0xa25   :  { %v8449_v47 = vsel %vm502_vm2, %v16538_v10, %v8409_v58  ;;  %v8469_v46 = vsel %vm502_vm2, %v8409_v58, %v16302_v63  ;;  %v8304_v28 = vsel %vm340_vm4, %v18110_v8, %v18109_v39  ;;  %v8467_v10 = vsel %vm502_vm2, %v16383_v56, %v18092_v35 }
 0xa26   :  { %v8482_v16 = vmul.f32 %v8469_v46, %v18108_v61  ;;  %v8485_v2 = vmul.f32 %v8449_v47, %v17908_v15  ;;  %9751 = vmatpush1.bf16.msra.mxu1 %v11396_v18  ;;  %v8267_v54 = vpop.permute.xlu1 %8266  ;;  %v8484_v63 = vmul.f32 %v8448_v45, %v18107_v9  ;;  %v18113_v41 = vpack.c.bf16 %v18111_v27, %v18112_v14  ;;  %v18123_v27 = vld [vmem:[#allocation75_spill] sm:$0xff] }
 0xa27   :  { %9752 = vmatprep.subr.bf16.mxu1 %v11393_v36  ;;  %v8343_v59 = vmul.f32 %v8307_v38, %v18114_v52  ;;  %v8470_v15 = vmul.f32 %v8466_v24, %v18108_v61  ;;  %v8331_v7 = vmul.f32 %v8298_v48, %v18114_v52  ;;  %v11389_v56 = vpack.c.bf16 %v8475_v53, %v16655_v50  ;;  %v18115_v50 = vld [vmem:[#allocation53_spill] sm:$0xff]  ;;  %v18116_v53 = vld [vmem:[#allocation58_spill] sm:$0xff] }
 0xa28   :  { %9833 = vmatpush1.bf16.msra.mxu0 %v18113_v41  ;;  %v11392_v62 = vpack.c.bf16 %v8482_v16, %v8478_v11  ;;  %v16715_v3 = vpop.permute.xlu0 %8750  ;;  %v11395_v6 = vpack.c.bf16 %v8485_v2, %v8481_v60  ;;  %v11394_v21 = vpack.c.bf16 %v8484_v63, %v8480_v0  ;;  %v8339_v35 = vmul.f32 %v8304_v28, %v18114_v52  ;;  %v18118_v11 = vld [vmem:[#allocation22_spill] sm:$0xff] }
 0xa29   :  { %v8474_v1 = vmul.f32 %v8467_v10, %v18108_v61  ;;  %v8305_v18 = vsel %vm340_vm4, %v18109_v39, %v16581_v43  ;;  %v8335_v45 = vmul.f32 %v8301_v42, %v18114_v52  ;;  %v8306_v58 = vsel %vm340_vm4, %v16581_v43, %v8267_v54  ;;  %v18122_v39 = vld [vmem:[#allocation25_spill] sm:$0xff]  ;;  %v18124_v52 = vld [vmem:[#allocation60_spill] sm:$0xff] }
 0xa2a   :  { %9753 = vmatpush1.bf16.msra.mxu1 %v11392_v62  ;;  %9834 = vmatprep.subr.bf16.mxu0 %v11395_v6  ;;  %v8115_v38 = vpop.permute.xlu1 %8114  ;;  %v8328_v48 = vsel %vm340_vm4, %v8267_v54, %v18110_v8  ;;  %v8167_v57 = vsel %vm178_vm5, %v18116_v53, %v18115_v50  ;;  %v8308_v24 = vsel %vm340_vm4, %v18104_v37, %v16560_v32 }
 0xa2b   :  { %9754 = vmatprep.subr.bf16.mxu1 %v11389_v56  ;;  %v11388_v36 = vpack.c.bf16 %v8474_v1, %v8470_v15  ;;  %v18117_v42 = vpack.c.bf16 %v16507_v22, %v16510_v44  ;;  %v11385_v43 = vpack.c.bf16 %v8343_v59, %v8339_v35  ;;  %v8326_v0 = vsel %vm340_vm4, %v16514_v29, %v18102_v5  ;;  %v18119_v29 = vld [vmem:[#allocation74_spill] sm:$0xff] }
 0xa2c   :  { %9835 = vmatpush1.bf16.msra.mxu0 %v11394_v21  ;;  %v8269_v9 = vpop.permute.xlu0 %8268  ;;  %v8340_v47 = vmul.f32 %v8305_v18, %v17903_v19  ;;  %v8338_v37 = vmul.f32 %v8328_v48, %v18118_v11  ;;  %v8341_v60 = vmul.f32 %v8306_v58, %v17915_v33  ;;  %v18120_v5 = vld [vmem:[#allocation86_spill] sm:$0xff]  ;;  %v18121_v54 = vpack.c.bf16 %v16354_v31, %v16357_v12 }
 0xa2d   :  { %9836 = vmatprep.subr.bf16.mxu0 %v18117_v42  ;;  %v8309_v46 = vsel %vm340_vm4, %v16560_v32, %v8269_v9  ;;  %v8329_v61 = vsel %vm340_vm4, %v8269_v9, %v18105_v17  ;;  %v8164_v2 = vsel %vm178_vm5, %v18120_v5, %v18119_v29  ;;  %v8327_v32 = vsel %vm340_vm4, %v16403_v34, %v18103_v25 }
 0xa2e   :  { %v8342_v22 = vmul.f32 %v8329_v61, %v18118_v11  ;;  %v8345_v44 = vmul.f32 %v8309_v46, %v17915_v33  ;;  %9755 = vmatpush1.bf16.msra.mxu1 %v11388_v36  ;;  %v16750_v16 = vpop.permute.xlu1 %9040  ;;  %v8344_v17 = vmul.f32 %v8308_v24, %v17903_v19  ;;  %v8203_v33 = vmul.f32 %v8167_v57, %v18122_v39  ;;  %v18129_v36 = vld [vmem:[#allocation51_spill] sm:$0xff]  ;;  %v18131_v46 = vld [vmem:[#allocation94_spill] sm:$0xff] }
 0xa2f   :  { %9756 = vmatprep.subr.bf16.mxu1 %v11385_v43  ;;  %v8330_v8 = vmul.f32 %v8326_v0, %v18118_v11  ;;  %v8161_v14 = vsel %vm178_vm5, %v18123_v27, %v16164_v55  ;;  %v11381_v25 = vpack.c.bf16 %v8335_v45, %v8331_v7  ;;  %v8199_v19 = vmul.f32 %v8164_v2, %v18122_v39  ;;  %v18132_v61 = vld [vmem:[#allocation102_spill] sm:$0xff] }
 0xa30   :  { %9837 = vmatpush1.bf16.msra.mxu0 %v18121_v54  ;;  %v11384_v28 = vpack.c.bf16 %v8342_v22, %v8338_v37  ;;  %v16764_v10 = vpop.permute.xlu0 %8746  ;;  %v11387_v63 = vpack.c.bf16 %v8345_v44, %v8341_v60  ;;  %v11386_v34 = vpack.c.bf16 %v8344_v17, %v8340_v47  ;;  %v8334_v41 = vmul.f32 %v8327_v32, %v18118_v11  ;;  %v18133_v60 = vld [vmem:[#allocation62_spill] sm:$0xff]  ;;  %v18134_v22 = vld [vmem:[#allocation67_spill] sm:$0xff] }
 0xa31   :  { %v8165_v12 = vsel %vm178_vm5, %v18119_v29, %v16597_v4  ;;  %v8158_v59 = vsel %vm178_vm5, %v18124_v52, %v16109_v40  ;;  %v8166_v55 = vsel %vm178_vm5, %v16597_v4, %v8115_v38  ;;  %v8188_v15 = vsel %vm178_vm5, %v8115_v38, %v18120_v5  ;;  %v18126_v38 = vld [vmem:[#allocation26_spill] sm:$0xff]  ;;  %v18136_v32 = vld [vmem:[#allocation71_spill] sm:$0xff] }
 0xa32   :  { %9757 = vmatpush1.bf16.msra.mxu1 %v11384_v28  ;;  %9838 = vmatprep.subr.bf16.mxu0 %v11387_v63  ;;  %v16774_v31 = vpop.permute.xlu1 %8748  ;;  %v8195_v62 = vmul.f32 %v8161_v14, %v18122_v39  ;;  %v11380_v6 = vpack.c.bf16 %v8334_v41, %v8330_v8  ;;  %v8168_v7 = vsel %vm178_vm5, %v18115_v50, %v16577_v23  ;;  %v18127_v50 = vld [vmem:[#allocation112_spill] sm:$0xff]  ;;  %v18135_v2 = vld [vmem:[#allocation98_spill] sm:$0xff]  ;;  %v18138_v54 = vld [vmem:[#allocation55_spill] sm:$0xff] }
 0xa33   :  { %9758 = vmatprep.subr.bf16.mxu1 %v11381_v25  ;;  %v18125_v56 = vpack.c.bf16 %v16521_v13, %v16524_v51  ;;  %v11377_v40 = vpack.c.bf16 %v8203_v33, %v8199_v19  ;;  %v8186_v4 = vsel %vm178_vm5, %v16526_v26, %v18124_v52  ;;  %v8200_v35 = vmul.f32 %v8165_v12, %v17933_v20  ;;  %v18139_v33 = vld [vmem:[#allocation29_spill] sm:$0xff]  ;;  %v18140_v63 = vld [vmem:[#allocation84_spill] sm:$0xff]  ;;  %v18145_v12 = vld [vmem:[#allocation50_spill] sm:$0xff] }
 0xa34   :  { %9839 = vmatpush1.bf16.msra.mxu0 %v11386_v34  ;;  %v8117_v21 = vpop.permute.xlu0 %8116  ;;  %v8198_v45 = vmul.f32 %v8188_v15, %v18126_v38  ;;  %v8201_v58 = vmul.f32 %v8166_v55, %v17929_v49  ;;  %v8191_v26 = vmul.f32 %v8158_v59, %v18122_v39  ;;  %v8204_v57 = vmul.f32 %v8168_v7, %v17933_v20  ;;  %v18141_v34 = vld [vmem:[#allocation118_spill] sm:$0xff]  ;;  %v18142_v25 = vld [vmem:[#allocation117_spill] sm:$0xff]  ;;  %v18144_v41 = vld [vmem:[#allocation92_spill] sm:$0xff] }
 0xa35   :  { %9840 = vmatprep.subr.bf16.mxu0 %v18125_v56  ;;  %v8169_v1 = vsel %vm178_vm5, %v16577_v23, %v8117_v21  ;;  %v8189_v18 = vsel %vm178_vm5, %v8117_v21, %v18116_v53  ;;  %v8187_v23 = vsel %vm178_vm5, %v18127_v50, %v18123_v27  ;;  %v18128_v53 = vld [vmem:[#allocation54_spill] sm:$0xff]  ;;  %v8190_v9 = vmul.f32 %v8186_v4, %v18126_v38  ;;  %v18148_v7 = vld [vmem:[#allocation101_spill] sm:$0xff]  ;;  %v18149_v21 = vld [vmem:[#allocation64_spill] sm:$0xff] }
 0xa36   :  { %v8202_v13 = vmul.f32 %v8189_v18, %v18126_v38  ;;  %v8205_v51 = vmul.f32 %v8169_v1, %v17929_v49  ;;  %9759 = vmatpush1.bf16.msra.mxu1 %v11380_v6  ;;  %v16802_v48 = vpop.permute.xlu1 %8738  ;;  %v18130_v24 = vpack.c.bf16 %v18128_v53, %v18129_v36  ;;  %v11378_v0 = vpack.c.bf16 %v8204_v57, %v8200_v35  ;;  %v18147_v59 = vld [vmem:[#allocation30_spill] sm:$0xff]  ;;  %v18151_v4 = vld [vmem:[#allocation111_spill] sm:$0xff]  ;;  %v18157_v57 = vld [vmem:[#allocation33_spill] sm:$0xff] }
 0xa37   :  { %9760 = vmatprep.subr.bf16.mxu1 %v11377_v40  ;;  %v11373_v47 = vpack.c.bf16 %v8195_v62, %v8191_v26  ;;  %v9054_v11 = vsel %vm1202_vm6, %v18132_v61, %v18131_v46  ;;  %v8194_v37 = vmul.f32 %v8187_v23, %v18126_v38  ;;  %v9051_v44 = vsel %vm1202_vm6, %v18134_v22, %v18133_v60  ;;  %v18150_v40 = vld [vmem:[#allocation47_spill] sm:$0xff]  ;;  %v18153_v38 = vld [vmem:[#allocation73_spill] sm:$0xff] }
 0xa38   :  { %9841 = vmatpush1.bf16.msra.mxu0 %v18130_v24  ;;  %v11376_v42 = vpack.c.bf16 %v8202_v13, %v8198_v45  ;;  %v16813_v49 = vpop.permute.xlu0 %8892  ;;  %v11379_v43 = vpack.c.bf16 %v8205_v51, %v8201_v58  ;;  %v18137_v17 = vpack.c.bf16 %v18135_v2, %v18136_v32  ;;  %v9053_v39 = vsel %vm1202_vm6, %v18138_v54, %v18132_v61  ;;  %v18154_v58 = vld [vmem:[#allocation93_spill] sm:$0xff]  ;;  %v18155_v13 = vld [vmem:[#allocation32_spill] sm:$0xff]  ;;  %v18156_v50 = vld [vmem:[#allocation83_spill] sm:$0xff] }
 0xa39   :  { %v11372_v29 = vpack.c.bf16 %v8194_v37, %v8190_v9  ;;  %v9091_v8 = vmul.f32 %v9054_v11, %v18139_v33  ;;  %v9050_v27 = vsel %vm1202_vm6, %v18140_v63, %v18134_v22  ;;  %v9087_v14 = vmul.f32 %v9051_v44, %v18139_v33  ;;  %v18158_v24 = vld [vmem:[#allocation34_spill] sm:$0xff]  ;;  %v18161_v61 = vld [vmem:[#allocation121_spill] sm:$0xff]  ;;  %v18162_v11 = vld [vmem:[#allocation120_spill] sm:$0xff] }
 0xa3a   :  { %9761 = vmatpush1.bf16.msra.mxu1 %v11376_v42  ;;  %9842 = vmatprep.subr.bf16.mxu0 %v11379_v43  ;;  %v16819_v20 = vpop.permute.xlu1 %8900  ;;  %v18143_v19 = vpack.c.bf16 %v18141_v34, %v18142_v25  ;;  %v18146_v52 = vpack.c.bf16 %v18144_v41, %v18145_v12  ;;  %v9090_v55 = vmul.f32 %v9053_v39, %v18147_v59  ;;  %v18159_v43 = vld [vmem:[#allocation109_spill] sm:$0xff]  ;;  %v18166_v39 = vld [vmem:[#allocation35_spill] sm:$0xff]  ;;  %v18167_v33 = vld [vmem:[#allocation36_spill] sm:$0xff] }
 0xa3b   :  { %9762 = vmatprep.subr.bf16.mxu1 %v11373_v47  ;;  %v11429_v62 = vpack.c.bf16 %v9091_v8, %v9087_v14  ;;  %v9086_v6 = vmul.f32 %v9050_v27, %v18147_v59  ;;  %v8914_v56 = vsel %vm1040_vm7, %v18149_v21, %v18148_v7  ;;  %v18152_v35 = vpack.c.bf16 %v18150_v40, %v18151_v4  ;;  %v18160_v47 = vld [vmem:[#allocation56_spill] sm:$0xff]  ;;  %v18165_v32 = vld [vmem:[#allocation113_spill] sm:$0xff]  ;;  %v18171_v12 = vld [vmem:[#allocation78_spill] sm:$0xff] }
 0xa3c   :  { %9843 = vmatpush1.bf16.msra.mxu0 %v11378_v0  ;;  %v16824_v5 = vpop.permute.xlu0 %9178  ;;  %v8913_v45 = vsel %vm1040_vm7, %v18153_v38, %v18149_v21  ;;  %v8911_v51 = vsel %vm1040_vm7, %v18155_v13, %v18154_v58  ;;  %v8910_v23 = vsel %vm1040_vm7, %v18156_v50, %v18155_v13  ;;  %v8951_v53 = vmul.f32 %v8914_v56, %v18157_v57  ;;  %v18168_v14 = vld [vmem:[#allocation69_spill] sm:$0xff]  ;;  %v18169_v34 = vld [vmem:[#allocation108_spill] sm:$0xff] }
 0xa3d   :  { %9844 = vmatprep.subr.bf16.mxu0 %v18137_v17  ;;  %v11428_v18 = vpack.c.bf16 %v9090_v55, %v9086_v6  ;;  %v8950_v9 = vmul.f32 %v8913_v45, %v18158_v24  ;;  %v8947_v42 = vmul.f32 %v8911_v51, %v18157_v57  ;;  %v9058_v0 = vsel %vm1202_vm6, %v18159_v43, %v16750_v16  ;;  %v18172_v59 = vld [vmem:[#allocation37_spill] sm:$0xff]  ;;  %v18174_v13 = vld [vmem:[#allocation20_spill] sm:$0xff]  ;;  %v18175_v51 = vld [vmem:[#allocation27_spill] sm:$0xff] }
 0xa3e   :  { %9763 = vmatpush1.bf16.msra.mxu1 %v11372_v29  ;;  %v8885_v28 = vpop.permute.xlu1 %8884  ;;  %v9084_v46 = vsel %vm1202_vm6, %v16750_v16, %v18160_v47  ;;  %v18163_v37 = vpack.c.bf16 %v18161_v61, %v18162_v11  ;;  %v8946_v60 = vmul.f32 %v8910_v23, %v18158_v24  ;;  %v8774_v44 = vsel %vm878_vm8, %v16774_v31, %v16715_v3  ;;  %v18164_v29 = vld [vmem:[#allocation116_spill] sm:$0xff]  ;;  %v18176_v57 = vld [vmem:[#allocation38_spill] sm:$0xff]  ;;  %v18179_v43 = vld [vmem:[#allocation123_spill] sm:$0xff] }
 0xa3f   :  { %9764 = vmatprep.subr.bf16.mxu1 %v18143_v19  ;;  %v11421_v54 = vpack.c.bf16 %v8951_v53, %v8947_v42  ;;  %v9096_v16 = vmul.f32 %v9058_v0, %v18166_v39  ;;  %v9097_v8 = vmul.f32 %v9084_v46, %v18167_v33  ;;  %v18170_v25 = vpack.c.bf16 %v18168_v14, %v18169_v34  ;;  %v18177_v24 = vld [vmem:[#allocation72_spill] sm:$0xff]  ;;  %v18178_v42 = vld [vmem:[#allocation31_spill] sm:$0xff]  ;;  %v18191_v14 = vld [vmem:[#allocation57_spill] sm:$0xff] }
 0xa40   :  { %9845 = vmatpush1.bf16.msra.mxu0 %v18146_v52  ;;  %v16844_v15 = vpop.permute.xlu0 %9186  ;;  %v11420_v41 = vpack.c.bf16 %v8950_v9, %v8946_v60  ;;  %v8771_v52 = vsel %vm878_vm8, %v18171_v12, %v16666_v30  ;;  %v8811_v55 = vmul.f32 %v8774_v44, %v18172_v59  ;;  %v8773_v40 = vsel %vm878_vm8, %v16764_v10, %v16774_v31  ;;  %v18184_v44 = vld [vmem:[#allocation39_spill] sm:$0xff]  ;;  %v18192_v34 = vld [vmem:[#allocation114_spill] sm:$0xff] }
 0xa41   :  { %v8807_v4 = vmul.f32 %v8771_v52, %v18172_v59  ;;  %v11404_v23 = vpack.c.bf16 %v18175_v51, %v18174_v13  ;;  %v8944_v9 = vsel %vm1040_vm7, %v16819_v20, %v18177_v24  ;;  %v8942_v31 = vsel %vm1040_vm7, %v8885_v28, %v18156_v50  ;;  %v18199_v24 = vld [vmem:[#allocation77_spill] sm:$0xff] }
 0xa42   :  { %9765 = vmatpush2.bf16.msra.mxu1 %v18152_v35  ;;  %v16853_v1 = vpop.permute.xlu1 %8760  ;;  %v18173_v35 = vld [vmem:[#allocation52_spill] sm:$0xff]  ;;  %v18180_v0 = vpack.c.bf16 %v18178_v42, %v18179_v43  ;;  %v8810_v47 = vmul.f32 %v8773_v40, %v18176_v57  ;;  %v8915_v46 = vsel %vm1040_vm7, %v18148_v7, %v16813_v49  ;;  %v8912_v61 = vsel %vm1040_vm7, %v18154_v58, %v8885_v28  ;;  %v18200_v43 = vld [vmem:[#allocation81_spill] sm:$0xff] }
 0xa43   :  { %9766 = vmatprep.subr.bf16.mxu1 %v11429_v62  ;;  %v8770_v62 = vsel %vm878_vm8, %v16802_v48, %v18171_v12  ;;  %v11413_v50 = vpack.c.bf16 %v8811_v55, %v8807_v4  ;;  %v18195_v12 = vld [vmem:[#allocation80_spill] sm:$0xff]  ;;  %v18196_v55 = vld [vmem:[#allocation95_spill] sm:$0xff]  ;;  %v8952_v4 = vmul.f32 %v8915_v46, %v18184_v44 }
 0xa44   :  { %v16861_v26 = vpop.permute.xlu0 %9182  ;;  %v8806_v53 = vmul.f32 %v8770_v62, %v18176_v57  ;;  %v8778_v62 = vsel %vm878_vm8, %v18196_v55, %v16853_v1 }
 0xa46   :  { %9767 = vmatpush2.bf16.msra.mxu1 %v11428_v18  ;;  %v16867_v36 = vpop.permute.xlu1 %9176  ;;  %v8918_v18 = vsel %vm1040_vm7, %v18173_v35, %v16819_v20  ;;  %v18182_v20 = vld [vmem:[#allocation115_spill] sm:$0xff]  ;;  %v18197_v35 = vld [vmem:[#allocation106_spill] sm:$0xff] }
 0xa47   :  { %9768 = vmatprep.subr.bf16.mxu1 %v18163_v37  ;;  %v18181_v37 = vld [vmem:[#allocation13_spill] sm:$0xff] }
 0xa48   :  { %v9049_v22 = vpop.permute.xlu0 %9048  ;;  %v18183_v60 = vpack.c.bf16 %v18181_v37, %v18182_v20 }
 0xa49   :  { %v9061_v2 = vsel %vm1202_vm6, %v18164_v29, %v9049_v22  ;;  %v9085_v17 = vsel %vm1202_vm6, %v9049_v22, %v18165_v32  ;;  %v8943_v22 = vsel %vm1040_vm7, %v16813_v49, %v18153_v38  ;;  %v8956_v29 = vmul.f32 %v8918_v18, %v18184_v44 }
 0xa4a   :  { %v9100_v63 = vmul.f32 %v9061_v2, %v18166_v39  ;;  %v9101_v27 = vmul.f32 %v9085_v17, %v18167_v33  ;;  %9769 = vmatpush2.bf16.msra.mxu1 %v18170_v25  ;;  %v16895_v19 = vpop.permute.xlu1 %9184  ;;  %v18185_v2 = vld [vmem:[#allocation119_spill] sm:$0xff]  ;;  %v18186_v17 = vld [vmem:[#allocation66_spill] sm:$0xff]  ;;  %v11412_v38 = vpack.c.bf16 %v8810_v47, %v8806_v53  ;;  %v18193_v25 = vpack.c.bf16 %v18191_v14, %v18192_v34  ;;  %v18198_v53 = vld [vmem:[#allocation48_spill] sm:$0xff] }
 0xa4b   :  { %9770 = vmatprep.subr.bf16.mxu1 %v11421_v54  ;;  %v18187_v54 = vld [vmem:[#allocation40_spill] sm:$0xff]  ;;  %v18188_v33 = vld [vmem:[#allocation107_spill] sm:$0xff]  ;;  %v8804_v18 = vsel %vm878_vm8, %v16853_v1, %v18197_v35  ;;  %v9200_v57 = vsel %vm1364_vm1, %v16895_v19, %v16844_v15  ;;  %v18203_v1 = vld [vmem:[#allocation41_spill] sm:$0xff] }
 0xa4c   :  { %v11434_v6 = vpack.c.bf16 %v9100_v63, %v9096_v16  ;;  %v16904_v21 = vpop.permute.xlu0 %8752  ;;  %v11435_v56 = vpack.c.bf16 %v9101_v27, %v9097_v8  ;;  %v8957_v28 = vmul.f32 %v8944_v9, %v18187_v54  ;;  %v8949_v58 = vmul.f32 %v8942_v31, %v18187_v54  ;;  %v18189_v8 = vld [vmem:[#allocation87_spill] sm:$0xff] }
 0xa4d   :  { %v18190_v63 = vpack.c.bf16 %v18188_v33, %v18189_v8  ;;  %v8948_v27 = vmul.f32 %v8912_v61, %v18184_v44  ;;  %v8953_v59 = vmul.f32 %v8943_v22, %v18187_v54  ;;  %v11409_v9 = vpack.c.bf16 %v18199_v24, %v18198_v53  ;;  %v18202_v61 = vld [vmem:[#allocation97_spill] sm:$0xff] }
 0xa4e   :  { %9771 = vmatpush2.bf16.msra.mxu1 %v11420_v41  ;;  %9846 = vmatprep.subr.bf16.mxu0 %v11435_v56  ;;  %v16913_v45 = vpop.permute.xlu1 %9174  ;;  %v18194_v41 = vld [vmem:[#allocation65_spill] sm:$0xff]  ;;  %v16975_v46 = vcombine.low %v18202_v61, %v18202_v61  ;;  %v8816_v37 = vmul.f32 %v8778_v62, %v18203_v1  ;;  %v9197_v22 = vsel %vm1364_vm1, %v16867_v36, %v16824_v5 }
 0xa4f   :  { %9772 = vmatprep.subr.bf16.mxu1 %v18180_v0  ;;  %9847 = vmatpush2.bf16.msra.mxu0 %v11434_v6  ;;  %v11405_v52 = vpack.c.bf16 %v18195_v12, %v18194_v41  ;;  %v11423_v42 = vpack.c.bf16 %v8953_v59, %v8949_v58  ;;  %v18201_v0 = vld [vmem:[#allocation24_spill] sm:$0xff]  ;;  %v18210_v24 = vld [vmem:[#allocation105_spill] sm:$0xff] }
 0xa50   :  { %v8909_v11 = vpop.permute.xlu0 %8908  ;;  %9848 = vmatprep.subr.bf16.mxu0 %v18183_v60  ;;  %v11408_v47 = vpack.c.bf16 %v18201_v0, %v18200_v43  ;;  %v18204_v60 = vld [vmem:[#allocation42_spill] sm:$0xff] }
 0xa51   :  { %v8921_v32 = vsel %vm1040_vm7, %v18185_v2, %v8909_v11  ;;  %v8945_v7 = vsel %vm1040_vm7, %v8909_v11, %v18186_v17  ;;  %v11422_v11 = vpack.c.bf16 %v8952_v4, %v8948_v27  ;;  %v9196_v17 = vsel %vm1364_vm1, %v16913_v45, %v16867_v36 }
 0xa52   :  { %v8960_v39 = vmul.f32 %v8921_v32, %v18184_v44  ;;  %v8961_v16 = vmul.f32 %v8945_v7, %v18187_v54  ;;  %9773 = vmatpush2.bf16.msra.mxu1 %v18190_v63  ;;  %v8745_v49 = vpop.permute.xlu1 %8744  ;;  %v9199_v44 = vsel %vm1364_vm1, %v16861_v26, %v16895_v19  ;;  %v18206_v7 = vld [vmem:[#allocation122_spill] sm:$0xff]  ;;  %v8775_v36 = vsel %vm878_vm8, %v16715_v3, %v16904_v21 }
 0xa53   :  { %9774 = vmatprep.subr.bf16.mxu1 %v11413_v50  ;;  %9849 = vmatpush2.bf16.msra.mxu0 %v18193_v25  ;;  %v8802_v20 = vsel %vm878_vm8, %v8745_v49, %v16802_v48  ;;  %v8817_v50 = vmul.f32 %v8804_v18, %v18204_v60  ;;  %v8803_v48 = vsel %vm878_vm8, %v16904_v21, %v16764_v10 }
 0xa54   :  { %v11426_v6 = vpack.c.bf16 %v8960_v39, %v8956_v29  ;;  %v16960_v56 = vpop.permute.xlu0 %9162  ;;  %v11427_v40 = vpack.c.bf16 %v8961_v16, %v8957_v28  ;;  %v18205_v29 = vld [vmem:[#allocation15_spill] sm:$0xff]  ;;  %v18207_v28 = vld [vmem:[#allocation104_spill] sm:$0xff]  ;;  %v8772_v19 = vsel %vm878_vm8, %v16666_v30, %v8745_v49  ;;  %v8809_v39 = vmul.f32 %v8802_v20, %v18204_v60 }
 0xa55   :  { %v9239_v2 = vmul.f32 %v9200_v57, %v18205_v29  ;;  %v9235_v8 = vmul.f32 %v9197_v22, %v18205_v29  ;;  %v8813_v30 = vmul.f32 %v8803_v48, %v18204_v60  ;;  %v18208_v49 = vld [vmem:[#allocation16_spill] sm:$0xff]  ;;  %v8808_v41 = vmul.f32 %v8772_v19, %v18203_v1 }
 0xa56   :  { %9775 = vmatpush2.bf16.msra.mxu1 %v11412_v38  ;;  %9850 = vmatprep.subr.bf16.mxu0 %v11427_v40  ;;  %v9161_v31 = vpop.permute.xlu1 %9160  ;;  %v9234_v38 = vmul.f32 %v9196_v17, %v18208_v49  ;;  %v9238_v25 = vmul.f32 %v9199_v44, %v18208_v49  ;;  %v8812_v62 = vmul.f32 %v8775_v36, %v18203_v1  ;;  %v11497_v22 = vld [vmem:[#allocation8 + $0x8] ss:$0 sps:$4 sm:$0xff]   ;;  %v18216_v44 = vld [vmem:[#allocation43_spill] sm:$0xff] }
 0xa57   :  { %9776 = vmatprep.subr.bf16.mxu1 %v11409_v9  ;;  %9851 = vmatpush2.bf16.msra.mxu0 %v11426_v6  ;;  %v9191_v63 = vsel %vm1364_vm1, %v9161_v31, %v16960_v56  ;;  %v11441_v59 = vpack.c.bf16 %v9239_v2, %v9235_v8  ;;  %v11415_v55 = vpack.c.bf16 %v8813_v30, %v8809_v39 }
 0xa58   :  { %v8769_v32 = vpop.permute.xlu0 %8768  ;;  %9852 = vmatprep.subr.bf16.mxu0 %v11423_v42  ;;  %v9227_v3 = vmul.f32 %v9191_v63, %v18205_v29  ;;  %v11440_v40 = vpack.c.bf16 %v9238_v25, %v9234_v38  ;;  %v11414_v18 = vpack.c.bf16 %v8812_v62, %v8808_v41 }
 0xa59   :  { %v8781_v54 = vsel %vm878_vm8, %v18206_v7, %v8769_v32  ;;  %v8805_v58 = vsel %vm878_vm8, %v8769_v32, %v18207_v28 }
 0xa5a   :  { %v8820_v16 = vmul.f32 %v8781_v54, %v18203_v1  ;;  %v8821_v33 = vmul.f32 %v8805_v58, %v18204_v60  ;;  %9777 = vmatpush2.bf16.msra.mxu1 %v11408_v47  ;;  %v9169_v10 = vpop.permute.xlu1 %9168  ;;  %v18212_v1 = vld [vmem:[#allocation90_spill] sm:$0xff]  ;;  %v18214_v60 = vld [vmem:[#allocation68_spill] sm:$0xff] }
 0xa5b   :  { %9778 = vmatprep.subr.bf16.mxu1 %v11405_v52  ;;  %9853 = vmatpush2.bf16.msra.mxu0 %v11422_v11 }
 0xa5c   :  { %v11418_v27 = vpack.c.bf16 %v8820_v16, %v8816_v37  ;;  %v9171_v14 = vpop.permute.xlu0 %9170  ;;  %v11419_v34 = vpack.c.bf16 %v8821_v33, %v8817_v50  ;;  %v18213_v37 = vld [vmem:[#allocation49_spill] sm:$0xff]  ;;  %v18215_v50 = vld [vmem:[#allocation28_spill] sm:$0xff]  ;;  %v18218_v16 = vld [vmem:[#allocation82_spill] sm:$0xff] }
 0xa5d   :  { %v9194_v12 = vsel %vm1364_vm1, %v9169_v10, %v9171_v14  ;;  %v11410_v20 = vpack.c.bf16 %v18213_v37, %v18212_v1  ;;  %v18219_v33 = vld [vmem:[#allocation63_spill] sm:$0xff] }
 0xa5e   :  { %v9231_v21 = vmul.f32 %v9194_v12, %v18205_v29  ;;  %9854 = vmatprep.subr.bf16.mxu0 %v11419_v34  ;;  %v9159_v52 = vpop.permute.xlu1 %9158  ;;  %9779 = vmatpush2.bf16.msra.mxu1 %v11404_v23  ;;  %v18209_v23 = vld [vmem:[#allocation70_spill] sm:$0xff]  ;;  %v18217_v29 = vld [vmem:[#allocation44_spill] sm:$0xff] }
 0xa5f   :  { %v9190_v6 = vsel %vm1364_vm1, %v9159_v52, %v9161_v31  ;;  %9801 = vmatprep.subr.bf16.mxu1 %v11441_v59  ;;  %9855 = vmatpush2.bf16.msra.mxu0 %v11418_v27  ;;  %v11411_v9 = vpack.c.bf16 %v18210_v24, %v18209_v23  ;;  %v18211_v31 = vmov 0  }
 0xa60   :  { %v9167_v4 = vpop.permute.xlu0 %9166  ;;  %9856 = vmatprep.subr.bf16.mxu0 %v11415_v55  ;;  %v11437_v35 = vpack.c.bf16 %v9231_v21, %v9227_v3  ;;  %v9226_v53 = vmul.f32 %v9190_v6, %v18208_v49  ;;  %v11516_v55 = vld [vmem:[#allocation3] sm:$0xff]  ;;  %v11517_v6 = vld [vmem:[#allocation3 + $0x8] sm:$0xff] }
 0xa61   :  { %v9193_v57 = vsel %vm1364_vm1, %v9167_v4, %v9169_v10  ;;  %9781 = vmatmul.mubr.bf16.vlgmr.msra.gmra.mxu1 %v16975_v46  ;;  %v11406_v10 = vpack.c.bf16 %v18219_v33, %v18218_v16 }
 0xa62   :  { %v9230_v13 = vmul.f32 %v9193_v57, %v18208_v49  ;;  %v9181_v51 = vpop.permute.xlu1 %9180  ;;  %9802 = vmatpush1.bf16.msra.mxu1 %v11440_v40  ;;  %9821 = vmatprep.mubr.bf16.mxu1 %v18211_v31 }
 0xa63   :  { %v9198_v42 = vsel %vm1364_vm1, %v16824_v5, %v9181_v51  ;;  %v9224_v43 = vsel %vm1364_vm1, %v9181_v51, %v16913_v45  ;;  %9803 = vmatprep.subr.bf16.mxu1 %v11437_v35  ;;  %9857 = vmatpush2.bf16.msra.mxu0 %v11414_v18  ;;  %v11407_v5 = vpack.c.bf16 %v18215_v50, %v18214_v60 }
 0xa64   :  { %v11436_v0 = vpack.c.bf16 %v9230_v13, %v9226_v53  ;;  %v9189_v47 = vpop.permute.xlu0 %9188  ;;  %9858 = vmatprep.subr.bf16.mxu0 %v11411_v9  ;;  %v9236_v45 = vmul.f32 %v9198_v42, %v18216_v44  ;;  %v9237_v2 = vmul.f32 %v9224_v43, %v18217_v29  ;;  %v11518_v43 = vld [vmem:[#allocation3 + $0x10] sm:$0xff] }
 0xa65   :  { %v9201_v61 = vsel %vm1364_vm1, %v16844_v15, %v9189_v47  ;;  %v9225_v11 = vsel %vm1364_vm1, %v9189_v47, %v16861_v26  ;;  %v11519_v47 = vld [vmem:[#allocation3 + $0x18] sm:$0xff] }
 0xa66   :  { %v9240_v32 = vmul.f32 %v9201_v61, %v18216_v44  ;;  %v9241_v48 = vmul.f32 %v9225_v11, %v18217_v29  ;;  %v9165_v17 = vpop.permute.xlu1 %9164  ;;  %9804 = vmatpush1.bf16.msra.mxu1 %v11436_v0 }
 0xa67   :  { %v9192_v15 = vsel %vm1364_vm1, %v16960_v56, %v9165_v17  ;;  %v9222_v26 = vsel %vm1364_vm1, %v9165_v17, %v9159_v52  ;;  %9859 = vmatpush2.bf16.msra.mxu0 %v11410_v20 }
 0xa68   :  { %v11442_v7 = vpack.c.bf16 %v9240_v32, %v9236_v45  ;;  %v9173_v54 = vpop.permute.xlu0 %9172  ;;  %9860 = vmatprep.subr.bf16.mxu0 %v11407_v5  ;;  %v11443_v28 = vpack.c.bf16 %v9241_v48, %v9237_v2  ;;  %v9228_v58 = vmul.f32 %v9192_v15, %v18216_v44  ;;  %v9229_v56 = vmul.f32 %v9222_v26, %v18217_v29 }
 0xa69   :  { %v9195_v19 = vsel %vm1364_vm1, %v9171_v14, %v9173_v54  ;;  %v9223_v39 = vsel %vm1364_vm1, %v9173_v54, %v9167_v4  ;;  %10721 = vmatmul.mubr.msk.bf16.vlgmr.msra.gmra.mxu1 %vm1976_vm3, %v11497_v22 }
 0xa6a   :  { %v9232_v8 = vmul.f32 %v9195_v19, %v18216_v44  ;;  %v9233_v36 = vmul.f32 %v9223_v39, %v18217_v29  ;;  %9883 = vmatprep.subr.bf16.mxu1 %v11443_v28  ;;  %9903 = vmatprep.mubr.bf16.mxu1 %v18211_v31 }
 0xa6b   :  { %9861 = vmatpush2.bf16.msra.mxu0 %v11406_v10  ;;  %9884 = vmatpush1.bf16.msra.mxu1 %v11442_v7 }
 0xa6c   :  { %v11438_v63 = vpack.c.bf16 %v9232_v8, %v9228_v58  ;;  %v11439_v30 = vpack.c.bf16 %v9233_v36, %v9229_v56 }
 0xa6e   :  { %9863 = vmatmul.mubr.bf16.vlgmr.msra.gmra.mxu0 %v16975_v46  ;;  %9885 = vmatprep.subr.bf16.mxu1 %v11439_v30 }
 0xa6f   :  { %9886 = vmatpush1.bf16.msra.mxu1 %v11438_v63 }
 0xa72   :  { %10722 = vmatmul.mubr.msk.bf16.vlgmr.msra.gmra.mxu1 %vm1976_vm3, %v11497_v22 }
 0xa73   :  { %v9373_v14 = vpop.permute.xlu1 %9372 }
 0xb21   :  { %v9782_v49 = vpop.f32.mrf.mxu1 }
 0xb22   :  { %v9783_v25 = vadd.f32 %v9782_v49, %v9373_v14 }
 0xb23   :  { %v9784_v38 = vpop.f32.mrf.mxu1 }
 0xb24   :  { %v9785_v12 = vadd.f32 %v9784_v38, %v9373_v14 }
 0xb25   :  { %v9786_v27 = vpop.f32.mrf.mxu1 }
 0xb27   :  { %v9787_v34 = vpop.f32.mrf.mxu1 }
 0xb29   :  { %v9823_v41 = vpop.f32.mrf.mxu1 }
 0xb2a   :  { %v9824_v59 = vadd.f32 %v9823_v41, %v9783_v25 }
 0xb2b   :  { %v9825_v3 = vpop.f32.mrf.mxu1 }
 0xb2c   :  { %v9826_v21 = vadd.f32 %v9825_v3, %v9785_v12  ;;  %v9912_v62 = vadd.f32 %v11516_v55, %v9824_v59 }
 0xb2d   :  { %v9827_v52 = vpop.f32.mrf.mxu1 }
 0xb2e   :  { %v9913_v46 = vadd.f32 %v11517_v6, %v9826_v21  ;;  %v9864_v40 = vpop.f32.mrf.mxu0 }
 0xb2f   :  { %v9828_v4 = vpop.f32.mrf.mxu1  ;;  %v9865_v57 = vadd.f32 %v9864_v40, %v9373_v14 }
 0xb30   :  { %v9918_v35 = vcombine.low %v9912_v62, %v9913_v46  ;;  %v9866_v18 = vpop.f32.mrf.mxu0 }
 0xb31   :  { %v9867_v51 = vadd.f32 %v9866_v18, %v9373_v14 }
 0xb32   :  { %9920 = vst [vmem:[%s17073_s8] sm:$0x77] %v9918_v35  ;;  %v9868_v53 = vpop.f32.mrf.mxu0  ;;  %v9905_v13 = vpop.f32.mrf.mxu1 }
 0xb33   :  { %v9906_v23 = vadd.f32 %v9905_v13, %v9865_v57 }
 0xb34   :  { %v9869_v24 = vpop.f32.mrf.mxu0  ;;  %v9907_v9 = vpop.f32.mrf.mxu1 }
 0xb35   :  { %v9908_v31 = vadd.f32 %v9907_v9, %v9867_v51  ;;  %v9914_v0 = vadd.f32 %v11518_v43, %v9906_v23 }
 0xb36   :  { %v9909_v42 = vpop.f32.mrf.mxu1 }
 0xb37   :  { %v9915_v61 = vadd.f32 %v11519_v47, %v9908_v31 }
 0xb38   :  { %v9910_v11 = vpop.f32.mrf.mxu1 }
 0xb39   :  { %v9923_v1 = vcombine.low %v9914_v0, %v9915_v61 }
 0xb3b   :  { %10723 = vst [vmem:[%s17073_s8 + $0x8] sm:$0x77] %v9923_v1 }
 0xb3c   :  { %9931 = vsyncpa [#allocation4], 1 }
 0xb3d   :  { %9932 = vsyncpa [#allocation6], 1 }
 0xb3e   :  { %9933 = vsyncpa [#allocation9], 1 }

</bundles_post_ra>
